<compile_context>
chip_gen: v7x
topology: tpu7x:2x2x1
jax: 0.10.0
libtpu: 0.0.40
codegen_flags: <defaults>
</compile_context>

<pallas_src>
import numpy as np
import jax
import jax.numpy as jnp
from jax import lax
from jax.experimental import pallas as pl
from jax.experimental.pallas import tpu as pltpu

NUM_CLUSTERS = 23
DIM = 512          # CRN hard-codes 512 input channels -> dim must be 512
ALPHA = 100.0
H = W = 7          # CRN LayerNorm hard-codes normalized_shape=[7, 7]
P = H * W          # 49 descriptor positions
TAPS = 49          # 7x7 taps of the fused (3x3 | 5x5 | 7x7 -> 84 ch) conv


# --------------------------- host-side CRN folding ---------------------------

def bilinear_matrix(out_size, in_size):
    """1-D bilinear interpolation matrix, align_corners=True (as nn.Upsample)."""
    U = np.zeros((out_size, in_size), dtype=np.float64)
    scale = (in_size - 1) / (out_size - 1)
    for i in range(out_size):
        src = i * scale
        lo = int(np.floor(src))
        hi = min(lo + 1, in_size - 1)
        w = src - lo
        U[i, lo] += 1.0 - w
        U[i, hi] += w
    return U


def fold_crn_params(crn):
    """Fold the affine CRN tail (everything after the LayerNorm) into
         ctx = const + sum_t (vmat[t] @ XN) @ g[t]
       where XN is the LayerNormed input laid out as (512 channels, 49 positions).

       vmat : (49, 512)    per-tap channel mixing (accumulation conv folded in)
       g    : (49, 49, 49) per-tap spatial map: upsample+shift -> conv grid ->
                           downsample_width -> permute -> downsample_height,
                           flattened (w'*7 + h') exactly like the reference
       const: (1, 49)      all biases folded through the affine tail
    """
    f64 = lambda a: np.asarray(a, np.float64)
    w3, b3 = f64(crn['w3']), f64(crn['b3'])
    w5, b5 = f64(crn['w5']), f64(crn['b5'])
    w7, b7 = f64(crn['w7']), f64(crn['b7'])
    dw_w, dw_b = f64(crn['dw_w']), f64(crn['dw_b'])
    dh_w, dh_b = f64(crn['dh_w']), f64(crn['dh_b'])
    acc_w = f64(crn['acc_w']).reshape(-1)            # (84,)
    acc_b = float(f64(crn['acc_b']).reshape(-1)[0])

    # fuse the three multi-scale convs into one 84-channel 7x7 conv
    wc = np.zeros((84, DIM, 7, 7), np.float64)
    wc[0:32, :, 2:5, 2:5] = w3
    wc[32:64, :, 1:6, 1:6] = w5
    wc[64:84] = w7
    cb = np.concatenate([b3, b5, b7])                # (84,)

    U = bilinear_matrix(13, 7)                       # (13, 7)

    # downsample_width (over x), permute, downsample_height (over y) as one
    # (169 -> 49) matrix; output flattened w'-major (j*7 + i) like the reference.
    m1 = np.zeros((169, 91), np.float64)             # (y*13+x) -> (y*7+j)
    for y in range(13):
        for x in range(13):
            for j in range(7):
                m1[y * 13 + x, y * 7 + j] = dw_w[j, x]
    m2 = np.zeros((91, 49), np.float64)              # (y*7+j) -> (j*7+i)
    for y in range(13):
        for j in range(7):
            for i in range(7):
                m2[y * 7 + j, j * 7 + i] = dh_w[i, y]
    m12 = m1 @ m2                                    # (169, 49)

    vmat = np.zeros((TAPS, DIM), np.float64)
    g = np.zeros((TAPS, P, P), np.float64)
    for dy in range(7):
        for dx in range(7):
            t = dy * 7 + dx
            vmat[t] = acc_w @ wc[:, :, dy, dx]       # 1x1 accumulation folded in
            # A_t: (49 source positions, 169 conv-output positions); the conv
            # output (y, x) reads the upsampled pixel (y+dy-3, x+dx-3)
            # (zero outside the 13x13 image -> 'same' padding of 3/2/1).
            uy = np.zeros((13, 7), np.float64)
            ux = np.zeros((13, 7), np.float64)
            for y in range(13):
                if 0 <= y + dy - 3 <= 12:
                    uy[y] = U[y + dy - 3]
            for x in range(13):
                if 0 <= x + dx - 3 <= 12:
                    ux[x] = U[x + dx - 3]
            a_t = np.einsum('ya,xb->abyx', uy, ux).reshape(P, 169)
            g[t] = a_t @ m12

    # all bias terms folded through the affine tail
    sw = dw_w.sum(axis=1)                            # sum_x dw_w[j, x]
    sh = dh_w.sum(axis=1)                            # sum_y dh_w[i, y]
    aw = acc_w.sum()
    cwb = float(acc_w @ cb)
    const = np.zeros((P,), np.float64)
    for j in range(7):
        for i in range(7):
            const[j * 7 + i] = (acc_b + aw * dh_b[i]
                                + sh[i] * (aw * dw_b[j] + cwb * sw[j]))

    return (jnp.asarray(vmat, jnp.float32),
            jnp.asarray(g, jnp.float32),
            jnp.asarray(const.reshape(1, P), jnp.float32))


# ------------------------------- Pallas kernel -------------------------------

def reweight_vlad_kernel(x_ref, gamma_ref, beta_ref, vmat_ref, g_ref, const_ref,
                         cw_ref, cb_ref, cent_ref, vlad_ref, ctx_ref):
    """One batch sample per grid step; everything stays VMEM resident.

    x_ref     : (1, 512, 49)  raw descriptors (channels on sublanes, P on lanes)
    gamma/beta: (1, 49)       LayerNorm([7,7]) affine parameters
    vmat_ref  : (49, 512)     folded CRN per-tap channel mixing
    g_ref     : (49, 49, 49)  folded CRN per-tap spatial mixing
    const_ref : (1, 49)       folded CRN biases
    cw_ref    : (23, 512)     soft-assignment 1x1 conv weight (2*alpha*centroids)
    cb_ref    : (23, 1)       soft-assignment bias (-alpha*||c_k||)
    cent_ref  : (23, 512)     centroids
    vlad_ref  : (1, 23, 512)  output VLAD block (lane-dense on C=512)
    ctx_ref   : (1, 1, 49)    output CRN context weights (used for validation)
    """
    x = x_ref[0]                                                   # (C, P)

    # ---- CRN: LayerNorm over the 7x7 plane per channel (eps=1e-5, biased var)
    mean = jnp.mean(x, axis=-1, keepdims=True)
    var = jnp.mean((x - mean) ** 2, axis=-1, keepdims=True)
    xg = (x - mean) * lax.rsqrt(var + 1e-5) * gamma_ref[...] + beta_ref[...]

    # ---- CRN tail (upsample -> 84ch 7x7 conv -> Linears -> 1x1 conv), folded
    q = jnp.dot(vmat_ref[...], xg, preferred_element_type=jnp.float32)  # (T, P)
    ctx = const_ref[...]                                           # (1, P)
    for t in range(TAPS):                                          # unrolled
        ctx = ctx + jnp.dot(q[t:t + 1, :], g_ref[t],
                            preferred_element_type=jnp.float32)
    ctx_ref[0] = ctx.astype(ctx_ref.dtype)

    # ---- VLAD ----
    # descriptor-wise L2 normalization (F.normalize over channels, eps=1e-12)
    denom = jnp.maximum(jnp.sqrt(jnp.sum(x * x, axis=0, keepdims=True)), 1e-12)
    xn = x / denom                                                 # (C, P)
    # soft assignment: 1x1 conv == (2*alpha*centroids) @ xn + bias, softmax on K
    s = jnp.dot(cw_ref[...], xn, preferred_element_type=jnp.float32) + cb_ref[...]
    s = s - jnp.max(s, axis=0, keepdims=True)
    e = jnp.exp(s)
    soft_assign = e / jnp.sum(e, axis=0, keepdims=True)            # (K, P)
    mask = soft_assign * ctx                                       # (K, P)
    # vlad[k, c] = sum_p mask[k, p] * (xn[c, p] - centroids[k, c])
    vlad = lax.dot_general(mask, xn, (((1,), (1,)), ((), ())),
                           preferred_element_type=jnp.float32)     # (K, C)
    vlad = vlad - cent_ref[...] * jnp.sum(mask, axis=1, keepdims=True)
    # intra-normalization over the descriptor dim, then global per-sample L2
    vlad = vlad / jnp.maximum(
        jnp.sqrt(jnp.sum(vlad * vlad, axis=1, keepdims=True)), 1e-12)
    vlad = vlad / jnp.maximum(jnp.sqrt(jnp.sum(vlad * vlad)), 1e-12)
    vlad_ref[0] = vlad.astype(vlad_ref.dtype)


def reweight_vlad_forward(x, params):
    """Returns (vlad (N, K*C), ctx (N, 1, 49)); vlad matches the PyTorch module."""
    n, c, h, w = x.shape
    assert (c, h, w) == (DIM, H, W)
    x_flat = x.reshape(n, c, h * w)
    k = NUM_CLUSTERS
    vlad, ctx = pl.pallas_call(
        reweight_vlad_kernel,
        out_shape=(jax.ShapeDtypeStruct((n, k, c), jnp.float32),
                   jax.ShapeDtypeStruct((n, 1, P), jnp.float32)),
        grid_spec=pltpu.PrefetchScalarGridSpec(
            num_scalar_prefetch=0,
            grid=(n,),
            in_specs=[
                pl.BlockSpec((1, c, P), lambda i: (i, 0, 0)),       # x
                pl.BlockSpec((1, P), lambda i: (0, 0)),             # ln gamma
                pl.BlockSpec((1, P), lambda i: (0, 0)),             # ln beta
                pl.BlockSpec((TAPS, c), lambda i: (0, 0)),          # folded vmat
                pl.BlockSpec((TAPS, P, P), lambda i: (0, 0, 0)),    # folded g
                pl.BlockSpec((1, P), lambda i: (0, 0)),             # folded const
                pl.BlockSpec((k, c), lambda i: (0, 0)),             # conv_w
                pl.BlockSpec((k, 1), lambda i: (0, 0)),             # conv_b
                pl.BlockSpec((k, c), lambda i: (0, 0)),             # centroids
            ],
            out_specs=[pl.BlockSpec((1, k, c), lambda i: (i, 0, 0)),
                       pl.BlockSpec((1, 1, P), lambda i: (i, 0, 0))]),
        compiler_params=pltpu.CompilerParams(
            dimension_semantics=("parallel",)),
    )(x_flat, params['ln_gamma'], params['ln_beta'], params['crn_vmat'],
      params['crn_g'], params['crn_const'], params['conv_w'], params['conv_b'],
      params['centroids'])
    return vlad.reshape(n, -1), ctx


# ----------------------------- parameter creation ----------------------------

def init_params(key):
    keys = jax.random.split(key, 12)
    crn_raw = dict(
        ln_gamma=jnp.ones((7, 7), jnp.float32),
        ln_beta=jnp.zeros((7, 7), jnp.float32),
        w3=jax.random.normal(keys[0], (32, DIM, 3, 3), jnp.float32) * 0.02,
        b3=jax.random.normal(keys[1], (32,), jnp.float32) * 0.02,
        w5=jax.random.normal(keys[2], (32, DIM, 5, 5), jnp.float32) * 0.02,
        b5=jax.random.normal(keys[3], (32,), jnp.float32) * 0.02,
        w7=jax.random.normal(keys[4], (20, DIM, 7, 7), jnp.float32) * 0.02,
        b7=jax.random.normal(keys[5], (20,), jnp.float32) * 0.02,
        dw_w=jax.random.normal(keys[6], (7, 13), jnp.float32) * 0.1,
        dw_b=jax.random.normal(keys[7], (7,), jnp.float32) * 0.1,
        dh_w=jax.random.normal(keys[8], (7, 13), jnp.float32) * 0.1,
        dh_b=jax.random.normal(keys[9], (7,), jnp.float32) * 0.1,
        acc_w=jax.random.normal(keys[10], (1, 84, 1, 1), jnp.float32) * 0.1,
        acc_b=jax.random.normal(keys[11], (1,), jnp.float32) * 0.1,
    )
    vmat, g, const = fold_crn_params(crn_raw)
    centroids = jax.random.uniform(jax.random.PRNGKey(1),
                                   (NUM_CLUSTERS, DIM), jnp.float32)
    conv_w = 2.0 * ALPHA * centroids                                 # (K, C)
    conv_b = (-ALPHA * jnp.sqrt(jnp.sum(centroids ** 2, axis=1))
              ).reshape(NUM_CLUSTERS, 1)                             # (K, 1)
    return dict(
        crn_raw=crn_raw,
        ln_gamma=crn_raw['ln_gamma'].reshape(1, P),
        ln_beta=crn_raw['ln_beta'].reshape(1, P),
        crn_vmat=vmat, crn_g=g, crn_const=const,
        centroids=centroids, conv_w=conv_w, conv_b=conv_b,
    )


# ------------------- plain-JAX reference (validation only) -------------------

def reference_forward(x, params):
    """Straightforward jnp transcription of the PyTorch module (no Pallas)."""
    hp = lax.Precision.HIGHEST
    crn = params['crn_raw']
    n, c = x.shape[:2]
    # CRN
    mean = jnp.mean(x, axis=(2, 3), keepdims=True)
    var = jnp.mean((x - mean) ** 2, axis=(2, 3), keepdims=True)
    xg = (x - mean) / jnp.sqrt(var + 1e-5)
    xg = xg * crn['ln_gamma'][None, None] + crn['ln_beta'][None, None]
    U = jnp.asarray(bilinear_matrix(13, 7), jnp.float32)
    up = jnp.einsum('ia,ncab,jb->ncij', U, xg, U, precision=hp)

    def conv(inp, wgt, bias, pad):
        out = lax.conv_general_dilated(
            inp, wgt, window_strides=(1, 1), padding=((pad, pad), (pad, pad)),
            dimension_numbers=('NCHW', 'OIHW', 'NCHW'), precision=hp)
        return out + bias.reshape(1, -1, 1, 1)

    cat = jnp.concatenate([conv(up, crn['w3'], crn['b3'], 1),
                           conv(up, crn['w5'], crn['b5'], 2),
                           conv(up, crn['w7'], crn['b7'], 3)], axis=1)
    t1 = jnp.einsum('nchw,jw->nchj', cat, crn['dw_w'], precision=hp) + crn['dw_b']
    t1 = jnp.transpose(t1, (0, 1, 3, 2))
    t2 = jnp.einsum('ncjh,ih->ncji', t1, crn['dh_w'], precision=hp) + crn['dh_b']
    ctx = (jnp.einsum('ncji,c->nji', t2, crn['acc_w'].reshape(-1), precision=hp)
           + crn['acc_b'][0]).reshape(n, 1, P)
    # VLAD
    xn = x / jnp.maximum(jnp.linalg.norm(x, axis=1, keepdims=True), 1e-12)
    s = (jnp.einsum('kc,nchw->nkhw', params['conv_w'], xn,
                    precision=hp).reshape(n, NUM_CLUSTERS, -1)
         + params['conv_b'].reshape(1, NUM_CLUSTERS, 1))
    soft = jax.nn.softmax(s, axis=1)
    mask = soft * ctx
    xf = xn.reshape(n, c, -1)
    vlad = (jnp.einsum('nkp,ncp->nkc', mask, xf, precision=hp)
            - params['centroids'][None] * jnp.sum(mask, axis=2, keepdims=True))
    vlad = vlad / jnp.maximum(jnp.linalg.norm(vlad, axis=2, keepdims=True), 1e-12)
    vlad = vlad.reshape(n, -1)
    vlad = vlad / jnp.maximum(jnp.linalg.norm(vlad, axis=1, keepdims=True), 1e-12)
    return vlad, ctx


if __name__ == "__main__":
    params = init_params(jax.random.PRNGKey(0))
    x = jax.random.normal(jax.random.PRNGKey(2), (2, DIM, H, W), jnp.float32)

    fwd = jax.jit(lambda xx: reweight_vlad_forward(xx, params))
    vlad, ctx = jax.block_until_ready(fwd(x))
    assert vlad.shape == (2, NUM_CLUSTERS * DIM)
    assert bool(jnp.all(jnp.isfinite(vlad)))

    # validate the folded-CRN Pallas pipeline against a plain-JAX reference
    ref_fn = jax.jit(lambda xx: reference_forward(xx, params))
    vlad_gold, ctx_gold = jax.block_until_ready(ref_fn(x))
    ctx_err = float(jnp.max(jnp.abs(ctx - ctx_gold))
                    / jnp.maximum(jnp.max(jnp.abs(ctx_gold)), 1e-12))
    assert ctx_err < 2e-2, f"CRN context mismatch: rel_err={ctx_err}"
    # loose end-to-end bound: alpha=100 makes the soft-assignment softmax nearly
    # hard, so tiny matmul-rounding differences at near-tied positions can move
    # a little assignment mass between clusters.
    vlad_err = float(jnp.max(jnp.abs(vlad - vlad_gold))
                     / jnp.maximum(jnp.max(jnp.abs(vlad_gold)), 1e-12))
    assert vlad_err < 0.15, f"VLAD mismatch: rel_err={vlad_err}"

    print("KERNEL_OK")
</pallas_src>

<mosaic_0001>
module attributes {stable_mosaic.version = 11 : i64} {
  func.func @reweight_vlad_kernel(%arg0: i32, %arg1: memref<1x512x49xf32, #tpu.memory_space<vmem>>, %arg2: memref<1x49xf32, #tpu.memory_space<vmem>>, %arg3: memref<1x49xf32, #tpu.memory_space<vmem>>, %arg4: memref<49x512xf32, #tpu.memory_space<vmem>>, %arg5: memref<49x49x49xf32, #tpu.memory_space<vmem>>, %arg6: memref<1x49xf32, #tpu.memory_space<vmem>>, %arg7: memref<23x512xf32, #tpu.memory_space<vmem>>, %arg8: memref<23x1xf32, #tpu.memory_space<vmem>>, %arg9: memref<23x512xf32, #tpu.memory_space<vmem>>, %arg10: memref<1x23x512xf32, #tpu.memory_space<vmem>>, %arg11: memref<1x1x49xf32, #tpu.memory_space<vmem>>) attributes {dimension_semantics = [#tpu.dimension_semantics<parallel>], iteration_bounds = array<i64: 2>, scalar_prefetch = 0 : i64, scratch_operands = 0 : i64, tpu.core_type = #tpu.core_type<tc>, window_params = [{transform_indices = @transform_0, window_bounds = array<i64: 1, 512, 49>}, {pipeline_mode = #tpu.pipeline_mode<synchronous>, transform_indices = @transform_1, window_bounds = array<i64: 1, 49>}, {pipeline_mode = #tpu.pipeline_mode<synchronous>, transform_indices = @transform_2, window_bounds = array<i64: 1, 49>}, {pipeline_mode = #tpu.pipeline_mode<synchronous>, transform_indices = @transform_3, window_bounds = array<i64: 49, 512>}, {pipeline_mode = #tpu.pipeline_mode<synchronous>, transform_indices = @transform_4, window_bounds = array<i64: 49, 49, 49>}, {pipeline_mode = #tpu.pipeline_mode<synchronous>, transform_indices = @transform_5, window_bounds = array<i64: 1, 49>}, {pipeline_mode = #tpu.pipeline_mode<synchronous>, transform_indices = @transform_6, window_bounds = array<i64: 23, 512>}, {pipeline_mode = #tpu.pipeline_mode<synchronous>, transform_indices = @transform_7, window_bounds = array<i64: 23, 1>}, {pipeline_mode = #tpu.pipeline_mode<synchronous>, transform_indices = @transform_8, window_bounds = array<i64: 23, 512>}, {transform_indices = @transform_9, window_bounds = array<i64: 1, 23, 512>}, {transform_indices = @transform_10, window_bounds = array<i64: 1, 1, 49>}]} {
    %c0 = arith.constant 0 : index
    %c0_0 = arith.constant 0 : index
    %c0_1 = arith.constant 0 : index
    %0 = vector.load %arg1[%c0, %c0_0, %c0_1] : memref<1x512x49xf32, #tpu.memory_space<vmem>>, vector<1x512x49xf32>
    %1 = vector.shape_cast %0 : vector<1x512x49xf32> to vector<512x49xf32>
    %cst = arith.constant dense<0.000000e+00> : vector<512xf32>
    %2 = vector.multi_reduction <add>, %1, %cst [1] : vector<512x49xf32> to vector<512xf32>
    %3 = vector.shape_cast %2 : vector<512xf32> to vector<512x1xf32>
    %cst_2 = arith.constant 4.900000e+01 : f32
    %4 = vector.broadcast %cst_2 : f32 to vector<512x1xf32>
    %5 = arith.divf %3, %4 : vector<512x1xf32>
    %6 = vector.broadcast %5 : vector<512x1xf32> to vector<512x49xf32>
    %7 = arith.subf %1, %6 : vector<512x49xf32>
    %8 = arith.mulf %7, %7 : vector<512x49xf32>
    %cst_3 = arith.constant dense<0.000000e+00> : vector<512xf32>
    %9 = vector.multi_reduction <add>, %8, %cst_3 [1] : vector<512x49xf32> to vector<512xf32>
    %10 = vector.shape_cast %9 : vector<512xf32> to vector<512x1xf32>
    %cst_4 = arith.constant 4.900000e+01 : f32
    %11 = vector.broadcast %cst_4 : f32 to vector<512x1xf32>
    %12 = arith.divf %10, %11 : vector<512x1xf32>
    %13 = vector.broadcast %5 : vector<512x1xf32> to vector<512x49xf32>
    %14 = arith.subf %1, %13 : vector<512x49xf32>
    %cst_5 = arith.constant 9.99999974E-6 : f32
    %15 = vector.broadcast %cst_5 : f32 to vector<512x1xf32>
    %16 = arith.addf %12, %15 : vector<512x1xf32>
    %17 = math.rsqrt %16 : vector<512x1xf32>
    %18 = vector.broadcast %17 : vector<512x1xf32> to vector<512x49xf32>
    %19 = arith.mulf %14, %18 : vector<512x49xf32>
    %c0_6 = arith.constant 0 : index
    %c0_7 = arith.constant 0 : index
    %20 = vector.load %arg2[%c0_6, %c0_7] : memref<1x49xf32, #tpu.memory_space<vmem>>, vector<1x49xf32>
    %21 = vector.broadcast %20 : vector<1x49xf32> to vector<512x49xf32>
    %22 = arith.mulf %19, %21 : vector<512x49xf32>
    %c0_8 = arith.constant 0 : index
    %c0_9 = arith.constant 0 : index
    %23 = vector.load %arg3[%c0_8, %c0_9] : memref<1x49xf32, #tpu.memory_space<vmem>>, vector<1x49xf32>
    %24 = vector.broadcast %23 : vector<1x49xf32> to vector<512x49xf32>
    %25 = arith.addf %22, %24 : vector<512x49xf32>
    %c0_10 = arith.constant 0 : index
    %c0_11 = arith.constant 0 : index
    %26 = vector.load %arg4[%c0_10, %c0_11] : memref<49x512xf32, #tpu.memory_space<vmem>>, vector<49x512xf32>
    %cst_12 = arith.constant dense<0.000000e+00> : vector<49x49xf32>
    %27 = tpu.matmul %26, %25, %cst_12 {dimension_numbers = #tpu.dot_dimension_numbers<[1], [0], [0], [1], [0, 0, 1, 1], [], []>} : vector<49x512xf32>, vector<512x49xf32>, vector<49x49xf32> -> vector<49x49xf32>
    %c0_13 = arith.constant 0 : index
    %c0_14 = arith.constant 0 : index
    %28 = vector.load %arg6[%c0_13, %c0_14] : memref<1x49xf32, #tpu.memory_space<vmem>>, vector<1x49xf32>
    %29 = vector.extract_strided_slice %27 {offsets = [0, 0], sizes = [1, 49], strides = [1, 1]} : vector<49x49xf32> to vector<1x49xf32>
    %c0_15 = arith.constant 0 : index
    %c0_16 = arith.constant 0 : index
    %c0_17 = arith.constant 0 : index
    %30 = vector.load %arg5[%c0_15, %c0_16, %c0_17] : memref<49x49x49xf32, #tpu.memory_space<vmem>>, vector<1x49x49xf32>
    %31 = vector.shape_cast %30 : vector<1x49x49xf32> to vector<49x49xf32>
    %cst_18 = arith.constant dense<0.000000e+00> : vector<1x49xf32>
    %32 = tpu.matmul %29, %31, %cst_18 {dimension_numbers = #tpu.dot_dimension_numbers<[1], [0], [0], [1], [0, 0, 1, 1], [], []>} : vector<1x49xf32>, vector<49x49xf32>, vector<1x49xf32> -> vector<1x49xf32>
    %33 = arith.addf %28, %32 : vector<1x49xf32>
    %34 = vector.extract_strided_slice %27 {offsets = [1, 0], sizes = [1, 49], strides = [1, 1]} : vector<49x49xf32> to vector<1x49xf32>
    %c1 = arith.constant 1 : index
    %c0_19 = arith.constant 0 : index
    %c0_20 = arith.constant 0 : index
    %35 = vector.load %arg5[%c1, %c0_19, %c0_20] : memref<49x49x49xf32, #tpu.memory_space<vmem>>, vector<1x49x49xf32>
    %36 = vector.shape_cast %35 : vector<1x49x49xf32> to vector<49x49xf32>
    %cst_21 = arith.constant dense<0.000000e+00> : vector<1x49xf32>
    %37 = tpu.matmul %34, %36, %cst_21 {dimension_numbers = #tpu.dot_dimension_numbers<[1], [0], [0], [1], [0, 0, 1, 1], [], []>} : vector<1x49xf32>, vector<49x49xf32>, vector<1x49xf32> -> vector<1x49xf32>
    %38 = arith.addf %33, %37 : vector<1x49xf32>
    %39 = vector.extract_strided_slice %27 {offsets = [2, 0], sizes = [1, 49], strides = [1, 1]} : vector<49x49xf32> to vector<1x49xf32>
    %c2 = arith.constant 2 : index
    %c0_22 = arith.constant 0 : index
    %c0_23 = arith.constant 0 : index
    %40 = vector.load %arg5[%c2, %c0_22, %c0_23] : memref<49x49x49xf32, #tpu.memory_space<vmem>>, vector<1x49x49xf32>
    %41 = vector.shape_cast %40 : vector<1x49x49xf32> to vector<49x49xf32>
    %cst_24 = arith.constant dense<0.000000e+00> : vector<1x49xf32>
    %42 = tpu.matmul %39, %41, %cst_24 {dimension_numbers = #tpu.dot_dimension_numbers<[1], [0], [0], [1], [0, 0, 1, 1], [], []>} : vector<1x49xf32>, vector<49x49xf32>, vector<1x49xf32> -> vector<1x49xf32>
    %43 = arith.addf %38, %42 : vector<1x49xf32>
    %44 = vector.extract_strided_slice %27 {offsets = [3, 0], sizes = [1, 49], strides = [1, 1]} : vector<49x49xf32> to vector<1x49xf32>
    %c3 = arith.constant 3 : index
    %c0_25 = arith.constant 0 : index
    %c0_26 = arith.constant 0 : index
    %45 = vector.load %arg5[%c3, %c0_25, %c0_26] : memref<49x49x49xf32, #tpu.memory_space<vmem>>, vector<1x49x49xf32>
    %46 = vector.shape_cast %45 : vector<1x49x49xf32> to vector<49x49xf32>
    %cst_27 = arith.constant dense<0.000000e+00> : vector<1x49xf32>
    %47 = tpu.matmul %44, %46, %cst_27 {dimension_numbers = #tpu.dot_dimension_numbers<[1], [0], [0], [1], [0, 0, 1, 1], [], []>} : vector<1x49xf32>, vector<49x49xf32>, vector<1x49xf32> -> vector<1x49xf32>
    %48 = arith.addf %43, %47 : vector<1x49xf32>
    %49 = vector.extract_strided_slice %27 {offsets = [4, 0], sizes = [1, 49], strides = [1, 1]} : vector<49x49xf32> to vector<1x49xf32>
    %c4 = arith.constant 4 : index
    %c0_28 = arith.constant 0 : index
    %c0_29 = arith.constant 0 : index
    %50 = vector.load %arg5[%c4, %c0_28, %c0_29] : memref<49x49x49xf32, #tpu.memory_space<vmem>>, vector<1x49x49xf32>
    %51 = vector.shape_cast %50 : vector<1x49x49xf32> to vector<49x49xf32>
    %cst_30 = arith.constant dense<0.000000e+00> : vector<1x49xf32>
    %52 = tpu.matmul %49, %51, %cst_30 {dimension_numbers = #tpu.dot_dimension_numbers<[1], [0], [0], [1], [0, 0, 1, 1], [], []>} : vector<1x49xf32>, vector<49x49xf32>, vector<1x49xf32> -> vector<1x49xf32>
    %53 = arith.addf %48, %52 : vector<1x49xf32>
    %54 = vector.extract_strided_slice %27 {offsets = [5, 0], sizes = [1, 49], strides = [1, 1]} : vector<49x49xf32> to vector<1x49xf32>
    %c5 = arith.constant 5 : index
    %c0_31 = arith.constant 0 : index
    %c0_32 = arith.constant 0 : index
    %55 = vector.load %arg5[%c5, %c0_31, %c0_32] : memref<49x49x49xf32, #tpu.memory_space<vmem>>, vector<1x49x49xf32>
    %56 = vector.shape_cast %55 : vector<1x49x49xf32> to vector<49x49xf32>
    %cst_33 = arith.constant dense<0.000000e+00> : vector<1x49xf32>
    %57 = tpu.matmul %54, %56, %cst_33 {dimension_numbers = #tpu.dot_dimension_numbers<[1], [0], [0], [1], [0, 0, 1, 1], [], []>} : vector<1x49xf32>, vector<49x49xf32>, vector<1x49xf32> -> vector<1x49xf32>
    %58 = arith.addf %53, %57 : vector<1x49xf32>
    %59 = vector.extract_strided_slice %27 {offsets = [6, 0], sizes = [1, 49], strides = [1, 1]} : vector<49x49xf32> to vector<1x49xf32>
    %c6 = arith.constant 6 : index
    %c0_34 = arith.constant 0 : index
    %c0_35 = arith.constant 0 : index
    %60 = vector.load %arg5[%c6, %c0_34, %c0_35] : memref<49x49x49xf32, #tpu.memory_space<vmem>>, vector<1x49x49xf32>
    %61 = vector.shape_cast %60 : vector<1x49x49xf32> to vector<49x49xf32>
    %cst_36 = arith.constant dense<0.000000e+00> : vector<1x49xf32>
    %62 = tpu.matmul %59, %61, %cst_36 {dimension_numbers = #tpu.dot_dimension_numbers<[1], [0], [0], [1], [0, 0, 1, 1], [], []>} : vector<1x49xf32>, vector<49x49xf32>, vector<1x49xf32> -> vector<1x49xf32>
    %63 = arith.addf %58, %62 : vector<1x49xf32>
    %64 = vector.extract_strided_slice %27 {offsets = [7, 0], sizes = [1, 49], strides = [1, 1]} : vector<49x49xf32> to vector<1x49xf32>
    %c7 = arith.constant 7 : index
    %c0_37 = arith.constant 0 : index
    %c0_38 = arith.constant 0 : index
    %65 = vector.load %arg5[%c7, %c0_37, %c0_38] : memref<49x49x49xf32, #tpu.memory_space<vmem>>, vector<1x49x49xf32>
    %66 = vector.shape_cast %65 : vector<1x49x49xf32> to vector<49x49xf32>
    %cst_39 = arith.constant dense<0.000000e+00> : vector<1x49xf32>
    %67 = tpu.matmul %64, %66, %cst_39 {dimension_numbers = #tpu.dot_dimension_numbers<[1], [0], [0], [1], [0, 0, 1, 1], [], []>} : vector<1x49xf32>, vector<49x49xf32>, vector<1x49xf32> -> vector<1x49xf32>
    %68 = arith.addf %63, %67 : vector<1x49xf32>
    %69 = vector.extract_strided_slice %27 {offsets = [8, 0], sizes = [1, 49], strides = [1, 1]} : vector<49x49xf32> to vector<1x49xf32>
    %c8 = arith.constant 8 : index
    %c0_40 = arith.constant 0 : index
    %c0_41 = arith.constant 0 : index
    %70 = vector.load %arg5[%c8, %c0_40, %c0_41] : memref<49x49x49xf32, #tpu.memory_space<vmem>>, vector<1x49x49xf32>
    %71 = vector.shape_cast %70 : vector<1x49x49xf32> to vector<49x49xf32>
    %cst_42 = arith.constant dense<0.000000e+00> : vector<1x49xf32>
    %72 = tpu.matmul %69, %71, %cst_42 {dimension_numbers = #tpu.dot_dimension_numbers<[1], [0], [0], [1], [0, 0, 1, 1], [], []>} : vector<1x49xf32>, vector<49x49xf32>, vector<1x49xf32> -> vector<1x49xf32>
    %73 = arith.addf %68, %72 : vector<1x49xf32>
    %74 = vector.extract_strided_slice %27 {offsets = [9, 0], sizes = [1, 49], strides = [1, 1]} : vector<49x49xf32> to vector<1x49xf32>
    %c9 = arith.constant 9 : index
    %c0_43 = arith.constant 0 : index
    %c0_44 = arith.constant 0 : index
    %75 = vector.load %arg5[%c9, %c0_43, %c0_44] : memref<49x49x49xf32, #tpu.memory_space<vmem>>, vector<1x49x49xf32>
    %76 = vector.shape_cast %75 : vector<1x49x49xf32> to vector<49x49xf32>
    %cst_45 = arith.constant dense<0.000000e+00> : vector<1x49xf32>
    %77 = tpu.matmul %74, %76, %cst_45 {dimension_numbers = #tpu.dot_dimension_numbers<[1], [0], [0], [1], [0, 0, 1, 1], [], []>} : vector<1x49xf32>, vector<49x49xf32>, vector<1x49xf32> -> vector<1x49xf32>
    %78 = arith.addf %73, %77 : vector<1x49xf32>
    %79 = vector.extract_strided_slice %27 {offsets = [10, 0], sizes = [1, 49], strides = [1, 1]} : vector<49x49xf32> to vector<1x49xf32>
    %c10 = arith.constant 10 : index
    %c0_46 = arith.constant 0 : index
    %c0_47 = arith.constant 0 : index
    %80 = vector.load %arg5[%c10, %c0_46, %c0_47] : memref<49x49x49xf32, #tpu.memory_space<vmem>>, vector<1x49x49xf32>
    %81 = vector.shape_cast %80 : vector<1x49x49xf32> to vector<49x49xf32>
    %cst_48 = arith.constant dense<0.000000e+00> : vector<1x49xf32>
    %82 = tpu.matmul %79, %81, %cst_48 {dimension_numbers = #tpu.dot_dimension_numbers<[1], [0], [0], [1], [0, 0, 1, 1], [], []>} : vector<1x49xf32>, vector<49x49xf32>, vector<1x49xf32> -> vector<1x49xf32>
    %83 = arith.addf %78, %82 : vector<1x49xf32>
    %84 = vector.extract_strided_slice %27 {offsets = [11, 0], sizes = [1, 49], strides = [1, 1]} : vector<49x49xf32> to vector<1x49xf32>
    %c11 = arith.constant 11 : index
    %c0_49 = arith.constant 0 : index
    %c0_50 = arith.constant 0 : index
    %85 = vector.load %arg5[%c11, %c0_49, %c0_50] : memref<49x49x49xf32, #tpu.memory_space<vmem>>, vector<1x49x49xf32>
    %86 = vector.shape_cast %85 : vector<1x49x49xf32> to vector<49x49xf32>
    %cst_51 = arith.constant dense<0.000000e+00> : vector<1x49xf32>
    %87 = tpu.matmul %84, %86, %cst_51 {dimension_numbers = #tpu.dot_dimension_numbers<[1], [0], [0], [1], [0, 0, 1, 1], [], []>} : vector<1x49xf32>, vector<49x49xf32>, vector<1x49xf32> -> vector<1x49xf32>
    %88 = arith.addf %83, %87 : vector<1x49xf32>
    %89 = vector.extract_strided_slice %27 {offsets = [12, 0], sizes = [1, 49], strides = [1, 1]} : vector<49x49xf32> to vector<1x49xf32>
    %c12 = arith.constant 12 : index
    %c0_52 = arith.constant 0 : index
    %c0_53 = arith.constant 0 : index
    %90 = vector.load %arg5[%c12, %c0_52, %c0_53] : memref<49x49x49xf32, #tpu.memory_space<vmem>>, vector<1x49x49xf32>
    %91 = vector.shape_cast %90 : vector<1x49x49xf32> to vector<49x49xf32>
    %cst_54 = arith.constant dense<0.000000e+00> : vector<1x49xf32>
    %92 = tpu.matmul %89, %91, %cst_54 {dimension_numbers = #tpu.dot_dimension_numbers<[1], [0], [0], [1], [0, 0, 1, 1], [], []>} : vector<1x49xf32>, vector<49x49xf32>, vector<1x49xf32> -> vector<1x49xf32>
    %93 = arith.addf %88, %92 : vector<1x49xf32>
    %94 = vector.extract_strided_slice %27 {offsets = [13, 0], sizes = [1, 49], strides = [1, 1]} : vector<49x49xf32> to vector<1x49xf32>
    %c13 = arith.constant 13 : index
    %c0_55 = arith.constant 0 : index
    %c0_56 = arith.constant 0 : index
    %95 = vector.load %arg5[%c13, %c0_55, %c0_56] : memref<49x49x49xf32, #tpu.memory_space<vmem>>, vector<1x49x49xf32>
    %96 = vector.shape_cast %95 : vector<1x49x49xf32> to vector<49x49xf32>
    %cst_57 = arith.constant dense<0.000000e+00> : vector<1x49xf32>
    %97 = tpu.matmul %94, %96, %cst_57 {dimension_numbers = #tpu.dot_dimension_numbers<[1], [0], [0], [1], [0, 0, 1, 1], [], []>} : vector<1x49xf32>, vector<49x49xf32>, vector<1x49xf32> -> vector<1x49xf32>
    %98 = arith.addf %93, %97 : vector<1x49xf32>
    %99 = vector.extract_strided_slice %27 {offsets = [14, 0], sizes = [1, 49], strides = [1, 1]} : vector<49x49xf32> to vector<1x49xf32>
    %c14 = arith.constant 14 : index
    %c0_58 = arith.constant 0 : index
    %c0_59 = arith.constant 0 : index
    %100 = vector.load %arg5[%c14, %c0_58, %c0_59] : memref<49x49x49xf32, #tpu.memory_space<vmem>>, vector<1x49x49xf32>
    %101 = vector.shape_cast %100 : vector<1x49x49xf32> to vector<49x49xf32>
    %cst_60 = arith.constant dense<0.000000e+00> : vector<1x49xf32>
    %102 = tpu.matmul %99, %101, %cst_60 {dimension_numbers = #tpu.dot_dimension_numbers<[1], [0], [0], [1], [0, 0, 1, 1], [], []>} : vector<1x49xf32>, vector<49x49xf32>, vector<1x49xf32> -> vector<1x49xf32>
    %103 = arith.addf %98, %102 : vector<1x49xf32>
    %104 = vector.extract_strided_slice %27 {offsets = [15, 0], sizes = [1, 49], strides = [1, 1]} : vector<49x49xf32> to vector<1x49xf32>
    %c15 = arith.constant 15 : index
    %c0_61 = arith.constant 0 : index
    %c0_62 = arith.constant 0 : index
    %105 = vector.load %arg5[%c15, %c0_61, %c0_62] : memref<49x49x49xf32, #tpu.memory_space<vmem>>, vector<1x49x49xf32>
    %106 = vector.shape_cast %105 : vector<1x49x49xf32> to vector<49x49xf32>
    %cst_63 = arith.constant dense<0.000000e+00> : vector<1x49xf32>
    %107 = tpu.matmul %104, %106, %cst_63 {dimension_numbers = #tpu.dot_dimension_numbers<[1], [0], [0], [1], [0, 0, 1, 1], [], []>} : vector<1x49xf32>, vector<49x49xf32>, vector<1x49xf32> -> vector<1x49xf32>
    %108 = arith.addf %103, %107 : vector<1x49xf32>
    %109 = vector.extract_strided_slice %27 {offsets = [16, 0], sizes = [1, 49], strides = [1, 1]} : vector<49x49xf32> to vector<1x49xf32>
    %c16 = arith.constant 16 : index
    %c0_64 = arith.constant 0 : index
    %c0_65 = arith.constant 0 : index
    %110 = vector.load %arg5[%c16, %c0_64, %c0_65] : memref<49x49x49xf32, #tpu.memory_space<vmem>>, vector<1x49x49xf32>
    %111 = vector.shape_cast %110 : vector<1x49x49xf32> to vector<49x49xf32>
    %cst_66 = arith.constant dense<0.000000e+00> : vector<1x49xf32>
    %112 = tpu.matmul %109, %111, %cst_66 {dimension_numbers = #tpu.dot_dimension_numbers<[1], [0], [0], [1], [0, 0, 1, 1], [], []>} : vector<1x49xf32>, vector<49x49xf32>, vector<1x49xf32> -> vector<1x49xf32>
    %113 = arith.addf %108, %112 : vector<1x49xf32>
    %114 = vector.extract_strided_slice %27 {offsets = [17, 0], sizes = [1, 49], strides = [1, 1]} : vector<49x49xf32> to vector<1x49xf32>
    %c17 = arith.constant 17 : index
    %c0_67 = arith.constant 0 : index
    %c0_68 = arith.constant 0 : index
    %115 = vector.load %arg5[%c17, %c0_67, %c0_68] : memref<49x49x49xf32, #tpu.memory_space<vmem>>, vector<1x49x49xf32>
    %116 = vector.shape_cast %115 : vector<1x49x49xf32> to vector<49x49xf32>
    %cst_69 = arith.constant dense<0.000000e+00> : vector<1x49xf32>
    %117 = tpu.matmul %114, %116, %cst_69 {dimension_numbers = #tpu.dot_dimension_numbers<[1], [0], [0], [1], [0, 0, 1, 1], [], []>} : vector<1x49xf32>, vector<49x49xf32>, vector<1x49xf32> -> vector<1x49xf32>
    %118 = arith.addf %113, %117 : vector<1x49xf32>
    %119 = vector.extract_strided_slice %27 {offsets = [18, 0], sizes = [1, 49], strides = [1, 1]} : vector<49x49xf32> to vector<1x49xf32>
    %c18 = arith.constant 18 : index
    %c0_70 = arith.constant 0 : index
    %c0_71 = arith.constant 0 : index
    %120 = vector.load %arg5[%c18, %c0_70, %c0_71] : memref<49x49x49xf32, #tpu.memory_space<vmem>>, vector<1x49x49xf32>
    %121 = vector.shape_cast %120 : vector<1x49x49xf32> to vector<49x49xf32>
    %cst_72 = arith.constant dense<0.000000e+00> : vector<1x49xf32>
    %122 = tpu.matmul %119, %121, %cst_72 {dimension_numbers = #tpu.dot_dimension_numbers<[1], [0], [0], [1], [0, 0, 1, 1], [], []>} : vector<1x49xf32>, vector<49x49xf32>, vector<1x49xf32> -> vector<1x49xf32>
    %123 = arith.addf %118, %122 : vector<1x49xf32>
    %124 = vector.extract_strided_slice %27 {offsets = [19, 0], sizes = [1, 49], strides = [1, 1]} : vector<49x49xf32> to vector<1x49xf32>
    %c19 = arith.constant 19 : index
    %c0_73 = arith.constant 0 : index
    %c0_74 = arith.constant 0 : index
    %125 = vector.load %arg5[%c19, %c0_73, %c0_74] : memref<49x49x49xf32, #tpu.memory_space<vmem>>, vector<1x49x49xf32>
    %126 = vector.shape_cast %125 : vector<1x49x49xf32> to vector<49x49xf32>
    %cst_75 = arith.constant dense<0.000000e+00> : vector<1x49xf32>
    %127 = tpu.matmul %124, %126, %cst_75 {dimension_numbers = #tpu.dot_dimension_numbers<[1], [0], [0], [1], [0, 0, 1, 1], [], []>} : vector<1x49xf32>, vector<49x49xf32>, vector<1x49xf32> -> vector<1x49xf32>
    %128 = arith.addf %123, %127 : vector<1x49xf32>
    %129 = vector.extract_strided_slice %27 {offsets = [20, 0], sizes = [1, 49], strides = [1, 1]} : vector<49x49xf32> to vector<1x49xf32>
    %c20 = arith.constant 20 : index
    %c0_76 = arith.constant 0 : index
    %c0_77 = arith.constant 0 : index
    %130 = vector.load %arg5[%c20, %c0_76, %c0_77] : memref<49x49x49xf32, #tpu.memory_space<vmem>>, vector<1x49x49xf32>
    %131 = vector.shape_cast %130 : vector<1x49x49xf32> to vector<49x49xf32>
    %cst_78 = arith.constant dense<0.000000e+00> : vector<1x49xf32>
    %132 = tpu.matmul %129, %131, %cst_78 {dimension_numbers = #tpu.dot_dimension_numbers<[1], [0], [0], [1], [0, 0, 1, 1], [], []>} : vector<1x49xf32>, vector<49x49xf32>, vector<1x49xf32> -> vector<1x49xf32>
    %133 = arith.addf %128, %132 : vector<1x49xf32>
    %134 = vector.extract_strided_slice %27 {offsets = [21, 0], sizes = [1, 49], strides = [1, 1]} : vector<49x49xf32> to vector<1x49xf32>
    %c21 = arith.constant 21 : index
    %c0_79 = arith.constant 0 : index
    %c0_80 = arith.constant 0 : index
    %135 = vector.load %arg5[%c21, %c0_79, %c0_80] : memref<49x49x49xf32, #tpu.memory_space<vmem>>, vector<1x49x49xf32>
    %136 = vector.shape_cast %135 : vector<1x49x49xf32> to vector<49x49xf32>
    %cst_81 = arith.constant dense<0.000000e+00> : vector<1x49xf32>
    %137 = tpu.matmul %134, %136, %cst_81 {dimension_numbers = #tpu.dot_dimension_numbers<[1], [0], [0], [1], [0, 0, 1, 1], [], []>} : vector<1x49xf32>, vector<49x49xf32>, vector<1x49xf32> -> vector<1x49xf32>
    %138 = arith.addf %133, %137 : vector<1x49xf32>
    %139 = vector.extract_strided_slice %27 {offsets = [22, 0], sizes = [1, 49], strides = [1, 1]} : vector<49x49xf32> to vector<1x49xf32>
    %c22 = arith.constant 22 : index
    %c0_82 = arith.constant 0 : index
    %c0_83 = arith.constant 0 : index
    %140 = vector.load %arg5[%c22, %c0_82, %c0_83] : memref<49x49x49xf32, #tpu.memory_space<vmem>>, vector<1x49x49xf32>
    %141 = vector.shape_cast %140 : vector<1x49x49xf32> to vector<49x49xf32>
    %cst_84 = arith.constant dense<0.000000e+00> : vector<1x49xf32>
    %142 = tpu.matmul %139, %141, %cst_84 {dimension_numbers = #tpu.dot_dimension_numbers<[1], [0], [0], [1], [0, 0, 1, 1], [], []>} : vector<1x49xf32>, vector<49x49xf32>, vector<1x49xf32> -> vector<1x49xf32>
    %143 = arith.addf %138, %142 : vector<1x49xf32>
    %144 = vector.extract_strided_slice %27 {offsets = [23, 0], sizes = [1, 49], strides = [1, 1]} : vector<49x49xf32> to vector<1x49xf32>
    %c23 = arith.constant 23 : index
    %c0_85 = arith.constant 0 : index
    %c0_86 = arith.constant 0 : index
    %145 = vector.load %arg5[%c23, %c0_85, %c0_86] : memref<49x49x49xf32, #tpu.memory_space<vmem>>, vector<1x49x49xf32>
    %146 = vector.shape_cast %145 : vector<1x49x49xf32> to vector<49x49xf32>
    %cst_87 = arith.constant dense<0.000000e+00> : vector<1x49xf32>
    %147 = tpu.matmul %144, %146, %cst_87 {dimension_numbers = #tpu.dot_dimension_numbers<[1], [0], [0], [1], [0, 0, 1, 1], [], []>} : vector<1x49xf32>, vector<49x49xf32>, vector<1x49xf32> -> vector<1x49xf32>
    %148 = arith.addf %143, %147 : vector<1x49xf32>
    %149 = vector.extract_strided_slice %27 {offsets = [24, 0], sizes = [1, 49], strides = [1, 1]} : vector<49x49xf32> to vector<1x49xf32>
    %c24 = arith.constant 24 : index
    %c0_88 = arith.constant 0 : index
    %c0_89 = arith.constant 0 : index
    %150 = vector.load %arg5[%c24, %c0_88, %c0_89] : memref<49x49x49xf32, #tpu.memory_space<vmem>>, vector<1x49x49xf32>
    %151 = vector.shape_cast %150 : vector<1x49x49xf32> to vector<49x49xf32>
    %cst_90 = arith.constant dense<0.000000e+00> : vector<1x49xf32>
    %152 = tpu.matmul %149, %151, %cst_90 {dimension_numbers = #tpu.dot_dimension_numbers<[1], [0], [0], [1], [0, 0, 1, 1], [], []>} : vector<1x49xf32>, vector<49x49xf32>, vector<1x49xf32> -> vector<1x49xf32>
    %153 = arith.addf %148, %152 : vector<1x49xf32>
    %154 = vector.extract_strided_slice %27 {offsets = [25, 0], sizes = [1, 49], strides = [1, 1]} : vector<49x49xf32> to vector<1x49xf32>
    %c25 = arith.constant 25 : index
    %c0_91 = arith.constant 0 : index
    %c0_92 = arith.constant 0 : index
    %155 = vector.load %arg5[%c25, %c0_91, %c0_92] : memref<49x49x49xf32, #tpu.memory_space<vmem>>, vector<1x49x49xf32>
    %156 = vector.shape_cast %155 : vector<1x49x49xf32> to vector<49x49xf32>
    %cst_93 = arith.constant dense<0.000000e+00> : vector<1x49xf32>
    %157 = tpu.matmul %154, %156, %cst_93 {dimension_numbers = #tpu.dot_dimension_numbers<[1], [0], [0], [1], [0, 0, 1, 1], [], []>} : vector<1x49xf32>, vector<49x49xf32>, vector<1x49xf32> -> vector<1x49xf32>
    %158 = arith.addf %153, %157 : vector<1x49xf32>
    %159 = vector.extract_strided_slice %27 {offsets = [26, 0], sizes = [1, 49], strides = [1, 1]} : vector<49x49xf32> to vector<1x49xf32>
    %c26 = arith.constant 26 : index
    %c0_94 = arith.constant 0 : index
    %c0_95 = arith.constant 0 : index
    %160 = vector.load %arg5[%c26, %c0_94, %c0_95] : memref<49x49x49xf32, #tpu.memory_space<vmem>>, vector<1x49x49xf32>
    %161 = vector.shape_cast %160 : vector<1x49x49xf32> to vector<49x49xf32>
    %cst_96 = arith.constant dense<0.000000e+00> : vector<1x49xf32>
    %162 = tpu.matmul %159, %161, %cst_96 {dimension_numbers = #tpu.dot_dimension_numbers<[1], [0], [0], [1], [0, 0, 1, 1], [], []>} : vector<1x49xf32>, vector<49x49xf32>, vector<1x49xf32> -> vector<1x49xf32>
    %163 = arith.addf %158, %162 : vector<1x49xf32>
    %164 = vector.extract_strided_slice %27 {offsets = [27, 0], sizes = [1, 49], strides = [1, 1]} : vector<49x49xf32> to vector<1x49xf32>
    %c27 = arith.constant 27 : index
    %c0_97 = arith.constant 0 : index
    %c0_98 = arith.constant 0 : index
    %165 = vector.load %arg5[%c27, %c0_97, %c0_98] : memref<49x49x49xf32, #tpu.memory_space<vmem>>, vector<1x49x49xf32>
    %166 = vector.shape_cast %165 : vector<1x49x49xf32> to vector<49x49xf32>
    %cst_99 = arith.constant dense<0.000000e+00> : vector<1x49xf32>
    %167 = tpu.matmul %164, %166, %cst_99 {dimension_numbers = #tpu.dot_dimension_numbers<[1], [0], [0], [1], [0, 0, 1, 1], [], []>} : vector<1x49xf32>, vector<49x49xf32>, vector<1x49xf32> -> vector<1x49xf32>
    %168 = arith.addf %163, %167 : vector<1x49xf32>
    %169 = vector.extract_strided_slice %27 {offsets = [28, 0], sizes = [1, 49], strides = [1, 1]} : vector<49x49xf32> to vector<1x49xf32>
    %c28 = arith.constant 28 : index
    %c0_100 = arith.constant 0 : index
    %c0_101 = arith.constant 0 : index
    %170 = vector.load %arg5[%c28, %c0_100, %c0_101] : memref<49x49x49xf32, #tpu.memory_space<vmem>>, vector<1x49x49xf32>
    %171 = vector.shape_cast %170 : vector<1x49x49xf32> to vector<49x49xf32>
    %cst_102 = arith.constant dense<0.000000e+00> : vector<1x49xf32>
    %172 = tpu.matmul %169, %171, %cst_102 {dimension_numbers = #tpu.dot_dimension_numbers<[1], [0], [0], [1], [0, 0, 1, 1], [], []>} : vector<1x49xf32>, vector<49x49xf32>, vector<1x49xf32> -> vector<1x49xf32>
    %173 = arith.addf %168, %172 : vector<1x49xf32>
    %174 = vector.extract_strided_slice %27 {offsets = [29, 0], sizes = [1, 49], strides = [1, 1]} : vector<49x49xf32> to vector<1x49xf32>
    %c29 = arith.constant 29 : index
    %c0_103 = arith.constant 0 : index
    %c0_104 = arith.constant 0 : index
    %175 = vector.load %arg5[%c29, %c0_103, %c0_104] : memref<49x49x49xf32, #tpu.memory_space<vmem>>, vector<1x49x49xf32>
    %176 = vector.shape_cast %175 : vector<1x49x49xf32> to vector<49x49xf32>
    %cst_105 = arith.constant dense<0.000000e+00> : vector<1x49xf32>
    %177 = tpu.matmul %174, %176, %cst_105 {dimension_numbers = #tpu.dot_dimension_numbers<[1], [0], [0], [1], [0, 0, 1, 1], [], []>} : vector<1x49xf32>, vector<49x49xf32>, vector<1x49xf32> -> vector<1x49xf32>
    %178 = arith.addf %173, %177 : vector<1x49xf32>
    %179 = vector.extract_strided_slice %27 {offsets = [30, 0], sizes = [1, 49], strides = [1, 1]} : vector<49x49xf32> to vector<1x49xf32>
    %c30 = arith.constant 30 : index
    %c0_106 = arith.constant 0 : index
    %c0_107 = arith.constant 0 : index
    %180 = vector.load %arg5[%c30, %c0_106, %c0_107] : memref<49x49x49xf32, #tpu.memory_space<vmem>>, vector<1x49x49xf32>
    %181 = vector.shape_cast %180 : vector<1x49x49xf32> to vector<49x49xf32>
    %cst_108 = arith.constant dense<0.000000e+00> : vector<1x49xf32>
    %182 = tpu.matmul %179, %181, %cst_108 {dimension_numbers = #tpu.dot_dimension_numbers<[1], [0], [0], [1], [0, 0, 1, 1], [], []>} : vector<1x49xf32>, vector<49x49xf32>, vector<1x49xf32> -> vector<1x49xf32>
    %183 = arith.addf %178, %182 : vector<1x49xf32>
    %184 = vector.extract_strided_slice %27 {offsets = [31, 0], sizes = [1, 49], strides = [1, 1]} : vector<49x49xf32> to vector<1x49xf32>
    %c31 = arith.constant 31 : index
    %c0_109 = arith.constant 0 : index
    %c0_110 = arith.constant 0 : index
    %185 = vector.load %arg5[%c31, %c0_109, %c0_110] : memref<49x49x49xf32, #tpu.memory_space<vmem>>, vector<1x49x49xf32>
    %186 = vector.shape_cast %185 : vector<1x49x49xf32> to vector<49x49xf32>
    %cst_111 = arith.constant dense<0.000000e+00> : vector<1x49xf32>
    %187 = tpu.matmul %184, %186, %cst_111 {dimension_numbers = #tpu.dot_dimension_numbers<[1], [0], [0], [1], [0, 0, 1, 1], [], []>} : vector<1x49xf32>, vector<49x49xf32>, vector<1x49xf32> -> vector<1x49xf32>
    %188 = arith.addf %183, %187 : vector<1x49xf32>
    %189 = vector.extract_strided_slice %27 {offsets = [32, 0], sizes = [1, 49], strides = [1, 1]} : vector<49x49xf32> to vector<1x49xf32>
    %c32 = arith.constant 32 : index
    %c0_112 = arith.constant 0 : index
    %c0_113 = arith.constant 0 : index
    %190 = vector.load %arg5[%c32, %c0_112, %c0_113] : memref<49x49x49xf32, #tpu.memory_space<vmem>>, vector<1x49x49xf32>
    %191 = vector.shape_cast %190 : vector<1x49x49xf32> to vector<49x49xf32>
    %cst_114 = arith.constant dense<0.000000e+00> : vector<1x49xf32>
    %192 = tpu.matmul %189, %191, %cst_114 {dimension_numbers = #tpu.dot_dimension_numbers<[1], [0], [0], [1], [0, 0, 1, 1], [], []>} : vector<1x49xf32>, vector<49x49xf32>, vector<1x49xf32> -> vector<1x49xf32>
    %193 = arith.addf %188, %192 : vector<1x49xf32>
    %194 = vector.extract_strided_slice %27 {offsets = [33, 0], sizes = [1, 49], strides = [1, 1]} : vector<49x49xf32> to vector<1x49xf32>
    %c33 = arith.constant 33 : index
    %c0_115 = arith.constant 0 : index
    %c0_116 = arith.constant 0 : index
    %195 = vector.load %arg5[%c33, %c0_115, %c0_116] : memref<49x49x49xf32, #tpu.memory_space<vmem>>, vector<1x49x49xf32>
    %196 = vector.shape_cast %195 : vector<1x49x49xf32> to vector<49x49xf32>
    %cst_117 = arith.constant dense<0.000000e+00> : vector<1x49xf32>
    %197 = tpu.matmul %194, %196, %cst_117 {dimension_numbers = #tpu.dot_dimension_numbers<[1], [0], [0], [1], [0, 0, 1, 1], [], []>} : vector<1x49xf32>, vector<49x49xf32>, vector<1x49xf32> -> vector<1x49xf32>
    %198 = arith.addf %193, %197 : vector<1x49xf32>
    %199 = vector.extract_strided_slice %27 {offsets = [34, 0], sizes = [1, 49], strides = [1, 1]} : vector<49x49xf32> to vector<1x49xf32>
    %c34 = arith.constant 34 : index
    %c0_118 = arith.constant 0 : index
    %c0_119 = arith.constant 0 : index
    %200 = vector.load %arg5[%c34, %c0_118, %c0_119] : memref<49x49x49xf32, #tpu.memory_space<vmem>>, vector<1x49x49xf32>
    %201 = vector.shape_cast %200 : vector<1x49x49xf32> to vector<49x49xf32>
    %cst_120 = arith.constant dense<0.000000e+00> : vector<1x49xf32>
    %202 = tpu.matmul %199, %201, %cst_120 {dimension_numbers = #tpu.dot_dimension_numbers<[1], [0], [0], [1], [0, 0, 1, 1], [], []>} : vector<1x49xf32>, vector<49x49xf32>, vector<1x49xf32> -> vector<1x49xf32>
    %203 = arith.addf %198, %202 : vector<1x49xf32>
    %204 = vector.extract_strided_slice %27 {offsets = [35, 0], sizes = [1, 49], strides = [1, 1]} : vector<49x49xf32> to vector<1x49xf32>
    %c35 = arith.constant 35 : index
    %c0_121 = arith.constant 0 : index
    %c0_122 = arith.constant 0 : index
    %205 = vector.load %arg5[%c35, %c0_121, %c0_122] : memref<49x49x49xf32, #tpu.memory_space<vmem>>, vector<1x49x49xf32>
    %206 = vector.shape_cast %205 : vector<1x49x49xf32> to vector<49x49xf32>
    %cst_123 = arith.constant dense<0.000000e+00> : vector<1x49xf32>
    %207 = tpu.matmul %204, %206, %cst_123 {dimension_numbers = #tpu.dot_dimension_numbers<[1], [0], [0], [1], [0, 0, 1, 1], [], []>} : vector<1x49xf32>, vector<49x49xf32>, vector<1x49xf32> -> vector<1x49xf32>
    %208 = arith.addf %203, %207 : vector<1x49xf32>
    %209 = vector.extract_strided_slice %27 {offsets = [36, 0], sizes = [1, 49], strides = [1, 1]} : vector<49x49xf32> to vector<1x49xf32>
    %c36 = arith.constant 36 : index
    %c0_124 = arith.constant 0 : index
    %c0_125 = arith.constant 0 : index
    %210 = vector.load %arg5[%c36, %c0_124, %c0_125] : memref<49x49x49xf32, #tpu.memory_space<vmem>>, vector<1x49x49xf32>
    %211 = vector.shape_cast %210 : vector<1x49x49xf32> to vector<49x49xf32>
    %cst_126 = arith.constant dense<0.000000e+00> : vector<1x49xf32>
    %212 = tpu.matmul %209, %211, %cst_126 {dimension_numbers = #tpu.dot_dimension_numbers<[1], [0], [0], [1], [0, 0, 1, 1], [], []>} : vector<1x49xf32>, vector<49x49xf32>, vector<1x49xf32> -> vector<1x49xf32>
    %213 = arith.addf %208, %212 : vector<1x49xf32>
    %214 = vector.extract_strided_slice %27 {offsets = [37, 0], sizes = [1, 49], strides = [1, 1]} : vector<49x49xf32> to vector<1x49xf32>
    %c37 = arith.constant 37 : index
    %c0_127 = arith.constant 0 : index
    %c0_128 = arith.constant 0 : index
    %215 = vector.load %arg5[%c37, %c0_127, %c0_128] : memref<49x49x49xf32, #tpu.memory_space<vmem>>, vector<1x49x49xf32>
    %216 = vector.shape_cast %215 : vector<1x49x49xf32> to vector<49x49xf32>
    %cst_129 = arith.constant dense<0.000000e+00> : vector<1x49xf32>
    %217 = tpu.matmul %214, %216, %cst_129 {dimension_numbers = #tpu.dot_dimension_numbers<[1], [0], [0], [1], [0, 0, 1, 1], [], []>} : vector<1x49xf32>, vector<49x49xf32>, vector<1x49xf32> -> vector<1x49xf32>
    %218 = arith.addf %213, %217 : vector<1x49xf32>
    %219 = vector.extract_strided_slice %27 {offsets = [38, 0], sizes = [1, 49], strides = [1, 1]} : vector<49x49xf32> to vector<1x49xf32>
    %c38 = arith.constant 38 : index
    %c0_130 = arith.constant 0 : index
    %c0_131 = arith.constant 0 : index
    %220 = vector.load %arg5[%c38, %c0_130, %c0_131] : memref<49x49x49xf32, #tpu.memory_space<vmem>>, vector<1x49x49xf32>
    %221 = vector.shape_cast %220 : vector<1x49x49xf32> to vector<49x49xf32>
    %cst_132 = arith.constant dense<0.000000e+00> : vector<1x49xf32>
    %222 = tpu.matmul %219, %221, %cst_132 {dimension_numbers = #tpu.dot_dimension_numbers<[1], [0], [0], [1], [0, 0, 1, 1], [], []>} : vector<1x49xf32>, vector<49x49xf32>, vector<1x49xf32> -> vector<1x49xf32>
    %223 = arith.addf %218, %222 : vector<1x49xf32>
    %224 = vector.extract_strided_slice %27 {offsets = [39, 0], sizes = [1, 49], strides = [1, 1]} : vector<49x49xf32> to vector<1x49xf32>
    %c39 = arith.constant 39 : index
    %c0_133 = arith.constant 0 : index
    %c0_134 = arith.constant 0 : index
    %225 = vector.load %arg5[%c39, %c0_133, %c0_134] : memref<49x49x49xf32, #tpu.memory_space<vmem>>, vector<1x49x49xf32>
    %226 = vector.shape_cast %225 : vector<1x49x49xf32> to vector<49x49xf32>
    %cst_135 = arith.constant dense<0.000000e+00> : vector<1x49xf32>
    %227 = tpu.matmul %224, %226, %cst_135 {dimension_numbers = #tpu.dot_dimension_numbers<[1], [0], [0], [1], [0, 0, 1, 1], [], []>} : vector<1x49xf32>, vector<49x49xf32>, vector<1x49xf32> -> vector<1x49xf32>
    %228 = arith.addf %223, %227 : vector<1x49xf32>
    %229 = vector.extract_strided_slice %27 {offsets = [40, 0], sizes = [1, 49], strides = [1, 1]} : vector<49x49xf32> to vector<1x49xf32>
    %c40 = arith.constant 40 : index
    %c0_136 = arith.constant 0 : index
    %c0_137 = arith.constant 0 : index
    %230 = vector.load %arg5[%c40, %c0_136, %c0_137] : memref<49x49x49xf32, #tpu.memory_space<vmem>>, vector<1x49x49xf32>
    %231 = vector.shape_cast %230 : vector<1x49x49xf32> to vector<49x49xf32>
    %cst_138 = arith.constant dense<0.000000e+00> : vector<1x49xf32>
    %232 = tpu.matmul %229, %231, %cst_138 {dimension_numbers = #tpu.dot_dimension_numbers<[1], [0], [0], [1], [0, 0, 1, 1], [], []>} : vector<1x49xf32>, vector<49x49xf32>, vector<1x49xf32> -> vector<1x49xf32>
    %233 = arith.addf %228, %232 : vector<1x49xf32>
    %234 = vector.extract_strided_slice %27 {offsets = [41, 0], sizes = [1, 49], strides = [1, 1]} : vector<49x49xf32> to vector<1x49xf32>
    %c41 = arith.constant 41 : index
    %c0_139 = arith.constant 0 : index
    %c0_140 = arith.constant 0 : index
    %235 = vector.load %arg5[%c41, %c0_139, %c0_140] : memref<49x49x49xf32, #tpu.memory_space<vmem>>, vector<1x49x49xf32>
    %236 = vector.shape_cast %235 : vector<1x49x49xf32> to vector<49x49xf32>
    %cst_141 = arith.constant dense<0.000000e+00> : vector<1x49xf32>
    %237 = tpu.matmul %234, %236, %cst_141 {dimension_numbers = #tpu.dot_dimension_numbers<[1], [0], [0], [1], [0, 0, 1, 1], [], []>} : vector<1x49xf32>, vector<49x49xf32>, vector<1x49xf32> -> vector<1x49xf32>
    %238 = arith.addf %233, %237 : vector<1x49xf32>
    %239 = vector.extract_strided_slice %27 {offsets = [42, 0], sizes = [1, 49], strides = [1, 1]} : vector<49x49xf32> to vector<1x49xf32>
    %c42 = arith.constant 42 : index
    %c0_142 = arith.constant 0 : index
    %c0_143 = arith.constant 0 : index
    %240 = vector.load %arg5[%c42, %c0_142, %c0_143] : memref<49x49x49xf32, #tpu.memory_space<vmem>>, vector<1x49x49xf32>
    %241 = vector.shape_cast %240 : vector<1x49x49xf32> to vector<49x49xf32>
    %cst_144 = arith.constant dense<0.000000e+00> : vector<1x49xf32>
    %242 = tpu.matmul %239, %241, %cst_144 {dimension_numbers = #tpu.dot_dimension_numbers<[1], [0], [0], [1], [0, 0, 1, 1], [], []>} : vector<1x49xf32>, vector<49x49xf32>, vector<1x49xf32> -> vector<1x49xf32>
    %243 = arith.addf %238, %242 : vector<1x49xf32>
    %244 = vector.extract_strided_slice %27 {offsets = [43, 0], sizes = [1, 49], strides = [1, 1]} : vector<49x49xf32> to vector<1x49xf32>
    %c43 = arith.constant 43 : index
    %c0_145 = arith.constant 0 : index
    %c0_146 = arith.constant 0 : index
    %245 = vector.load %arg5[%c43, %c0_145, %c0_146] : memref<49x49x49xf32, #tpu.memory_space<vmem>>, vector<1x49x49xf32>
    %246 = vector.shape_cast %245 : vector<1x49x49xf32> to vector<49x49xf32>
    %cst_147 = arith.constant dense<0.000000e+00> : vector<1x49xf32>
    %247 = tpu.matmul %244, %246, %cst_147 {dimension_numbers = #tpu.dot_dimension_numbers<[1], [0], [0], [1], [0, 0, 1, 1], [], []>} : vector<1x49xf32>, vector<49x49xf32>, vector<1x49xf32> -> vector<1x49xf32>
    %248 = arith.addf %243, %247 : vector<1x49xf32>
    %249 = vector.extract_strided_slice %27 {offsets = [44, 0], sizes = [1, 49], strides = [1, 1]} : vector<49x49xf32> to vector<1x49xf32>
    %c44 = arith.constant 44 : index
    %c0_148 = arith.constant 0 : index
    %c0_149 = arith.constant 0 : index
    %250 = vector.load %arg5[%c44, %c0_148, %c0_149] : memref<49x49x49xf32, #tpu.memory_space<vmem>>, vector<1x49x49xf32>
    %251 = vector.shape_cast %250 : vector<1x49x49xf32> to vector<49x49xf32>
    %cst_150 = arith.constant dense<0.000000e+00> : vector<1x49xf32>
    %252 = tpu.matmul %249, %251, %cst_150 {dimension_numbers = #tpu.dot_dimension_numbers<[1], [0], [0], [1], [0, 0, 1, 1], [], []>} : vector<1x49xf32>, vector<49x49xf32>, vector<1x49xf32> -> vector<1x49xf32>
    %253 = arith.addf %248, %252 : vector<1x49xf32>
    %254 = vector.extract_strided_slice %27 {offsets = [45, 0], sizes = [1, 49], strides = [1, 1]} : vector<49x49xf32> to vector<1x49xf32>
    %c45 = arith.constant 45 : index
    %c0_151 = arith.constant 0 : index
    %c0_152 = arith.constant 0 : index
    %255 = vector.load %arg5[%c45, %c0_151, %c0_152] : memref<49x49x49xf32, #tpu.memory_space<vmem>>, vector<1x49x49xf32>
    %256 = vector.shape_cast %255 : vector<1x49x49xf32> to vector<49x49xf32>
    %cst_153 = arith.constant dense<0.000000e+00> : vector<1x49xf32>
    %257 = tpu.matmul %254, %256, %cst_153 {dimension_numbers = #tpu.dot_dimension_numbers<[1], [0], [0], [1], [0, 0, 1, 1], [], []>} : vector<1x49xf32>, vector<49x49xf32>, vector<1x49xf32> -> vector<1x49xf32>
    %258 = arith.addf %253, %257 : vector<1x49xf32>
    %259 = vector.extract_strided_slice %27 {offsets = [46, 0], sizes = [1, 49], strides = [1, 1]} : vector<49x49xf32> to vector<1x49xf32>
    %c46 = arith.constant 46 : index
    %c0_154 = arith.constant 0 : index
    %c0_155 = arith.constant 0 : index
    %260 = vector.load %arg5[%c46, %c0_154, %c0_155] : memref<49x49x49xf32, #tpu.memory_space<vmem>>, vector<1x49x49xf32>
    %261 = vector.shape_cast %260 : vector<1x49x49xf32> to vector<49x49xf32>
    %cst_156 = arith.constant dense<0.000000e+00> : vector<1x49xf32>
    %262 = tpu.matmul %259, %261, %cst_156 {dimension_numbers = #tpu.dot_dimension_numbers<[1], [0], [0], [1], [0, 0, 1, 1], [], []>} : vector<1x49xf32>, vector<49x49xf32>, vector<1x49xf32> -> vector<1x49xf32>
    %263 = arith.addf %258, %262 : vector<1x49xf32>
    %264 = vector.extract_strided_slice %27 {offsets = [47, 0], sizes = [1, 49], strides = [1, 1]} : vector<49x49xf32> to vector<1x49xf32>
    %c47 = arith.constant 47 : index
    %c0_157 = arith.constant 0 : index
    %c0_158 = arith.constant 0 : index
    %265 = vector.load %arg5[%c47, %c0_157, %c0_158] : memref<49x49x49xf32, #tpu.memory_space<vmem>>, vector<1x49x49xf32>
    %266 = vector.shape_cast %265 : vector<1x49x49xf32> to vector<49x49xf32>
    %cst_159 = arith.constant dense<0.000000e+00> : vector<1x49xf32>
    %267 = tpu.matmul %264, %266, %cst_159 {dimension_numbers = #tpu.dot_dimension_numbers<[1], [0], [0], [1], [0, 0, 1, 1], [], []>} : vector<1x49xf32>, vector<49x49xf32>, vector<1x49xf32> -> vector<1x49xf32>
    %268 = arith.addf %263, %267 : vector<1x49xf32>
    %269 = vector.extract_strided_slice %27 {offsets = [48, 0], sizes = [1, 49], strides = [1, 1]} : vector<49x49xf32> to vector<1x49xf32>
    %c48 = arith.constant 48 : index
    %c0_160 = arith.constant 0 : index
    %c0_161 = arith.constant 0 : index
    %270 = vector.load %arg5[%c48, %c0_160, %c0_161] : memref<49x49x49xf32, #tpu.memory_space<vmem>>, vector<1x49x49xf32>
    %271 = vector.shape_cast %270 : vector<1x49x49xf32> to vector<49x49xf32>
    %cst_162 = arith.constant dense<0.000000e+00> : vector<1x49xf32>
    %272 = tpu.matmul %269, %271, %cst_162 {dimension_numbers = #tpu.dot_dimension_numbers<[1], [0], [0], [1], [0, 0, 1, 1], [], []>} : vector<1x49xf32>, vector<49x49xf32>, vector<1x49xf32> -> vector<1x49xf32>
    %273 = arith.addf %268, %272 : vector<1x49xf32>
    %c0_163 = arith.constant 0 : index
    %c0_164 = arith.constant 0 : index
    %c0_165 = arith.constant 0 : index
    %274 = vector.load %arg11[%c0_163, %c0_164, %c0_165] : memref<1x1x49xf32, #tpu.memory_space<vmem>>, vector<1x1x49xf32>
    %275 = vector.shape_cast %274 : vector<1x1x49xf32> to vector<1x49xf32>
    %276 = vector.shape_cast %273 : vector<1x49xf32> to vector<1x1x49xf32>
    tpu.vector_store %arg11[%c0_163, %c0_164, %c0_165], %276 {strides = array<i32>} : memref<1x1x49xf32, #tpu.memory_space<vmem>>, vector<1x1x49xf32>,
    %277 = arith.mulf %1, %1 : vector<512x49xf32>
    %cst_166 = arith.constant dense<0.000000e+00> : vector<49xf32>
    %278 = vector.multi_reduction <add>, %277, %cst_166 [0] : vector<512x49xf32> to vector<49xf32>
    %279 = vector.shape_cast %278 : vector<49xf32> to vector<1x49xf32>
    %280 = math.sqrt %279 : vector<1x49xf32>
    %cst_167 = arith.constant 9.99999996E-13 : f32
    %281 = vector.broadcast %cst_167 : f32 to vector<1x49xf32>
    %282 = arith.maximumf %280, %281 : vector<1x49xf32>
    %283 = vector.broadcast %282 : vector<1x49xf32> to vector<512x49xf32>
    %284 = arith.divf %1, %283 : vector<512x49xf32>
    %c0_168 = arith.constant 0 : index
    %c0_169 = arith.constant 0 : index
    %285 = vector.load %arg7[%c0_168, %c0_169] : memref<23x512xf32, #tpu.memory_space<vmem>>, vector<23x512xf32>
    %cst_170 = arith.constant dense<0.000000e+00> : vector<23x49xf32>
    %286 = tpu.matmul %285, %284, %cst_170 {dimension_numbers = #tpu.dot_dimension_numbers<[1], [0], [0], [1], [0, 0, 1, 1], [], []>} : vector<23x512xf32>, vector<512x49xf32>, vector<23x49xf32> -> vector<23x49xf32>
    %c0_171 = arith.constant 0 : index
    %c0_172 = arith.constant 0 : index
    %287 = vector.load %arg8[%c0_171, %c0_172] : memref<23x1xf32, #tpu.memory_space<vmem>>, vector<23x1xf32>
    %288 = vector.broadcast %287 : vector<23x1xf32> to vector<23x49xf32>
    %289 = arith.addf %286, %288 : vector<23x49xf32>
    %cst_173 = arith.constant dense<0xFF800000> : vector<49xf32>
    %290 = vector.multi_reduction <maximumf>, %289, %cst_173 [0] : vector<23x49xf32> to vector<49xf32>
    %291 = vector.shape_cast %290 : vector<49xf32> to vector<1x49xf32>
    %292 = vector.broadcast %291 : vector<1x49xf32> to vector<23x49xf32>
    %293 = arith.subf %289, %292 : vector<23x49xf32>
    %294 = math.exp %293 : vector<23x49xf32>
    %cst_174 = arith.constant dense<0.000000e+00> : vector<49xf32>
    %295 = vector.multi_reduction <add>, %294, %cst_174 [0] : vector<23x49xf32> to vector<49xf32>
    %296 = vector.shape_cast %295 : vector<49xf32> to vector<1x49xf32>
    %297 = vector.broadcast %296 : vector<1x49xf32> to vector<23x49xf32>
    %298 = arith.divf %294, %297 : vector<23x49xf32>
    %299 = vector.broadcast %273 : vector<1x49xf32> to vector<23x49xf32>
    %300 = arith.mulf %298, %299 : vector<23x49xf32>
    %cst_175 = arith.constant dense<0.000000e+00> : vector<23x512xf32>
    %301 = tpu.matmul %300, %284, %cst_175 {dimension_numbers = #tpu.dot_dimension_numbers<[1], [1], [0], [0], [0, 0, 1, 0], [], []>} : vector<23x49xf32>, vector<512x49xf32>, vector<23x512xf32> -> vector<23x512xf32>
    %c0_176 = arith.constant 0 : index
    %c0_177 = arith.constant 0 : index
    %302 = vector.load %arg9[%c0_176, %c0_177] : memref<23x512xf32, #tpu.memory_space<vmem>>, vector<23x512xf32>
    %cst_178 = arith.constant dense<0.000000e+00> : vector<23xf32>
    %303 = vector.multi_reduction <add>, %300, %cst_178 [1] : vector<23x49xf32> to vector<23xf32>
    %304 = vector.shape_cast %303 : vector<23xf32> to vector<23x1xf32>
    %305 = vector.broadcast %304 : vector<23x1xf32> to vector<23x512xf32>
    %306 = arith.mulf %302, %305 : vector<23x512xf32>
    %307 = arith.subf %301, %306 : vector<23x512xf32>
    %308 = arith.mulf %307, %307 : vector<23x512xf32>
    %cst_179 = arith.constant dense<0.000000e+00> : vector<23xf32>
    %309 = vector.multi_reduction <add>, %308, %cst_179 [1] : vector<23x512xf32> to vector<23xf32>
    %310 = vector.shape_cast %309 : vector<23xf32> to vector<23x1xf32>
    %311 = math.sqrt %310 : vector<23x1xf32>
    %cst_180 = arith.constant 9.99999996E-13 : f32
    %312 = vector.broadcast %cst_180 : f32 to vector<23x1xf32>
    %313 = arith.maximumf %311, %312 : vector<23x1xf32>
    %314 = vector.broadcast %313 : vector<23x1xf32> to vector<23x512xf32>
    %315 = arith.divf %307, %314 : vector<23x512xf32>
    %316 = arith.mulf %315, %315 : vector<23x512xf32>
    %317 = vector.shape_cast %316 : vector<23x512xf32> to vector<1x23x512xf32>
    %cst_181 = arith.constant dense<0.000000e+00> : vector<1xf32>
    %318 = vector.multi_reduction <add>, %317, %cst_181 [1, 2] : vector<1x23x512xf32> to vector<1xf32>
    %319 = vector.shape_cast %318 : vector<1xf32> to vector<1x1x1xf32>
    %320 = vector.extract %319[0, 0, 0] : f32 from vector<1x1x1xf32>
    %321 = math.sqrt %320 : f32
    %cst_182 = arith.constant 9.99999996E-13 : f32
    %322 = arith.maximumf %321, %cst_182 : f32
    %323 = vector.broadcast %322 : f32 to vector<23x512xf32>
    %324 = arith.divf %315, %323 : vector<23x512xf32>
    %c0_183 = arith.constant 0 : index
    %c0_184 = arith.constant 0 : index
    %c0_185 = arith.constant 0 : index
    %325 = vector.load %arg10[%c0_183, %c0_184, %c0_185] : memref<1x23x512xf32, #tpu.memory_space<vmem>>, vector<1x23x512xf32>
    %326 = vector.shape_cast %325 : vector<1x23x512xf32> to vector<23x512xf32>
    %327 = vector.shape_cast %324 : vector<23x512xf32> to vector<1x23x512xf32>
    tpu.vector_store %arg10[%c0_183, %c0_184, %c0_185], %327 {strides = array<i32>} : memref<1x23x512xf32, #tpu.memory_space<vmem>>, vector<1x23x512xf32>,
    return
  }
  func.func @transform_0(%arg0: i32) -> (i32, i32, i32) {
    %c0_i32 = arith.constant 0 : i32
    %c0_i32_0 = arith.constant 0 : i32
    %c0_i32_1 = arith.constant 0 : i32
    return %arg0, %c0_i32, %c0_i32_0 : i32, i32, i32
  }
  func.func @transform_1(%arg0: i32) -> (i32, i32) {
    %c0_i32 = arith.constant 0 : i32
    %c0_i32_0 = arith.constant 0 : i32
    %c0_i32_1 = arith.constant 0 : i32
    return %c0_i32, %c0_i32_0 : i32, i32
  }
  func.func @transform_2(%arg0: i32) -> (i32, i32) {
    %c0_i32 = arith.constant 0 : i32
    %c0_i32_0 = arith.constant 0 : i32
    %c0_i32_1 = arith.constant 0 : i32
    return %c0_i32, %c0_i32_0 : i32, i32
  }
  func.func @transform_3(%arg0: i32) -> (i32, i32) {
    %c0_i32 = arith.constant 0 : i32
    %c0_i32_0 = arith.constant 0 : i32
    %c0_i32_1 = arith.constant 0 : i32
    return %c0_i32, %c0_i32_0 : i32, i32
  }
  func.func @transform_4(%arg0: i32) -> (i32, i32, i32) {
    %c0_i32 = arith.constant 0 : i32
    %c0_i32_0 = arith.constant 0 : i32
    %c0_i32_1 = arith.constant 0 : i32
    %c0_i32_2 = arith.constant 0 : i32
    return %c0_i32, %c0_i32_0, %c0_i32_1 : i32, i32, i32
  }
  func.func @transform_5(%arg0: i32) -> (i32, i32) {
    %c0_i32 = arith.constant 0 : i32
    %c0_i32_0 = arith.constant 0 : i32
    %c0_i32_1 = arith.constant 0 : i32
    return %c0_i32, %c0_i32_0 : i32, i32
  }
  func.func @transform_6(%arg0: i32) -> (i32, i32) {
    %c0_i32 = arith.constant 0 : i32
    %c0_i32_0 = arith.constant 0 : i32
    %c0_i32_1 = arith.constant 0 : i32
    return %c0_i32, %c0_i32_0 : i32, i32
  }
  func.func @transform_7(%arg0: i32) -> (i32, i32) {
    %c0_i32 = arith.constant 0 : i32
    %c0_i32_0 = arith.constant 0 : i32
    %c0_i32_1 = arith.constant 0 : i32
    return %c0_i32, %c0_i32_0 : i32, i32
  }
  func.func @transform_8(%arg0: i32) -> (i32, i32) {
    %c0_i32 = arith.constant 0 : i32
    %c0_i32_0 = arith.constant 0 : i32
    %c0_i32_1 = arith.constant 0 : i32
    return %c0_i32, %c0_i32_0 : i32, i32
  }
  func.func @transform_9(%arg0: i32) -> (i32, i32, i32) {
    %c0_i32 = arith.constant 0 : i32
    %c0_i32_0 = arith.constant 0 : i32
    %c0_i32_1 = arith.constant 0 : i32
    return %arg0, %c0_i32, %c0_i32_0 : i32, i32, i32
  }
  func.func @transform_10(%arg0: i32) -> (i32, i32, i32) {
    %c0_i32 = arith.constant 0 : i32
    %c0_i32_0 = arith.constant 0 : i32
    %c0_i32_1 = arith.constant 0 : i32
    return %arg0, %c0_i32, %c0_i32_0 : i32, i32, i32
  }
}

</mosaic_0001>

<bundles_post_ra>
// kernel: _lambda_.1
= control target key start
LH: loop header
LB: loop body
LE: loop exit
PB: predicated region body
PF: predicated region fallthrough
CT: control target
= control target key end

     0   :  { %s12571_s0 = inlined_call_operand.vmem [shape: f32[2,512,49], index: 0, kind: input, shape index: {}]   ;;  %s12572_s1 = inlined_call_operand.vmem [shape: f32[1,49], index: 1, kind: input, shape index: {}]   ;;  %s12573_s2 = inlined_call_operand.vmem [shape: f32[1,49], index: 2, kind: input, shape index: {}]   ;;  %s12574_s3 = inlined_call_operand.hbm [shape: f32[49,512], index: 3, kind: input, shape index: {}]   ;;  %s12575_s4 = inlined_call_operand.hbm [shape: f32[49,49,49], index: 4, kind: input, shape index: {}]   ;;  %s12576_s5 = inlined_call_operand.hbm [shape: f32[1,49], index: 5, kind: input, shape index: {}]   ;;  %s12577_s6 = inlined_call_operand.hbm [shape: f32[23,512], index: 6, kind: input, shape index: {}]   ;;  %s12578_s7 = inlined_call_operand.hbm [shape: f32[23,1], index: 7, kind: input, shape index: {}]   ;;  %s12579_s8 = inlined_call_operand.hbm [shape: f32[23,512], index: 8, kind: input, shape index: {}]   ;;  %s12580_s9 = inlined_call_operand.vmem [shape: f32[2,23,512], index: 9, kind: output, shape index: {0}]   ;;  %s12581_s10 = inlined_call_operand.hbm [shape: f32[2,1,49], index: 10, kind: output, shape index: {1}]  }
   0x1   :  { %12628 = sst [smem:[#allocation47_spill]] %s12580_s9 }
   0x2   :  { %16 = vsyncpa [#allocation3], 0 }
   0x3   :  { %17 = vsyncpa [#allocation6], 0 }
   0x4   :  { %18 = vsyncpa [#allocation9], 0 }
   0x5   :  { %19 = vsyncpa [#allocation12], 0 }
   0x6   :  { %20 = vsyncpa [#allocation4], 0 }
   0x7   :  { %22 = vsyncpa [#allocation4 + $0x1], 0  ;;  %s10272_s13 = smov 0   ;;  %s10274_s14 = smov 0  }
   0x8   :  { %s10276_s15 = smov 0   ;;  %s10278_s16 = smov 0  }
   0x9 LB: > { %12629 = sst [smem:[#allocation19_spill]] %s10187_s13  ;;  %s10293_s17 = sadd.s32 4294967295, %s10199_s16   ;;  %s10199_s16 = sphi %s10278_s16, %s12728_s16   ;;  %s10195_s15 = sphi %s10276_s15, %s12730_s15   ;;  %s10191_s14 = sphi %s10274_s14, %s12732_s14   ;;  %s10187_s13 = sphi %s10272_s13, %s12731_s13  }
   0xa   : > { %12630 = sst [smem:[#allocation20_spill]] %s10195_s15  ;;  %s7113_s18 = sadd.s32 4294967294, %s10199_s16  }
   0xb   : > { %12631 = sst [smem:[#allocation21_spill]] %s10199_s16  ;;  %s10297_s19 = sadd.s32 1, %s10199_s16  }
   0xc   : > { %12632 = sst [smem:[#allocation22_spill]] %s10297_s19  ;;  %s255_s20 = sadd.s32 1, %s10195_s15 }
   0xd   : > { %s252_s21 = ssub.s32 %s10199_s16, %s10297_s19  ;;  %p265_p0 = scmp.ne.s32.totalorder %s10195_s15, %s10191_s14 }
   0xe   : > { %p253_p1 = scmp.eq.s32.totalorder %s252_s21, 0  ;;  %p266_p2 = scmp.eq.s32.totalorder %s10293_s17, 1 }
   0xf   : > { %p271_p3 = scmp.ne.s32.totalorder %s10191_s14, %s10187_s13  ;;  %p272_p4 = scmp.eq.s32.totalorder %s7113_s18, 1 }
  0x10   : > { %s10308_s22 = scalar_select %p253_p1, %s10195_s15, %s255_s20  }
  0x11   : > { %p10310_p5 = por %p266_p2, %p265_p0  ;;  %p10314_p6 = por %p272_p4, %p271_p3 }
  0x12   : > { %12633 = sst [smem:[#allocation23_spill]] %s10308_s22  ;;  %p7114_p7 = scmp.ge.s32.totalorder %s10199_s16, 1 }
  0x13   : > { %s12634_s23 = scalar_select %p10310_p5, 1, 0 }
  0x14   : > { %s12635_s24 = scalar_select %p10314_p6, 1, 0 }
  0x15   : > { %p279_p8 = scmp.lt.s32.totalorder %s10199_s16, 3  ;;  %p12583_p9 = scmp.eq.s32.totalorder %s10293_s17, 0 }
  0x16   : > { %12636 = sst [smem:[#allocation24_spill]] %s12635_s24  ;;  %s10201_s26 = smov [#allocation5]  }
  0x17   : > { %p10321_p10 = pnand %p7114_p7, %p279_p8  ;;  %s310_s27 = sshll.u32 %s10201_s26, 4  ;;  %s311_s27 = int_to_ptr.vmem [resolvable:$true] %s310_s27 }
  0x18   : > { %s10202_s29 = smov [#allocation8]   ;;  %s9953_s18 = scalar_lea.hbm %s12575_s4, 43904 }
  0x19   : > { %s12637_s25 = scalar_select %p10321_p10, 1, 0 }
  0x1a   : > { %p9587_p11 = pneg %p10321_p10  ;;  %s334_s30 = sshll.u32 %s10202_s29, 4  ;;  %s335_s30 = int_to_ptr.vmem [resolvable:$true] %s334_s30 }
  0x1b   : > { %p9954_p13 = scmp.ne.s32.totalorder %s12575_s4, %s9953_s18  ;;  %p9960_p3 = scmp.lt.u32.totalorder %s9953_s18, %s12575_s4 }
  0x1c   : > { %p10329_p12 = pnand %p12583_p9, %p9587_p11 }
  0x1e   : > { %p10341_p0 = pneg %p10329_p12 }
  0x20   : > { %p9956_p1 = pnand %p10341_p0, %p9954_p13 }
  0x22   : > { %p9957_p2 = pneg %p9956_p1 }
  0x24   : > { %p9962_p4 = pnand %p9960_p3, %p9957_p2 }
  0x26   : > { %9965 = shalt.err (!%p9962_p4)
}
  0x27   : > { %s9966_s29 = scalar_lea.vmem %s311_s27, 43904  ;;  %p9974_p9 = scmp.lt.s32.totalorder %s311_s27, %s311_s27 }
  0x28   : > { %p9967_p7 = scmp.ne.s32.totalorder %s311_s27, %s9966_s29  ;;  %p9975_p6 = scmp.lt.s32.totalorder %s9966_s29, %s9966_s29 }
  0x2a   : > { %p9969_p8 = pnand %p9967_p7, %p10341_p0  ;;  %p9976_p5 = por %p9975_p6, %p9974_p9 }
  0x2c   : > { %p9970_p11 = pneg %p9969_p8 }
  0x2e   : > { %p9977_p10 = pnand %p9976_p5, %p9970_p11 }
  0x30   : > { %9980 = shalt.err (!%p9977_p10)
}
  0x31   : > { %s12591_s11 = smov 128   ;;  %s12592_s12 = smov 8  }
  0x32   : > { %9593 = dma.hbm_to_vmem [thread:$0]  (!%p10329_p12), %s12575_s4, 43904, %s311_s27, [#allocation6], %s12591_s11, %s12591_s11, %s12592_s12  }
  0x33   : > { %s10205_s18 = smov [#allocation2]   ;;  %s9981_s19 = scalar_lea.hbm %s12577_s6, 1536 }
  0x34   : > { %s297_s20 = sshll.u32 %s10205_s18, 4  ;;  %p9982_p5 = scmp.ne.s32.totalorder %s12577_s6, %s9981_s19  ;;  %s298_s20 = int_to_ptr.vmem [resolvable:$true] %s297_s20 }
  0x35   : > { %p9988_p10 = scmp.lt.u32.totalorder %s9981_s19, %s12577_s6 }
  0x36   : > { %p9984_p6 = pnand %p9982_p5, %p10341_p0 }
  0x38   : > { %p9985_p9 = pneg %p9984_p6 }
  0x3a   : > { %p9990_p13 = pnand %p9988_p10, %p9985_p9 }
  0x3c   : > { %9993 = shalt.err (!%p9990_p13)
}
  0x3d   : > { %s9994_s27 = scalar_lea.vmem %s335_s30, 1536  ;;  %p10002_p4 = scmp.lt.s32.totalorder %s335_s30, %s335_s30 }
  0x3e   : > { %p9995_p1 = scmp.ne.s32.totalorder %s335_s30, %s9994_s27  ;;  %p10003_p7 = scmp.lt.s32.totalorder %s9994_s27, %s9994_s27 }
  0x40   : > { %p9997_p2 = pnand %p9995_p1, %p10341_p0  ;;  %p10004_p8 = por %p10003_p7, %p10002_p4 }
  0x42   : > { %p9998_p3 = pneg %p9997_p2 }
  0x44   : > { %p10005_p11 = pnand %p10004_p8, %p9998_p3 }
  0x46   : > { %10008 = shalt.err (!%p10005_p11)
}
  0x47   : > { %s12593_s13 = smov 512   ;;  %s10207_s24 = smov 32  }
  0x48   : > { %9599 = dma.hbm_to_vmem [thread:$0]  (!%p10329_p12), %s12577_s6, 1536, %s335_s30, [#allocation9], %s12593_s13, %s12593_s13, %s10207_s24  }
  0x49   : > { %s10009_s22 = scalar_lea.hbm %s12574_s3, 3584 }
  0x4a   : > { %p10010_p5 = scmp.ne.s32.totalorder %s12574_s3, %s10009_s22  ;;  %p10016_p10 = scmp.lt.u32.totalorder %s10009_s22, %s12574_s3 }
  0x4c   : > { %p10012_p6 = pnand %p10010_p5, %p10341_p0 }
  0x4e   : > { %p10013_p9 = pneg %p10012_p6 }
  0x50   : > { %p10018_p13 = pnand %p10016_p10, %p10013_p9 }
  0x52   : > { %10021 = shalt.err (!%p10018_p13)
}
  0x53   : > { %s10022_s9 = scalar_lea.vmem %s298_s20, 3584  ;;  %p10030_p4 = scmp.lt.s32.totalorder %s298_s20, %s298_s20 }
  0x54   : > { %p10023_p1 = scmp.ne.s32.totalorder %s298_s20, %s10022_s9  ;;  %p10031_p7 = scmp.lt.s32.totalorder %s10022_s9, %s10022_s9 }
  0x56   : > { %p10025_p2 = pnand %p10023_p1, %p10341_p0  ;;  %p10032_p8 = por %p10031_p7, %p10030_p4 }
  0x58   : > { %p10026_p3 = pneg %p10025_p2 }
  0x5a   : > { %p10033_p11 = pnand %p10032_p8, %p10026_p3 }
  0x5c   : > { %10036 = shalt.err (!%p10033_p11)
}
  0x5d   : > { %9590 = dma.hbm_to_vmem [thread:$0]  (!%p10329_p12), %s12574_s3, 3584, %s298_s20, [#allocation3], %s12593_s13, %s12593_s13, %s10207_s24  }
  0x5e   : > { %s10208_s19 = smov [#allocation7]   ;;  %s10209_s22 = smov [#allocation10]  }
  0x5f   : > { %s324_s15 = sshll.u32 %s10208_s19, 4  ;;  %s347_s18 = sshll.u32 %s10209_s22, 4  ;;  %s325_s15 = int_to_ptr.vmem [resolvable:$true] %s324_s15  ;;  %s348_s18 = int_to_ptr.vmem [resolvable:$true] %s347_s18 }
  0x60   : > { %s10037_s27 = scalar_lea.hbm %s12576_s5, 16 }
  0x61   : > { %p10038_p5 = scmp.ne.s32.totalorder %s12576_s5, %s10037_s27  ;;  %p10044_p10 = scmp.lt.u32.totalorder %s10037_s27, %s12576_s5 }
  0x63   : > { %p10040_p6 = pnand %p10038_p5, %p10341_p0 }
  0x65   : > { %p10041_p9 = pneg %p10040_p6 }
  0x67   : > { %p10046_p13 = pnand %p10044_p10, %p10041_p9 }
  0x69   : > { %10049 = shalt.err (!%p10046_p13)
}
  0x6a   : > { %s10050_s20 = scalar_lea.vmem %s325_s15, 16  ;;  %s10057_s16 = scalar_lea.vmem %s325_s15, 32 }
  0x6b   : > { %p10051_p1 = scmp.ne.s32.totalorder %s325_s15, %s10050_s20  ;;  %p10058_p4 = scmp.lt.s32.totalorder %s325_s15, %s325_s15 }
  0x6c   : > { %p10059_p7 = scmp.lt.s32.totalorder %s10057_s16, %s10050_s20 }
  0x6d   : > { %p10053_p2 = pnand %p10051_p1, %p10341_p0 }
  0x6e   : > { %p10060_p8 = por %p10059_p7, %p10058_p4 }
  0x6f   : > { %p10054_p3 = pneg %p10053_p2 }
  0x71   : > { %p10061_p11 = pnand %p10060_p8, %p10054_p3 }
  0x73   : > { %10064 = shalt.err (!%p10061_p11)
}
  0x74   : > { %9596 = dma.hbm_to_vmem [thread:$0]  (!%p10329_p12), %s12576_s5, 16, %s325_s15, [#allocation6]  }
  0x75   : > { %s10065_s21 = scalar_lea.hbm %s12578_s7, 384 }
  0x76   : > { %p10066_p5 = scmp.ne.s32.totalorder %s12578_s7, %s10065_s21  ;;  %p10072_p10 = scmp.lt.u32.totalorder %s10065_s21, %s12578_s7 }
  0x78   : > { %p10068_p6 = pnand %p10066_p5, %p10341_p0 }
  0x7a   : > { %p10069_p9 = pneg %p10068_p6 }
  0x7c   : > { %p10074_p13 = pnand %p10072_p10, %p10069_p9 }
  0x7e   : > { %10077 = shalt.err (!%p10074_p13)
}
  0x7f   : > { %s10078_s20 = scalar_lea.vmem %s348_s18, 384  ;;  %p10086_p4 = scmp.lt.s32.totalorder %s348_s18, %s348_s18 }
  0x80   : > { %p10079_p1 = scmp.ne.s32.totalorder %s348_s18, %s10078_s20  ;;  %p10087_p7 = scmp.lt.s32.totalorder %s10078_s20, %s10078_s20 }
  0x82   : > { %p10081_p2 = pnand %p10079_p1, %p10341_p0  ;;  %p10088_p8 = por %p10087_p7, %p10086_p4 }
  0x84   : > { %p10082_p3 = pneg %p10081_p2 }
  0x86   : > { %p10089_p11 = pnand %p10088_p8, %p10082_p3 }
  0x88   : > { %10092 = shalt.err (!%p10089_p11)
}
  0x89   : > { %s12640_s15 = smov 8   ;;  %s12641_s16 = smov 128  }
  0x8a   : > { %9602 = dma.hbm_to_vmem [thread:$0]  (!%p10329_p12), %s12578_s7, 384, %s348_s18, [#allocation9], %s12641_s16, %s12641_s16, %s12640_s15  }
  0x8b   : > { %s10210_s12 = smov [#allocation11]   ;;  %s10093_s27 = scalar_lea.hbm %s12579_s8, 1536 }
  0x8c   : > { %s360_s22 = sshll.u32 %s10210_s12, 4  ;;  %p10094_p5 = scmp.ne.s32.totalorder %s12579_s8, %s10093_s27  ;;  %s361_s22 = int_to_ptr.vmem [resolvable:$true] %s360_s22 }
  0x8d   : > { %p10100_p10 = scmp.lt.u32.totalorder %s10093_s27, %s12579_s8 }
  0x8e   : > { %p10096_p6 = pnand %p10094_p5, %p10341_p0 }
  0x90   : > { %p10097_p9 = pneg %p10096_p6 }
  0x92   : > { %p10102_p13 = pnand %p10100_p10, %p10097_p9 }
  0x94   : > { %10105 = shalt.err (!%p10102_p13)
}
  0x95   : > { %s10106_s18 = scalar_lea.vmem %s361_s22, 1536  ;;  %p10114_p4 = scmp.lt.s32.totalorder %s361_s22, %s361_s22 }
  0x96   : > { %p10107_p1 = scmp.ne.s32.totalorder %s361_s22, %s10106_s18  ;;  %p10115_p7 = scmp.lt.s32.totalorder %s10106_s18, %s10106_s18 }
  0x98   : > { %p10109_p2 = pnand %p10107_p1, %p10341_p0  ;;  %p10116_p8 = por %p10115_p7, %p10114_p4 }
  0x9a   : > { %p10110_p3 = pneg %p10109_p2 }
  0x9c   : > { %p10117_p11 = pnand %p10116_p8, %p10110_p3 }
  0x9e   : > { %10120 = shalt.err (!%p10117_p11)
}
  0x9f   : > { %s12642_s15 = smov 512   ;;  %p12643_p5 = scmp.ne.s32.totalorder %s12637_s25, 0 }
  0xa0   : > { %9605 = dma.hbm_to_vmem [thread:$0]  (!%p10329_p12), %s12579_s8, 1536, %s361_s22, [#allocation12], %s12642_s15, %s12642_s15, %s10207_s24  }
  0xa1   : > { %384 = sbr.rel (%p12643_p5) target bundleno = 2328 (0x918), region = 56 }
  0xa8   : > { %p12644_p0 = scmp.eq.s32.totalorder %s10293_s17, 0 }
  0xaa   : > { %10166 = dma.done.wait (%p12644_p0), [#allocation3], 3584   ;;  %p12645_p6 = pmov %p12644_p0 }
  0xab   : > { %p12646_p9 = pmov %p12644_p0 }
  0xac   : > { %10168 = vsyncadd (%p12645_p6), [#allocation3], 4294963712 }
  0xad   : > { %10170 = dma.done.wait (%p12646_p9), [#allocation6], 43920   ;;  %p12647_p10 = pmov %p12644_p0 }
  0xae   : > { %p12648_p13 = pmov %p12644_p0 }
  0xaf   : > { %10172 = vsyncadd (%p12647_p10), [#allocation6], 4294923376 }
  0xb0   : > { %10174 = dma.done.wait (%p12648_p13), [#allocation9], 1920   ;;  %p12649_p12 = pmov %p12644_p0 }
  0xb1   : > { %p12650_p1 = pmov %p12644_p0 }
  0xb2   : > { %10176 = vsyncadd (%p12649_p12), [#allocation9], 4294965376 }
  0xb3   : > { %10178 = dma.done.wait (%p12650_p1), [#allocation12], 1536   ;;  %p12651_p2 = pmov %p12644_p0 }
  0xb4   : > { %p446_p3 = scmp.lt.s32.totalorder %s10293_s17, 1  ;;  %vm520_vm0 = vcmask 400384   ;;  %vm1735_vm1 = vcmask 1040384   ;;  %vm10213_vm2 = vmmov 0   ;;  %vm6354_vm6 = vcmask 399360   ;;  %s444_s20 = sand.u32 1, %s10191_s14  }
  0xb5   : > { %10180 = vsyncadd (%p12651_p2), [#allocation12], 4294965760  ;;  %vm5890_vm7 = vcmask 393216   ;;  %s12333_s18 = scalar_lea.vmem [#allocation13], %s444_s20  ;;  %vm6831_vm8 = vcmask 1046528   ;;  %s7302_s15 = sshll.u32 %s10293_s17, 4 }
  0xb6   : > { %s10482_s25 = scalar_select %p446_p3, %s10293_s17, 1  ;;  %vm12233_vm5 = vmpackc.low %vm520_vm0, %vm520_vm0 }
  0xb7   : > { %s6973_s13 = sshll.u32 %s12333_s18, 4  ;;  %s12517_s26 = scalar_lea.hbm %s12581_s10, %s7302_s15  ;;  %s6974_s13 = int_to_ptr.vmem [resolvable:$true] %s6973_s13 }
  0xb8   : > { %s7305_s28 = sshll.u32 %s10482_s25, 9  ;;  %s6958_s24 = scalar_lea.sflag [#allocation4], %s444_s20 }
  0xb9   : > { %s10488_s11 = scalar_lea.vmem %s12571_s0, %s7305_s28  ;;  %p12722_p7 = scmp.ne.s32.totalorder %s12634_s23, 0 }
  0xba   : > { %v10491_v0 = vld [vmem:[%s10488_s11 + $0x80] sm:$0xff]  ;;  %v10494_v1 = vld [vmem:[%s10488_s11 + $0x88] sm:$0xff]  ;;  %v10509_v7 = vld [vmem:[%s10488_s11 + $0x90] sm:$0xff]  ;;  %s10215_s19 = smov [#allocation13]  }
  0xbb   : > { %v10497_v2 = vld [vmem:[%s10488_s11] sm:$0xff]  ;;  %v569_v3 = vsel %vm520_vm0, %v10491_v0, 0.0  ;;  %v572_v5 = vsel %vm520_vm0, %v10494_v1, 0.0  ;;  %v10506_v6 = vld [vmem:[%s10488_s11 + $0x8] sm:$0xff]  ;;  %v10512_v8 = vld [vmem:[%s10488_s11 + $0x10] sm:$0xff]  ;;  %v575_v10 = vsel %vm520_vm0, %v10509_v7, 0.0 }
  0xbc   : > { %570 = vadd.xlane.f32.xlu0 %v569_v3  ;;  %v521_v4 = vsel %vm520_vm0, %v10497_v2, 0.0  ;;  %v10515_v9 = vld [vmem:[%s10488_s11 + $0x98] sm:$0xff]  ;;  %v524_v11 = vsel %vm520_vm0, %v10506_v6, 0.0  ;;  %v527_v12 = vsel %vm520_vm0, %v10512_v8, 0.0  ;;  %v10529_v15 = vld [vmem:[%s10488_s11 + $0xa0] sm:$0xff]  ;;  %v10539_v19 = vld [vmem:[%s10488_s11 + $0xa8] sm:$0xff] }
  0xbd   : > { %522 = vadd.xlane.f32.xlu1 %v521_v4  ;;  %v578_v13 = vsel %vm520_vm0, %v10515_v9, 0.0  ;;  %v10526_v14 = vld [vmem:[%s10488_s11 + $0x18] sm:$0xff]  ;;  %v581_v16 = vsel %vm520_vm0, %v10529_v15, 0.0  ;;  %v10536_v18 = vld [vmem:[%s10488_s11 + $0x20] sm:$0xff]  ;;  %v584_v21 = vsel %vm520_vm0, %v10539_v19, 0.0  ;;  %v10546_v22 = vld [vmem:[%s10488_s11 + $0x28] sm:$0xff] }
  0xbe   : > { %v530_v17 = vsel %vm520_vm0, %v10526_v14, 0.0  ;;  %v533_v20 = vsel %vm520_vm0, %v10536_v18, 0.0  ;;  %v10549_v23 = vld [vmem:[%s10488_s11 + $0xb0] sm:$0xff]  ;;  %v536_v25 = vsel %vm520_vm0, %v10546_v22, 0.0  ;;  %v10559_v27 = vld [vmem:[%s10488_s11 + $0xb8] sm:$0xff]  ;;  %v10569_v31 = vld [vmem:[%s10488_s11 + $0xc0] sm:$0xff] }
  0xbf   : > { %v587_v24 = vsel %vm520_vm0, %v10549_v23, 0.0  ;;  %v10556_v26 = vld [vmem:[%s10488_s11 + $0x30] sm:$0xff]  ;;  %v590_v29 = vsel %vm520_vm0, %v10559_v27, 0.0  ;;  %v10566_v30 = vld [vmem:[%s10488_s11 + $0x38] sm:$0xff]  ;;  %v593_v32 = vsel %vm520_vm0, %v10569_v31, 0.0  ;;  %v10576_v34 = vld [vmem:[%s10488_s11 + $0x40] sm:$0xff] }
  0xc0   : > { %573 = vadd.xlane.f32.xlu0 %v572_v5  ;;  %v539_v28 = vsel %vm520_vm0, %v10556_v26, 0.0  ;;  %v542_v33 = vsel %vm520_vm0, %v10566_v30, 0.0  ;;  %v10579_v35 = vld [vmem:[%s10488_s11 + $0xc8] sm:$0xff]  ;;  %v545_v36 = vsel %vm520_vm0, %v10576_v34, 0.0  ;;  %v10589_v39 = vld [vmem:[%s10488_s11 + $0xd0] sm:$0xff]  ;;  %v10599_v43 = vld [vmem:[%s10488_s11 + $0xd8] sm:$0xff] }
  0xc1   : > { %525 = vadd.xlane.f32.xlu1 %v524_v11  ;;  %v596_v37 = vsel %vm520_vm0, %v10579_v35, 0.0  ;;  %v10586_v38 = vld [vmem:[%s10488_s11 + $0x48] sm:$0xff]  ;;  %v599_v40 = vsel %vm520_vm0, %v10589_v39, 0.0  ;;  %v10596_v42 = vld [vmem:[%s10488_s11 + $0x50] sm:$0xff]  ;;  %v602_v45 = vsel %vm520_vm0, %v10599_v43, 0.0  ;;  %v10606_v46 = vld [vmem:[%s10488_s11 + $0x58] sm:$0xff] }
  0xc2   : > { %v548_v41 = vsel %vm520_vm0, %v10586_v38, 0.0  ;;  %v551_v44 = vsel %vm520_vm0, %v10596_v42, 0.0  ;;  %v10609_v47 = vld [vmem:[%s10488_s11 + $0xe0] sm:$0xff]  ;;  %v554_v49 = vsel %vm520_vm0, %v10606_v46, 0.0  ;;  %v10619_v51 = vld [vmem:[%s10488_s11 + $0xe8] sm:$0xff]  ;;  %v10629_v55 = vld [vmem:[%s10488_s11 + $0xf0] sm:$0xff] }
  0xc3   : > { %v605_v48 = vsel %vm520_vm0, %v10609_v47, 0.0  ;;  %v10616_v50 = vld [vmem:[%s10488_s11 + $0x60] sm:$0xff]  ;;  %v608_v53 = vsel %vm520_vm0, %v10619_v51, 0.0  ;;  %v10626_v54 = vld [vmem:[%s10488_s11 + $0x68] sm:$0xff]  ;;  %v611_v56 = vsel %vm520_vm0, %v10629_v55, 0.0  ;;  %v10636_v58 = vld [vmem:[%s10488_s11 + $0x70] sm:$0xff] }
  0xc4   : > { %576 = vadd.xlane.f32.xlu0 %v575_v10  ;;  %v557_v52 = vsel %vm520_vm0, %v10616_v50, 0.0  ;;  %v560_v57 = vsel %vm520_vm0, %v10626_v54, 0.0  ;;  %v10639_v59 = vld [vmem:[%s10488_s11 + $0xf8] sm:$0xff]  ;;  %v563_v60 = vsel %vm520_vm0, %v10636_v58, 0.0  ;;  %v10649_v63 = vld [vmem:[%s10488_s11 + $0x180] sm:$0xff]  ;;  %v10659_v10 = vld [vmem:[%s10488_s11 + $0x188] sm:$0xff] }
  0xc5   : > { %579 = vadd.xlane.f32.xlu1 %v578_v13  ;;  %v614_v61 = vsel %vm520_vm0, %v10639_v59, 0.0  ;;  %v10646_v62 = vld [vmem:[%s10488_s11 + $0x78] sm:$0xff]  ;;  %v665_v3 = vsel %vm520_vm0, %v10649_v63, 0.0  ;;  %v10656_v5 = vld [vmem:[%s10488_s11 + $0x100] sm:$0xff]  ;;  %v10666_v13 = vld [vmem:[%s10488_s11 + $0x108] sm:$0xff]  ;;  %s10125_s12 = sshll.u32 %s10215_s19, 4  ;;  %s10126_s12 = int_to_ptr.vmem [resolvable:$false] %s10125_s12 }
  0xc6   : > { %v566_v4 = vsel %vm520_vm0, %v10646_v62, 0.0  ;;  %v617_v11 = vsel %vm520_vm0, %v10656_v5, 0.0  ;;  %s10127_s22 = scalar_lea.vmem %s10126_s12, 32  ;;  %p10128_p5 = scmp.lt.s32.totalorder %s6974_s13, %s10126_s12 }
  0xc8   : > { %528 = vadd.xlane.f32.xlu0 %v527_v12  ;;  %v668_v12 = vsel %vm520_vm0, %v10659_v10, 0.0 }
  0xc9   : > { %531 = vadd.xlane.f32.xlu1 %v530_v17 }
  0xcc   : > { %582 = vadd.xlane.f32.xlu0 %v581_v16  ;;  %v10669_v16 = vld [vmem:[%s10488_s11 + $0x190] sm:$0xff] }
  0xcd   : > { %585 = vadd.xlane.f32.xlu1 %v584_v21  ;;  %v671_v17 = vsel %vm520_vm0, %v10669_v16, 0.0  ;;  %v10676_v21 = vld [vmem:[%s10488_s11 + $0x110] sm:$0xff] }
  0xd0   : > { %534 = vadd.xlane.f32.xlu0 %v533_v20  ;;  %v620_v20 = vsel %vm520_vm0, %v10666_v13, 0.0 }
  0xd1   : > { %537 = vadd.xlane.f32.xlu1 %v536_v25  ;;  %v623_v25 = vsel %vm520_vm0, %v10676_v21, 0.0 }
  0xd4   : > { %588 = vadd.xlane.f32.xlu0 %v587_v24  ;;  %v10679_v24 = vld [vmem:[%s10488_s11 + $0x198] sm:$0xff] }
  0xd5   : > { %591 = vadd.xlane.f32.xlu1 %v590_v29  ;;  %v10686_v29 = vld [vmem:[%s10488_s11 + $0x118] sm:$0xff] }
  0xd8   : > { %540 = vadd.xlane.f32.xlu0 %v539_v28  ;;  %v674_v28 = vsel %vm520_vm0, %v10679_v24, 0.0 }
  0xd9   : > { %543 = vadd.xlane.f32.xlu1 %v542_v33 }
  0xdc   : > { %594 = vadd.xlane.f32.xlu0 %v593_v32  ;;  %v10689_v32 = vld [vmem:[%s10488_s11 + $0x1a0] sm:$0xff] }
  0xdd   : > { %597 = vadd.xlane.f32.xlu1 %v596_v37  ;;  %v677_v33 = vsel %vm520_vm0, %v10689_v32, 0.0  ;;  %v10696_v37 = vld [vmem:[%s10488_s11 + $0x120] sm:$0xff] }
  0xe0   : > { %546 = vadd.xlane.f32.xlu0 %v545_v36  ;;  %v626_v36 = vsel %vm520_vm0, %v10686_v29, 0.0 }
  0xe1   : > { %549 = vadd.xlane.f32.xlu1 %v548_v41  ;;  %v629_v41 = vsel %vm520_vm0, %v10696_v37, 0.0 }
  0xe4   : > { %600 = vadd.xlane.f32.xlu0 %v599_v40  ;;  %v10699_v40 = vld [vmem:[%s10488_s11 + $0x1a8] sm:$0xff] }
  0xe5   : > { %603 = vadd.xlane.f32.xlu1 %v602_v45  ;;  %v10706_v45 = vld [vmem:[%s10488_s11 + $0x128] sm:$0xff] }
  0xe8   : > { %552 = vadd.xlane.f32.xlu0 %v551_v44  ;;  %v680_v44 = vsel %vm520_vm0, %v10699_v40, 0.0 }
  0xe9   : > { %555 = vadd.xlane.f32.xlu1 %v554_v49 }
  0xec   : > { %606 = vadd.xlane.f32.xlu0 %v605_v48  ;;  %v10709_v48 = vld [vmem:[%s10488_s11 + $0x1b0] sm:$0xff] }
  0xed   : > { %609 = vadd.xlane.f32.xlu1 %v608_v53  ;;  %v683_v49 = vsel %vm520_vm0, %v10709_v48, 0.0  ;;  %v10716_v53 = vld [vmem:[%s10488_s11 + $0x130] sm:$0xff] }
  0xf0   : > { %558 = vadd.xlane.f32.xlu0 %v557_v52  ;;  %v632_v52 = vsel %vm520_vm0, %v10706_v45, 0.0 }
  0xf1   : > { %561 = vadd.xlane.f32.xlu1 %v560_v57  ;;  %v635_v57 = vsel %vm520_vm0, %v10716_v53, 0.0 }
  0xf4   : > { %612 = vadd.xlane.f32.xlu0 %v611_v56  ;;  %v10719_v56 = vld [vmem:[%s10488_s11 + $0x1b8] sm:$0xff] }
  0xf5   : > { %615 = vadd.xlane.f32.xlu1 %v614_v61  ;;  %v10726_v61 = vld [vmem:[%s10488_s11 + $0x138] sm:$0xff] }
  0xf8   : > { %564 = vadd.xlane.f32.xlu0 %v563_v60  ;;  %v686_v60 = vsel %vm520_vm0, %v10719_v56, 0.0 }
  0xf9   : > { %567 = vadd.xlane.f32.xlu1 %v566_v4 }
  0xfc   : > { %666 = vadd.xlane.f32.xlu0 %v665_v3  ;;  %v10729_v3 = vld [vmem:[%s10488_s11 + $0x1c0] sm:$0xff] }
  0xfd   : > { %669 = vadd.xlane.f32.xlu1 %v668_v12  ;;  %v689_v4 = vsel %vm520_vm0, %v10729_v3, 0.0  ;;  %v10736_v12 = vld [vmem:[%s10488_s11 + $0x140] sm:$0xff] }
 0x100   : > { %618 = vadd.xlane.f32.xlu0 %v617_v11  ;;  %v638_v11 = vsel %vm520_vm0, %v10726_v61, 0.0 }
 0x101   : > { %621 = vadd.xlane.f32.xlu1 %v620_v20  ;;  %v641_v20 = vsel %vm520_vm0, %v10736_v12, 0.0 }
 0x104   : > { %672 = vadd.xlane.f32.xlu0 %v671_v17  ;;  %v10739_v17 = vld [vmem:[%s10488_s11 + $0x1c8] sm:$0xff] }
 0x105   : > { %675 = vadd.xlane.f32.xlu1 %v674_v28  ;;  %12652 = vst [vmem:[#allocation25_spill] sm:$0xff] %v10739_v17  ;;  %v10746_v28 = vld [vmem:[%s10488_s11 + $0x148] sm:$0xff] }
 0x106   : > { %12653 = vst [vmem:[#allocation26_spill] sm:$0xff] %v10746_v28 }
 0x108   : > { %624 = vadd.xlane.f32.xlu0 %v623_v25  ;;  %v692_v25 = vsel %vm520_vm0, %v10739_v17, 0.0  ;;  %v10802_v17 = vld [vmem:[%s10488_s11 + $0x1f8] sm:$0xff] }
 0x109   : > { %627 = vadd.xlane.f32.xlu1 %v626_v36 }
 0x10c   : > { %678 = vadd.xlane.f32.xlu0 %v677_v33  ;;  %v10749_v33 = vld [vmem:[%s10488_s11 + $0x1d0] sm:$0xff] }
 0x10d   : > { %681 = vadd.xlane.f32.xlu1 %v680_v44  ;;  %12654 = vst [vmem:[#allocation27_spill] sm:$0xff] %v10749_v33  ;;  %v695_v36 = vsel %vm520_vm0, %v10749_v33, 0.0  ;;  %v10756_v44 = vld [vmem:[%s10488_s11 + $0x150] sm:$0xff] }
 0x10e   : > { %12655 = vst [vmem:[#allocation28_spill] sm:$0xff] %v10756_v44 }
 0x110   : > { %630 = vadd.xlane.f32.xlu0 %v629_v41  ;;  %v644_v41 = vsel %vm520_vm0, %v10746_v28, 0.0  ;;  %v10792_v28 = vld [vmem:[%s10488_s11 + $0x170] sm:$0xff] }
 0x111   : > { %633 = vadd.xlane.f32.xlu1 %v632_v52  ;;  %v647_v52 = vsel %vm520_vm0, %v10756_v44, 0.0 }
 0x114   : > { %684 = vadd.xlane.f32.xlu0 %v683_v49  ;;  %v10759_v49 = vld [vmem:[%s10488_s11 + $0x1d8] sm:$0xff] }
 0x115   : > { %687 = vadd.xlane.f32.xlu1 %v686_v60  ;;  %12656 = vst [vmem:[#allocation29_spill] sm:$0xff] %v10759_v49  ;;  %v10766_v60 = vld [vmem:[%s10488_s11 + $0x158] sm:$0xff] }
 0x116   : > { %12657 = vst [vmem:[#allocation30_spill] sm:$0xff] %v10766_v60 }
 0x118   : > { %636 = vadd.xlane.f32.xlu0 %v635_v57  ;;  %v698_v57 = vsel %vm520_vm0, %v10759_v49, 0.0  ;;  %v10786_v49 = vld [vmem:[%s10488_s11 + $0x168] sm:$0xff] }
 0x119   : > { %639 = vadd.xlane.f32.xlu1 %v638_v11  ;;  %12661 = vst [vmem:[#allocation34_spill] sm:$0xff] %v10786_v49 }
 0x11c   : > { %690 = vadd.xlane.f32.xlu0 %v689_v4  ;;  %v10769_v4 = vld [vmem:[%s10488_s11 + $0x1e0] sm:$0xff] }
 0x11d   : > { %693 = vadd.xlane.f32.xlu1 %v692_v25  ;;  %12658 = vst [vmem:[#allocation31_spill] sm:$0xff] %v10769_v4  ;;  %v701_v11 = vsel %vm520_vm0, %v10769_v4, 0.0  ;;  %v10776_v25 = vld [vmem:[%s10488_s11 + $0x160] sm:$0xff]  ;;  %v10789_v4 = vld [vmem:[%s10488_s11 + $0x1f0] sm:$0xff] }
 0x11e   : > { %12659 = vst [vmem:[#allocation32_spill] sm:$0xff] %v10776_v25  ;;  %12662 = vst [vmem:[#allocation35_spill] sm:$0xff] %v10789_v4 }
 0x120   : > { %642 = vadd.xlane.f32.xlu0 %v641_v20  ;;  %v650_v20 = vsel %vm520_vm0, %v10766_v60, 0.0 }
 0x121   : > { %645 = vadd.xlane.f32.xlu1 %v644_v41  ;;  %v653_v41 = vsel %vm520_vm0, %v10776_v25, 0.0 }
 0x124   : > { %696 = vadd.xlane.f32.xlu0 %v695_v36  ;;  %v10779_v36 = vld [vmem:[%s10488_s11 + $0x1e8] sm:$0xff] }
 0x125   : > { %699 = vadd.xlane.f32.xlu1 %v698_v57  ;;  %12660 = vst [vmem:[#allocation33_spill] sm:$0xff] %v10779_v36 }
 0x128   : > { %648 = vadd.xlane.f32.xlu0 %v647_v52  ;;  %v704_v52 = vsel %vm520_vm0, %v10779_v36, 0.0 }
 0x129   : > { %651 = vadd.xlane.f32.xlu1 %v650_v20  ;;  %v656_v20 = vsel %vm520_vm0, %v10786_v49, 0.0 }
 0x12c   : > { %702 = vadd.xlane.f32.xlu0 %v701_v11  ;;  %v707_v11 = vsel %vm520_vm0, %v10789_v4, 0.0 }
 0x12d   : > { %705 = vadd.xlane.f32.xlu1 %v704_v52  ;;  %v710_v52 = vsel %vm520_vm0, %v10802_v17, 0.0 }
 0x130   : > { %654 = vadd.xlane.f32.xlu0 %v653_v41  ;;  %v659_v41 = vsel %vm520_vm0, %v10792_v28, 0.0 }
 0x131   : > { %657 = vadd.xlane.f32.xlu1 %v656_v20 }
 0x134   : > { %708 = vadd.xlane.f32.xlu0 %v707_v11 }
 0x135   : > { %711 = vadd.xlane.f32.xlu1 %v710_v52 }
 0x138   : > { %660 = vadd.xlane.f32.xlu0 %v659_v41 }
 0x149   : > { %v571_v57 = vpop.xlane.xlu0 %570 }
 0x14a   : > { %v730_v44 = vmul.f32 0.020408163, %v571_v57  ;;  %v523_v60 = vpop.xlane.xlu1 %522 }
 0x14b   : > { %v714_v33 = vmul.f32 0.020408163, %v523_v60 }
 0x14c   : > { %v10799_v36 = vsub.f32 %v10491_v0, %v730_v44  ;;  %v10817_v44 = vld [vmem:[%s10488_s11 + $0x178] sm:$0xff] }
 0x14d   : > { %v574_v25 = vpop.xlane.xlu0 %573  ;;  %v10812_v49 = vsub.f32 %v10497_v2, %v714_v33  ;;  %12665 = vst [vmem:[#allocation38_spill] sm:$0xff] %v10817_v44  ;;  %v662_v60 = vsel %vm520_vm0, %v10817_v44, 0.0 }
 0x14e   : > { %12663 = vst [vmem:[#allocation36_spill] sm:$0xff] %v10799_v36  ;;  %v731_v57 = vmul.f32 0.020408163, %v574_v25  ;;  %v858_v0 = vmul.f32 %v10799_v36, %v10799_v36  ;;  %663 = vadd.xlane.f32.xlu1 %v662_v60 }
 0x150   : > { %v10809_v4 = vsub.f32 %v10494_v1, %v731_v57  ;;  %v954_v25 = vsel %vm520_vm0, %v858_v0, 0.0  ;;  %v842_v1 = vmul.f32 %v10812_v49, %v10812_v49  ;;  %v526_v57 = vpop.xlane.xlu1 %525 }
 0x151   : > { %955 = vadd.xlane.f32.xlu0 %v954_v25  ;;  %v577_v20 = vpop.xlane.xlu0 %576  ;;  %v715_v52 = vmul.f32 0.020408163, %v526_v57 }
 0x152   : > { %12664 = vst [vmem:[#allocation37_spill] sm:$0xff] %v10809_v4  ;;  %v859_v11 = vmul.f32 %v10809_v4, %v10809_v4  ;;  %v906_v33 = vsel %vm520_vm0, %v842_v1, 0.0  ;;  %v732_v41 = vmul.f32 0.020408163, %v577_v20 }
 0x153   : > { %v10832_v4 = vsub.f32 %v10506_v6, %v715_v52 }
 0x154   : > { %v957_v2 = vsel %vm520_vm0, %v859_v11, 0.0  ;;  %v580_v0 = vpop.xlane.xlu1 %579  ;;  %v10829_v44 = vsub.f32 %v10509_v7, %v732_v41 }
 0x155   : > { %958 = vadd.xlane.f32.xlu1 %v957_v2  ;;  %907 = vadd.xlane.f32.xlu0 %v906_v33  ;;  %v529_v36 = vpop.xlane.xlu0 %528  ;;  %v733_v25 = vmul.f32 0.020408163, %v580_v0  ;;  %v843_v33 = vmul.f32 %v10832_v4, %v10832_v4 }
 0x156   : > { %v716_v60 = vmul.f32 0.020408163, %v529_v36  ;;  %v860_v2 = vmul.f32 %v10829_v44, %v10829_v44 }
 0x157   : > { %v10838_v1 = vsub.f32 %v10515_v9, %v733_v25  ;;  %v909_v36 = vsel %vm520_vm0, %v843_v33, 0.0 }
 0x158   : > { %v10835_v11 = vsub.f32 %v10512_v8, %v716_v60  ;;  %v532_v7 = vpop.xlane.xlu1 %531  ;;  %v960_v6 = vsel %vm520_vm0, %v860_v2, 0.0 }
 0x159   : > { %v583_v20 = vpop.xlane.xlu0 %582  ;;  %v717_v41 = vmul.f32 0.020408163, %v532_v7  ;;  %961 = vadd.xlane.f32.xlu0 %v960_v6  ;;  %910 = vadd.xlane.f32.xlu1 %v909_v36  ;;  %v861_v9 = vmul.f32 %v10838_v1, %v10838_v1 }
 0x15a   : > { %v734_v57 = vmul.f32 0.020408163, %v583_v20  ;;  %v844_v8 = vmul.f32 %v10835_v11, %v10835_v11 }
 0x15b   : > { %v10854_v0 = vsub.f32 %v10526_v14, %v717_v41  ;;  %v963_v2 = vsel %vm520_vm0, %v861_v9, 0.0 }
 0x15c   : > { %v10851_v52 = vsub.f32 %v10529_v15, %v734_v57  ;;  %v912_v25 = vsel %vm520_vm0, %v844_v8, 0.0  ;;  %v586_v33 = vpop.xlane.xlu1 %585 }
 0x15d   : > { %v535_v60 = vpop.xlane.xlu0 %534  ;;  %v735_v7 = vmul.f32 0.020408163, %v586_v33  ;;  %v845_v36 = vmul.f32 %v10854_v0, %v10854_v0  ;;  %913 = vadd.xlane.f32.xlu0 %v912_v25  ;;  %964 = vadd.xlane.f32.xlu1 %v963_v2 }
 0x15e   : > { %12666 = vst [vmem:[#allocation39_spill] sm:$0xff] %v10851_v52  ;;  %v718_v20 = vmul.f32 0.020408163, %v535_v60  ;;  %v862_v6 = vmul.f32 %v10851_v52, %v10851_v52 }
 0x15f   : > { %v10866_v14 = vsub.f32 %v10539_v19, %v735_v7  ;;  %v915_v41 = vsel %vm520_vm0, %v845_v36, 0.0 }
 0x160   : > { %v10863_v15 = vsub.f32 %v10536_v18, %v718_v20  ;;  %v966_v57 = vsel %vm520_vm0, %v862_v6, 0.0  ;;  %v538_v9 = vpop.xlane.xlu1 %537 }
 0x161   : > { %v589_v8 = vpop.xlane.xlu0 %588  ;;  %v719_v33 = vmul.f32 0.020408163, %v538_v9  ;;  %v863_v25 = vmul.f32 %v10866_v14, %v10866_v14  ;;  %967 = vadd.xlane.f32.xlu0 %v966_v57  ;;  %916 = vadd.xlane.f32.xlu1 %v915_v41 }
 0x162   : > { %v736_v60 = vmul.f32 0.020408163, %v589_v8  ;;  %v846_v52 = vmul.f32 %v10863_v15, %v10863_v15 }
 0x163   : > { %v10878_v19 = vsub.f32 %v10546_v22, %v719_v33  ;;  %v969_v20 = vsel %vm520_vm0, %v863_v25, 0.0 }
 0x164   : > { %v10875_v18 = vsub.f32 %v10549_v23, %v736_v60  ;;  %v918_v2 = vsel %vm520_vm0, %v846_v52, 0.0  ;;  %v592_v6 = vpop.xlane.xlu1 %591 }
 0x165   : > { %v541_v7 = vpop.xlane.xlu0 %540  ;;  %v737_v8 = vmul.f32 0.020408163, %v592_v6  ;;  %v847_v57 = vmul.f32 %v10878_v19, %v10878_v19  ;;  %919 = vadd.xlane.f32.xlu0 %v918_v2  ;;  %970 = vadd.xlane.f32.xlu1 %v969_v20 }
 0x166   : > { %v720_v36 = vmul.f32 0.020408163, %v541_v7  ;;  %v864_v9 = vmul.f32 %v10875_v18, %v10875_v18 }
 0x167   : > { %v10890_v22 = vsub.f32 %v10559_v27, %v737_v8  ;;  %v921_v41 = vsel %vm520_vm0, %v847_v57, 0.0 }
 0x168   : > { %v10887_v23 = vsub.f32 %v10556_v26, %v720_v36  ;;  %v972_v52 = vsel %vm520_vm0, %v864_v9, 0.0  ;;  %v544_v33 = vpop.xlane.xlu1 %543 }
 0x169   : > { %v595_v60 = vpop.xlane.xlu0 %594  ;;  %v721_v7 = vmul.f32 0.020408163, %v544_v33  ;;  %v865_v2 = vmul.f32 %v10890_v22, %v10890_v22  ;;  %973 = vadd.xlane.f32.xlu0 %v972_v52  ;;  %922 = vadd.xlane.f32.xlu1 %v921_v41 }
 0x16a   : > { %v738_v25 = vmul.f32 0.020408163, %v595_v60  ;;  %v848_v6 = vmul.f32 %v10887_v23, %v10887_v23 }
 0x16b   : > { %v10902_v27 = vsub.f32 %v10566_v30, %v721_v7  ;;  %v975_v36 = vsel %vm520_vm0, %v865_v2, 0.0 }
 0x16c   : > { %v10899_v26 = vsub.f32 %v10569_v31, %v738_v25  ;;  %v924_v20 = vsel %vm520_vm0, %v848_v6, 0.0  ;;  %v598_v9 = vpop.xlane.xlu1 %597 }
 0x16d   : > { %v547_v8 = vpop.xlane.xlu0 %546  ;;  %v739_v60 = vmul.f32 0.020408163, %v598_v9  ;;  %v849_v52 = vmul.f32 %v10902_v27, %v10902_v27  ;;  %925 = vadd.xlane.f32.xlu0 %v924_v20  ;;  %976 = vadd.xlane.f32.xlu1 %v975_v36 }
 0x16e   : > { %v722_v57 = vmul.f32 0.020408163, %v547_v8  ;;  %v866_v33 = vmul.f32 %v10899_v26, %v10899_v26 }
 0x16f   : > { %v10914_v30 = vsub.f32 %v10579_v35, %v739_v60  ;;  %v927_v25 = vsel %vm520_vm0, %v849_v52, 0.0 }
 0x170   : > { %v10911_v31 = vsub.f32 %v10576_v34, %v722_v57  ;;  %v978_v41 = vsel %vm520_vm0, %v866_v33, 0.0  ;;  %v550_v6 = vpop.xlane.xlu1 %549 }
 0x171   : > { %v601_v7 = vpop.xlane.xlu0 %600  ;;  %v723_v8 = vmul.f32 0.020408163, %v550_v6  ;;  %v867_v20 = vmul.f32 %v10914_v30, %v10914_v30  ;;  %979 = vadd.xlane.f32.xlu0 %v978_v41  ;;  %928 = vadd.xlane.f32.xlu1 %v927_v25 }
 0x172   : > { %v740_v2 = vmul.f32 0.020408163, %v601_v7  ;;  %v850_v9 = vmul.f32 %v10911_v31, %v10911_v31 }
 0x173   : > { %v10926_v35 = vsub.f32 %v10586_v38, %v723_v8  ;;  %v981_v57 = vsel %vm520_vm0, %v867_v20, 0.0 }
 0x174   : > { %v10923_v34 = vsub.f32 %v10589_v39, %v740_v2  ;;  %v930_v36 = vsel %vm520_vm0, %v850_v9, 0.0  ;;  %v604_v33 = vpop.xlane.xlu1 %603 }
 0x175   : > { %v553_v60 = vpop.xlane.xlu0 %552  ;;  %v741_v7 = vmul.f32 0.020408163, %v604_v33  ;;  %v851_v41 = vmul.f32 %v10926_v35, %v10926_v35  ;;  %931 = vadd.xlane.f32.xlu0 %v930_v36  ;;  %982 = vadd.xlane.f32.xlu1 %v981_v57 }
 0x176   : > { %v724_v52 = vmul.f32 0.020408163, %v553_v60  ;;  %v868_v6 = vmul.f32 %v10923_v34, %v10923_v34 }
 0x177   : > { %v10938_v38 = vsub.f32 %v10599_v43, %v741_v7  ;;  %v933_v2 = vsel %vm520_vm0, %v851_v41, 0.0 }
 0x178   : > { %v10935_v39 = vsub.f32 %v10596_v42, %v724_v52  ;;  %v984_v25 = vsel %vm520_vm0, %v868_v6, 0.0  ;;  %v556_v9 = vpop.xlane.xlu1 %555 }
 0x179   : > { %v607_v8 = vpop.xlane.xlu0 %606  ;;  %v725_v60 = vmul.f32 0.020408163, %v556_v9  ;;  %v869_v36 = vmul.f32 %v10938_v38, %v10938_v38  ;;  %985 = vadd.xlane.f32.xlu0 %v984_v25  ;;  %934 = vadd.xlane.f32.xlu1 %v933_v2 }
 0x17a   : > { %v742_v20 = vmul.f32 0.020408163, %v607_v8  ;;  %v852_v33 = vmul.f32 %v10935_v39, %v10935_v39 }
 0x17b   : > { %v10950_v43 = vsub.f32 %v10606_v46, %v725_v60  ;;  %v987_v52 = vsel %vm520_vm0, %v869_v36, 0.0 }
 0x17c   : > { %v10947_v42 = vsub.f32 %v10609_v47, %v742_v20  ;;  %v936_v57 = vsel %vm520_vm0, %v852_v33, 0.0  ;;  %v610_v6 = vpop.xlane.xlu1 %609 }
 0x17d   : > { %v559_v7 = vpop.xlane.xlu0 %558  ;;  %v743_v8 = vmul.f32 0.020408163, %v610_v6  ;;  %v853_v25 = vmul.f32 %v10950_v43, %v10950_v43  ;;  %937 = vadd.xlane.f32.xlu0 %v936_v57  ;;  %988 = vadd.xlane.f32.xlu1 %v987_v52 }
 0x17e   : > { %v726_v41 = vmul.f32 0.020408163, %v559_v7  ;;  %v870_v9 = vmul.f32 %v10947_v42, %v10947_v42 }
 0x17f   : > { %v10962_v46 = vsub.f32 %v10619_v51, %v743_v8  ;;  %v939_v20 = vsel %vm520_vm0, %v853_v25, 0.0 }
 0x180   : > { %v10959_v47 = vsub.f32 %v10616_v50, %v726_v41  ;;  %v990_v2 = vsel %vm520_vm0, %v870_v9, 0.0  ;;  %v562_v33 = vpop.xlane.xlu1 %561 }
 0x181   : > { %v613_v60 = vpop.xlane.xlu0 %612  ;;  %v727_v7 = vmul.f32 0.020408163, %v562_v33  ;;  %v871_v57 = vmul.f32 %v10962_v46, %v10962_v46  ;;  %991 = vadd.xlane.f32.xlu0 %v990_v2  ;;  %940 = vadd.xlane.f32.xlu1 %v939_v20 }
 0x182   : > { %v744_v36 = vmul.f32 0.020408163, %v613_v60  ;;  %v854_v6 = vmul.f32 %v10959_v47, %v10959_v47 }
 0x183   : > { %v10974_v51 = vsub.f32 %v10626_v54, %v727_v7  ;;  %v993_v41 = vsel %vm520_vm0, %v871_v57, 0.0 }
 0x184   : > { %v10971_v50 = vsub.f32 %v10629_v55, %v744_v36  ;;  %v942_v52 = vsel %vm520_vm0, %v854_v6, 0.0  ;;  %v616_v9 = vpop.xlane.xlu1 %615 }
 0x185   : > { %v565_v8 = vpop.xlane.xlu0 %564  ;;  %v745_v60 = vmul.f32 0.020408163, %v616_v9  ;;  %v855_v2 = vmul.f32 %v10974_v51, %v10974_v51  ;;  %943 = vadd.xlane.f32.xlu0 %v942_v52  ;;  %994 = vadd.xlane.f32.xlu1 %v993_v41 }
 0x186   : > { %v728_v25 = vmul.f32 0.020408163, %v565_v8  ;;  %v872_v33 = vmul.f32 %v10971_v50, %v10971_v50 }
 0x187   : > { %v10986_v54 = vsub.f32 %v10639_v59, %v745_v60  ;;  %v945_v36 = vsel %vm520_vm0, %v855_v2, 0.0 }
 0x188   : > { %v10983_v55 = vsub.f32 %v10636_v58, %v728_v25  ;;  %v996_v20 = vsel %vm520_vm0, %v872_v33, 0.0  ;;  %v568_v6 = vpop.xlane.xlu1 %567 }
 0x189   : > { %v667_v7 = vpop.xlane.xlu0 %666  ;;  %v729_v8 = vmul.f32 0.020408163, %v568_v6  ;;  %v873_v52 = vmul.f32 %v10986_v54, %v10986_v54  ;;  %997 = vadd.xlane.f32.xlu0 %v996_v20  ;;  %946 = vadd.xlane.f32.xlu1 %v945_v36 }
 0x18a   : > { %v762_v57 = vmul.f32 0.020408163, %v667_v7  ;;  %v856_v9 = vmul.f32 %v10983_v55, %v10983_v55 }
 0x18b   : > { %v10998_v59 = vsub.f32 %v10646_v62, %v729_v8  ;;  %v999_v25 = vsel %vm520_vm0, %v873_v52, 0.0 }
 0x18c   : > { %v10995_v58 = vsub.f32 %v10649_v63, %v762_v57  ;;  %v948_v41 = vsel %vm520_vm0, %v856_v9, 0.0  ;;  %v670_v33 = vpop.xlane.xlu1 %669 }
 0x18d   : > { %v619_v60 = vpop.xlane.xlu0 %618  ;;  %v763_v7 = vmul.f32 0.020408163, %v670_v33  ;;  %v857_v20 = vmul.f32 %v10998_v59, %v10998_v59  ;;  %949 = vadd.xlane.f32.xlu0 %v948_v41  ;;  %1000 = vadd.xlane.f32.xlu1 %v999_v25 }
 0x18e   : > { %v746_v2 = vmul.f32 0.020408163, %v619_v60  ;;  %v890_v6 = vmul.f32 %v10995_v58, %v10995_v58 }
 0x18f   : > { %v11010_v62 = vsub.f32 %v10659_v10, %v763_v7  ;;  %v951_v57 = vsel %vm520_vm0, %v857_v20, 0.0 }
 0x190   : > { %v11007_v63 = vsub.f32 %v10656_v5, %v746_v2  ;;  %v1050_v36 = vsel %vm520_vm0, %v890_v6, 0.0  ;;  %v622_v9 = vpop.xlane.xlu1 %621 }
 0x191   : > { %v673_v8 = vpop.xlane.xlu0 %672  ;;  %v747_v60 = vmul.f32 0.020408163, %v622_v9  ;;  %v891_v41 = vmul.f32 %v11010_v62, %v11010_v62  ;;  %1051 = vadd.xlane.f32.xlu0 %v1050_v36  ;;  %952 = vadd.xlane.f32.xlu1 %v951_v57 }
 0x192   : > { %v764_v52 = vmul.f32 0.020408163, %v673_v8  ;;  %v874_v33 = vmul.f32 %v11007_v63, %v11007_v63 }
 0x193   : > { %v11022_v10 = vsub.f32 %v10666_v13, %v747_v60  ;;  %v1053_v2 = vsel %vm520_vm0, %v891_v41, 0.0 }
 0x194   : > { %v11019_v5 = vsub.f32 %v10669_v16, %v764_v52  ;;  %v1002_v25 = vsel %vm520_vm0, %v874_v33, 0.0  ;;  %v676_v6 = vpop.xlane.xlu1 %675 }
 0x195   : > { %v625_v7 = vpop.xlane.xlu0 %624  ;;  %v765_v8 = vmul.f32 0.020408163, %v676_v6  ;;  %v875_v36 = vmul.f32 %v11022_v10, %v11022_v10  ;;  %1003 = vadd.xlane.f32.xlu0 %v1002_v25  ;;  %1054 = vadd.xlane.f32.xlu1 %v1053_v2 }
 0x196   : > { %v748_v20 = vmul.f32 0.020408163, %v625_v7  ;;  %v892_v9 = vmul.f32 %v11019_v5, %v11019_v5 }
 0x197   : > { %v11034_v13 = vsub.f32 %v10679_v24, %v765_v8  ;;  %v1005_v52 = vsel %vm520_vm0, %v875_v36, 0.0 }
 0x198   : > { %v11031_v16 = vsub.f32 %v10676_v21, %v748_v20  ;;  %v1056_v57 = vsel %vm520_vm0, %v892_v9, 0.0  ;;  %v628_v33 = vpop.xlane.xlu1 %627 }
 0x199   : > { %v679_v60 = vpop.xlane.xlu0 %678  ;;  %v749_v7 = vmul.f32 0.020408163, %v628_v33  ;;  %v893_v25 = vmul.f32 %v11034_v13, %v11034_v13  ;;  %1057 = vadd.xlane.f32.xlu0 %v1056_v57  ;;  %1006 = vadd.xlane.f32.xlu1 %v1005_v52 }
 0x19a   : > { %v766_v41 = vmul.f32 0.020408163, %v679_v60  ;;  %v876_v6 = vmul.f32 %v11031_v16, %v11031_v16 }
 0x19b   : > { %v11046_v24 = vsub.f32 %v10686_v29, %v749_v7  ;;  %v1059_v20 = vsel %vm520_vm0, %v893_v25, 0.0 }
 0x19c   : > { %v11043_v21 = vsub.f32 %v10689_v32, %v766_v41  ;;  %v1008_v2 = vsel %vm520_vm0, %v876_v6, 0.0  ;;  %v682_v9 = vpop.xlane.xlu1 %681 }
 0x19d   : > { %v631_v8 = vpop.xlane.xlu0 %630  ;;  %v767_v60 = vmul.f32 0.020408163, %v682_v9  ;;  %v877_v57 = vmul.f32 %v11046_v24, %v11046_v24  ;;  %1009 = vadd.xlane.f32.xlu0 %v1008_v2  ;;  %1060 = vadd.xlane.f32.xlu1 %v1059_v20 }
 0x19e   : > { %v750_v36 = vmul.f32 0.020408163, %v631_v8  ;;  %v894_v33 = vmul.f32 %v11043_v21, %v11043_v21 }
 0x19f   : > { %v11058_v29 = vsub.f32 %v10699_v40, %v767_v60  ;;  %v1011_v41 = vsel %vm520_vm0, %v877_v57, 0.0 }
 0x1a0   : > { %v11055_v32 = vsub.f32 %v10696_v37, %v750_v36  ;;  %v1062_v52 = vsel %vm520_vm0, %v894_v33, 0.0  ;;  %v634_v6 = vpop.xlane.xlu1 %633 }
 0x1a1   : > { %v685_v7 = vpop.xlane.xlu0 %684  ;;  %v751_v8 = vmul.f32 0.020408163, %v634_v6  ;;  %v895_v2 = vmul.f32 %v11058_v29, %v11058_v29  ;;  %1063 = vadd.xlane.f32.xlu0 %v1062_v52  ;;  %1012 = vadd.xlane.f32.xlu1 %v1011_v41 }
 0x1a2   : > { %v768_v25 = vmul.f32 0.020408163, %v685_v7  ;;  %v878_v9 = vmul.f32 %v11055_v32, %v11055_v32 }
 0x1a3   : > { %v11070_v40 = vsub.f32 %v10706_v45, %v751_v8  ;;  %v1065_v36 = vsel %vm520_vm0, %v895_v2, 0.0 }
 0x1a4   : > { %v11067_v37 = vsub.f32 %v10709_v48, %v768_v25  ;;  %v1014_v20 = vsel %vm520_vm0, %v878_v9, 0.0  ;;  %v688_v33 = vpop.xlane.xlu1 %687 }
 0x1a5   : > { %v637_v60 = vpop.xlane.xlu0 %636  ;;  %v769_v7 = vmul.f32 0.020408163, %v688_v33  ;;  %v879_v52 = vmul.f32 %v11070_v40, %v11070_v40  ;;  %1015 = vadd.xlane.f32.xlu0 %v1014_v20  ;;  %1066 = vadd.xlane.f32.xlu1 %v1065_v36 }
 0x1a6   : > { %v752_v57 = vmul.f32 0.020408163, %v637_v60  ;;  %v896_v6 = vmul.f32 %v11067_v37, %v11067_v37 }
 0x1a7   : > { %v11082_v45 = vsub.f32 %v10719_v56, %v769_v7  ;;  %v1017_v25 = vsel %vm520_vm0, %v879_v52, 0.0 }
 0x1a8   : > { %v11079_v48 = vsub.f32 %v10716_v53, %v752_v57  ;;  %v1068_v41 = vsel %vm520_vm0, %v896_v6, 0.0  ;;  %v640_v9 = vpop.xlane.xlu1 %639 }
 0x1a9   : > { %12668 = vst [vmem:[#allocation41_spill] sm:$0xff] %v11082_v45  ;;  %v691_v8 = vpop.xlane.xlu0 %690  ;;  %v753_v60 = vmul.f32 0.020408163, %v640_v9  ;;  %v897_v20 = vmul.f32 %v11082_v45, %v11082_v45  ;;  %1069 = vadd.xlane.f32.xlu0 %v1068_v41  ;;  %1018 = vadd.xlane.f32.xlu1 %v1017_v25 }
 0x1aa   : > { %12667 = vst [vmem:[#allocation40_spill] sm:$0xff] %v11079_v48  ;;  %v770_v2 = vmul.f32 0.020408163, %v691_v8  ;;  %v880_v33 = vmul.f32 %v11079_v48, %v11079_v48 }
 0x1ab   : > { %v11094_v56 = vsub.f32 %v10726_v61, %v753_v60  ;;  %v1071_v57 = vsel %vm520_vm0, %v897_v20, 0.0  ;;  %v12672_v61 = vld [vmem:[#allocation25_spill] sm:$0xff] }
 0x1ac   : > { %v11091_v53 = vsub.f32 %v10729_v3, %v770_v2  ;;  %v1020_v36 = vsel %vm520_vm0, %v880_v33, 0.0  ;;  %v694_v6 = vpop.xlane.xlu1 %693 }
 0x1ad   : > { %12670 = vst [vmem:[#allocation43_spill] sm:$0xff] %v11094_v56  ;;  %v643_v7 = vpop.xlane.xlu0 %642  ;;  %v771_v8 = vmul.f32 0.020408163, %v694_v6  ;;  %v881_v41 = vmul.f32 %v11094_v56, %v11094_v56  ;;  %1021 = vadd.xlane.f32.xlu0 %v1020_v36  ;;  %1072 = vadd.xlane.f32.xlu1 %v1071_v57 }
 0x1ae   : > { %12669 = vst [vmem:[#allocation42_spill] sm:$0xff] %v11091_v53  ;;  %v754_v52 = vmul.f32 0.020408163, %v643_v7  ;;  %v898_v9 = vmul.f32 %v11091_v53, %v11091_v53 }
 0x1af   : > { %v11106_v25 = vsub.f32 %v12672_v61, %v771_v8  ;;  %v1023_v60 = vsel %vm520_vm0, %v881_v41, 0.0 }
 0x1b0   : > { %v11103_v3 = vsub.f32 %v10736_v12, %v754_v52  ;;  %v1074_v2 = vsel %vm520_vm0, %v898_v9, 0.0  ;;  %v646_v20 = vpop.xlane.xlu1 %645  ;;  %v12674_v12 = vld [vmem:[#allocation27_spill] sm:$0xff]  ;;  %v12676_v52 = vld [vmem:[#allocation26_spill] sm:$0xff] }
 0x1b1   : > { %12673 = vst [vmem:[#allocation25_spill] sm:$0xff] %v11106_v25  ;;  %v697_v33 = vpop.xlane.xlu0 %696  ;;  %v755_v6 = vmul.f32 0.020408163, %v646_v20  ;;  %v899_v36 = vmul.f32 %v11106_v25, %v11106_v25  ;;  %1075 = vadd.xlane.f32.xlu0 %v1074_v2  ;;  %1024 = vadd.xlane.f32.xlu1 %v1023_v60  ;;  %v12678_v60 = vld [vmem:[#allocation28_spill] sm:$0xff] }
 0x1b2   : > { %12671 = vst [vmem:[#allocation44_spill] sm:$0xff] %v11103_v3  ;;  %v772_v7 = vmul.f32 0.020408163, %v697_v33  ;;  %v882_v53 = vmul.f32 %v11103_v3, %v11103_v3 }
 0x1b3   : > { %v11118_v8 = vsub.f32 %v12676_v52, %v755_v6  ;;  %v1077_v41 = vsel %vm520_vm0, %v899_v36, 0.0  ;;  %v12680_v6 = vld [vmem:[#allocation29_spill] sm:$0xff] }
 0x1b4   : > { %v11115_v57 = vsub.f32 %v12674_v12, %v772_v7  ;;  %v1026_v9 = vsel %vm520_vm0, %v882_v53, 0.0  ;;  %v700_v33 = vpop.xlane.xlu1 %699 }
 0x1b5   : > { %12677 = vst [vmem:[#allocation26_spill] sm:$0xff] %v11118_v8  ;;  %v649_v61 = vpop.xlane.xlu0 %648  ;;  %v773_v56 = vmul.f32 0.020408163, %v700_v33  ;;  %v883_v2 = vmul.f32 %v11118_v8, %v11118_v8  ;;  %1027 = vadd.xlane.f32.xlu0 %v1026_v9  ;;  %1078 = vadd.xlane.f32.xlu1 %v1077_v41  ;;  %v12682_v41 = vld [vmem:[#allocation31_spill] sm:$0xff] }
 0x1b6   : > { %12675 = vst [vmem:[#allocation27_spill] sm:$0xff] %v11115_v57  ;;  %v756_v20 = vmul.f32 0.020408163, %v649_v61  ;;  %v900_v3 = vmul.f32 %v11115_v57, %v11115_v57 }
 0x1b7   : > { %v11130_v12 = vsub.f32 %v12680_v6, %v773_v56  ;;  %v1029_v36 = vsel %vm520_vm0, %v883_v2, 0.0  ;;  %v12684_v56 = vld [vmem:[#allocation30_spill] sm:$0xff] }
 0x1b8   : > { %v11127_v7 = vsub.f32 %v12678_v60, %v756_v20  ;;  %v1080_v53 = vsel %vm520_vm0, %v900_v3, 0.0  ;;  %v652_v61 = vpop.xlane.xlu1 %651 }
 0x1b9   : > { %12681 = vst [vmem:[#allocation29_spill] sm:$0xff] %v11130_v12  ;;  %v703_v52 = vpop.xlane.xlu0 %702  ;;  %v757_v25 = vmul.f32 0.020408163, %v652_v61  ;;  %v901_v9 = vmul.f32 %v11130_v12, %v11130_v12  ;;  %1081 = vadd.xlane.f32.xlu0 %v1080_v53  ;;  %1030 = vadd.xlane.f32.xlu1 %v1029_v36  ;;  %v12686_v36 = vld [vmem:[#allocation32_spill] sm:$0xff] }
 0x1ba   : > { %12679 = vst [vmem:[#allocation28_spill] sm:$0xff] %v11127_v7  ;;  %v774_v33 = vmul.f32 0.020408163, %v703_v52  ;;  %v884_v57 = vmul.f32 %v11127_v7, %v11127_v7 }
 0x1bb   : > { %v11142_v60 = vsub.f32 %v12684_v56, %v757_v25  ;;  %v1083_v2 = vsel %vm520_vm0, %v901_v9, 0.0  ;;  %v12688_v25 = vld [vmem:[#allocation33_spill] sm:$0xff]  ;;  %v1497_v56 = vld [vmem:[#allocation2 + $0x8] sm:$0xff] }
 0x1bc   : > { %v11139_v20 = vsub.f32 %v12682_v41, %v774_v33  ;;  %v1032_v3 = vsel %vm520_vm0, %v884_v57, 0.0  ;;  %v706_v52 = vpop.xlane.xlu1 %705  ;;  %1588 = vmatprep.mubr.f32.mxu1 %v1497_v56 }
 0x1bd   : > { %12685 = vst [vmem:[#allocation30_spill] sm:$0xff] %v11142_v60  ;;  %v655_v6 = vpop.xlane.xlu0 %654  ;;  %v775_v8 = vmul.f32 0.020408163, %v706_v52  ;;  %v885_v53 = vmul.f32 %v11142_v60, %v11142_v60  ;;  %1033 = vadd.xlane.f32.xlu0 %v1032_v3  ;;  %1084 = vadd.xlane.f32.xlu1 %v1083_v2 }
 0x1be   : > { %12683 = vst [vmem:[#allocation31_spill] sm:$0xff] %v11139_v20  ;;  %v758_v61 = vmul.f32 0.020408163, %v655_v6  ;;  %v902_v7 = vmul.f32 %v11139_v20, %v11139_v20 }
 0x1bf   : > { %v11154_v41 = vsub.f32 %v12688_v25, %v775_v8  ;;  %v1035_v9 = vsel %vm520_vm0, %v885_v53, 0.0  ;;  %v12690_v8 = vld [vmem:[#allocation35_spill] sm:$0xff] }
 0x1c0   : > { %v11151_v33 = vsub.f32 %v12686_v36, %v758_v61  ;;  %v1086_v57 = vsel %vm520_vm0, %v902_v7, 0.0  ;;  %v658_v52 = vpop.xlane.xlu1 %657  ;;  %v12692_v7 = vld [vmem:[#allocation34_spill] sm:$0xff] }
 0x1c1   : > { %12689 = vst [vmem:[#allocation33_spill] sm:$0xff] %v11154_v41  ;;  %v709_v6 = vpop.xlane.xlu0 %708  ;;  %v759_v12 = vmul.f32 0.020408163, %v658_v52  ;;  %v903_v2 = vmul.f32 %v11154_v41, %v11154_v41  ;;  %1087 = vadd.xlane.f32.xlu0 %v1086_v57  ;;  %1036 = vadd.xlane.f32.xlu1 %v1035_v9 }
 0x1c2   : > { %12687 = vst [vmem:[#allocation32_spill] sm:$0xff] %v11151_v33  ;;  %v776_v20 = vmul.f32 0.020408163, %v709_v6  ;;  %v886_v3 = vmul.f32 %v11151_v33, %v11151_v33 }
 0x1c3   : > { %v11166_v36 = vsub.f32 %v12692_v7, %v759_v12  ;;  %v1089_v25 = vsel %vm520_vm0, %v903_v2, 0.0 }
 0x1c4   : > { %v11163_v61 = vsub.f32 %v12690_v8, %v776_v20  ;;  %v1038_v53 = vsel %vm520_vm0, %v886_v3, 0.0  ;;  %v712_v6 = vpop.xlane.xlu1 %711 }
 0x1c5   : > { %12693 = vst [vmem:[#allocation34_spill] sm:$0xff] %v11166_v36  ;;  %v661_v56 = vpop.xlane.xlu0 %660  ;;  %v777_v60 = vmul.f32 0.020408163, %v712_v6  ;;  %v887_v57 = vmul.f32 %v11166_v36, %v11166_v36  ;;  %1039 = vadd.xlane.f32.xlu0 %v1038_v53  ;;  %1090 = vadd.xlane.f32.xlu1 %v1089_v25 }
 0x1c6   : > { %12691 = vst [vmem:[#allocation35_spill] sm:$0xff] %v11163_v61  ;;  %v760_v52 = vmul.f32 0.020408163, %v661_v56  ;;  %v904_v33 = vmul.f32 %v11163_v61, %v11163_v61 }
 0x1c7   : > { %v11178_v12 = vsub.f32 %v10802_v17, %v777_v60  ;;  %v1041_v3 = vsel %vm520_vm0, %v887_v57, 0.0 }
 0x1c8   : > { %v11175_v20 = vsub.f32 %v10792_v28, %v760_v52  ;;  %v1092_v9 = vsel %vm520_vm0, %v904_v33, 0.0  ;;  %v12696_v28 = vld [vmem:[#allocation38_spill] sm:$0xff] }
 0x1c9   : > { %12695 = vst [vmem:[#allocation46_spill] sm:$0xff] %v11178_v12  ;;  %v905_v53 = vmul.f32 %v11178_v12, %v11178_v12  ;;  %1093 = vadd.xlane.f32.xlu0 %v1092_v9  ;;  %1042 = vadd.xlane.f32.xlu1 %v1041_v3 }
 0x1ca   : > { %12694 = vst [vmem:[#allocation45_spill] sm:$0xff] %v11175_v20  ;;  %v888_v56 = vmul.f32 %v11175_v20, %v11175_v20 }
 0x1cb   : > { %v1095_v60 = vsel %vm520_vm0, %v905_v53, 0.0 }
 0x1cc   : > { %v1044_v17 = vsel %vm520_vm0, %v888_v56, 0.0  ;;  %v11198_v56 = vld [vmem:[%s12572_s1] ss:$0 sm:$0xff] }
 0x1cd   : > { %1045 = vadd.xlane.f32.xlu0 %v1044_v17  ;;  %1096 = vadd.xlane.f32.xlu1 %v1095_v60 }
 0x1db   : > { %v664_v2 = vpop.xlane.xlu1 %663 }
 0x1dc   : > { %v761_v7 = vmul.f32 0.020408163, %v664_v2 }
 0x1de   : > { %v956_v8 = vpop.xlane.xlu0 %955  ;;  %v11187_v6 = vsub.f32 %v12696_v28, %v761_v7  ;;  %v12698_v7 = vld [vmem:[#allocation36_spill] sm:$0xff] }
 0x1df   : > { %v1114_v25 = vmul.f32 0.020408163, %v956_v8 }
 0x1e0   : > { %12697 = vst [vmem:[#allocation38_spill] sm:$0xff] %v11187_v6  ;;  %v889_v57 = vmul.f32 %v11187_v6, %v11187_v6  ;;  %v12699_v6 = vld [vmem:[#allocation37_spill] sm:$0xff] }
 0x1e1   : > { %v1178_v33 = vadd.f32 1e-05, %v1114_v25 }
 0x1e2   : > { %v959_v52 = vpop.xlane.xlu1 %958  ;;  %v1047_v8 = vsel %vm520_vm0, %v889_v57, 0.0  ;;  %v908_v53 = vpop.xlane.xlu0 %907 }
 0x1e3   : > { %9672 = vrsqrt.f32 %v1178_v33  ;;  %v1115_v2 = vmul.f32 0.020408163, %v959_v52  ;;  %1048 = vadd.xlane.f32.xlu1 %v1047_v8  ;;  %v1098_v60 = vmul.f32 0.020408163, %v908_v53  ;;  %v11205_v52 = vld [vmem:[%s12573_s2] ss:$0 sm:$0xff] }
 0x1e5   : > { %v1179_v9 = vadd.f32 1e-05, %v1115_v2 }
 0x1e7   : > { %9674 = vrsqrt.f32 %v1179_v9  ;;  %v1162_v9 = vadd.f32 1e-05, %v1098_v60 }
 0x1e9   : > { %9676 = vrsqrt.f32 %v1162_v9 }
 0x1ed   : > { %v9673_v3 = vpop.eup %9672 }
 0x1ee   : > { %v1306_v28 = vmul.f32 %v9673_v3, %v12698_v7  ;;  %v962_v7 = vpop.xlane.xlu0 %961 }
 0x1f0   : > { %v1377_v17 = vmul.f32 %v11198_v56, %v1306_v28 }
 0x1f1   : > { %v9675_v25 = vpop.eup %9674 }
 0x1f2   : > { %v1307_v33 = vmul.f32 %v9675_v25, %v12699_v6  ;;  %v1448_v2 = vadd.f32 %v11205_v52, %v1377_v17  ;;  %v911_v6 = vpop.xlane.xlu1 %910  ;;  %v1116_v25 = vmul.f32 0.020408163, %v962_v7  ;;  %v914_v20 = vpop.xlane.xlu0 %913 }
 0x1f3   : > { %v1099_v28 = vmul.f32 0.020408163, %v911_v6  ;;  %v1100_v36 = vmul.f32 0.020408163, %v914_v20  ;;  %v9677_v60 = vpop.eup %9676 }
 0x1f4   : > { %v1378_v57 = vmul.f32 %v11198_v56, %v1307_v33  ;;  %v1180_v53 = vadd.f32 1e-05, %v1116_v25  ;;  %v1290_v25 = vmul.f32 %v9677_v60, %v10812_v49 }
 0x1f5   : > { %v1163_v12 = vadd.f32 1e-05, %v1099_v28  ;;  %v1164_v33 = vadd.f32 1e-05, %v1100_v36 }
 0x1f6   : > { %v1449_v8 = vadd.f32 %v11205_v52, %v1378_v57  ;;  %v965_v61 = vpop.xlane.xlu1 %964  ;;  %9678 = vrsqrt.f32 %v1180_v53  ;;  %v968_v45 = vpop.xlane.xlu0 %967 }
 0x1f7   : > { %v1117_v41 = vmul.f32 0.020408163, %v965_v61  ;;  %9680 = vrsqrt.f32 %v1163_v12 }
 0x1f8   : > { %v8795_v3 = vpack.c.bf16 %v1449_v8, %v1448_v2  ;;  %9682 = vrsqrt.f32 %v1164_v33  ;;  %v1118_v2 = vmul.f32 0.020408163, %v968_v45  ;;  %v1361_v45 = vmul.f32 %v11198_v56, %v1290_v25 }
 0x1f9   : > { %v1181_v17 = vadd.f32 1e-05, %v1117_v41 }
 0x1fa   : > { %8796 = vmatprep.subr.bf16.mxu1 %v8795_v3  ;;  %v917_v57 = vpop.xlane.xlu1 %916  ;;  %v1182_v9 = vadd.f32 1e-05, %v1118_v2  ;;  %v920_v7 = vpop.xlane.xlu0 %919 }
 0x1fb   : > { %v1101_v8 = vmul.f32 0.020408163, %v917_v57  ;;  %9684 = vrsqrt.f32 %v1181_v17  ;;  %v1102_v28 = vmul.f32 0.020408163, %v920_v7 }
 0x1fc   : > { %9686 = vrsqrt.f32 %v1182_v9 }
 0x1fd   : > { %v1165_v3 = vadd.f32 1e-05, %v1101_v8  ;;  %v1166_v36 = vadd.f32 1e-05, %v1102_v28  ;;  %v1432_v28 = vadd.f32 %v11205_v52, %v1361_v45 }
 0x1fe   : > { %v971_v6 = vpop.xlane.xlu1 %970  ;;  %v974_v53 = vpop.xlane.xlu0 %973 }
 0x1ff   : > { %v1119_v20 = vmul.f32 0.020408163, %v971_v6  ;;  %9688 = vrsqrt.f32 %v1165_v3  ;;  %v1120_v33 = vmul.f32 0.020408163, %v974_v53 }
 0x200   : > { %v9679_v61 = vpop.eup %9678  ;;  %9690 = vrsqrt.f32 %v1166_v36 }
 0x201   : > { %v1183_v41 = vadd.f32 1e-05, %v1119_v20  ;;  %v9681_v12 = vpop.eup %9680  ;;  %v1308_v49 = vmul.f32 %v9679_v61, %v10829_v44  ;;  %v1184_v2 = vadd.f32 1e-05, %v1120_v33 }
 0x202   : > { %v923_v48 = vpop.xlane.xlu1 %922  ;;  %v1291_v57 = vmul.f32 %v9681_v12, %v10832_v4  ;;  %v9683_v60 = vpop.eup %9682 }
 0x203   : > { %v1103_v17 = vmul.f32 0.020408163, %v923_v48  ;;  %9692 = vrsqrt.f32 %v1183_v41  ;;  %v926_v7 = vpop.xlane.xlu0 %925  ;;  %v1292_v25 = vmul.f32 %v9683_v60, %v10835_v11  ;;  %v1379_v61 = vmul.f32 %v11198_v56, %v1308_v49 }
 0x204   : > { %v1362_v9 = vmul.f32 %v11198_v56, %v1291_v57  ;;  %9694 = vrsqrt.f32 %v1184_v2  ;;  %v1104_v20 = vmul.f32 0.020408163, %v926_v7 }
 0x205   : > { %v1167_v8 = vadd.f32 1e-05, %v1103_v17  ;;  %v9685_v3 = vpop.eup %9684  ;;  %v1363_v11 = vmul.f32 %v11198_v56, %v1292_v25 }
 0x206   : > { %v977_v6 = vpop.xlane.xlu1 %976  ;;  %v1433_v4 = vadd.f32 %v11205_v52, %v1362_v9  ;;  %v1309_v44 = vmul.f32 %v9685_v3, %v10838_v1  ;;  %v9687_v36 = vpop.eup %9686  ;;  %v1168_v41 = vadd.f32 1e-05, %v1104_v20  ;;  %v1450_v1 = vadd.f32 %v11205_v52, %v1379_v61  ;;  %v12700_v9 = vld [vmem:[#allocation39_spill] sm:$0xff] }
 0x207   : > { %v1121_v48 = vmul.f32 0.020408163, %v977_v6  ;;  %9696 = vrsqrt.f32 %v1167_v8  ;;  %v980_v17 = vpop.xlane.xlu0 %979  ;;  %v1310_v3 = vmul.f32 %v9687_v36, %v12700_v9 }
 0x208   : > { %v8797_v53 = vpack.c.bf16 %v1433_v4, %v1432_v28  ;;  %v1380_v45 = vmul.f32 %v11198_v56, %v1309_v44  ;;  %9698 = vrsqrt.f32 %v1168_v41  ;;  %v1122_v60 = vmul.f32 0.020408163, %v980_v17 }
 0x209   : > { %v1185_v12 = vadd.f32 1e-05, %v1121_v48  ;;  %v9689_v33 = vpop.eup %9688  ;;  %v1434_v41 = vadd.f32 %v11205_v52, %v1363_v11 }
 0x20a   : > { %v929_v57 = vpop.xlane.xlu1 %928  ;;  %8798 = vmatpush3.bf16.msra.mxu1 %v8797_v53  ;;  %v1293_v8 = vmul.f32 %v9689_v33, %v10854_v0  ;;  %v1451_v49 = vadd.f32 %v11205_v52, %v1380_v45  ;;  %v9691_v7 = vpop.eup %9690  ;;  %v1186_v6 = vadd.f32 1e-05, %v1122_v60  ;;  %v1381_v33 = vmul.f32 %v11198_v56, %v1310_v3 }
 0x20b   : > { %v1105_v2 = vmul.f32 0.020408163, %v929_v57  ;;  %9700 = vrsqrt.f32 %v1185_v12  ;;  %v932_v25 = vpop.xlane.xlu0 %931  ;;  %v1294_v0 = vmul.f32 %v9691_v7, %v10863_v15 }
 0x20c   : > { %v1364_v20 = vmul.f32 %v11198_v56, %v1293_v8  ;;  %v8799_v4 = vpack.c.bf16 %v1451_v49, %v1450_v1  ;;  %9702 = vrsqrt.f32 %v1186_v6  ;;  %v1106_v12 = vmul.f32 0.020408163, %v932_v25 }
 0x20d   : > { %v1169_v28 = vadd.f32 1e-05, %v1105_v2  ;;  %v9693_v48 = vpop.eup %9692  ;;  %v1365_v1 = vmul.f32 %v11198_v56, %v1294_v0 }
 0x20e   : > { %v983_v44 = vpop.xlane.xlu1 %982  ;;  %v1435_v53 = vadd.f32 %v11205_v52, %v1364_v20  ;;  %8800 = vmatprep.subr.bf16.mxu1 %v8799_v4  ;;  %v1311_v36 = vmul.f32 %v9693_v48, %v10866_v14  ;;  %v9695_v17 = vpop.eup %9694  ;;  %v1170_v57 = vadd.f32 1e-05, %v1106_v12  ;;  %v1452_v14 = vadd.f32 %v11205_v52, %v1381_v33 }
 0x20f   : > { %v1123_v61 = vmul.f32 0.020408163, %v983_v44  ;;  %9704 = vrsqrt.f32 %v1169_v28  ;;  %v986_v8 = vpop.xlane.xlu0 %985  ;;  %v1312_v6 = vmul.f32 %v9695_v17, %v10875_v18  ;;  %v1436_v12 = vadd.f32 %v11205_v52, %v1365_v1 }
 0x210   : > { %v8801_v60 = vpack.c.bf16 %v1435_v53, %v1434_v41  ;;  %v1382_v15 = vmul.f32 %v11198_v56, %v1311_v36  ;;  %9706 = vrsqrt.f32 %v1170_v57  ;;  %v1124_v49 = vmul.f32 0.020408163, %v986_v8 }
 0x211   : > { %v1187_v45 = vadd.f32 1e-05, %v1123_v61  ;;  %v9697_v2 = vpop.eup %9696  ;;  %v1383_v33 = vmul.f32 %v11198_v56, %v1312_v6 }
 0x212   : > { %v935_v11 = vpop.xlane.xlu1 %934  ;;  %8802 = vmatpush3.bf16.msra.mxu1 %v8801_v60  ;;  %v1295_v7 = vmul.f32 %v9697_v2, %v10878_v19  ;;  %v1453_v3 = vadd.f32 %v11205_v52, %v1382_v15  ;;  %v9699_v28 = vpop.eup %9698  ;;  %v1188_v20 = vadd.f32 1e-05, %v1124_v49 }
 0x213   : > { %v1107_v9 = vmul.f32 0.020408163, %v935_v11  ;;  %9708 = vrsqrt.f32 %v1187_v45  ;;  %v938_v44 = vpop.xlane.xlu0 %937  ;;  %v1296_v19 = vmul.f32 %v9699_v28, %v10887_v23 }
 0x214   : > { %v1366_v25 = vmul.f32 %v11198_v56, %v1295_v7  ;;  %v8803_v41 = vpack.c.bf16 %v1453_v3, %v1452_v14  ;;  %9710 = vrsqrt.f32 %v1188_v20  ;;  %v1108_v61 = vmul.f32 0.020408163, %v938_v44 }
 0x215   : > { %v1171_v48 = vadd.f32 1e-05, %v1107_v9  ;;  %v9701_v4 = vpop.eup %9700  ;;  %v1367_v15 = vmul.f32 %v11198_v56, %v1296_v19 }
 0x216   : > { %v989_v0 = vpop.xlane.xlu1 %988  ;;  %v1437_v36 = vadd.f32 %v11205_v52, %v1366_v25  ;;  %8804 = vmatprep.subr.bf16.mxu1 %v8803_v41  ;;  %v1313_v18 = vmul.f32 %v9701_v4, %v10890_v22  ;;  %v9703_v17 = vpop.eup %9702  ;;  %v1172_v57 = vadd.f32 1e-05, %v1108_v61  ;;  %v1454_v22 = vadd.f32 %v11205_v52, %v1383_v33 }
 0x217   : > { %v1125_v53 = vmul.f32 0.020408163, %v989_v0  ;;  %9712 = vrsqrt.f32 %v1171_v48  ;;  %v992_v8 = vpop.xlane.xlu0 %991  ;;  %v1314_v14 = vmul.f32 %v9703_v17, %v10899_v26  ;;  %v1438_v41 = vadd.f32 %v11205_v52, %v1367_v15 }
 0x218   : > { %v8805_v60 = vpack.c.bf16 %v1437_v36, %v1436_v12  ;;  %v1384_v23 = vmul.f32 %v11198_v56, %v1313_v18  ;;  %9714 = vrsqrt.f32 %v1172_v57  ;;  %v1126_v1 = vmul.f32 0.020408163, %v992_v8 }
 0x219   : > { %v1189_v45 = vadd.f32 1e-05, %v1125_v53  ;;  %v9705_v2 = vpop.eup %9704  ;;  %v1385_v61 = vmul.f32 %v11198_v56, %v1314_v14 }
 0x21a   : > { %v941_v11 = vpop.xlane.xlu1 %940  ;;  %8806 = vmatpush3.bf16.msra.mxu1 %v8805_v60  ;;  %v1297_v9 = vmul.f32 %v9705_v2, %v10902_v27  ;;  %v1455_v7 = vadd.f32 %v11205_v52, %v1384_v23  ;;  %v9707_v3 = vpop.eup %9706  ;;  %v1190_v6 = vadd.f32 1e-05, %v1126_v1 }
 0x21b   : > { %v1109_v49 = vmul.f32 0.020408163, %v941_v11  ;;  %9716 = vrsqrt.f32 %v1189_v45  ;;  %v944_v25 = vpop.xlane.xlu0 %943  ;;  %v1298_v27 = vmul.f32 %v9707_v3, %v10911_v31 }
 0x21c   : > { %v1368_v20 = vmul.f32 %v11198_v56, %v1297_v9  ;;  %v8807_v4 = vpack.c.bf16 %v1455_v7, %v1454_v22  ;;  %9718 = vrsqrt.f32 %v1190_v6  ;;  %v1110_v0 = vmul.f32 0.020408163, %v944_v25 }
 0x21d   : > { %v1173_v28 = vadd.f32 1e-05, %v1109_v49  ;;  %v9709_v48 = vpop.eup %9708  ;;  %v1369_v60 = vmul.f32 %v11198_v56, %v1298_v27 }
 0x21e   : > { %v995_v44 = vpop.xlane.xlu1 %994  ;;  %v1439_v19 = vadd.f32 %v11205_v52, %v1368_v20  ;;  %8808 = vmatprep.subr.bf16.mxu1 %v8807_v4  ;;  %v1315_v26 = vmul.f32 %v9709_v48, %v10914_v30  ;;  %v9711_v53 = vpop.eup %9710  ;;  %v1174_v36 = vadd.f32 1e-05, %v1110_v0  ;;  %v1456_v30 = vadd.f32 %v11205_v52, %v1385_v61 }
 0x21f   : > { %v1127_v12 = vmul.f32 0.020408163, %v995_v44  ;;  %9720 = vrsqrt.f32 %v1173_v28  ;;  %v998_v57 = vpop.xlane.xlu0 %997  ;;  %v1316_v15 = vmul.f32 %v9711_v53, %v10923_v34  ;;  %v1440_v28 = vadd.f32 %v11205_v52, %v1369_v60 }
 0x220   : > { %v8809_v33 = vpack.c.bf16 %v1439_v19, %v1438_v41  ;;  %v1386_v31 = vmul.f32 %v11198_v56, %v1315_v26  ;;  %9722 = vrsqrt.f32 %v1174_v36  ;;  %v1128_v2 = vmul.f32 0.020408163, %v998_v57 }
 0x221   : > { %v1191_v18 = vadd.f32 1e-05, %v1127_v12  ;;  %v9713_v17 = vpop.eup %9712  ;;  %v1387_v4 = vmul.f32 %v11198_v56, %v1316_v15 }
 0x222   : > { %v947_v45 = vpop.xlane.xlu1 %946  ;;  %8810 = vmatpush3.bf16.msra.mxu1 %v8809_v33  ;;  %v1299_v11 = vmul.f32 %v9713_v17, %v10926_v35  ;;  %v1457_v23 = vadd.f32 %v11205_v52, %v1386_v31  ;;  %v9715_v1 = vpop.eup %9714  ;;  %v1192_v49 = vadd.f32 1e-05, %v1128_v2 }
 0x223   : > { %v1111_v8 = vmul.f32 0.020408163, %v947_v45  ;;  %9724 = vrsqrt.f32 %v1191_v18  ;;  %v950_v14 = vpop.xlane.xlu0 %949  ;;  %v1300_v35 = vmul.f32 %v9715_v1, %v10935_v39 }
 0x224   : > { %v1370_v22 = vmul.f32 %v11198_v56, %v1299_v11  ;;  %v8811_v3 = vpack.c.bf16 %v1457_v23, %v1456_v30  ;;  %9726 = vrsqrt.f32 %v1192_v49  ;;  %v1112_v20 = vmul.f32 0.020408163, %v950_v14 }
 0x225   : > { %v1175_v9 = vadd.f32 1e-05, %v1111_v8  ;;  %v9717_v7 = vpop.eup %9716  ;;  %v1371_v61 = vmul.f32 %v11198_v56, %v1300_v35 }
 0x226   : > { %v1001_v6 = vpop.xlane.xlu1 %1000  ;;  %v1441_v25 = vadd.f32 %v11205_v52, %v1370_v22  ;;  %8812 = vmatprep.subr.bf16.mxu1 %v8811_v3  ;;  %v1317_v34 = vmul.f32 %v9717_v7, %v10938_v38  ;;  %v9719_v44 = vpop.eup %9718  ;;  %v1176_v41 = vadd.f32 1e-05, %v1112_v20  ;;  %v1458_v38 = vadd.f32 %v11205_v52, %v1387_v4 }
 0x227   : > { %v1129_v48 = vmul.f32 0.020408163, %v1001_v6  ;;  %9728 = vrsqrt.f32 %v1175_v9  ;;  %v1052_v19 = vpop.xlane.xlu0 %1051  ;;  %v1318_v17 = vmul.f32 %v9719_v44, %v10947_v42  ;;  %v1442_v23 = vadd.f32 %v11205_v52, %v1371_v61 }
 0x228   : > { %v8813_v0 = vpack.c.bf16 %v1441_v25, %v1440_v28  ;;  %v1388_v39 = vmul.f32 %v11198_v56, %v1317_v34  ;;  %9730 = vrsqrt.f32 %v1176_v41  ;;  %v1146_v53 = vmul.f32 0.020408163, %v1052_v19 }
 0x229   : > { %v1193_v27 = vadd.f32 1e-05, %v1129_v48  ;;  %v9721_v12 = vpop.eup %9720  ;;  %v1389_v9 = vmul.f32 %v11198_v56, %v1318_v17 }
 0x22a   : > { %v953_v26 = vpop.xlane.xlu1 %952  ;;  %8814 = vmatpush3.bf16.msra.mxu1 %v8813_v0  ;;  %v1301_v18 = vmul.f32 %v9721_v12, %v10950_v43  ;;  %v1459_v33 = vadd.f32 %v11205_v52, %v1388_v39  ;;  %v9723_v57 = vpop.eup %9722  ;;  %v1210_v45 = vadd.f32 1e-05, %v1146_v53 }
 0x22b   : > { %v1113_v36 = vmul.f32 0.020408163, %v953_v26  ;;  %9732 = vrsqrt.f32 %v1193_v27  ;;  %v1004_v8 = vpop.xlane.xlu0 %1003  ;;  %v1302_v43 = vmul.f32 %v9723_v57, %v10959_v47 }
 0x22c   : > { %v1372_v60 = vmul.f32 %v11198_v56, %v1301_v18  ;;  %v8815_v11 = vpack.c.bf16 %v1459_v33, %v1458_v38  ;;  %9734 = vrsqrt.f32 %v1210_v45  ;;  %v1130_v15 = vmul.f32 0.020408163, %v1004_v8 }
 0x22d   : > { %v1177_v31 = vadd.f32 1e-05, %v1113_v36  ;;  %v9725_v2 = vpop.eup %9724  ;;  %v1373_v20 = vmul.f32 %v11198_v56, %v1302_v43 }
 0x22e   : > { %v1055_v30 = vpop.xlane.xlu1 %1054  ;;  %v1443_v49 = vadd.f32 %v11205_v52, %v1372_v60  ;;  %8816 = vmatprep.subr.bf16.mxu1 %v8815_v11  ;;  %v1319_v42 = vmul.f32 %v9725_v2, %v10962_v46  ;;  %v9727_v22 = vpop.eup %9726  ;;  %v1194_v7 = vadd.f32 1e-05, %v1130_v15  ;;  %v1460_v46 = vadd.f32 %v11205_v52, %v1389_v9 }
 0x22f   : > { %v1147_v1 = vmul.f32 0.020408163, %v1055_v30  ;;  %9736 = vrsqrt.f32 %v1177_v31  ;;  %v1058_v28 = vpop.xlane.xlu0 %1057  ;;  %v1320_v44 = vmul.f32 %v9727_v22, %v10971_v50  ;;  %v1444_v53 = vadd.f32 %v11205_v52, %v1373_v20 }
 0x230   : > { %v8817_v3 = vpack.c.bf16 %v1443_v49, %v1442_v23  ;;  %v1390_v47 = vmul.f32 %v11198_v56, %v1319_v42  ;;  %9738 = vrsqrt.f32 %v1194_v7  ;;  %v1148_v48 = vmul.f32 0.020408163, %v1058_v28 }
 0x231   : > { %v1211_v14 = vadd.f32 1e-05, %v1147_v1  ;;  %v9729_v6 = vpop.eup %9728  ;;  %v1391_v33 = vmul.f32 %v11198_v56, %v1320_v44 }
 0x232   : > { %v1007_v35 = vpop.xlane.xlu1 %1006  ;;  %8818 = vmatpush3.bf16.msra.mxu1 %v8817_v3  ;;  %v1303_v34 = vmul.f32 %v9729_v6, %v10974_v51  ;;  %v1461_v4 = vadd.f32 %v11205_v52, %v1390_v47  ;;  %v9731_v41 = vpop.eup %9730  ;;  %v1212_v27 = vadd.f32 1e-05, %v1148_v48 }
 0x233   : > { %v1131_v25 = vmul.f32 0.020408163, %v1007_v35  ;;  %9740 = vrsqrt.f32 %v1211_v14  ;;  %v1010_v26 = vpop.xlane.xlu0 %1009  ;;  %v1304_v51 = vmul.f32 %v9731_v41, %v10983_v55 }
 0x234   : > { %v1374_v12 = vmul.f32 %v11198_v56, %v1303_v34  ;;  %v8819_v39 = vpack.c.bf16 %v1461_v4, %v1460_v46  ;;  %9742 = vrsqrt.f32 %v1212_v27  ;;  %v1132_v36 = vmul.f32 0.020408163, %v1010_v26 }
 0x235   : > { %v1195_v0 = vadd.f32 1e-05, %v1131_v25  ;;  %v9733_v19 = vpop.eup %9732  ;;  %v1375_v11 = vmul.f32 %v11198_v56, %v1304_v51  ;;  %v1501_v51 = vld [vmem:[#allocation2 + $0x28] sm:$0xff] }
 0x236   : > { %v1061_v61 = vpop.xlane.xlu1 %1060  ;;  %v1445_v38 = vadd.f32 %v11205_v52, %v1374_v12  ;;  %8820 = vmatprep.subr.bf16.mxu1 %v8819_v39  ;;  %v1321_v50 = vmul.f32 %v9733_v19, %v10986_v54  ;;  %v9735_v17 = vpop.eup %9734  ;;  %v1196_v57 = vadd.f32 1e-05, %v1132_v36  ;;  %v1462_v54 = vadd.f32 %v11205_v52, %v1391_v33 }
 0x237   : > { %v1149_v18 = vmul.f32 0.020408163, %v1061_v61  ;;  %9744 = vrsqrt.f32 %v1195_v0  ;;  %v1064_v2 = vpop.xlane.xlu0 %1063  ;;  %v1338_v1 = vmul.f32 %v9735_v17, %v10995_v58 }
 0x238   : > { %v8821_v31 = vpack.c.bf16 %v1445_v38, %v1444_v53  ;;  %v1392_v55 = vmul.f32 %v11198_v56, %v1321_v50  ;;  %9746 = vrsqrt.f32 %v1196_v57  ;;  %v1150_v30 = vmul.f32 0.020408163, %v1064_v2 }
 0x239   : > { %v1213_v45 = vadd.f32 1e-05, %v1149_v18  ;;  %v9737_v60 = vpop.eup %9736  ;;  %v1409_v48 = vmul.f32 %v11198_v56, %v1338_v1 }
 0x23a   : > { %v1013_v8 = vpop.xlane.xlu1 %1012  ;;  %8822 = vmatpush3.bf16.msra.mxu1 %v8821_v31  ;;  %v1305_v43 = vmul.f32 %v9737_v60, %v10998_v59  ;;  %v1463_v15 = vadd.f32 %v11205_v52, %v1392_v55  ;;  %v9739_v49 = vpop.eup %9738  ;;  %v1214_v42 = vadd.f32 1e-05, %v1150_v30  ;;  %v1446_v59 = vadd.f32 %v11205_v52, %v1375_v11 }
 0x23b   : > { %v1133_v23 = vmul.f32 0.020408163, %v1013_v8  ;;  %9748 = vrsqrt.f32 %v1213_v45  ;;  %v1322_v14 = vmul.f32 %v9739_v49, %v11007_v63  ;;  %v1016_v3 = vpop.xlane.xlu0 %1015  ;;  %v1480_v39 = vadd.f32 %v11205_v52, %v1409_v48  ;;  %v1500_v8 = vld [vmem:[#allocation2 + $0x20] sm:$0xff] }
 0x23c   : > { %v1376_v22 = vmul.f32 %v11198_v56, %v1305_v43  ;;  %v8823_v6 = vpack.c.bf16 %v1463_v15, %v1462_v54  ;;  %9750 = vrsqrt.f32 %v1214_v42  ;;  %v1134_v35 = vmul.f32 0.020408163, %v1016_v3 }
 0x23d   : > { %v1197_v9 = vadd.f32 1e-05, %v1133_v23  ;;  %v9741_v7 = vpop.eup %9740  ;;  %v1393_v0 = vmul.f32 %v11198_v56, %v1322_v14  ;;  %v1504_v14 = vld [vmem:[#allocation2 + $0x40] sm:$0xff] }
 0x23e   : > { %v1067_v28 = vpop.xlane.xlu1 %1066  ;;  %v1447_v20 = vadd.f32 %v11205_v52, %v1376_v22  ;;  %8824 = vmatprep.subr.bf16.mxu1 %v8823_v6  ;;  %v1339_v58 = vmul.f32 %v9741_v7, %v11010_v62  ;;  %v9743_v25 = vpop.eup %9742  ;;  %v1198_v34 = vadd.f32 1e-05, %v1134_v35  ;;  %v1496_v62 = vld [vmem:[#allocation2] sm:$0xff] }
 0x23f   : > { %v1151_v47 = vmul.f32 0.020408163, %v1067_v28  ;;  %9752 = vrsqrt.f32 %v1197_v9  ;;  %v1070_v44 = vpop.xlane.xlu0 %1069  ;;  %v1340_v53 = vmul.f32 %v9743_v25, %v11019_v5  ;;  %v1464_v31 = vadd.f32 %v11205_v52, %v1393_v0 }
 0x240   : > { %v8825_v63 = vpack.c.bf16 %v1447_v20, %v1446_v59  ;;  %v1410_v27 = vmul.f32 %v11198_v56, %v1339_v58  ;;  %9754 = vrsqrt.f32 %v1198_v34  ;;  %v1152_v19 = vmul.f32 0.020408163, %v1070_v44  ;;  %v1509_v59 = vld [vmem:[#allocation2 + $0x68] sm:$0xff] }
 0x241   : > { %v1215_v46 = vadd.f32 1e-05, %v1151_v47  ;;  %v9745_v4 = vpop.eup %9744  ;;  %v1411_v11 = vmul.f32 %v11198_v56, %v1340_v53 }
 0x242   : > { %v1019_v41 = vpop.xlane.xlu1 %1018  ;;  %v1323_v12 = vmul.f32 %v9745_v4, %v11022_v10  ;;  %8826 = vmatpush3.bf16.msra.mxu1 %v8825_v63  ;;  %v1481_v61 = vadd.f32 %v11205_v52, %v1410_v27  ;;  %v9747_v36 = vpop.eup %9746  ;;  %v1216_v18 = vadd.f32 1e-05, %v1152_v19 }
 0x243   : > { %v1135_v26 = vmul.f32 0.020408163, %v1019_v41  ;;  %9756 = vrsqrt.f32 %v1215_v46  ;;  %v1324_v10 = vmul.f32 %v9747_v36, %v11031_v16  ;;  %v1022_v17 = vpop.xlane.xlu0 %1021  ;;  %v1505_v16 = vld [vmem:[#allocation2 + $0x48] sm:$0xff]  ;;  %v1482_v3 = vadd.f32 %v11205_v52, %v1411_v11  ;;  %v1508_v41 = vld [vmem:[#allocation2 + $0x60] sm:$0xff] }
 0x244   : > { %v1394_v50 = vmul.f32 %v11198_v56, %v1323_v12  ;;  %v8827_v57 = vpack.c.bf16 %v1481_v61, %v1480_v39  ;;  %9758 = vrsqrt.f32 %v1216_v18  ;;  %v1136_v60 = vmul.f32 0.020408163, %v1022_v17 }
 0x245   : > { %v1199_v38 = vadd.f32 1e-05, %v1135_v26  ;;  %v9749_v33 = vpop.eup %9748  ;;  %1589 = vmatmul.mubr.f32.vlgmr.msra.gmra.mrb[0].mxu1 %v1496_v62  ;;  %v1395_v9 = vmul.f32 %v11198_v56, %v1324_v10 }
 0x246   : > { %v1073_v45 = vpop.xlane.xlu1 %1072  ;;  %v1465_v5 = vadd.f32 %v11205_v52, %v1394_v50  ;;  %1593 = vmatprep.mubr.f32.mxu1 %v1501_v51  ;;  %8828 = vmatprep.subr.bf16.mxu1 %v8827_v57  ;;  %v1341_v55 = vmul.f32 %v9749_v33, %v11034_v13  ;;  %v9751_v30 = vpop.eup %9750  ;;  %v1200_v23 = vadd.f32 1e-05, %v1136_v60  ;;  %v1512_v50 = vld [vmem:[#allocation2 + $0x80] sm:$0xff]  ;;  %v1517_v57 = vld [vmem:[#allocation2 + $0xa8] sm:$0xff] }
 0x247   : > { %v1153_v2 = vmul.f32 0.020408163, %v1073_v45  ;;  %9760 = vrsqrt.f32 %v1199_v38  ;;  %v1076_v1 = vpop.xlane.xlu0 %1075  ;;  %v1342_v28 = vmul.f32 %v9751_v30, %v11043_v21  ;;  %v1466_v63 = vadd.f32 %v11205_v52, %v1395_v9 }
 0x248   : > { %v8829_v54 = vpack.c.bf16 %v1465_v5, %v1464_v31  ;;  %v1412_v42 = vmul.f32 %v11198_v56, %v1341_v55  ;;  %9762 = vrsqrt.f32 %v1200_v23  ;;  %v1154_v7 = vmul.f32 0.020408163, %v1076_v1  ;;  %v12701_v5 = vld [vmem:[#allocation40_spill] sm:$0xff] }
 0x249   : > { %v1217_v43 = vadd.f32 1e-05, %v1153_v2  ;;  %v9753_v15 = vpop.eup %9752  ;;  %1594 = vmatmul.mubr.f32.gmra.mrb[2].mxu1 %v1500_v8  ;;  %v1413_v0 = vmul.f32 %v11198_v56, %v1342_v28 }
 0x24a   : > { %v1025_v49 = vpop.xlane.xlu1 %1024  ;;  %v1325_v22 = vmul.f32 %v9753_v15, %v11046_v24  ;;  %8830 = vmatpush3.bf16.msra.mxu1 %v8829_v54  ;;  %1598 = vmatprep.mubr.f32.mxu1 %v1505_v16  ;;  %v1483_v6 = vadd.f32 %v11205_v52, %v1412_v42  ;;  %v9755_v35 = vpop.eup %9754  ;;  %v1218_v47 = vadd.f32 1e-05, %v1154_v7  ;;  %v1516_v54 = vld [vmem:[#allocation2 + $0xa0] sm:$0xff]  ;;  %v12702_v15 = vld [vmem:[#allocation41_spill] sm:$0xff]  ;;  %v1521_v42 = vld [vmem:[#allocation2 + $0xc8] sm:$0x1] }
 0x24b   : > { %v1137_v13 = vmul.f32 0.020408163, %v1025_v49  ;;  %9764 = vrsqrt.f32 %v1217_v43  ;;  %v1326_v48 = vmul.f32 %v9755_v35, %v11055_v32  ;;  %v1028_v25 = vpop.xlane.xlu0 %1027  ;;  %v1513_v32 = vld [vmem:[#allocation2 + $0x88] sm:$0xff]  ;;  %v1484_v33 = vadd.f32 %v11205_v52, %v1413_v0 }
 0x24c   : > { %v1396_v58 = vmul.f32 %v11198_v56, %v1325_v22  ;;  %v8831_v34 = vpack.c.bf16 %v1483_v6, %v1482_v3  ;;  %9766 = vrsqrt.f32 %v1218_v47  ;;  %v1138_v4 = vmul.f32 0.020408163, %v1028_v25  ;;  %v12703_v35 = vld [vmem:[#allocation43_spill] sm:$0xff]  ;;  %v12705_v0 = vld [vmem:[#allocation44_spill] sm:$0xff] }
 0x24d   : > { %v1201_v20 = vadd.f32 1e-05, %v1137_v13  ;;  %v9757_v24 = vpop.eup %9756  ;;  %1599 = vmatmul.mubr.f32.gmra.mrb[4].mxu1 %v1504_v14  ;;  %v1397_v36 = vmul.f32 %v11198_v56, %v1326_v48 }
 0x24e   : > { %v1079_v46 = vpop.xlane.xlu1 %1078  ;;  %v1467_v21 = vadd.f32 %v11205_v52, %v1396_v58  ;;  %1603 = vmatprep.mubr.f32.mxu1 %v1509_v59  ;;  %8832 = vmatprep.subr.bf16.mxu1 %v8831_v34  ;;  %v1343_v27 = vmul.f32 %v9757_v24, %v11058_v29  ;;  %v9759_v12 = vpop.eup %9758  ;;  %v1202_v19 = vadd.f32 1e-05, %v1138_v4  ;;  %v1520_v24 = vld [vmem:[#allocation2 + $0xc0] sm:$0x1] }
 0x24f   : > { %v1155_v44 = vmul.f32 0.020408163, %v1079_v46  ;;  %9768 = vrsqrt.f32 %v1201_v20  ;;  %v1082_v61 = vpop.xlane.xlu0 %1081  ;;  %v1344_v17 = vmul.f32 %v9759_v12, %v11067_v37  ;;  %v1468_v30 = vadd.f32 %v11205_v52, %v1397_v36  ;;  %v12704_v34 = vld [vmem:[#allocation42_spill] sm:$0xff] }
 0x250   : > { %v8833_v62 = vpack.c.bf16 %v1467_v21, %v1466_v63  ;;  %v1414_v51 = vmul.f32 %v11198_v56, %v1343_v27  ;;  %9770 = vrsqrt.f32 %v1202_v19  ;;  %v1156_v38 = vmul.f32 0.020408163, %v1082_v61  ;;  %v1499_v63 = vld [vmem:[#allocation2 + $0x18] sm:$0xff] }
 0x251   : > { %v1219_v26 = vadd.f32 1e-05, %v1155_v44  ;;  %v9761_v39 = vpop.eup %9760  ;;  %1604 = vmatmul.mubr.f32.gmra.mrb[6].mxu1 %v1508_v41  ;;  %v1415_v49 = vmul.f32 %v11198_v56, %v1344_v17 }
 0x252   : > { %v1031_v53 = vpop.xlane.xlu1 %1030  ;;  %v1327_v18 = vmul.f32 %v9761_v39, %v11070_v40  ;;  %8834 = vmatpush3.bf16.msra.mxu1 %v8833_v62  ;;  %1608 = vmatprep.mubr.f32.mxu1 %v1513_v32  ;;  %v1485_v10 = vadd.f32 %v11205_v52, %v1414_v51  ;;  %v9763_v45 = vpop.eup %9762  ;;  %v1220_v31 = vadd.f32 1e-05, %v1156_v38  ;;  %v12706_v51 = vld [vmem:[#allocation25_spill] sm:$0xff] }
 0x253   : > { %v1139_v29 = vmul.f32 0.020408163, %v1031_v53  ;;  %9772 = vrsqrt.f32 %v1219_v26  ;;  %v1328_v8 = vmul.f32 %v9763_v45, %v12701_v5  ;;  %v1034_v55 = vpop.xlane.xlu0 %1033  ;;  %v1486_v48 = vadd.f32 %v11205_v52, %v1415_v49 }
 0x254   : > { %v1398_v2 = vmul.f32 %v11198_v56, %v1327_v18  ;;  %v8835_v11 = vpack.c.bf16 %v1485_v10, %v1484_v33  ;;  %9774 = vrsqrt.f32 %v1220_v31  ;;  %v1140_v23 = vmul.f32 0.020408163, %v1034_v55 }
 0x255   : > { %v1203_v60 = vadd.f32 1e-05, %v1139_v29  ;;  %v9765_v40 = vpop.eup %9764  ;;  %1609 = vmatmul.mubr.f32.gmra.mrb[8].mxu1 %v1512_v50  ;;  %v1399_v59 = vmul.f32 %v11198_v56, %v1328_v8 }
 0x256   : > { %v1085_v16 = vpop.xlane.xlu1 %1084  ;;  %v1469_v37 = vadd.f32 %v11205_v52, %v1398_v2  ;;  %1613 = vmatprep.mubr.f32.mxu1 %v1517_v57  ;;  %8836 = vmatprep.subr.bf16.mxu1 %v8835_v11  ;;  %v1345_v1 = vmul.f32 %v9765_v40, %v12702_v15  ;;  %v9767_v9 = vpop.eup %9766  ;;  %v1204_v22 = vadd.f32 1e-05, %v1140_v23  ;;  %v12708_v11 = vld [vmem:[#allocation27_spill] sm:$0xff]  ;;  %v12709_v15 = vld [vmem:[#allocation28_spill] sm:$0xff] }
 0x257   : > { %v1157_v43 = vmul.f32 0.020408163, %v1085_v16  ;;  %9776 = vrsqrt.f32 %v1203_v60  ;;  %v1088_v3 = vpop.xlane.xlu0 %1087  ;;  %v1346_v46 = vmul.f32 %v9767_v9, %v12704_v34  ;;  %v1470_v62 = vadd.f32 %v11205_v52, %v1399_v59  ;;  %v12707_v60 = vld [vmem:[#allocation26_spill] sm:$0xff]  ;;  %v12711_v34 = vld [vmem:[#allocation31_spill] sm:$0xff] }
 0x258   : > { %v8837_v13 = vpack.c.bf16 %v1469_v37, %v1468_v30  ;;  %v1416_v28 = vmul.f32 %v11198_v56, %v1345_v1  ;;  %9778 = vrsqrt.f32 %v1204_v22  ;;  %v1158_v20 = vmul.f32 0.020408163, %v1088_v3  ;;  %v12710_v3 = vld [vmem:[#allocation29_spill] sm:$0xff] }
 0x259   : > { %v1221_v7 = vadd.f32 1e-05, %v1157_v43  ;;  %v9769_v14 = vpop.eup %9768  ;;  %1614 = vmatmul.mubr.f32.gmra.mrb[10].mxu1 %v1516_v54  ;;  %v1417_v18 = vmul.f32 %v11198_v56, %v1346_v46 }
 0x25a   : > { %v1037_v6 = vpop.xlane.xlu1 %1036  ;;  %v1329_v47 = vmul.f32 %v9769_v14, %v12703_v35  ;;  %8838 = vmatpush3.bf16.msra.mxu1 %v8837_v13  ;;  %1618 = vmatprep.mubr.f32.mxu1 %v1521_v42  ;;  %v1487_v25 = vadd.f32 %v11205_v52, %v1416_v28  ;;  %v9771_v4 = vpop.eup %9770  ;;  %v1222_v44 = vadd.f32 1e-05, %v1158_v20 }
 0x25b   : > { %v1141_v58 = vmul.f32 0.020408163, %v1037_v6  ;;  %9780 = vrsqrt.f32 %v1221_v7  ;;  %v1330_v32 = vmul.f32 %v9771_v4, %v12705_v0  ;;  %v1040_v12 = vpop.xlane.xlu0 %1039  ;;  %v1488_v8 = vadd.f32 %v11205_v52, %v1417_v18 }
 0x25c   : > { %v1400_v41 = vmul.f32 %v11198_v56, %v1329_v47  ;;  %v8839_v19 = vpack.c.bf16 %v1487_v25, %v1486_v48  ;;  %9782 = vrsqrt.f32 %v1222_v44  ;;  %v1142_v39 = vmul.f32 0.020408163, %v1040_v12 }
 0x25d   : > { %v1205_v21 = vadd.f32 1e-05, %v1141_v58  ;;  %v9773_v27 = vpop.eup %9772  ;;  %1619 = vmatmul.mubr.f32.gmra.mrb[12].mxu1 %v1520_v24  ;;  %v1401_v31 = vmul.f32 %v11198_v56, %v1330_v32 }
 0x25e   : > { %v1091_v26 = vpop.xlane.xlu1 %1090  ;;  %v1471_v53 = vadd.f32 %v11205_v52, %v1400_v41  ;;  %1688 = vmatprep.mubr.f32.mxu1 %v1499_v63  ;;  %8840 = vmatprep.subr.bf16.mxu1 %v8839_v19  ;;  %v1347_v36 = vmul.f32 %v9773_v27, %v12706_v51  ;;  %v9775_v38 = vpop.eup %9774  ;;  %v1206_v29 = vadd.f32 1e-05, %v1142_v39  ;;  %v12712_v63 = vld [vmem:[#allocation30_spill] sm:$0xff]  ;;  %v12713_v39 = vld [vmem:[#allocation32_spill] sm:$0xff]  ;;  %v12714_v51 = vld [vmem:[#allocation33_spill] sm:$0xff] }
 0x25f   : > { %v1159_v61 = vmul.f32 0.020408163, %v1091_v26  ;;  %9784 = vrsqrt.f32 %v1205_v21  ;;  %v1094_v17 = vpop.xlane.xlu0 %1093  ;;  %v1348_v16 = vmul.f32 %v9775_v38, %v12708_v11 }
 0x260   : > { %v8841_v33 = vpack.c.bf16 %v1471_v53, %v1470_v62  ;;  %v1418_v45 = vmul.f32 %v11198_v56, %v1347_v36  ;;  %9786 = vrsqrt.f32 %v1206_v29  ;;  %v1160_v40 = vmul.f32 0.020408163, %v1094_v17  ;;  %v11361_v56 = vld [vmem:[%s12572_s1] ss:$0 sm:$0xff] }
 0x261   : > { %v1223_v50 = vadd.f32 1e-05, %v1159_v61  ;;  %v9777_v10 = vpop.eup %9776  ;;  %v1419_v28 = vmul.f32 %v11361_v56, %v1348_v16 }
 0x262   : > { %v1043_v57 = vpop.xlane.xlu1 %1042  ;;  %v1331_v2 = vmul.f32 %v9777_v10, %v12707_v60  ;;  %8842 = vmatpush3.bf16.msra.mxu1 %v8841_v33  ;;  %v1489_v55 = vadd.f32 %v11205_v52, %v1418_v45  ;;  %v9779_v30 = vpop.eup %9778  ;;  %v1224_v23 = vadd.f32 1e-05, %v1160_v40  ;;  %v11368_v52 = vld [vmem:[%s12573_s2] ss:$0 sm:$0xff] }
 0x263   : > { %v1143_v5 = vmul.f32 0.020408163, %v1043_v57  ;;  %9788 = vrsqrt.f32 %v1223_v50  ;;  %v1332_v1 = vmul.f32 %v9779_v30, %v12709_v15  ;;  %v1046_v49 = vpop.xlane.xlu0 %1045  ;;  %v1472_v22 = vadd.f32 %v11368_v52, %v1401_v31  ;;  %v12715_v10 = vld [vmem:[#allocation34_spill] sm:$0xff]  ;;  %v12716_v31 = vld [vmem:[#allocation35_spill] sm:$0xff] }
 0x264   : > { %v1402_v37 = vmul.f32 %v11361_v56, %v1331_v2  ;;  %v8843_v42 = vpack.c.bf16 %v1489_v55, %v1488_v8  ;;  %9790 = vrsqrt.f32 %v1224_v23  ;;  %v1144_v7 = vmul.f32 0.020408163, %v1046_v49  ;;  %v12717_v55 = vld [vmem:[#allocation45_spill] sm:$0xff]  ;;  %v12718_v23 = vld [vmem:[#allocation46_spill] sm:$0xff] }
 0x265   : > { %v1207_v43 = vadd.f32 1e-05, %v1143_v5  ;;  %v9781_v54 = vpop.eup %9780  ;;  %v1403_v25 = vmul.f32 %v11361_v56, %v1332_v1  ;;  %v1490_v21 = vadd.f32 %v11368_v52, %v1419_v28  ;;  %v12719_v49 = vld [vmem:[#allocation38_spill] sm:$0xff] }
 0x266   : > { %v1097_v9 = vpop.xlane.xlu1 %1096  ;;  %v1473_v14 = vadd.f32 %v11368_v52, %v1402_v37  ;;  %8844 = vmatprep.subr.bf16.mxu1 %v8843_v42  ;;  %v1349_v6 = vmul.f32 %v9781_v54, %v12710_v3  ;;  %v9783_v59 = vpop.eup %9782  ;;  %v1208_v35 = vadd.f32 1e-05, %v1144_v7 }
 0x267   : > { %v1161_v13 = vmul.f32 0.020408163, %v1097_v9  ;;  %9792 = vrsqrt.f32 %v1207_v43  ;;  %v1350_v46 = vmul.f32 %v9783_v59, %v12711_v34  ;;  %v1474_v26 = vadd.f32 %v11368_v52, %v1403_v25  ;;  %v1498_v59 = vld [vmem:[#allocation2 + $0x10] sm:$0xff]  ;;  %v1519_v25 = vld [vmem:[#allocation2 + $0xb8] sm:$0xff] }
 0x268   : > { %v8845_v20 = vpack.c.bf16 %v1473_v14, %v1472_v22  ;;  %v1420_v48 = vmul.f32 %v11361_v56, %v1349_v6  ;;  %9794 = vrsqrt.f32 %v1208_v35  ;;  %v1503_v35 = vld [vmem:[#allocation2 + $0x38] sm:$0xff]  ;;  %v1518_v34 = vld [vmem:[#allocation2 + $0xb0] sm:$0xff] }
 0x269   : > { %v1225_v47 = vadd.f32 1e-05, %v1161_v13  ;;  %v9785_v58 = vpop.eup %9784  ;;  %v1421_v62 = vmul.f32 %v11361_v56, %v1350_v46  ;;  %v1523_v46 = vld [vmem:[#allocation2 + $0xd8] sm:$0x1] }
 0x26a   : > { %v1333_v4 = vmul.f32 %v9785_v58, %v12712_v63  ;;  %8846 = vmatpush3.bf16.msra.mxu1 %v8845_v20  ;;  %v1491_v41 = vadd.f32 %v11368_v52, %v1420_v48  ;;  %v9787_v27 = vpop.eup %9786  ;;  %v1507_v20 = vld [vmem:[#allocation2 + $0x58] sm:$0xff]  ;;  %v1506_v58 = vld [vmem:[#allocation2 + $0x50] sm:$0xff] }
 0x26b   : > { %9796 = vrsqrt.f32 %v1225_v47  ;;  %v1334_v61 = vmul.f32 %v9787_v27, %v12713_v39  ;;  %v1492_v33 = vadd.f32 %v11368_v52, %v1421_v62  ;;  %v1502_v47 = vld [vmem:[#allocation2 + $0x30] sm:$0xff]  ;;  %v1515_v48 = vld [vmem:[#allocation2 + $0x98] sm:$0xff]  ;;  %v9830_v62 = vld [vmem:[%s10488_s11] sm:$0xff] }
 0x26c   : > { %v1404_v32 = vmul.f32 %v11361_v56, %v1333_v4  ;;  %v8847_v19 = vpack.c.bf16 %v1491_v41, %v1490_v21  ;;  %v1522_v63 = vld [vmem:[#allocation2 + $0xd0] sm:$0x1]  ;;  %v10211_v4 = vmov 0.0|0.0   ;;  %v1726_v21 = vld [vmem:[#allocation5 + $0x8] sm:$0xff]  ;;  %v5892_v39 = vmul.f32 %v9830_v62, %v9830_v62 }
 0x26d   : > { %v9789_v12 = vpop.eup %9788  ;;  %v1405_v45 = vmul.f32 %v11361_v56, %v1334_v61  ;;  %8994 = vmatprep.subr.bf16.mxu0 %v10211_v4  ;;  %v1727_v27 = vld [vmem:[#allocation5 + $0x10] sm:$0xff]  ;;  %v9831_v61 = vld [vmem:[%s10488_s11 + $0x8] sm:$0xff] }
 0x26e   : > { %v1475_v53 = vadd.f32 %v11368_v52, %v1404_v32  ;;  %v1351_v36 = vmul.f32 %v9789_v12, %v12714_v51  ;;  %8848 = vmatprep.subr.bf16.mxu1 %v8847_v19  ;;  %v9791_v18 = vpop.eup %9790  ;;  %v3001_v32 = vld [vmem:[#allocation5 + $0x348] sm:$0xff]  ;;  %v3002_v19 = vld [vmem:[#allocation5 + $0x350] sm:$0xff]  ;;  %v1729_v51 = vld [vmem:[#allocation5 + $0x20] sm:$0xff] }
 0x26f   : > { %v1352_v60 = vmul.f32 %v9791_v18, %v12716_v31  ;;  %v1476_v16 = vadd.f32 %v11368_v52, %v1405_v45  ;;  %v1731_v45 = vld [vmem:[#allocation5 + $0x30] sm:$0x1]  ;;  %v10212_v31 = vmov 0.0  }
 0x270   : > { %v1049_v24 = vpop.xlane.xlu1 %1048  ;;  %v8849_v38 = vpack.c.bf16 %v1475_v53, %v1474_v26  ;;  %v1422_v29 = vmul.f32 %v11361_v56, %v1351_v36  ;;  %v8995_v26 = vpack.c.bf16 %v3002_v19, %v3001_v32  ;;  %v5893_v53 = vmul.f32 %v9831_v61, %v9831_v61  ;;  %v1730_v36 = vld [vmem:[#allocation5 + $0x28] sm:$0xff]  ;;  %8231 = vmatprep.mubr.msk.f32.mxu0 %vm10213_vm2, %v10212_v31  ;;  %v9844_v61 = vld [vmem:[%s10488_s11 + $0x70] sm:$0xff] }
 0x271   : > { %v1145_v44 = vmul.f32 0.020408163, %v1049_v24  ;;  %v9793_v50 = vpop.eup %9792  ;;  %v1423_v37 = vmul.f32 %v11361_v56, %v1352_v60  ;;  %v1511_v24 = vld [vmem:[#allocation2 + $0x78] sm:$0xff]  ;;  %v8866_v18 = vpack.c.bf16 %v1730_v36, %v1729_v51  ;;  %v3005_v60 = vld [vmem:[#allocation5 + $0x368] sm:$0xff] }
 0x272   : > { %v1335_v17 = vmul.f32 %v9793_v50, %v12715_v10  ;;  %8850 = vmatpush3.bf16.msra.mxu1 %v8849_v38  ;;  %v1493_v57 = vadd.f32 %v11368_v52, %v1422_v29  ;;  %v9795_v2 = vpop.eup %9794  ;;  %8996 = vmatpush3.bf16.msra.mxu0 %v8995_v26  ;;  %v3003_v38 = vld [vmem:[#allocation5 + $0x358] sm:$0xff]  ;;  %v3004_v29 = vld [vmem:[#allocation5 + $0x360] sm:$0xff]  ;;  %v9843_v19 = vld [vmem:[%s10488_s11 + $0x68] sm:$0xff] }
 0x273   : > { %v1209_v0 = vadd.f32 1e-05, %v1145_v44  ;;  %v1336_v11 = vmul.f32 %v9795_v2, %v12717_v55  ;;  %v1494_v22 = vadd.f32 %v11368_v52, %v1423_v37  ;;  %v1725_v44 = vld [vmem:[#allocation5] sm:$0xff]  ;;  %8997 = vmatprep.subr.bf16.mxu0 %v10211_v4  ;;  %v8998_v50 = vpack.c.bf16 %v3004_v29, %v3003_v38  ;;  %v3007_v37 = vld [vmem:[#allocation5 + $0x378] sm:$0x1] }
 0x274   : > { %v8851_v40 = vpack.c.bf16 %v1493_v57, %v1492_v33  ;;  %v1406_v5 = vmul.f32 %v11361_v56, %v1335_v17  ;;  %v8860_v41 = vpack.c.bf16 %v1726_v21, %v1725_v44  ;;  %v9832_v33 = vld [vmem:[%s10488_s11 + $0x10] sm:$0xff]  ;;  %v5956_v17 = vsel %vm520_vm0, %v5892_v39, 0.0 }
 0x275   : > { %9798 = vrsqrt.f32 %v1209_v0  ;;  %v9797_v8 = vpop.eup %9796  ;;  %v1407_v9 = vmul.f32 %v11361_v56, %v1336_v11  ;;  %v1728_v0 = vld [vmem:[#allocation5 + $0x18] sm:$0xff]  ;;  %v5894_v10 = vmul.f32 %v9832_v33, %v9832_v33  ;;  %v5957_v57 = vsel %vm520_vm0, %v5893_v53, 0.0  ;;  %v9846_v33 = vld [vmem:[%s10488_s11 + $0x80] sm:$0xff] }
 0x276   : > { %8852 = vmatprep.subr.bf16.mxu1 %v8851_v40  ;;  %v1477_v30 = vadd.f32 %v11368_v52, %v1406_v5  ;;  %v1353_v43 = vmul.f32 %v9797_v8, %v12718_v23  ;;  %v8863_v12 = vpack.c.bf16 %v1728_v0, %v1727_v27  ;;  %8999 = vmatpush3.bf16.msra.mxu0 %v8998_v50  ;;  %v3006_v40 = vld [vmem:[#allocation5 + $0x370] sm:$0xff]  ;;  %v9833_v5 = vld [vmem:[%s10488_s11 + $0x18] sm:$0xff]  ;;  %v9842_v27 = vld [vmem:[%s10488_s11 + $0x60] sm:$0xff] }
 0x277   : > { %v1478_v3 = vadd.f32 %v11368_v52, %v1407_v9  ;;  %9000 = vmatprep.subr.bf16.mxu0 %v10211_v4  ;;  %v5958_v2 = vadd.f32 %v5957_v57, %v5956_v17  ;;  %v5895_v8 = vmul.f32 %v9833_v5, %v9833_v5  ;;  %v5959_v55 = vsel %vm520_vm0, %v5894_v10, 0.0  ;;  %v9836_v9 = vld [vmem:[%s10488_s11 + $0x30] sm:$0xff] }
 0x278   : > { %v8853_v15 = vpack.c.bf16 %v1477_v30, %v1476_v16  ;;  %v1424_v1 = vmul.f32 %v11361_v56, %v1353_v43  ;;  %v9001_v11 = vpack.c.bf16 %v3006_v40, %v3005_v60  ;;  %v9834_v30 = vld [vmem:[%s10488_s11 + $0x20] sm:$0xff]  ;;  %v5904_v0 = vmul.f32 %v9842_v27, %v9842_v27  ;;  %v9847_v60 = vld [vmem:[%s10488_s11 + $0x88] sm:$0xff] }
 0x279   : > { %v5960_v16 = vadd.f32 %v5959_v55, %v5958_v2  ;;  %v5896_v23 = vmul.f32 %v9834_v30, %v9834_v30  ;;  %v5961_v43 = vsel %vm520_vm0, %v5895_v8, 0.0  ;;  %v5905_v26 = vmul.f32 %v9843_v19, %v9843_v19 }
 0x27a   : > { %8854 = vmatpush3.bf16.msra.mxu1 %v8853_v15  ;;  %v1495_v7 = vadd.f32 %v11368_v52, %v1424_v1  ;;  %9002 = vmatpush3.bf16.msra.mxu0 %v9001_v11  ;;  %v9835_v15 = vld [vmem:[%s10488_s11 + $0x28] sm:$0xff]  ;;  %v5979_v62 = vsel %vm520_vm0, %v5904_v0, 0.0  ;;  %v5906_v53 = vmul.f32 %v9844_v61, %v9844_v61  ;;  %v5908_v10 = vmul.f32 %v9846_v33, %v9846_v33  ;;  %v9848_v11 = vld [vmem:[%s10488_s11 + $0x90] sm:$0xff] }
 0x27b   : > { %8229 = vmatprep.subr.mxu0 %v10212_v31  ;;  %v5897_v1 = vmul.f32 %v9835_v15, %v9835_v15  ;;  %v5981_v51 = vsel %vm520_vm0, %v5905_v26, 0.0  ;;  %v5909_v2 = vmul.f32 %v9847_v60, %v9847_v60 }
 0x27c   : > { %v8855_v14 = vpack.c.bf16 %v1495_v7, %v1494_v22  ;;  %v5898_v22 = vmul.f32 %v9836_v9, %v9836_v9  ;;  %v5983_v29 = vsel %vm520_vm0, %v5906_v53, 0.0 }
 0x27d   : > { %v5965_v7 = vsel %vm520_vm0, %v5897_v1, 0.0  ;;  %v5989_v55 = vsel %vm520_vm0, %v5909_v2, 0.0 }
 0x27e   : > { %8856 = vmatprep.subr.bf16.mxu1 %v8855_v14  ;;  %8230 = vmatpush3.msk.msra.mxu0 %vm1735_vm1, %v3007_v37  ;;  %v9837_v14 = vld [vmem:[%s10488_s11 + $0x38] sm:$0xff] }
 0x27f   : > { %v9799_v54 = vpop.eup %9798  ;;  %9003 = vmatprep.subr.bf16.mxu0 %v10211_v4 }
 0x280   : > { %v1337_v42 = vmul.f32 %v9799_v54, %v12719_v49  ;;  %v5962_v54 = vadd.f32 %v5961_v43, %v5960_v16  ;;  %v5963_v49 = vsel %vm520_vm0, %v5896_v23, 0.0  ;;  %v5910_v16 = vmul.f32 %v9848_v11, %v9848_v11  ;;  %v9859_v11 = vld [vmem:[%s10488_s11 + $0xe8] sm:$0xff] }
 0x282   : > { %v1408_v13 = vmul.f32 %v11361_v56, %v1337_v42  ;;  %v1510_v56 = vld [vmem:[#allocation2 + $0x70] sm:$0xff]  ;;  %v5964_v42 = vadd.f32 %v5963_v49, %v5962_v54  ;;  %v9849_v54 = vld [vmem:[%s10488_s11 + $0x98] sm:$0xff]  ;;  %v5991_v1 = vsel %vm520_vm0, %v5910_v16, 0.0  ;;  %v5921_v16 = vmul.f32 %v9859_v11, %v9859_v11 }
 0x283   : > { %v5911_v15 = vmul.f32 %v9849_v54, %v9849_v54 }
 0x284   : > { %v1479_v6 = vadd.f32 %v11368_v52, %v1408_v13  ;;  %v1514_v52 = vld [vmem:[#allocation2 + $0x90] sm:$0xff]  ;;  %v5966_v13 = vadd.f32 %v5965_v7, %v5964_v42  ;;  %v9850_v7 = vld [vmem:[%s10488_s11 + $0xa0] sm:$0xff] }
 0x286   : > { %v8857_v28 = vpack.c.bf16 %v1479_v6, %v1478_v3  ;;  %v5899_v3 = vmul.f32 %v9837_v14, %v9837_v14  ;;  %v5967_v6 = vsel %vm520_vm0, %v5898_v22, 0.0  ;;  %v5993_v14 = vsel %vm520_vm0, %v5911_v15, 0.0 }
 0x287   : > { %v6013_v15 = vsel %vm520_vm0, %v5921_v16, 0.0 }
 0x288   : > { %8858 = vmatpush3.bf16.msra.mxu1 %v8857_v28  ;;  %v5968_v28 = vadd.f32 %v5967_v6, %v5966_v13  ;;  %v5912_v13 = vmul.f32 %v9850_v7, %v9850_v7 }
 0x289   : > { %8859 = vmatprep.subr.bf16.mxu1 %v10211_v4 }
 0x28b   : > { %1689 = vmatmul.mubr.f32.vlgmr.msra.gmra.mrb[14].mxu1 %v1498_v59  ;;  %v9838_v59 = vld [vmem:[%s10488_s11 + $0x40] sm:$0xff] }
 0x28c   : > { %1693 = vmatprep.mubr.f32.mxu1 %v1503_v35  ;;  %8861 = vmatpush3.bf16.msra.mxu1 %v8860_v41  ;;  %v5900_v35 = vmul.f32 %v9838_v59, %v9838_v59 }
 0x28d   : > { %8862 = vmatprep.subr.bf16.mxu1 %v10211_v4 }
 0x28f   : > { %1694 = vmatmul.mubr.f32.gmra.mrb[16].mxu1 %v1502_v47  ;;  %v5969_v47 = vsel %vm520_vm0, %v5899_v3, 0.0 }
 0x290   : > { %1698 = vmatprep.mubr.f32.mxu1 %v1507_v20  ;;  %8864 = vmatpush3.bf16.msra.mxu1 %v8863_v12  ;;  %v5970_v20 = vadd.f32 %v5969_v47, %v5968_v28 }
 0x291   : > { %8865 = vmatprep.subr.bf16.mxu1 %v10211_v4 }
 0x293   : > { %1699 = vmatmul.mubr.f32.gmra.mrb[18].mxu1 %v1506_v58  ;;  %v9839_v58 = vld [vmem:[%s10488_s11 + $0x48] sm:$0xff] }
 0x294   : > { %1703 = vmatprep.mubr.f32.mxu1 %v1511_v24  ;;  %8867 = vmatpush3.bf16.msra.mxu1 %v8866_v18  ;;  %v5901_v24 = vmul.f32 %v9839_v58, %v9839_v58  ;;  %v9845_v18 = vld [vmem:[%s10488_s11 + $0x78] sm:$0xff] }
 0x295   : > { %7974 = vmatprep.subr.mxu1 %v10212_v31  ;;  %v5907_v38 = vmul.f32 %v9845_v18, %v9845_v18 }
 0x297   : > { %1704 = vmatmul.mubr.f32.gmra.mrb[20].mxu1 %v1510_v56  ;;  %v5971_v56 = vsel %vm520_vm0, %v5900_v35, 0.0  ;;  %v5985_v17 = vsel %vm520_vm0, %v5907_v38, 0.0  ;;  %v9851_v35 = vld [vmem:[%s10488_s11 + $0xa8] sm:$0xff] }
 0x298   : > { %1708 = vmatprep.mubr.f32.mxu1 %v1515_v48  ;;  %7975 = vmatpush3.msk.msra.mxu1 %vm1735_vm1, %v1731_v45  ;;  %v5972_v48 = vadd.f32 %v5971_v56, %v5970_v20  ;;  %v5987_v45 = vsel %vm520_vm0, %v5908_v10, 0.0  ;;  %v5913_v47 = vmul.f32 %v9851_v35, %v9851_v35  ;;  %v5995_v20 = vsel %vm520_vm0, %v5912_v13, 0.0  ;;  %v9862_v13 = vld [vmem:[%s10488_s11 + $0x100] sm:$0xff] }
 0x299   : > { %8868 = vmatprep.subr.bf16.mxu1 %v10211_v4 }
 0x29b   : > { %1709 = vmatmul.mubr.f32.gmra.mrb[22].mxu1 %v1514_v52  ;;  %v9840_v52 = vld [vmem:[%s10488_s11 + $0x50] sm:$0xff] }
 0x29c   : > { %1713 = vmatprep.mubr.f32.mxu1 %v1519_v25  ;;  %v5902_v25 = vmul.f32 %v9840_v52, %v9840_v52  ;;  %v9852_v52 = vld [vmem:[%s10488_s11 + $0xb0] sm:$0xff] }
 0x29e   : > { %v5975_v21 = vsel %vm520_vm0, %v5902_v25, 0.0  ;;  %v5914_v25 = vmul.f32 %v9852_v52, %v9852_v52 }
 0x29f   : > { %1714 = vmatmul.mubr.f32.gmra.mrb[24].mxu1 %v1518_v34  ;;  %v5973_v34 = vsel %vm520_vm0, %v5901_v24, 0.0 }
 0x2a0   : > { %1718 = vmatprep.mubr.f32.mxu1 %v1523_v46  ;;  %v5974_v46 = vadd.f32 %v5973_v34, %v5972_v48  ;;  %v5997_v34 = vsel %vm520_vm0, %v5913_v47, 0.0  ;;  %v5999_v0 = vsel %vm520_vm0, %v5914_v25, 0.0 }
 0x2a2   : > { %v5976_v41 = vadd.f32 %v5975_v21, %v5974_v46 }
 0x2a3   : > { %1719 = vmatmul.mubr.f32.gmra.mrb[26].mxu1 %v1522_v63  ;;  %v9841_v63 = vld [vmem:[%s10488_s11 + $0x58] sm:$0xff] }
 0x2a4   : > { %7976 = vmatprep.mubr.msk.f32.mxu1 %vm10213_vm2, %v10212_v31  ;;  %v5903_v44 = vmul.f32 %v9841_v63, %v9841_v63 }
 0x2a6   : > { %v5977_v32 = vsel %vm520_vm0, %v5903_v44, 0.0 }
 0x2a7   : > { %v5978_v12 = vadd.f32 %v5977_v32, %v5976_v41  ;;  %v9853_v41 = vld [vmem:[%s10488_s11 + $0xb8] sm:$0xff] }
 0x2a8   : > { %v5915_v27 = vmul.f32 %v9853_v41, %v9853_v41 }
 0x2a9   : > { %v5980_v39 = vadd.f32 %v5979_v62, %v5978_v12  ;;  %v9854_v62 = vld [vmem:[%s10488_s11 + $0xc0] sm:$0xff] }
 0x2aa   : > { %v6001_v61 = vsel %vm520_vm0, %v5915_v27, 0.0 }
 0x2ab   : > { %v5982_v36 = vadd.f32 %v5981_v51, %v5980_v39  ;;  %v5916_v39 = vmul.f32 %v9854_v62, %v9854_v62 }
 0x2ad   : > { %v5984_v50 = vadd.f32 %v5983_v29, %v5982_v36  ;;  %v9855_v36 = vld [vmem:[%s10488_s11 + $0xc8] sm:$0xff]  ;;  %v6003_v38 = vsel %vm520_vm0, %v5916_v39, 0.0  ;;  %v3086_v39 = vld [vmem:[#allocation5 + $0x380] sm:$0xff] }
 0x2ae   : > { %v5917_v18 = vmul.f32 %v9855_v36, %v9855_v36 }
 0x2af   : > { %v5986_v57 = vadd.f32 %v5985_v17, %v5984_v50  ;;  %v9856_v50 = vld [vmem:[%s10488_s11 + $0xd0] sm:$0xff] }
 0x2b0   : > { %v5918_v33 = vmul.f32 %v9856_v50, %v9856_v50  ;;  %v6005_v10 = vsel %vm520_vm0, %v5917_v18, 0.0  ;;  %v1815_v50 = vld [vmem:[#allocation5 + $0x58] sm:$0xff] }
 0x2b1   : > { %v5988_v5 = vadd.f32 %v5987_v45, %v5986_v57  ;;  %v9857_v57 = vld [vmem:[%s10488_s11 + $0xd8] sm:$0xff] }
 0x2b2   : > { %v5919_v45 = vmul.f32 %v9857_v57, %v9857_v57  ;;  %v6007_v60 = vsel %vm520_vm0, %v5918_v33, 0.0  ;;  %v1816_v33 = vld [vmem:[#allocation5 + $0x60] sm:$0xff] }
 0x2b3   : > { %v5990_v43 = vadd.f32 %v5989_v55, %v5988_v5 }
 0x2b5   : > { %v5992_v9 = vadd.f32 %v5991_v1, %v5990_v43 }
 0x2b7   : > { %v5994_v28 = vadd.f32 %v5993_v14, %v5992_v9  ;;  %v5924_v14 = vmul.f32 %v9862_v13, %v9862_v13 }
 0x2b9   : > { %v5996_v56 = vadd.f32 %v5995_v20, %v5994_v28  ;;  %v6019_v47 = vsel %vm520_vm0, %v5924_v14, 0.0 }
 0x2bb   : > { %v5998_v44 = vadd.f32 %v5997_v34, %v5996_v56  ;;  %v1812_v56 = vld [vmem:[#allocation5 + $0x40] sm:$0xff]  ;;  %v9864_v34 = vld [vmem:[%s10488_s11 + $0x110] sm:$0xff] }
 0x2bd   : > { %v6000_v19 = vadd.f32 %v5999_v0, %v5998_v44  ;;  %v1813_v0 = vld [vmem:[#allocation5 + $0x48] sm:$0xff] }
 0x2bf   : > { %v6002_v51 = vadd.f32 %v6001_v61, %v6000_v19  ;;  %v3087_v61 = vld [vmem:[#allocation5 + $0x388] sm:$0xff] }
 0x2c1   : > { %v6004_v29 = vadd.f32 %v6003_v38, %v6002_v51  ;;  %v9865_v51 = vld [vmem:[%s10488_s11 + $0x118] sm:$0xff] }
 0x2c2   : > { %v5927_v36 = vmul.f32 %v9865_v51, %v9865_v51 }
 0x2c3   : > { %v6006_v17 = vadd.f32 %v6005_v10, %v6004_v29 }
 0x2c5   : > { %v6008_v2 = vadd.f32 %v6007_v60, %v6006_v17  ;;  %v9004_v17 = vpack.c.bf16 %v3087_v61, %v3086_v39  ;;  %v9869_v39 = vld [vmem:[%s10488_s11 + $0x138] sm:$0xff] }
 0x2c6   : > { %v5931_v61 = vmul.f32 %v9869_v39, %v9869_v39 }
 0x318   : > { %v7338_v40 = vpop.f32.mrb[0].mxu1 }
 0x319   : > { %v7339_v8 = vpop.f32.mrb[1].mxu1 }
 0x31a   : > { %v11459_v30 = vadd.f32 %v7339_v8, %v7338_v40  ;;  %v9858_v40 = vld [vmem:[%s10488_s11 + $0xe0] sm:$0xff]  ;;  %v6009_v8 = vsel %vm520_vm0, %v5919_v45, 0.0 }
 0x31b   : > { %v5920_v5 = vmul.f32 %v9858_v40, %v9858_v40  ;;  %v6010_v55 = vadd.f32 %v6009_v8, %v6008_v2  ;;  %v3088_v2 = vld [vmem:[#allocation5 + $0x390] sm:$0xff]  ;;  %v3089_v40 = vld [vmem:[#allocation5 + $0x398] sm:$0xff] }
 0x31c   : > { %v7341_v23 = vpop.f32.mrb[2].mxu1 }
 0x31d   : > { %v7342_v37 = vpop.f32.mrb[3].mxu1 }
 0x31e   : > { %v11463_v49 = vadd.f32 %v7342_v37, %v7341_v23  ;;  %v6011_v23 = vsel %vm520_vm0, %v5920_v5, 0.0  ;;  %v9860_v37 = vld [vmem:[%s10488_s11 + $0xf0] sm:$0xff]  ;;  %v9866_v5 = vld [vmem:[%s10488_s11 + $0x120] sm:$0xff] }
 0x31f   : > { %v6012_v43 = vadd.f32 %v6011_v23, %v6010_v55  ;;  %v5922_v54 = vmul.f32 %v9860_v37, %v9860_v37  ;;  %v5928_v8 = vmul.f32 %v9866_v5, %v9866_v5  ;;  %v6025_v55 = vsel %vm520_vm0, %v5927_v36, 0.0  ;;  %v1896_v37 = vld [vmem:[#allocation5 + $0x70] sm:$0xff] }
 0x320   : > { %v7344_v42 = vpop.f32.mrb[4].mxu1 }
 0x321   : > { %v7345_v22 = vpop.f32.mrb[5].mxu1  ;;  %v6014_v1 = vadd.f32 %v6013_v15, %v6012_v43  ;;  %v9007_v43 = vpack.c.bf16 %v3089_v40, %v3088_v2  ;;  %v1981_v40 = vld [vmem:[#allocation5 + $0xa8] sm:$0xff] }
 0x322   : > { %v11467_v3 = vadd.f32 %v7345_v22, %v7344_v42  ;;  %v9861_v42 = vld [vmem:[%s10488_s11 + $0xf8] sm:$0xff]  ;;  %v6015_v22 = vsel %vm520_vm0, %v5922_v54, 0.0 }
 0x323   : > { %v5923_v9 = vmul.f32 %v9861_v42, %v9861_v42  ;;  %v6016_v7 = vadd.f32 %v6015_v22, %v6014_v1  ;;  %v1897_v1 = vld [vmem:[#allocation5 + $0x78] sm:$0xff]  ;;  %v3090_v42 = vld [vmem:[#allocation5 + $0x3a0] sm:$0xff] }
 0x324   : > { %v7347_v6 = vpop.f32.mrb[6].mxu1 }
 0x325   : > { %v7348_v59 = vpop.f32.mrb[7].mxu1 }
 0x326   : > { %v11471_v58 = vadd.f32 %v7348_v59, %v7347_v6  ;;  %v6017_v6 = vsel %vm520_vm0, %v5923_v9, 0.0  ;;  %v9863_v59 = vld [vmem:[%s10488_s11 + $0x108] sm:$0xff] }
 0x327   : > { %v6018_v28 = vadd.f32 %v6017_v6, %v6016_v7  ;;  %v5925_v35 = vmul.f32 %v9863_v59, %v9863_v59  ;;  %v9867_v9 = vld [vmem:[%s10488_s11 + $0x128] sm:$0xff]  ;;  %v6027_v7 = vsel %vm520_vm0, %v5928_v8, 0.0  ;;  %v8878_v59 = vpack.c.bf16 %v1897_v1, %v1896_v37  ;;  %v1982_v8 = vld [vmem:[#allocation5 + $0xb0] sm:$0xff] }
 0x328   : > { %v7350_v24 = vpop.f32.mrb[8].mxu1  ;;  %v5929_v22 = vmul.f32 %v9867_v9, %v9867_v9  ;;  %v1817_v6 = vld [vmem:[#allocation5 + $0x68] sm:$0x1] }
 0x329   : > { %v7351_v48 = vpop.f32.mrb[9].mxu1  ;;  %v6020_v52 = vadd.f32 %v6019_v47, %v6018_v28  ;;  %v6021_v44 = vsel %vm520_vm0, %v5925_v35, 0.0 }
 0x32a   : > { %v11475_v46 = vadd.f32 %v7351_v48, %v7350_v24  ;;  %v1811_v24 = vld [vmem:[#allocation5 + $0x38] sm:$0xff] }
 0x32c   : > { %v7353_v63 = vpop.f32.mrb[10].mxu1 }
 0x32d   : > { %v7354_v21 = vpop.f32.mrb[11].mxu1 }
 0x32e   : > { %v11479_v32 = vadd.f32 %v7354_v21, %v7353_v63  ;;  %v5926_v63 = vmul.f32 %v9864_v34, %v9864_v34  ;;  %v8869_v21 = vpack.c.bf16 %v1812_v56, %v1811_v24  ;;  %v1898_v56 = vld [vmem:[#allocation5 + $0x80] sm:$0xff] }
 0x330   : > { %v7356_v12 = vpop.f32.mrb[12].mxu1  ;;  %v6023_v18 = vsel %vm520_vm0, %v5926_v63, 0.0 }
 0x331   : > { %v7357_v26 = vpop.f32.mrb[13].mxu1 }
 0x332   : > { %v11483_v53 = vadd.f32 %v7357_v26, %v7356_v12  ;;  %v1814_v12 = vld [vmem:[#allocation5 + $0x50] sm:$0xff]  ;;  %v6022_v26 = vadd.f32 %v6021_v44, %v6020_v52  ;;  %v3171_v44 = vld [vmem:[#allocation5 + $0x3b8] sm:$0xff] }
 0x333   : > { %v8872_v38 = vpack.c.bf16 %v1814_v12, %v1813_v0  ;;  %v9868_v52 = vld [vmem:[%s10488_s11 + $0x130] sm:$0xff] }
 0x334   : > { %v6024_v57 = vadd.f32 %v6023_v18, %v6022_v26  ;;  %v1900_v26 = vld [vmem:[#allocation5 + $0x90] sm:$0xff] }
 0x336   : > { %v6026_v54 = vadd.f32 %v6025_v55, %v6024_v57  ;;  %v3175_v55 = vld [vmem:[#allocation5 + $0x3d8] sm:$0xff] }
 0x338   : > { %v6028_v47 = vadd.f32 %v6027_v7, %v6026_v54  ;;  %v3257_v7 = vld [vmem:[#allocation5 + $0x3f8] sm:$0xff] }
 0x35e   : > { %v7391_v20 = vpop.f32.mrb[14].mxu1 }
 0x35f   : > { %v7392_v48 = vpop.f32.mrb[15].mxu1 }
 0x360   : > { %v7393_v25 = vadd.f32 %v7392_v48, %v7391_v20  ;;  %v1899_v48 = vld [vmem:[#allocation5 + $0x88] sm:$0xff] }
 0x361   : > { %v8881_v0 = vpack.c.bf16 %v1899_v48, %v1898_v56 }
 0x362   : > { %v11506_v41 = vadd.f32 %v7393_v25, %v11459_v30  ;;  %v7394_v27 = vpop.f32.mrb[16].mxu1  ;;  %v5930_v25 = vmul.f32 %v9868_v52, %v9868_v52  ;;  %v3258_v52 = vld [vmem:[#allocation5 + $0x400] sm:$0xff] }
 0x363   : > { %v7395_v19 = vpop.f32.mrb[17].mxu1 }
 0x364   : > { %v7396_v62 = vadd.f32 %v7395_v19, %v7394_v27  ;;  %7977 = vmatmul.mubr.msk.f32.vlgmr.msra.gmra.mrb[28].mxu1 %vm520_vm0, %v11506_v41  ;;  %v1818_v24 = vrot.slane %v11506_v41, 1  ;;  %v6031_v51 = vsel %vm520_vm0, %v5930_v25, 0.0  ;;  %v1903_v1 = vrot.slane %v11506_v41, 2  ;;  %v3259_v25 = vld [vmem:[#allocation5 + $0x408] sm:$0xff] }
 0x365   : > { %8870 = vmatpush3.bf16.msra.mxu1 %v8869_v21  ;;  %7993 = vmatprep.mubr.msk.f32.mxu1 %vm10213_vm2, %v10212_v31  ;;  %v3172_v21 = vld [vmem:[#allocation5 + $0x3c0] sm:$0xff] }
 0x366   : > { %v11515_v30 = vadd.f32 %v7396_v62, %v11463_v49  ;;  %v7397_v29 = vpop.f32.mrb[18].mxu1  ;;  %8871 = vmatprep.subr.bf16.mxu1 %v10211_v4  ;;  %v8875_v49 = vpack.c.bf16 %v1816_v33, %v1815_v50  ;;  %v1901_v62 = vld [vmem:[#allocation5 + $0x98] sm:$0xff]  ;;  %v9013_v36 = vpack.c.bf16 %v3172_v21, %v3171_v44  ;;  %v3174_v50 = vld [vmem:[#allocation5 + $0x3d0] sm:$0xff] }
 0x367   : > { %v7398_v10 = vpop.f32.mrb[19].mxu1 }
 0x368   : > { %v7399_v45 = vadd.f32 %v7398_v10, %v7397_v29  ;;  %v3008_v60 = vrot.slane %v11515_v30, 7  ;;  %v3173_v29 = vld [vmem:[#allocation5 + $0x3c8] sm:$0xff]  ;;  %v8884_v10 = vpack.c.bf16 %v1901_v62, %v1900_v26  ;;  %v3261_v26 = vld [vmem:[#allocation5 + $0x418] sm:$0xff]  ;;  %v9874_v62 = vld [vmem:[%s10488_s11 + $0x160] sm:$0xff] }
 0x369   : > { %8873 = vmatpush3.bf16.msra.mxu1 %v8872_v38  ;;  %v9016_v2 = vpack.c.bf16 %v3174_v50, %v3173_v29  ;;  %v5936_v39 = vmul.f32 %v9874_v62, %v9874_v62  ;;  %v1988_v50 = vrot.slane %v11506_v41, 3  ;;  %v2155_v62 = vld [vmem:[#allocation5 + $0x138] sm:$0xff] }
 0x36a   : > { %v11522_v11 = vadd.f32 %v7399_v45, %v11467_v3  ;;  %v7400_v16 = vpop.f32.mrb[20].mxu1  ;;  %8232 = vmatmul.mubr.msk.f32.vlgmr.msra.gmra.mrb[0].mxu0 %vm520_vm0, %v3008_v60  ;;  %8874 = vmatprep.subr.bf16.mxu1 %v10211_v4  ;;  %v3091_v3 = vld [vmem:[#allocation5 + $0x3a8] sm:$0xff]  ;;  %v9870_v45 = vld [vmem:[%s10488_s11 + $0x140] sm:$0xff] }
 0x36b   : > { %9005 = vmatpush3.bf16.msra.mxu0 %v9004_v17  ;;  %v7401_v23 = vpop.f32.mrb[21].mxu1  ;;  %8248 = vmatprep.mubr.msk.f32.mxu0 %vm10213_vm2, %v10212_v31  ;;  %v9010_v35 = vpack.c.bf16 %v3091_v3, %v3090_v42  ;;  %v5932_v60 = vmul.f32 %v9870_v45, %v9870_v45  ;;  %v1983_v42 = vld [vmem:[#allocation5 + $0xb8] sm:$0xff]  ;;  %v1984_v3 = vld [vmem:[#allocation5 + $0xc0] sm:$0xff]  ;;  %v6043_v45 = vsel %vm520_vm0, %v5936_v39, 0.0 }
 0x36c   : > { %v7402_v15 = vadd.f32 %v7401_v23, %v7400_v16  ;;  %9006 = vmatprep.subr.bf16.mxu0 %v10211_v4  ;;  %v1902_v23 = vld [vmem:[#allocation5 + $0xa0] sm:$0x1]  ;;  %v3178_v48 = vrot.slane %v11522_v11, 1 }
 0x36d   : > { %8876 = vmatpush3.bf16.msra.mxu1 %v8875_v49  ;;  %v3176_v49 = vld [vmem:[#allocation5 + $0x3e0] sm:$0xff]  ;;  %v6035_v54 = vsel %vm520_vm0, %v5932_v60, 0.0  ;;  %v3341_v60 = vld [vmem:[#allocation5 + $0x428] sm:$0xff] }
 0x36e   : > { %v11532_v13 = vadd.f32 %v7402_v15, %v11471_v58  ;;  %v7403_v14 = vpop.f32.mrb[22].mxu1  ;;  %7991 = vmatprep.subr.mxu1 %v10212_v31  ;;  %v6029_v58 = vsel %vm520_vm0, %v5929_v22, 0.0  ;;  %v9019_v15 = vpack.c.bf16 %v3176_v49, %v3175_v55  ;;  %v3256_v22 = vld [vmem:[#allocation5 + $0x3f0] sm:$0xff]  ;;  %v2070_v55 = vld [vmem:[#allocation5 + $0x100] sm:$0xff]  ;;  %v2071_v49 = vld [vmem:[#allocation5 + $0x108] sm:$0xff] }
 0x36f   : > { %9008 = vmatpush3.bf16.msra.mxu0 %v9007_v43  ;;  %v7404_v28 = vpop.f32.mrb[23].mxu1  ;;  %v6030_v12 = vadd.f32 %v6029_v58, %v6028_v47  ;;  %v9871_v43 = vld [vmem:[%s10488_s11 + $0x148] sm:$0xff]  ;;  %v9873_v58 = vld [vmem:[%s10488_s11 + $0x158] sm:$0xff]  ;;  %v2156_v39 = vld [vmem:[#allocation5 + $0x140] sm:$0xff] }
 0x370   : > { %v7405_v20 = vadd.f32 %v7404_v28, %v7403_v14  ;;  %9009 = vmatprep.subr.bf16.mxu0 %v10211_v4  ;;  %v5933_v37 = vmul.f32 %v9871_v43, %v9871_v43  ;;  %v9872_v14 = vld [vmem:[%s10488_s11 + $0x150] sm:$0xff]  ;;  %v1985_v47 = vld [vmem:[#allocation5 + $0xc8] sm:$0xff] }
 0x371   : > { %7992 = vmatpush3.msk.msra.mxu1 %vm1735_vm1, %v1817_v6  ;;  %v6032_v17 = vadd.f32 %v6031_v51, %v6030_v12  ;;  %v5934_v6 = vmul.f32 %v9872_v14, %v9872_v14  ;;  %v1987_v51 = vld [vmem:[#allocation5 + $0xd8] sm:$0x1] }
 0x372   : > { %v11541_v34 = vadd.f32 %v7405_v20, %v11475_v46  ;;  %7994 = vmatmul.mubr.msk.f32.vlgmr.msra.gmra.mrb[28].mxu1 %vm520_vm0, %v1818_v24  ;;  %8877 = vmatprep.subr.bf16.mxu1 %v10211_v4  ;;  %v7406_v63 = vpop.f32.mrb[24].mxu1  ;;  %v3092_v46 = vld [vmem:[#allocation5 + $0x3b0] sm:$0x1]  ;;  %v6037_v28 = vsel %vm520_vm0, %v5933_v37, 0.0  ;;  %v9022_v24 = vpack.c.bf16 %v3257_v7, %v3256_v22  ;;  %v2151_v14 = vld [vmem:[#allocation5 + $0x118] sm:$0xff] }
 0x373   : > { %8879 = vmatpush3.bf16.msra.mxu1 %v8878_v59  ;;  %9011 = vmatpush3.bf16.msra.mxu0 %v9010_v35  ;;  %v7407_v27 = vpop.f32.mrb[25].mxu1  ;;  %v8890_v59 = vpack.c.bf16 %v1984_v3, %v1983_v42  ;;  %v3177_v35 = vld [vmem:[#allocation5 + $0x3e8] sm:$0x1]  ;;  %v1986_v20 = vld [vmem:[#allocation5 + $0xd0] sm:$0xff]  ;;  %v6039_v44 = vsel %vm520_vm0, %v5934_v6, 0.0  ;;  %v9877_v3 = vld [vmem:[%s10488_s11 + $0x178] sm:$0xff] }
 0x374   : > { %v7408_v19 = vadd.f32 %v7407_v27, %v7406_v63  ;;  %8880 = vmatprep.subr.bf16.mxu1 %v10211_v4  ;;  %8246 = vmatprep.subr.mxu0 %v10212_v31  ;;  %v5935_v63 = vmul.f32 %v9873_v58, %v9873_v58  ;;  %v8893_v21 = vpack.c.bf16 %v1986_v20, %v1985_v47  ;;  %v2152_v6 = vld [vmem:[#allocation5 + $0x120] sm:$0xff]  ;;  %v2072_v47 = vld [vmem:[#allocation5 + $0x110] sm:$0x1]  ;;  %v2153_v58 = vld [vmem:[#allocation5 + $0x128] sm:$0xff] }
 0x375   : > { %8010 = vmatprep.mubr.msk.f32.mxu1 %vm10213_vm2, %v10212_v31  ;;  %v9025_v27 = vpack.c.bf16 %v3259_v25, %v3258_v52  ;;  %v9878_v20 = vld [vmem:[%s10488_s11 + $0x180] sm:$0xff]  ;;  %v2073_v25 = vrot.slane %v11506_v41, 4 }
 0x376   : > { %v11552_v18 = vadd.f32 %v7408_v19, %v11479_v32  ;;  %v7409_v38 = vpop.f32.mrb[26].mxu1  ;;  %v6033_v32 = vsel %vm520_vm0, %v5931_v61, 0.0  ;;  %v2067_v19 = vld [vmem:[#allocation5 + $0xe8] sm:$0xff]  ;;  %v6041_v61 = vsel %vm520_vm0, %v5935_v63, 0.0  ;;  %v2154_v63 = vld [vmem:[#allocation5 + $0x130] sm:$0xff] }
 0x377   : > { %8882 = vmatpush3.bf16.msra.mxu1 %v8881_v0  ;;  %8247 = vmatpush3.msk.msra.mxu0 %vm1735_vm1, %v3092_v46  ;;  %v7410_v33 = vpop.f32.mrb[27].mxu1  ;;  %v6034_v16 = vadd.f32 %v6033_v32, %v6032_v17  ;;  %v2066_v0 = vld [vmem:[#allocation5 + $0xe0] sm:$0xff]  ;;  %v3260_v46 = vld [vmem:[#allocation5 + $0x410] sm:$0xff]  ;;  %v9875_v17 = vld [vmem:[%s10488_s11 + $0x168] sm:$0xff] }
 0x378   : > { %v7411_v57 = vadd.f32 %v7410_v33, %v7409_v38  ;;  %8249 = vmatmul.mubr.msk.f32.vlgmr.msra.gmra.mrb[0].mxu0 %vm520_vm0, %v11522_v11  ;;  %9012 = vmatprep.subr.bf16.mxu0 %v10211_v4  ;;  %v9028_v38 = vpack.c.bf16 %v3261_v26, %v3260_v46  ;;  %v2068_v33 = vld [vmem:[#allocation5 + $0xf0] sm:$0xff]  ;;  %v8908_v46 = vpack.c.bf16 %v2154_v63, %v2153_v58  ;;  %v3347_v26 = vld [vmem:[#allocation5 + $0x458] sm:$0x1] }
 0x379   : > { %9014 = vmatpush3.bf16.msra.mxu0 %v9013_v36  ;;  %8883 = vmatprep.subr.bf16.mxu1 %v10211_v4  ;;  %v6036_v9 = vadd.f32 %v6035_v54, %v6034_v16  ;;  %v8896_v36 = vpack.c.bf16 %v2067_v19, %v2066_v0  ;;  %v3342_v32 = vld [vmem:[#allocation5 + $0x430] sm:$0xff]  ;;  %v3263_v54 = vrot.slane %v11522_v11, 2  ;;  %v9879_v0 = vld [vmem:[%s10488_s11 + $0x188] sm:$0xff] }
 0x37a   : > { %v11562_v5 = vadd.f32 %v7411_v57, %v11483_v53  ;;  %9015 = vmatprep.subr.bf16.mxu0 %v10211_v4  ;;  %8265 = vmatprep.mubr.msk.f32.mxu0 %vm10213_vm2, %v10212_v31  ;;  %v8887_v53 = vpack.c.bf16 %v1982_v8, %v1981_v40  ;;  %v5937_v57 = vmul.f32 %v9875_v17, %v9875_v17  ;;  %v3262_v8 = vld [vmem:[#allocation5 + $0x420] sm:$0x1]  ;;  %v9876_v16 = vld [vmem:[%s10488_s11 + $0x170] sm:$0xff] }
 0x37b   : > { %8885 = vmatpush3.bf16.msra.mxu1 %v8884_v10  ;;  %v6038_v56 = vadd.f32 %v6037_v28, %v6036_v9  ;;  %v2069_v10 = vld [vmem:[#allocation5 + $0xf8] sm:$0xff]  ;;  %v9031_v37 = vpack.c.bf16 %v3342_v32, %v3341_v60  ;;  %v5939_v9 = vmul.f32 %v9877_v3, %v9877_v3  ;;  %v3345_v28 = vld [vmem:[#allocation5 + $0x448] sm:$0xff]  ;;  %v8911_v17 = vpack.c.bf16 %v2156_v39, %v2155_v62  ;;  %v9884_v63 = vld [vmem:[%s10488_s11 + $0x1b0] sm:$0xff] }
 0x37c   : > { %8008 = vmatprep.subr.mxu1 %v10212_v31  ;;  %v6045_v43 = vsel %vm520_vm0, %v5937_v57, 0.0  ;;  %v2237_v32 = vld [vmem:[#allocation5 + $0x158] sm:$0xff]  ;;  %v2242_v62 = vld [vmem:[#allocation5 + $0x180] sm:$0x1] }
 0x37d   : > { %9017 = vmatpush3.bf16.msra.mxu0 %v9016_v2  ;;  %v6040_v12 = vadd.f32 %v6039_v44, %v6038_v56  ;;  %v8899_v2 = vpack.c.bf16 %v2069_v10, %v2068_v33  ;;  %v6049_v56 = vsel %vm520_vm0, %v5939_v9, 0.0  ;;  %v3511_v9 = vld [vmem:[#allocation5 + $0x498] sm:$0xff] }
 0x37e   : > { %9018 = vmatprep.subr.bf16.mxu0 %v10211_v4  ;;  %v9885_v39 = vld [vmem:[%s10488_s11 + $0x1b8] sm:$0xff] }
 0x37f   : > { %8009 = vmatpush3.msk.msra.mxu1 %vm1735_vm1, %v1902_v23  ;;  %v6042_v29 = vadd.f32 %v6041_v61, %v6040_v12  ;;  %v5938_v23 = vmul.f32 %v9876_v16, %v9876_v16  ;;  %v5941_v12 = vmul.f32 %v9879_v0, %v9879_v0  ;;  %v2157_v16 = vld [vmem:[#allocation5 + $0x148] sm:$0x1] }
 0x380   : > { %8011 = vmatmul.mubr.msk.f32.vlgmr.msra.gmra.mrb[28].mxu1 %vm520_vm0, %v1903_v1  ;;  %8886 = vmatprep.subr.bf16.mxu1 %v10211_v4  ;;  %v8902_v1 = vpack.c.bf16 %v2071_v49, %v2070_v55  ;;  %v2321_v0 = vld [vmem:[#allocation5 + $0x188] sm:$0xff] }
 0x381   : > { %8888 = vmatpush3.bf16.msra.mxu1 %v8887_v53  ;;  %9020 = vmatpush3.bf16.msra.mxu0 %v9019_v15  ;;  %v6044_v40 = vadd.f32 %v6043_v45, %v6042_v29  ;;  %v3343_v53 = vld [vmem:[#allocation5 + $0x438] sm:$0xff]  ;;  %v3344_v15 = vld [vmem:[#allocation5 + $0x440] sm:$0xff]  ;;  %v6047_v22 = vsel %vm520_vm0, %v5938_v23, 0.0  ;;  %v6053_v10 = vsel %vm520_vm0, %v5941_v12, 0.0  ;;  %v2236_v45 = vld [vmem:[#allocation5 + $0x150] sm:$0xff] }
 0x382   : > { %8889 = vmatprep.subr.bf16.mxu1 %v10211_v4  ;;  %8263 = vmatprep.subr.mxu0 %v10212_v31  ;;  %v9034_v7 = vpack.c.bf16 %v3344_v15, %v3343_v53  ;;  %v3429_v29 = vld [vmem:[#allocation5 + $0x478] sm:$0xff]  ;;  %v8914_v23 = vpack.c.bf16 %v2237_v32, %v2236_v45  ;;  %v2238_v53 = vld [vmem:[#allocation5 + $0x160] sm:$0xff]  ;;  %v2239_v15 = vld [vmem:[#allocation5 + $0x168] sm:$0xff] }
 0x383   : > { %8027 = vmatprep.mubr.msk.f32.mxu1 %vm10213_vm2, %v10212_v31  ;;  %v6046_v42 = vadd.f32 %v6045_v43, %v6044_v40  ;;  %v3431_v40 = vld [vmem:[#allocation5 + $0x488] sm:$0xff]  ;;  %v2322_v12 = vld [vmem:[#allocation5 + $0x190] sm:$0xff]  ;;  %v9886_v45 = vld [vmem:[%s10488_s11 + $0x1c0] sm:$0xff] }
 0x385   : > { %8891 = vmatpush3.bf16.msra.mxu1 %v8890_v59  ;;  %8264 = vmatpush3.msk.msra.mxu0 %vm1735_vm1, %v3177_v35  ;;  %v3346_v59 = vld [vmem:[#allocation5 + $0x450] sm:$0xff]  ;;  %v6048_v35 = vadd.f32 %v6047_v22, %v6046_v42  ;;  %v3512_v22 = vld [vmem:[#allocation5 + $0x4a0] sm:$0xff] }
 0x386   : > { %8266 = vmatmul.mubr.msk.f32.vlgmr.msra.gmra.mrb[0].mxu0 %vm520_vm0, %v3178_v48  ;;  %9021 = vmatprep.subr.bf16.mxu0 %v10211_v4  ;;  %v8905_v48 = vpack.c.bf16 %v2152_v6, %v2151_v14  ;;  %v9037_v52 = vpack.c.bf16 %v3346_v59, %v3345_v28  ;;  %v3432_v6 = vld [vmem:[#allocation5 + $0x490] sm:$0x1]  ;;  %v2241_v59 = vld [vmem:[#allocation5 + $0x178] sm:$0xff] }
 0x387   : > { %9023 = vmatpush3.bf16.msra.mxu0 %v9022_v24  ;;  %8892 = vmatprep.subr.bf16.mxu1 %v10211_v4  ;;  %v5940_v24 = vmul.f32 %v9878_v20, %v9878_v20  ;;  %v6050_v44 = vadd.f32 %v6049_v56, %v6048_v35  ;;  %v2240_v28 = vld [vmem:[#allocation5 + $0x170] sm:$0xff]  ;;  %v9883_v35 = vld [vmem:[%s10488_s11 + $0x1a8] sm:$0xff]  ;;  %v3433_v56 = vrot.slane %v11522_v11, 4 }
 0x388   : > { %9024 = vmatprep.subr.bf16.mxu0 %v10211_v4  ;;  %8282 = vmatprep.mubr.msk.f32.mxu0 %vm10213_vm2, %v10212_v31 }
 0x389   : > { %8894 = vmatpush3.bf16.msra.mxu1 %v8893_v21  ;;  %v3426_v21 = vld [vmem:[#allocation5 + $0x460] sm:$0xff]  ;;  %v6051_v19 = vsel %vm520_vm0, %v5940_v24, 0.0  ;;  %v9049_v24 = vpack.c.bf16 %v3512_v22, %v3511_v9  ;;  %v2407_v22 = vld [vmem:[#allocation5 + $0x1c8] sm:$0xff] }
 0x38a   : > { %8025 = vmatprep.subr.mxu1 %v10212_v31 }
 0x38b   : > { %9026 = vmatpush3.bf16.msra.mxu0 %v9025_v27  ;;  %v3427_v27 = vld [vmem:[#allocation5 + $0x468] sm:$0xff] }
 0x38c   : > { %9027 = vmatprep.subr.bf16.mxu0 %v10211_v4  ;;  %v9040_v61 = vpack.c.bf16 %v3427_v27, %v3426_v21 }
 0x38d   : > { %8026 = vmatpush3.msk.msra.mxu1 %vm1735_vm1, %v1987_v51  ;;  %v6052_v51 = vadd.f32 %v6051_v19, %v6050_v44  ;;  %v5946_v44 = vmul.f32 %v9884_v63, %v9884_v63  ;;  %v3515_v19 = vld [vmem:[#allocation5 + $0x4b8] sm:$0xff] }
 0x38e   : > { %8028 = vmatmul.mubr.msk.f32.vlgmr.msra.gmra.mrb[28].mxu1 %vm520_vm0, %v1988_v50  ;;  %8895 = vmatprep.subr.bf16.mxu1 %v10211_v4  ;;  %v9880_v50 = vld [vmem:[%s10488_s11 + $0x190] sm:$0xff] }
 0x38f   : > { %8897 = vmatpush3.bf16.msra.mxu1 %v8896_v36  ;;  %9029 = vmatpush3.bf16.msra.mxu0 %v9028_v38  ;;  %v3348_v36 = vrot.slane %v11522_v11, 3  ;;  %v3428_v38 = vld [vmem:[#allocation5 + $0x470] sm:$0xff]  ;;  %v5942_v33 = vmul.f32 %v9880_v50, %v9880_v50  ;;  %v6054_v60 = vadd.f32 %v6053_v10, %v6052_v51  ;;  %v6063_v51 = vsel %vm520_vm0, %v5946_v44, 0.0  ;;  %v2323_v50 = vld [vmem:[#allocation5 + $0x198] sm:$0xff]  ;;  %v3681_v44 = vld [vmem:[#allocation5 + $0x508] sm:$0xff] }
 0x390   : > { %8898 = vmatprep.subr.bf16.mxu1 %v10211_v4  ;;  %8280 = vmatprep.subr.mxu0 %v10212_v31  ;;  %v9043_v57 = vpack.c.bf16 %v3429_v29, %v3428_v38  ;;  %v2243_v29 = vrot.slane %v11506_v41, 6 }
 0x391   : > { %8044 = vmatprep.mubr.msk.f32.mxu1 %vm10213_vm2, %v10212_v31  ;;  %v6055_v49 = vsel %vm520_vm0, %v5942_v33, 0.0  ;;  %v2324_v33 = vld [vmem:[#allocation5 + $0x1a0] sm:$0xff] }
 0x393   : > { %8900 = vmatpush3.bf16.msra.mxu1 %v8899_v2  ;;  %8281 = vmatpush3.msk.msra.mxu0 %vm1735_vm1, %v3262_v8  ;;  %v3430_v2 = vld [vmem:[#allocation5 + $0x480] sm:$0xff]  ;;  %v9881_v8 = vld [vmem:[%s10488_s11 + $0x198] sm:$0xff] }
 0x394   : > { %8283 = vmatmul.mubr.msk.f32.vlgmr.msra.gmra.mrb[0].mxu0 %vm520_vm0, %v3263_v54  ;;  %9030 = vmatprep.subr.bf16.mxu0 %v10211_v4  ;;  %v5943_v55 = vmul.f32 %v9881_v8, %v9881_v8  ;;  %v9046_v43 = vpack.c.bf16 %v3431_v40, %v3430_v2  ;;  %v2158_v54 = vrot.slane %v11506_v41, 5  ;;  %v8926_v2 = vpack.c.bf16 %v2324_v33, %v2323_v50  ;;  %v3517_v40 = vld [vmem:[#allocation5 + $0x4c8] sm:$0x1] }
 0x395   : > { %9032 = vmatpush3.bf16.msra.mxu0 %v9031_v37  ;;  %8901 = vmatprep.subr.bf16.mxu1 %v10211_v4  ;;  %v6056_v37 = vadd.f32 %v6055_v49, %v6054_v60  ;;  %v5948_v60 = vmul.f32 %v9886_v45, %v9886_v45  ;;  %v2325_v8 = vld [vmem:[#allocation5 + $0x1a8] sm:$0xff]  ;;  %v2492_v45 = vld [vmem:[#allocation5 + $0x200] sm:$0xff] }
 0x396   : > { %9033 = vmatprep.subr.bf16.mxu0 %v10211_v4  ;;  %8299 = vmatprep.mubr.msk.f32.mxu0 %vm10213_vm2, %v10212_v31  ;;  %v6057_v3 = vsel %vm520_vm0, %v5943_v55, 0.0  ;;  %v2326_v55 = vld [vmem:[#allocation5 + $0x1b0] sm:$0xff]  ;;  %v11720_v50 = vld [vmem:[%s10488_s11 + $0x1e8] sm:$0xff] }
 0x397   : > { %8903 = vmatpush3.bf16.msra.mxu1 %v8902_v1  ;;  %v9882_v1 = vld [vmem:[%s10488_s11 + $0x1a0] sm:$0xff]  ;;  %v6058_v14 = vadd.f32 %v6057_v3, %v6056_v37  ;;  %v3599_v37 = vld [vmem:[#allocation5 + $0x4e8] sm:$0xff]  ;;  %v5953_v33 = vmul.f32 %v11720_v50, %v11720_v50 }
 0x398   : > { %8042 = vmatprep.subr.mxu1 %v10212_v31  ;;  %v5944_v42 = vmul.f32 %v9882_v1, %v9882_v1  ;;  %v8929_v1 = vpack.c.bf16 %v2326_v55, %v2325_v8  ;;  %v2406_v3 = vld [vmem:[#allocation5 + $0x1c0] sm:$0xff]  ;;  %v11731_v8 = vld [vmem:[%s10488_s11 + $0x1f0] sm:$0xff] }
 0x399   : > { %9035 = vmatpush3.bf16.msra.mxu0 %v9034_v7  ;;  %v8917_v7 = vpack.c.bf16 %v2239_v15, %v2238_v53  ;;  %v6067_v15 = vsel %vm520_vm0, %v5948_v60, 0.0  ;;  %v3685_v60 = vld [vmem:[#allocation5 + $0x528] sm:$0xff]  ;;  %v5954_v55 = vmul.f32 %v11731_v8, %v11731_v8 }
 0x39a   : > { %9036 = vmatprep.subr.bf16.mxu0 %v10211_v4  ;;  %v6059_v20 = vsel %vm520_vm0, %v5944_v42, 0.0 }
 0x39b   : > { %8043 = vmatpush3.msk.msra.mxu1 %vm1735_vm1, %v2072_v47  ;;  %v5945_v47 = vmul.f32 %v9883_v35, %v9883_v35  ;;  %v6060_v58 = vadd.f32 %v6059_v20, %v6058_v14  ;;  %v3601_v14 = vld [vmem:[#allocation5 + $0x4f8] sm:$0xff] }
 0x39c   : > { %8045 = vmatmul.mubr.msk.f32.vlgmr.msra.gmra.mrb[28].mxu1 %vm520_vm0, %v2073_v25  ;;  %8904 = vmatprep.subr.bf16.mxu1 %v10211_v4  ;;  %v8920_v25 = vpack.c.bf16 %v2241_v59, %v2240_v28  ;;  %v2327_v35 = vld [vmem:[#allocation5 + $0x1b8] sm:$0x1] }
 0x39d   : > { %8906 = vmatpush3.bf16.msra.mxu1 %v8905_v48  ;;  %9038 = vmatpush3.bf16.msra.mxu0 %v9037_v52  ;;  %v3513_v48 = vld [vmem:[#allocation5 + $0x4a8] sm:$0xff]  ;;  %v3514_v52 = vld [vmem:[#allocation5 + $0x4b0] sm:$0xff]  ;;  %v6061_v21 = vsel %vm520_vm0, %v5945_v47, 0.0  ;;  %v8932_v47 = vpack.c.bf16 %v2407_v22, %v2406_v3  ;;  %v6079_v3 = vsel %vm520_vm0, %v5954_v55, 0.0  ;;  %v3687_v22 = vld [vmem:[#allocation5 + $0x538] sm:$0x1] }
 0x39e   : > { %8907 = vmatprep.subr.bf16.mxu1 %v10211_v4  ;;  %8297 = vmatprep.subr.mxu0 %v10212_v31  ;;  %v9052_v27 = vpack.c.bf16 %v3514_v52, %v3513_v48  ;;  %v2408_v48 = vld [vmem:[#allocation5 + $0x1d0] sm:$0xff]  ;;  %v2409_v52 = vld [vmem:[#allocation5 + $0x1d8] sm:$0xff] }
 0x39f   : > { %8061 = vmatprep.mubr.msk.f32.mxu1 %vm10213_vm2, %v10212_v31 }
 0x3a1   : > { %8909 = vmatpush3.bf16.msra.mxu1 %v8908_v46  ;;  %8298 = vmatpush3.msk.msra.mxu0 %vm1735_vm1, %v3347_v26  ;;  %v3516_v46 = vld [vmem:[#allocation5 + $0x4c0] sm:$0xff]  ;;  %v6062_v26 = vadd.f32 %v6061_v21, %v6060_v58  ;;  %v8935_v21 = vpack.c.bf16 %v2409_v52, %v2408_v48  ;;  %v2576_v48 = vld [vmem:[#allocation5 + $0x230] sm:$0xff] }
 0x3a2   : > { %8300 = vmatmul.mubr.msk.f32.vlgmr.msra.gmra.mrb[0].mxu0 %vm520_vm0, %v3348_v36  ;;  %9039 = vmatprep.subr.bf16.mxu0 %v10211_v4  ;;  %v8923_v36 = vpack.c.bf16 %v2322_v12, %v2321_v0  ;;  %v9055_v38 = vpack.c.bf16 %v3516_v46, %v3515_v19  ;;  %v3602_v0 = vld [vmem:[#allocation5 + $0x500] sm:$0x1]  ;;  %v2411_v19 = vld [vmem:[#allocation5 + $0x1e8] sm:$0xff] }
 0x3a3   : > { %9041 = vmatpush3.bf16.msra.mxu0 %v9040_v61  ;;  %8910 = vmatprep.subr.bf16.mxu1 %v10211_v4  ;;  %v5947_v61 = vmul.f32 %v9885_v39, %v9885_v39  ;;  %v6064_v10 = vadd.f32 %v6063_v51, %v6062_v26  ;;  %v2410_v12 = vld [vmem:[#allocation5 + $0x1e0] sm:$0xff]  ;;  %v3683_v51 = vld [vmem:[#allocation5 + $0x518] sm:$0xff] }
 0x3a4   : > { %9042 = vmatprep.subr.bf16.mxu0 %v10211_v4  ;;  %8316 = vmatprep.mubr.msk.f32.mxu0 %vm10213_vm2, %v10212_v31  ;;  %v11708_v46 = vld [vmem:[%s10488_s11 + $0x1e0] sm:$0xff] }
 0x3a5   : > { %8912 = vmatpush3.bf16.msra.mxu1 %v8911_v17  ;;  %v3596_v17 = vld [vmem:[#allocation5 + $0x4d0] sm:$0xff]  ;;  %v6065_v32 = vsel %vm520_vm0, %v5947_v61, 0.0  ;;  %v5952_v26 = vmul.f32 %v11708_v46, %v11708_v46  ;;  %v3603_v61 = vrot.slane %v11522_v11, 6 }
 0x3a6   : > { %8059 = vmatprep.subr.mxu1 %v10212_v31 }
 0x3a7   : > { %9044 = vmatpush3.bf16.msra.mxu0 %v9043_v57  ;;  %v3597_v57 = vld [vmem:[#allocation5 + $0x4d8] sm:$0xff] }
 0x3a8   : > { %9045 = vmatprep.subr.bf16.mxu0 %v10211_v4  ;;  %v9058_v49 = vpack.c.bf16 %v3597_v57, %v3596_v17  ;;  %v2491_v57 = vld [vmem:[#allocation5 + $0x1f8] sm:$0xff] }
 0x3a9   : > { %8060 = vmatpush3.msk.msra.mxu1 %vm1735_vm1, %v2157_v16  ;;  %v6066_v16 = vadd.f32 %v6065_v32, %v6064_v10  ;;  %v6075_v10 = vsel %vm520_vm0, %v5952_v26, 0.0  ;;  %v3686_v32 = vld [vmem:[#allocation5 + $0x530] sm:$0xff]  ;;  %v3851_v26 = vld [vmem:[#allocation5 + $0x578] sm:$0xff] }
 0x3aa   : > { %8062 = vmatmul.mubr.msk.f32.vlgmr.msra.gmra.mrb[28].mxu1 %vm520_vm0, %v2158_v54  ;;  %8913 = vmatprep.subr.bf16.mxu1 %v10211_v4  ;;  %v9887_v54 = vld [vmem:[%s10488_s11 + $0x1c8] sm:$0xff] }
 0x3ab   : > { %8915 = vmatpush3.bf16.msra.mxu1 %v8914_v23  ;;  %9047 = vmatpush3.bf16.msra.mxu0 %v9046_v43  ;;  %v3518_v23 = vrot.slane %v11522_v11, 5  ;;  %v3598_v43 = vld [vmem:[#allocation5 + $0x4e0] sm:$0xff]  ;;  %v5949_v53 = vmul.f32 %v9887_v54, %v9887_v54  ;;  %v6068_v9 = vadd.f32 %v6067_v15, %v6066_v16  ;;  %v8941_v16 = vpack.c.bf16 %v2492_v45, %v2491_v57  ;;  %v3767_v15 = vld [vmem:[#allocation5 + $0x548] sm:$0xff] }
 0x3ac   : > { %8916 = vmatprep.subr.bf16.mxu1 %v10211_v4  ;;  %8314 = vmatprep.subr.mxu0 %v10212_v31  ;;  %v9061_v42 = vpack.c.bf16 %v3599_v37, %v3598_v43  ;;  %v2493_v43 = vld [vmem:[#allocation5 + $0x208] sm:$0xff]  ;;  %v2494_v37 = vld [vmem:[#allocation5 + $0x210] sm:$0xff] }
 0x3ad   : > { %8078 = vmatprep.mubr.msk.f32.mxu1 %vm10213_vm2, %v10212_v31  ;;  %v6069_v59 = vsel %vm520_vm0, %v5949_v53, 0.0  ;;  %v3766_v53 = vld [vmem:[#allocation5 + $0x540] sm:$0xff] }
 0x3af   : > { %8918 = vmatpush3.bf16.msra.mxu1 %v8917_v7  ;;  %8315 = vmatpush3.msk.msra.mxu0 %vm1735_vm1, %v3432_v6  ;;  %v3600_v7 = vld [vmem:[#allocation5 + $0x4f0] sm:$0xff] }
 0x3b0   : > { %8317 = vmatmul.mubr.msk.f32.vlgmr.msra.gmra.mrb[0].mxu0 %vm520_vm0, %v3433_v56  ;;  %9048 = vmatprep.subr.bf16.mxu0 %v10211_v4  ;;  %v9888_v6 = vld [vmem:[%s10488_s11 + $0x1d0] sm:$0xff]  ;;  %v9064_v20 = vpack.c.bf16 %v3601_v14, %v3600_v7  ;;  %v2328_v56 = vrot.slane %v11506_v41, 7  ;;  %v2495_v7 = vld [vmem:[#allocation5 + $0x218] sm:$0xff]  ;;  %v2496_v14 = vld [vmem:[#allocation5 + $0x220] sm:$0xff] }
 0x3b1   : > { %9050 = vmatpush3.bf16.msra.mxu0 %v9049_v24  ;;  %8919 = vmatprep.subr.bf16.mxu1 %v10211_v4  ;;  %v5950_v28 = vmul.f32 %v9888_v6, %v9888_v6  ;;  %v6070_v24 = vadd.f32 %v6069_v59, %v6068_v9  ;;  %v3682_v41 = vld [vmem:[#allocation5 + $0x510] sm:$0xff]  ;;  %v8944_v9 = vpack.c.bf16 %v2494_v37, %v2493_v43  ;;  %v3688_v59 = vrot.slane %v11522_v11, 7  ;;  %v2577_v11 = vld [vmem:[#allocation5 + $0x238] sm:$0xff] }
 0x3b2   : > { %9051 = vmatprep.subr.bf16.mxu0 %v10211_v4  ;;  %8333 = vmatprep.mubr.msk.f32.mxu0 %vm10213_vm2, %v10212_v31  ;;  %v9067_v39 = vpack.c.bf16 %v3682_v41, %v3681_v44  ;;  %v9076_v6 = vpack.c.bf16 %v3767_v15, %v3766_v53  ;;  %v2497_v44 = vld [vmem:[#allocation5 + $0x228] sm:$0x1]  ;;  %v8950_v41 = vpack.c.bf16 %v2577_v11, %v2576_v48  ;;  %v2583_v43 = vrot.slane %v11515_v30, 2  ;;  %v2663_v37 = vld [vmem:[#allocation5 + $0x278] sm:$0xff]  ;;  %v3936_v15 = vld [vmem:[#allocation5 + $0x5b0] sm:$0xff] }
 0x3b3   : > { %8921 = vmatpush3.bf16.msra.mxu1 %v8920_v25  ;;  %v11697_v25 = vld [vmem:[%s10488_s11 + $0x1d8] sm:$0xff]  ;;  %v6071_v63 = vsel %vm520_vm0, %v5950_v28, 0.0  ;;  %v3940_v48 = vld [vmem:[#allocation5 + $0x5d0] sm:$0xff] }
 0x3b4   : > { %8076 = vmatprep.subr.mxu1 %v10212_v31  ;;  %v5951_v58 = vmul.f32 %v11697_v25, %v11697_v25  ;;  %v2667_v11 = vld [vmem:[#allocation5 + $0x298] sm:$0x1] }
 0x3b5   : > { %9053 = vmatpush3.bf16.msra.mxu0 %v9052_v27  ;;  %v6072_v27 = vadd.f32 %v6071_v63, %v6070_v24  ;;  %v8947_v24 = vpack.c.bf16 %v2496_v14, %v2495_v7  ;;  %v3771_v63 = vld [vmem:[#allocation5 + $0x568] sm:$0xff]  ;;  %v2666_v7 = vld [vmem:[#allocation5 + $0x290] sm:$0xff] }
 0x3b6   : > { %9054 = vmatprep.subr.bf16.mxu0 %v10211_v4 }
 0x3b7   : > { %8077 = vmatpush3.msk.msra.mxu1 %vm1735_vm1, %v2242_v62  ;;  %v6073_v62 = vsel %vm520_vm0, %v5951_v58, 0.0  ;;  %v3770_v58 = vld [vmem:[#allocation5 + $0x560] sm:$0xff] }
 0x3b8   : > { %8079 = vmatmul.mubr.msk.f32.vlgmr.msra.gmra.mrb[28].mxu1 %vm520_vm0, %v2243_v29  ;;  %8922 = vmatprep.subr.bf16.mxu1 %v10211_v4  ;;  %v6074_v29 = vadd.f32 %v6073_v62, %v6072_v27  ;;  %v3852_v62 = vld [vmem:[#allocation5 + $0x580] sm:$0xff] }
 0x3b9   : > { %8924 = vmatpush3.bf16.msra.mxu1 %v8923_v36  ;;  %9056 = vmatpush3.bf16.msra.mxu0 %v9055_v38  ;;  %v3684_v36 = vld [vmem:[#allocation5 + $0x520] sm:$0xff]  ;;  %v8938_v38 = vpack.c.bf16 %v2411_v19, %v2410_v12  ;;  %v2579_v19 = vld [vmem:[#allocation5 + $0x248] sm:$0xff] }
 0x3ba   : > { %8925 = vmatprep.subr.bf16.mxu1 %v10211_v4  ;;  %8331 = vmatprep.subr.mxu0 %v10212_v31  ;;  %v9070_v17 = vpack.c.bf16 %v3684_v36, %v3683_v51  ;;  %v2578_v12 = vld [vmem:[#allocation5 + $0x240] sm:$0xff]  ;;  %v3772_v51 = vld [vmem:[#allocation5 + $0x570] sm:$0x1] }
 0x3bb   : > { %8095 = vmatprep.mubr.msk.f32.mxu1 %vm10213_vm2, %v10212_v31  ;;  %v2580_v36 = vld [vmem:[#allocation5 + $0x250] sm:$0xff] }
 0x3bd   : > { %8927 = vmatpush3.bf16.msra.mxu1 %v8926_v2  ;;  %8332 = vmatpush3.msk.msra.mxu0 %vm1735_vm1, %v3517_v40  ;;  %v6076_v2 = vadd.f32 %v6075_v10, %v6074_v29  ;;  %v2412_v40 = vld [vmem:[#allocation5 + $0x1f0] sm:$0x1]  ;;  %v9085_v29 = vpack.c.bf16 %v3852_v62, %v3851_v26  ;;  %v2750_v26 = vld [vmem:[#allocation5 + $0x2c0] sm:$0xff]  ;;  %v2751_v62 = vld [vmem:[#allocation5 + $0x2c8] sm:$0xff] }
 0x3be   : > { %8334 = vmatmul.mubr.msk.f32.vlgmr.msra.gmra.mrb[0].mxu0 %vm520_vm0, %v3518_v23  ;;  %9057 = vmatprep.subr.bf16.mxu0 %v10211_v4  ;;  %v9073_v23 = vpack.c.bf16 %v3686_v32, %v3685_v60  ;;  %v3854_v10 = vld [vmem:[#allocation5 + $0x590] sm:$0xff]  ;;  %v2661_v60 = vld [vmem:[#allocation5 + $0x268] sm:$0xff] }
 0x3bf   : > { %9059 = vmatpush3.bf16.msra.mxu0 %v9058_v49  ;;  %8928 = vmatprep.subr.bf16.mxu1 %v10211_v4  ;;  %v6077_v49 = vsel %vm520_vm0, %v5953_v33, 0.0  ;;  %v3853_v33 = vld [vmem:[#allocation5 + $0x588] sm:$0xff]  ;;  %v2662_v32 = vld [vmem:[#allocation5 + $0x270] sm:$0xff] }
 0x3c0   : > { %9060 = vmatprep.subr.bf16.mxu0 %v10211_v4  ;;  %8350 = vmatprep.mubr.msk.f32.mxu0 %vm10213_vm2, %v10212_v31  ;;  %v6078_v54 = vadd.f32 %v6077_v49, %v6076_v2  ;;  %v9088_v45 = vpack.c.bf16 %v3854_v10, %v3853_v33  ;;  %v3855_v2 = vld [vmem:[#allocation5 + $0x598] sm:$0xff]  ;;  %v2582_v49 = vld [vmem:[#allocation5 + $0x260] sm:$0x1] }
 0x3c1   : > { %8930 = vmatpush3.bf16.msra.mxu1 %v8929_v1  ;;  %v11742_v1 = vld [vmem:[%s10488_s11 + $0x1f8] sm:$0xff] }
 0x3c2   : > { %8093 = vmatprep.subr.mxu1 %v10212_v31  ;;  %v6080_v28 = vadd.f32 %v6079_v3, %v6078_v54  ;;  %v2664_v54 = vld [vmem:[#allocation5 + $0x280] sm:$0xff] }
 0x3c3   : > { %9062 = vmatpush3.bf16.msra.mxu0 %v9061_v42  ;;  %v5955_v42 = vmul.f32 %v11742_v1, %v11742_v1  ;;  %v8962_v3 = vpack.c.bf16 %v2664_v54, %v2663_v37  ;;  %v4106_v54 = vld [vmem:[#allocation5 + $0x620] sm:$0xff] }
 0x3c4   : > { %9063 = vmatprep.subr.bf16.mxu0 %v10211_v4 }
 0x3c5   : > { %8094 = vmatpush3.msk.msra.mxu1 %vm1735_vm1, %v2327_v35  ;;  %v3768_v35 = vld [vmem:[#allocation5 + $0x550] sm:$0xff] }
 0x3c6   : > { %8096 = vmatmul.mubr.msk.f32.vlgmr.msra.gmra.mrb[28].mxu1 %vm520_vm0, %v2328_v56  ;;  %8931 = vmatprep.subr.bf16.mxu1 %v10211_v4 }
 0x3c7   : > { %8933 = vmatpush3.bf16.msra.mxu1 %v8932_v47  ;;  %9065 = vmatpush3.bf16.msra.mxu0 %v9064_v20  ;;  %v3769_v47 = vld [vmem:[#allocation5 + $0x558] sm:$0xff]  ;;  %v6081_v20 = vsel %vm520_vm0, %v5955_v42, 0.0 }
 0x3c8   : > { %8934 = vmatprep.subr.bf16.mxu1 %v10211_v4  ;;  %8348 = vmatprep.subr.mxu0 %v10212_v31  ;;  %v9079_v56 = vpack.c.bf16 %v3769_v47, %v3768_v35  ;;  %v6082_v52 = vadd.f32 %v6081_v20, %v6080_v28  ;;  %v3937_v42 = vld [vmem:[#allocation5 + $0x5b8] sm:$0xff]  ;;  %v3858_v28 = vrot.slane %v11532_v13, 1  ;;  %v3939_v35 = vld [vmem:[#allocation5 + $0x5c8] sm:$0xff] }
 0x3c9   : > { %8112 = vmatprep.mubr.msk.f32.mxu1 %vm10213_vm2, %v10212_v31  ;;  %v9094_v14 = vpack.c.bf16 %v3937_v42, %v3936_v15  ;;  %v4027_v42 = vld [vmem:[#allocation5 + $0x618] sm:$0x1] }
 0x3ca   : > { %v6083_v27 = vrot.slane %v6082_v52, 4 }
 0x3cb   : > { %8936 = vmatpush3.bf16.msra.mxu1 %v8935_v21  ;;  %8349 = vmatpush3.msk.msra.mxu0 %vm1735_vm1, %v3602_v0  ;;  %v9082_v21 = vpack.c.bf16 %v3771_v63, %v3770_v58  ;;  %v2498_v0 = vrot.slane %v11515_v30, 1 }
 0x3cc   : > { %8351 = vmatmul.mubr.msk.f32.vlgmr.msra.gmra.mrb[0].mxu0 %vm520_vm0, %v3603_v61  ;;  %9066 = vmatprep.subr.bf16.mxu0 %v10211_v4  ;;  %v6084_v61 = vadd.f32 %v6083_v27, %v6082_v52  ;;  %v3941_v52 = vld [vmem:[#allocation5 + $0x5d8] sm:$0xff]  ;;  %v4021_v27 = vld [vmem:[#allocation5 + $0x5e8] sm:$0xff] }
 0x3cd   : > { %9068 = vmatpush3.bf16.msra.mxu0 %v9067_v39  ;;  %8937 = vmatprep.subr.bf16.mxu1 %v10211_v4  ;;  %v8953_v39 = vpack.c.bf16 %v2579_v19, %v2578_v12  ;;  %v9100_v63 = vpack.c.bf16 %v3941_v52, %v3940_v48  ;;  %v3942_v19 = vld [vmem:[#allocation5 + $0x5e0] sm:$0x1]  ;;  %v2837_v48 = vld [vmem:[#allocation5 + $0x308] sm:$0x1] }
 0x3ce   : > { %9069 = vmatprep.subr.bf16.mxu0 %v10211_v4  ;;  %8367 = vmatprep.mubr.msk.f32.mxu0 %vm10213_vm2, %v10212_v31  ;;  %v6085_v57 = vrot.slane %v6084_v61, 2 }
 0x3cf   : > { %8939 = vmatpush3.bf16.msra.mxu1 %v8938_v38  ;;  %v2581_v38 = vld [vmem:[#allocation5 + $0x258] sm:$0xff] }
 0x3d0   : > { %8110 = vmatprep.subr.mxu1 %v10212_v31  ;;  %v6086_v55 = vadd.f32 %v6085_v57, %v6084_v61  ;;  %v2832_v57 = vld [vmem:[#allocation5 + $0x2e0] sm:$0xff] }
 0x3d1   : > { %9071 = vmatpush3.bf16.msra.mxu0 %v9070_v17  ;;  %v8956_v17 = vpack.c.bf16 %v2581_v38, %v2580_v36  ;;  %v4023_v36 = vld [vmem:[#allocation5 + $0x5f8] sm:$0xff]  ;;  %v4024_v38 = vld [vmem:[#allocation5 + $0x600] sm:$0xff] }
 0x3d2   : > { %9072 = vmatprep.subr.bf16.mxu0 %v10211_v4  ;;  %v6087_v53 = vrot.slane %v6086_v55, 1  ;;  %v9106_v10 = vpack.c.bf16 %v4024_v38, %v4023_v36  ;;  %v9894_v38 = vld [vmem:[%s10488_s11 + $0x80] sm:$0xff] }
 0x3d3   : > { %8111 = vmatpush3.msk.msra.mxu1 %vm1735_vm1, %v2412_v40  ;;  %v3856_v40 = vld [vmem:[#allocation5 + $0x5a0] sm:$0xff] }
 0x3d4   : > { %8113 = vmatmul.mubr.msk.f32.vlgmr.msra.gmra.mrb[28].mxu1 %vm520_vm0, %v11515_v30  ;;  %8940 = vmatprep.subr.bf16.mxu1 %v10211_v4 }
 0x3d5   : > { %8942 = vmatpush3.bf16.msra.mxu1 %v8941_v16  ;;  %9074 = vmatpush3.bf16.msra.mxu0 %v9073_v23  ;;  %v8959_v16 = vpack.c.bf16 %v2662_v32, %v2661_v60  ;;  %v9091_v23 = vpack.c.bf16 %v3856_v40, %v3855_v2  ;;  %v4026_v60 = vld [vmem:[#allocation5 + $0x610] sm:$0xff] }
 0x3d6   : > { %8943 = vmatprep.subr.bf16.mxu1 %v10211_v4  ;;  %8365 = vmatprep.subr.mxu0 %v10212_v31  ;;  %v2752_v2 = vld [vmem:[#allocation5 + $0x2d0] sm:$0x1] }
 0x3d7   : > { %8129 = vmatprep.mubr.msk.f32.mxu1 %vm10213_vm2, %v10212_v31 }
 0x3d9   : > { %8945 = vmatpush3.bf16.msra.mxu1 %v8944_v9  ;;  %8366 = vmatpush3.msk.msra.mxu0 %vm1735_vm1, %v3687_v22  ;;  %v3857_v9 = vld [vmem:[#allocation5 + $0x5a8] sm:$0x1] }
 0x3da   : > { %8368 = vmatmul.mubr.msk.f32.vlgmr.msra.gmra.mrb[0].mxu0 %vm520_vm0, %v3688_v59  ;;  %9075 = vmatprep.subr.bf16.mxu0 %v10211_v4  ;;  %v2665_v22 = vld [vmem:[#allocation5 + $0x288] sm:$0xff]  ;;  %v3938_v59 = vld [vmem:[#allocation5 + $0x5c0] sm:$0xff] }
 0x3db   : > { %9077 = vmatpush3.bf16.msra.mxu0 %v9076_v6  ;;  %8946 = vmatprep.subr.bf16.mxu1 %v10211_v4  ;;  %v11788_v6 = vadd.f32 %v6087_v53, %v6086_v55  ;;  %v8965_v47 = vpack.c.bf16 %v2666_v7, %v2665_v22  ;;  %v9097_v20 = vpack.c.bf16 %v3939_v35, %v3938_v59  ;;  %v4107_v53 = vld [vmem:[#allocation5 + $0x628] sm:$0xff] }
 0x3dc   : > { %9078 = vmatprep.subr.bf16.mxu0 %v10211_v4  ;;  %8384 = vmatprep.mubr.msk.f32.mxu0 %vm10213_vm2, %v10212_v31  ;;  %v9112_v7 = vpack.c.bf16 %v4107_v53, %v4106_v54  ;;  %v9900_v54 = vld [vmem:[%s10488_s11 + $0x10] sm:$0xff] }
 0x3dd   : > { %8948 = vmatpush3.bf16.msra.mxu1 %v8947_v24  ;;  %v2746_v24 = vld [vmem:[#allocation5 + $0x2a0] sm:$0xff]  ;;  %9800 = vrsqrt.f32 %v11788_v6  ;;  %vm6091_vm3 = vcmp.eq.f32.partialorder %v11788_v6, inf  ;;  %v6094_v32 = vand.u32 2147483648, %v11788_v6  ;;  %vm6093_vm4 = vcmp.eq.f32.partialorder %v11788_v6, 0.0 }
 0x3de   : > { %8127 = vmatprep.subr.mxu1 %v10212_v31 }
 0x3df   : > { %9080 = vmatpush3.bf16.msra.mxu0 %v9079_v56  ;;  %v2747_v56 = vld [vmem:[#allocation5 + $0x2a8] sm:$0xff] }
 0x3e0   : > { %9081 = vmatprep.subr.bf16.mxu0 %v10211_v4  ;;  %v8968_v58 = vpack.c.bf16 %v2747_v56, %v2746_v24  ;;  %v4110_v24 = vld [vmem:[#allocation5 + $0x640] sm:$0xff]  ;;  %v4111_v56 = vld [vmem:[#allocation5 + $0x648] sm:$0xff] }
 0x3e1   : > { %8128 = vmatpush3.msk.msra.mxu1 %vm1735_vm1, %v2497_v44  ;;  %v2668_v44 = vrot.slane %v11515_v30, 3 }
 0x3e2   : > { %8130 = vmatmul.mubr.msk.f32.vlgmr.msra.gmra.mrb[28].mxu1 %vm520_vm0, %v2498_v0  ;;  %8949 = vmatprep.subr.bf16.mxu1 %v10211_v4  ;;  %v4022_v0 = vld [vmem:[#allocation5 + $0x5f0] sm:$0xff] }
 0x3e3   : > { %8951 = vmatpush3.bf16.msra.mxu1 %v8950_v41  ;;  %9083 = vmatpush3.bf16.msra.mxu0 %v9082_v21  ;;  %v2748_v41 = vld [vmem:[#allocation5 + $0x2b0] sm:$0xff]  ;;  %v2749_v21 = vld [vmem:[#allocation5 + $0x2b8] sm:$0xff] }
 0x3e4   : > { %8952 = vmatprep.subr.bf16.mxu1 %v10211_v4  ;;  %8382 = vmatprep.subr.mxu0 %v10212_v31  ;;  %v8971_v12 = vpack.c.bf16 %v2749_v21, %v2748_v41  ;;  %v4191_v41 = vld [vmem:[#allocation5 + $0x658] sm:$0xff]  ;;  %v4192_v21 = vld [vmem:[#allocation5 + $0x660] sm:$0xff] }
 0x3e5   : > { %8146 = vmatprep.mubr.msk.f32.mxu1 %vm10213_vm2, %v10212_v31 }
 0x3e7   : > { %8954 = vmatpush3.bf16.msra.mxu1 %v8953_v39  ;;  %8383 = vmatpush3.msk.msra.mxu0 %vm1735_vm1, %v3772_v51  ;;  %v9103_v39 = vpack.c.bf16 %v4022_v0, %v4021_v27  ;;  %v9801_v61 = vpop.eup %9800  ;;  %v3943_v51 = vrot.slane %v11532_v13, 2  ;;  %v4112_v0 = vld [vmem:[#allocation5 + $0x650] sm:$0x1] }
 0x3e8   : > { %8385 = vmatmul.mubr.msk.f32.vlgmr.msra.gmra.mrb[0].mxu0 %vm520_vm0, %v11532_v13  ;;  %9084 = vmatprep.subr.bf16.mxu0 %v10211_v4  ;;  %v6090_v33 = vmul.f32 %v9801_v61, %v11788_v6  ;;  %v4193_v61 = vld [vmem:[#allocation5 + $0x668] sm:$0xff] }
 0x3e9   : > { %9086 = vmatpush3.bf16.msra.mxu0 %v9085_v29  ;;  %8955 = vmatprep.subr.bf16.mxu1 %v10211_v4  ;;  %v8974_v29 = vpack.c.bf16 %v2751_v62, %v2750_v26  ;;  %v9121_v62 = vpack.c.bf16 %v4192_v21, %v4191_v41 }
 0x3ea   : > { %9087 = vmatprep.subr.bf16.mxu0 %v10211_v4  ;;  %8401 = vmatprep.mubr.msk.f32.mxu0 %vm10213_vm2, %v10212_v31  ;;  %v6092_v40 = vsel %vm6091_vm3, %v11788_v6, %v6090_v33  ;;  %v4108_v6 = vld [vmem:[#allocation5 + $0x630] sm:$0xff]  ;;  %v9895_v33 = vld [vmem:[%s10488_s11 + $0x88] sm:$0xff] }
 0x3eb   : > { %8957 = vmatpush3.bf16.msra.mxu1 %v8956_v17  ;;  %v2831_v17 = vld [vmem:[#allocation5 + $0x2d8] sm:$0xff]  ;;  %v6095_v37 = vsel %vm6093_vm4, %v6094_v32, %v6092_v40  ;;  %v4196_v40 = vld [vmem:[#allocation5 + $0x680] sm:$0xff] }
 0x3ec   : > { %8144 = vmatprep.subr.mxu1 %v10212_v31  ;;  %v8977_v55 = vpack.c.bf16 %v2832_v57, %v2831_v17  ;;  %v6096_v22 = vmax.f32 %v6095_v37, 1e-12  ;;  %v9896_v17 = vld [vmem:[%s10488_s11] sm:$0xff] }
 0x3ed   : > { %9089 = vmatpush3.bf16.msra.mxu0 %v9088_v45  ;;  %v4025_v45 = vld [vmem:[#allocation5 + $0x608] sm:$0xff] }
 0x3ee   : > { %9090 = vmatprep.subr.bf16.mxu0 %v10211_v4  ;;  %9802 = vrcp.f32 %v6096_v22  ;;  %v2923_v22 = vrot.slane %v11515_v30, 6 }
 0x3ef   : > { %8145 = vmatpush3.msk.msra.mxu1 %vm1735_vm1, %v2582_v49  ;;  %v9109_v49 = vpack.c.bf16 %v4026_v60, %v4025_v45  ;;  %v9897_v45 = vld [vmem:[%s10488_s11 + $0x8] sm:$0xff] }
 0x3f0   : > { %8147 = vmatmul.mubr.msk.f32.vlgmr.msra.gmra.mrb[28].mxu1 %vm520_vm0, %v2583_v43  ;;  %8958 = vmatprep.subr.bf16.mxu1 %v10211_v4  ;;  %v2834_v43 = vld [vmem:[#allocation5 + $0x2f0] sm:$0xff] }
 0x3f1   : > { %8960 = vmatpush3.bf16.msra.mxu1 %v8959_v16  ;;  %9092 = vmatpush3.bf16.msra.mxu0 %v9091_v23  ;;  %v2753_v16 = vrot.slane %v11515_v30, 4  ;;  %v2833_v23 = vld [vmem:[#allocation5 + $0x2e8] sm:$0xff] }
 0x3f2   : > { %8961 = vmatprep.subr.bf16.mxu1 %v10211_v4  ;;  %8399 = vmatprep.subr.mxu0 %v10212_v31  ;;  %v8980_v15 = vpack.c.bf16 %v2834_v43, %v2833_v23  ;;  %v2922_v43 = vld [vmem:[#allocation5 + $0x340] sm:$0x1] }
 0x3f3   : > { %8163 = vmatprep.mubr.msk.f32.mxu1 %vm10213_vm2, %v10212_v31 }
 0x3f5   : > { %8963 = vmatpush3.bf16.msra.mxu1 %v8962_v3  ;;  %8400 = vmatpush3.msk.msra.mxu0 %vm1735_vm1, %v3857_v9  ;;  %v2835_v3 = vld [vmem:[#allocation5 + $0x2f8] sm:$0xff]  ;;  %v2836_v9 = vld [vmem:[#allocation5 + $0x300] sm:$0xff] }
 0x3f6   : > { %8402 = vmatmul.mubr.msk.f32.vlgmr.msra.gmra.mrb[0].mxu0 %vm520_vm0, %v3858_v28  ;;  %9093 = vmatprep.subr.bf16.mxu0 %v10211_v4  ;;  %v4109_v28 = vld [vmem:[#allocation5 + $0x638] sm:$0xff]  ;;  %v8983_v59 = vpack.c.bf16 %v2836_v9, %v2835_v3 }
 0x3f7   : > { %9095 = vmatpush3.bf16.msra.mxu0 %v9094_v14  ;;  %8964 = vmatprep.subr.bf16.mxu1 %v10211_v4  ;;  %v4028_v14 = vrot.slane %v11532_v13, 3  ;;  %v9115_v35 = vpack.c.bf16 %v4109_v28, %v4108_v6  ;;  %v4277_v6 = vld [vmem:[#allocation5 + $0x698] sm:$0xff]  ;;  %v9902_v28 = vld [vmem:[%s10488_s11 + $0xa0] sm:$0xff] }
 0x3f8   : > { %9096 = vmatprep.subr.bf16.mxu0 %v10211_v4  ;;  %8418 = vmatprep.mubr.msk.f32.mxu0 %vm10213_vm2, %v10212_v31  ;;  %v11848_v26 = vpop.eup %9802 }
 0x3f9   : > { %8966 = vmatpush3.bf16.msra.mxu1 %v8965_v47  ;;  %v2916_v47 = vld [vmem:[#allocation5 + $0x310] sm:$0xff]  ;;  %v6098_v57 = vmul.f32 %v9896_v17, %v11848_v26  ;;  %v6099_v60 = vmul.f32 %v9897_v45, %v11848_v26  ;;  %v6100_v53 = vmul.f32 %v9900_v54, %v11848_v26  ;;  %v9915_v54 = vld [vmem:[%s10488_s11 + $0xd8] sm:$0xff] }
 0x3fa   : > { %8161 = vmatprep.subr.mxu1 %v10212_v31  ;;  %v4280_v45 = vld [vmem:[#allocation5 + $0x6b0] sm:$0xff] }
 0x3fb   : > { %9098 = vmatpush3.bf16.msra.mxu0 %v9097_v20  ;;  %v2917_v20 = vld [vmem:[#allocation5 + $0x318] sm:$0xff]  ;;  %v11879_v9 = vpack.c.bf16 %v6099_v60, %v6098_v57 }
 0x3fc   : > { %9099 = vmatprep.subr.bf16.mxu0 %v10211_v4  ;;  %v8986_v52 = vpack.c.bf16 %v2917_v20, %v2916_v47  ;;  %v6163_v47 = vld [vmem:[#allocation8 + $0x8] sm:$0xff]  ;;  %v4281_v60 = vld [vmem:[#allocation5 + $0x6b8] sm:$0xff] }
 0x3fd   : > { %8162 = vmatpush3.msk.msra.mxu1 %vm1735_vm1, %v2667_v11  ;;  %v9118_v11 = vpack.c.bf16 %v4111_v56, %v4110_v24  ;;  %v9904_v20 = vld [vmem:[%s10488_s11 + $0x20] sm:$0xff]  ;;  %v9905_v56 = vld [vmem:[%s10488_s11 + $0x28] sm:$0xff] }
 0x3fe   : > { %8164 = vmatmul.mubr.msk.f32.vlgmr.msra.gmra.mrb[28].mxu1 %vm520_vm0, %v2668_v44  ;;  %8967 = vmatprep.subr.bf16.mxu1 %v10211_v4  ;;  %v2919_v44 = vld [vmem:[#allocation5 + $0x328] sm:$0xff]  ;;  %v6102_v24 = vmul.f32 %v9904_v20, %v11848_v26 }
 0x3ff   : > { %8969 = vmatpush3.bf16.msra.mxu1 %v8968_v58  ;;  %9101 = vmatpush3.bf16.msra.mxu0 %v9100_v63  ;;  %v2838_v58 = vrot.slane %v11515_v30, 5  ;;  %v2918_v63 = vld [vmem:[#allocation5 + $0x320] sm:$0xff]  ;;  %v9919_v20 = vld [vmem:[%s10488_s11 + $0xe8] sm:$0xff] }
 0x400   : > { %8970 = vmatprep.subr.bf16.mxu1 %v10211_v4  ;;  %8416 = vmatprep.subr.mxu0 %v10212_v31  ;;  %v8989_v27 = vpack.c.bf16 %v2919_v44, %v2918_v63  ;;  %v9907_v44 = vld [vmem:[%s10488_s11 + $0xb8] sm:$0xff] }
 0x401   : > { %8180 = vmatprep.mubr.msk.f32.mxu1 %vm10213_vm2, %v10212_v31  ;;  %v6121_v41 = vmul.f32 %v9907_v44, %v11848_v26 }
 0x403   : > { %8972 = vmatpush3.bf16.msra.mxu1 %v8971_v12  ;;  %8417 = vmatpush3.msk.msra.mxu0 %vm1735_vm1, %v3942_v19  ;;  %v2920_v12 = vld [vmem:[#allocation5 + $0x330] sm:$0xff]  ;;  %v2921_v19 = vld [vmem:[#allocation5 + $0x338] sm:$0xff] }
 0x404   : > { %8419 = vmatmul.mubr.msk.f32.vlgmr.msra.gmra.mrb[0].mxu0 %vm520_vm0, %v3943_v51  ;;  %9102 = vmatprep.subr.bf16.mxu0 %v10211_v4  ;;  %v4194_v51 = vld [vmem:[#allocation5 + $0x670] sm:$0xff]  ;;  %v8992_v36 = vpack.c.bf16 %v2921_v19, %v2920_v12  ;;  %v4279_v12 = vld [vmem:[#allocation5 + $0x6a8] sm:$0xff] }
 0x405   : > { %9104 = vmatpush3.bf16.msra.mxu0 %v9103_v39  ;;  %8973 = vmatprep.subr.bf16.mxu1 %v10211_v4  ;;  %v4113_v39 = vrot.slane %v11532_v13, 4  ;;  %v9124_v32 = vpack.c.bf16 %v4194_v51, %v4193_v61  ;;  %v9909_v61 = vld [vmem:[%s10488_s11 + $0x38] sm:$0xff] }
 0x406   : > { %9105 = vmatprep.subr.bf16.mxu0 %v10211_v4  ;;  %8435 = vmatprep.mubr.msk.f32.mxu0 %vm10213_vm2, %v10212_v31  ;;  %v6105_v51 = vmul.f32 %v9909_v61, %v11848_v26  ;;  %v9923_v61 = vld [vmem:[%s10488_s11 + $0xf8] sm:$0xff] }
 0x407   : > { %8975 = vmatpush3.bf16.msra.mxu1 %v8974_v29  ;;  %v6114_v29 = vmul.f32 %v9894_v38, %v11848_v26 }
 0x408   : > { %8178 = vmatprep.subr.mxu1 %v10212_v31 }
 0x409   : > { %9107 = vmatpush3.bf16.msra.mxu0 %v9106_v10  ;;  %v6115_v10 = vmul.f32 %v9895_v33, %v11848_v26 }
 0x40a   : > { %9108 = vmatprep.subr.bf16.mxu0 %v10211_v4 }
 0x40b   : > { %8179 = vmatpush3.msk.msra.mxu1 %vm1735_vm1, %v2752_v2  ;;  %v4195_v2 = vld [vmem:[#allocation5 + $0x678] sm:$0xff]  ;;  %v11873_v37 = vpack.c.bf16 %v6115_v10, %v6114_v29  ;;  %v9910_v29 = vld [vmem:[%s10488_s11 + $0xc0] sm:$0xff]  ;;  %v9911_v10 = vld [vmem:[%s10488_s11 + $0xc8] sm:$0xff] }
 0x40c   : > { %8181 = vmatmul.mubr.msk.f32.vlgmr.msra.gmra.mrb[28].mxu1 %vm520_vm0, %v2753_v16  ;;  %8976 = vmatprep.subr.bf16.mxu1 %v10211_v4  ;;  %v9899_v16 = vld [vmem:[%s10488_s11 + $0x98] sm:$0xff]  ;;  %v9127_v3 = vpack.c.bf16 %v4196_v40, %v4195_v2  ;;  %v6122_v33 = vmul.f32 %v9910_v29, %v11848_v26  ;;  %v6123_v17 = vmul.f32 %v9911_v10, %v11848_v26  ;;  %v9913_v40 = vld [vmem:[%s10488_s11 + $0x48] sm:$0xff] }
 0x40d   : > { %8978 = vmatpush3.bf16.msra.mxu1 %v8977_v55  ;;  %9110 = vmatpush3.bf16.msra.mxu0 %v9109_v49  ;;  %v9898_v55 = vld [vmem:[%s10488_s11 + $0x90] sm:$0xff]  ;;  %v6117_v23 = vmul.f32 %v9899_v16, %v11848_v26 }
 0x40e   : > { %8979 = vmatprep.subr.bf16.mxu1 %v10211_v4  ;;  %8433 = vmatprep.subr.mxu0 %v10212_v31  ;;  %v6116_v49 = vmul.f32 %v9898_v55, %v11848_v26  ;;  %v6107_v55 = vmul.f32 %v9913_v40, %v11848_v26  ;;  %v11936_v16 = vpack.c.bf16 %v6123_v17, %v6122_v33  ;;  %v9924_v33 = vld [vmem:[%s10488_s11 + $0x70] sm:$0xff]  ;;  %v9925_v17 = vld [vmem:[%s10488_s11 + $0x78] sm:$0xff]  ;;  %v9926_v40 = vld [vmem:[%s10488_s11 + $0x180] sm:$0xff] }
 0x40f   : > { %8197 = vmatprep.mubr.msk.f32.mxu1 %vm10213_vm2, %v10212_v31  ;;  %v6112_v10 = vmul.f32 %v9924_v33, %v11848_v26  ;;  %v9935_v33 = vld [vmem:[%s10488_s11 + $0x1a8] sm:$0xff] }
 0x411   : > { %8981 = vmatpush3.bf16.msra.mxu1 %v8980_v15  ;;  %8434 = vmatpush3.msk.msra.mxu0 %vm1735_vm1, %v4027_v42  ;;  %v9901_v15 = vld [vmem:[%s10488_s11 + $0x18] sm:$0xff] }
 0x412   : > { %8436 = vmatmul.mubr.msk.f32.vlgmr.msra.gmra.mrb[0].mxu0 %vm520_vm0, %v4028_v14  ;;  %9111 = vmatprep.subr.bf16.mxu0 %v10211_v4  ;;  %v6101_v42 = vmul.f32 %v9901_v15, %v11848_v26  ;;  %v4276_v14 = vld [vmem:[#allocation5 + $0x690] sm:$0xff]  ;;  %v9136_v15 = vpack.c.bf16 %v4281_v60, %v4280_v45  ;;  %v4365_v45 = vld [vmem:[#allocation5 + $0x6e8] sm:$0xff] }
 0x413   : > { %9113 = vmatpush3.bf16.msra.mxu0 %v9112_v7  ;;  %8982 = vmatprep.subr.bf16.mxu1 %v10211_v4  ;;  %v11883_v7 = vpack.c.bf16 %v6117_v23, %v6116_v49  ;;  %v9130_v21 = vpack.c.bf16 %v4277_v6, %v4276_v14  ;;  %v9914_v23 = vld [vmem:[%s10488_s11 + $0xd0] sm:$0xff]  ;;  %v9917_v14 = vld [vmem:[%s10488_s11 + $0x58] sm:$0xff] }
 0x414   : > { %9114 = vmatprep.subr.bf16.mxu0 %v10211_v4  ;;  %8452 = vmatprep.mubr.msk.f32.mxu0 %vm10213_vm2, %v10212_v31  ;;  %v6109_v6 = vmul.f32 %v9917_v14, %v11848_v26  ;;  %v4366_v60 = vld [vmem:[#allocation5 + $0x6f0] sm:$0xff]  ;;  %v9929_v14 = vld [vmem:[%s10488_s11 + $0x108] sm:$0xff] }
 0x415   : > { %8984 = vmatpush3.bf16.msra.mxu1 %v8983_v59  ;;  %v6118_v59 = vmul.f32 %v9902_v28, %v11848_v26  ;;  %v4361_v28 = vld [vmem:[#allocation5 + $0x6c8] sm:$0xff] }
 0x416   : > { %8195 = vmatprep.subr.mxu1 %v10212_v31 }
 0x417   : > { %9116 = vmatpush3.bf16.msra.mxu0 %v9115_v35  ;;  %v9903_v35 = vld [vmem:[%s10488_s11 + $0xa8] sm:$0xff] }
 0x418   : > { %9117 = vmatprep.subr.bf16.mxu0 %v10211_v4  ;;  %v6119_v30 = vmul.f32 %v9903_v35, %v11848_v26 }
 0x419   : > { %8196 = vmatpush3.msk.msra.mxu1 %vm1735_vm1, %v2837_v48  ;;  %v6103_v48 = vmul.f32 %v9905_v56, %v11848_v26  ;;  %v4282_v56 = vld [vmem:[#allocation5 + $0x6c0] sm:$0x1] }
 0x41a   : > { %8198 = vmatmul.mubr.msk.f32.vlgmr.msra.gmra.mrb[28].mxu1 %vm520_vm0, %v2838_v58  ;;  %8985 = vmatprep.subr.bf16.mxu1 %v10211_v4  ;;  %v9906_v58 = vld [vmem:[%s10488_s11 + $0xb0] sm:$0xff]  ;;  %v11906_v19 = vpack.c.bf16 %v6119_v30, %v6118_v59  ;;  %v9918_v30 = vld [vmem:[%s10488_s11 + $0xe0] sm:$0xff] }
 0x41b   : > { %8987 = vmatpush3.bf16.msra.mxu1 %v8986_v52  ;;  %9119 = vmatpush3.bf16.msra.mxu0 %v9118_v11  ;;  %v11897_v52 = vpack.c.bf16 %v6101_v42, %v6100_v53  ;;  %v4197_v11 = vld [vmem:[#allocation5 + $0x688] sm:$0x1]  ;;  %v6120_v63 = vmul.f32 %v9906_v58, %v11848_v26  ;;  %v6125_v53 = vmul.f32 %v9915_v54, %v11848_v26  ;;  %v4362_v59 = vld [vmem:[#allocation5 + $0x6d0] sm:$0xff] }
 0x41c   : > { %8988 = vmatprep.subr.bf16.mxu1 %v10211_v4  ;;  %8450 = vmatprep.subr.mxu0 %v10212_v31  ;;  %v9145_v54 = vpack.c.bf16 %v4366_v60, %v4365_v45  ;;  %v9936_v45 = vld [vmem:[%s10488_s11 + $0x120] sm:$0xff] }
 0x41d   : > { %8214 = vmatprep.mubr.msk.f32.mxu1 %vm10213_vm2, %v10212_v31  ;;  %v11918_v38 = vpack.c.bf16 %v6121_v41, %v6120_v63  ;;  %v9921_v63 = vld [vmem:[%s10488_s11 + $0x68] sm:$0xff]  ;;  %v4283_v41 = vrot.slane %v11532_v13, 6  ;;  %v6134_v60 = vmul.f32 %v9936_v45, %v11848_v26 }
 0x41e   : > { %v6111_v44 = vmul.f32 %v9921_v63, %v11848_v26  ;;  %v4533_v45 = vld [vmem:[#allocation5 + $0x748] sm:$0xff] }
 0x41f   : > { %8990 = vmatpush3.bf16.msra.mxu1 %v8989_v27  ;;  %8451 = vmatpush3.msk.msra.mxu0 %vm1735_vm1, %v4112_v0  ;;  %v4198_v27 = vrot.slane %v11532_v13, 5  ;;  %v4278_v0 = vld [vmem:[#allocation5 + $0x6a0] sm:$0xff] }
 0x420   : > { %8453 = vmatmul.mubr.msk.f32.vlgmr.msra.gmra.mrb[0].mxu0 %vm520_vm0, %v4113_v39  ;;  %9120 = vmatprep.subr.bf16.mxu0 %v10211_v4  ;;  %v9133_v57 = vpack.c.bf16 %v4279_v12, %v4278_v0 }
 0x421   : > { %9122 = vmatpush3.bf16.msra.mxu0 %v9121_v62  ;;  %8991 = vmatprep.subr.bf16.mxu1 %v10211_v4  ;;  %v9908_v62 = vld [vmem:[%s10488_s11 + $0x30] sm:$0xff] }
 0x422   : > { %9123 = vmatprep.subr.bf16.mxu0 %v10211_v4  ;;  %8469 = vmatprep.mubr.msk.f32.mxu0 %vm10213_vm2, %v10212_v31  ;;  %v6104_v39 = vmul.f32 %v9908_v62, %v11848_v26  ;;  %v9922_v62 = vld [vmem:[%s10488_s11 + $0xf0] sm:$0xff] }
 0x423   : > { %8993 = vmatpush3.bf16.msra.mxu1 %v8992_v36  ;;  %v11914_v36 = vpack.c.bf16 %v6103_v48, %v6102_v24  ;;  %v6127_v24 = vmul.f32 %v9919_v20, %v11848_v26  ;;  %v9139_v48 = vpack.c.bf16 %v4362_v59, %v4361_v28  ;;  %v4446_v28 = vld [vmem:[#allocation5 + $0x700] sm:$0xff]  ;;  %v4447_v59 = vld [vmem:[#allocation5 + $0x708] sm:$0xff]  ;;  %v9931_v20 = vld [vmem:[%s10488_s11 + $0x198] sm:$0xff] }
 0x424   : > { %8212 = vmatprep.subr.mxu1 %v10212_v31  ;;  %v11933_v49 = vpack.c.bf16 %v6105_v51, %v6104_v39  ;;  %v6128_v39 = vmul.f32 %v9922_v62, %v11848_v26  ;;  %v6129_v51 = vmul.f32 %v9923_v61, %v11848_v26  ;;  %v4449_v62 = vld [vmem:[#allocation5 + $0x718] sm:$0xff] }
 0x425   : > { %9125 = vmatpush3.bf16.msra.mxu0 %v9124_v32  ;;  %v9912_v32 = vld [vmem:[%s10488_s11 + $0x40] sm:$0xff] }
 0x426   : > { %9126 = vmatprep.subr.bf16.mxu0 %v10211_v4  ;;  %v6106_v2 = vmul.f32 %v9912_v32, %v11848_v26 }
 0x427   : > { %8213 = vmatpush3.msk.msra.mxu1 %vm1735_vm1, %v2922_v43  ;;  %v6124_v43 = vmul.f32 %v9914_v23, %v11848_v26  ;;  %v9927_v23 = vld [vmem:[%s10488_s11 + $0x188] sm:$0xff] }
 0x428   : > { %8215 = vmatmul.mubr.msk.f32.vlgmr.msra.gmra.mrb[28].mxu1 %vm520_vm0, %v2923_v22  ;;  %9301 = vmatprep.subr.bf16.mxu1 %v11873_v37  ;;  %v11944_v42 = vpack.c.bf16 %v6107_v55, %v6106_v2  ;;  %v11987_v2 = vpack.c.bf16 %v6129_v51, %v6128_v39  ;;  %v6146_v55 = vmul.f32 %v9926_v40, %v11848_v26  ;;  %v9934_v51 = vld [vmem:[%s10488_s11 + $0x1a0] sm:$0xff]  ;;  %v9937_v40 = vld [vmem:[%s10488_s11 + $0x128] sm:$0xff] }
 0x429   : > { %9128 = vmatpush3.bf16.msra.mxu0 %v9127_v3  ;;  %9303 = vmatpush3.bf16.msra.mxu1 %v11879_v9  ;;  %v9916_v3 = vld [vmem:[%s10488_s11 + $0x50] sm:$0xff]  ;;  %v11951_v35 = vpack.c.bf16 %v6125_v53, %v6124_v43  ;;  %v6147_v43 = vmul.f32 %v9927_v23, %v11848_v26  ;;  %v4450_v23 = vld [vmem:[#allocation5 + $0x720] sm:$0xff] }
 0x42a   : > { %8467 = vmatprep.subr.mxu0 %v10212_v31  ;;  %9305 = vmatprep.subr.bf16.mxu1 %v11883_v7  ;;  %v6108_v22 = vmul.f32 %v9916_v3, %v11848_v26  ;;  %v9928_v3 = vld [vmem:[%s10488_s11 + $0x100] sm:$0xff] }
 0x42b   : > { %6256 = vmatprep.mubr.f32.mxu1 %v6163_v47  ;;  %v6126_v47 = vmul.f32 %v9918_v30, %v11848_v26  ;;  %v9930_v30 = vld [vmem:[%s10488_s11 + $0x190] sm:$0xff] }
 0x42c   : > { %v11965_v0 = vpack.c.bf16 %v6109_v6, %v6108_v22  ;;  %v6130_v22 = vmul.f32 %v9928_v3, %v11848_v26  ;;  %v6131_v6 = vmul.f32 %v9929_v14, %v11848_v26  ;;  %v6171_v3 = vld [vmem:[#allocation8 + $0x48] sm:$0x7f]  ;;  %v9938_v14 = vld [vmem:[%s10488_s11 + $0x1b0] sm:$0xff] }
 0x42d   : > { %8468 = vmatpush3.msk.msra.mxu0 %vm1735_vm1, %v4197_v11  ;;  %9307 = vmatpush3.bf16.msra.mxu1 %v11897_v52  ;;  %v9920_v11 = vld [vmem:[%s10488_s11 + $0x60] sm:$0xff]  ;;  %v11968_v12 = vpack.c.bf16 %v6127_v24, %v6126_v47  ;;  %v6148_v47 = vmul.f32 %v9930_v30, %v11848_v26  ;;  %v6149_v24 = vmul.f32 %v9931_v20, %v11848_v26 }
 0x42e   : > { %8470 = vmatmul.mubr.msk.f32.vlgmr.msra.gmra.mrb[0].mxu0 %vm520_vm0, %v4198_v27  ;;  %9129 = vmatprep.subr.bf16.mxu0 %v10211_v4  ;;  %v6110_v58 = vmul.f32 %v9920_v11, %v11848_v26  ;;  %v4364_v27 = vld [vmem:[#allocation5 + $0x6e0] sm:$0xff]  ;;  %v9148_v11 = vpack.c.bf16 %v4447_v59, %v4446_v28  ;;  %v12016_v39 = vpack.c.bf16 %v6131_v6, %v6130_v22  ;;  %v9939_v28 = vld [vmem:[%s10488_s11 + $0x1b8] sm:$0xff] }
 0x42f   : > { %9131 = vmatpush3.bf16.msra.mxu0 %v9130_v21  ;;  %8486 = vmatprep.mubr.msk.f32.mxu0 %vm10213_vm2, %v10212_v31  ;;  %v4363_v21 = vld [vmem:[#allocation5 + $0x6d8] sm:$0xff]  ;;  %v12019_v61 = vpack.c.bf16 %v6149_v24, %v6148_v47  ;;  %v6152_v6 = vmul.f32 %v9938_v14, %v11848_v26  ;;  %v6153_v59 = vmul.f32 %v9939_v28, %v11848_v26 }
 0x430   : > { %9132 = vmatprep.subr.bf16.mxu0 %v10211_v4  ;;  %9309 = vmatprep.subr.bf16.mxu1 %v11906_v19  ;;  %v9142_v29 = vpack.c.bf16 %v4364_v27, %v4363_v21  ;;  %v11984_v32 = vpack.c.bf16 %v6111_v44, %v6110_v58  ;;  %v9932_v58 = vld [vmem:[%s10488_s11 + $0x110] sm:$0xff]  ;;  %v9933_v44 = vld [vmem:[%s10488_s11 + $0x118] sm:$0xff]  ;;  %v4368_v21 = vrot.slane %v11532_v13, 7  ;;  %v6167_v13 = vld [vmem:[#allocation8 + $0x28] sm:$0xff] }
 0x431   : > { %9311 = vmatpush3.bf16.msra.mxu1 %v11914_v36  ;;  %v6132_v63 = vmul.f32 %v9932_v58, %v11848_v26  ;;  %v4448_v27 = vld [vmem:[#allocation5 + $0x710] sm:$0xff]  ;;  %v6170_v47 = vld [vmem:[#allocation8 + $0x40] sm:$0x7f] }
 0x432   : > { %9313 = vmatprep.subr.bf16.mxu1 %v11918_v38  ;;  %v6165_v24 = vld [vmem:[#allocation8 + $0x18] sm:$0xff] }
 0x433   : > { %9134 = vmatpush3.bf16.msra.mxu0 %v9133_v57  ;;  %v6113_v57 = vmul.f32 %v9925_v17, %v11848_v26  ;;  %v9151_v17 = vpack.c.bf16 %v4449_v62, %v4448_v27  ;;  %v9941_v58 = vld [vmem:[%s10488_s11 + $0x138] sm:$0xff]  ;;  %v9943_v62 = vld [vmem:[%s10488_s11 + $0x1c8] sm:$0xff] }
 0x434   : > { %9135 = vmatprep.subr.bf16.mxu0 %v10211_v4 }
 0x435   : > { %9315 = vmatpush3.bf16.msra.mxu1 %v11933_v49  ;;  %v11995_v53 = vpack.c.bf16 %v6113_v57, %v6112_v10  ;;  %v6151_v10 = vmul.f32 %v9935_v33, %v11848_v26  ;;  %v6166_v57 = vld [vmem:[#allocation8 + $0x20] sm:$0xff] }
 0x436   : > { %9317 = vmatprep.subr.bf16.mxu1 %v11936_v16 }
 0x437   : > { %9137 = vmatpush3.bf16.msra.mxu0 %v9136_v15  ;;  %v11998_v15 = vpack.c.bf16 %v6147_v43, %v6146_v55  ;;  %v6135_v55 = vmul.f32 %v9937_v40, %v11848_v26  ;;  %v4451_v43 = vld [vmem:[#allocation5 + $0x728] sm:$0xff] }
 0x438   : > { %8484 = vmatprep.subr.mxu0 %v10212_v31  ;;  %v9154_v30 = vpack.c.bf16 %v4451_v43, %v4450_v23  ;;  %v9946_v23 = vld [vmem:[%s10488_s11 + $0x1d0] sm:$0xff] }
 0x439   : > { %9319 = vmatpush3.bf16.msra.mxu1 %v11944_v42  ;;  %v12046_v20 = vpack.c.bf16 %v6135_v55, %v6134_v60  ;;  %v4534_v60 = vld [vmem:[#allocation5 + $0x750] sm:$0xff]  ;;  %v6156_v43 = vmul.f32 %v9946_v23, %v11848_v26  ;;  %v4538_v23 = vrot.slane %v11541_v34, 1 }
 0x43a   : > { %9321 = vmatprep.subr.bf16.mxu1 %v11951_v35  ;;  %v9160_v14 = vpack.c.bf16 %v4534_v60, %v4533_v45  ;;  %v9952_v45 = vld [vmem:[%s10488_s11 + $0x178] sm:$0xff] }
 0x43b   : > { %8485 = vmatpush3.msk.msra.mxu0 %vm1735_vm1, %v4282_v56  ;;  %v4367_v56 = vld [vmem:[#allocation5 + $0x6f8] sm:$0x1]  ;;  %v6145_v60 = vmul.f32 %v9952_v45, %v11848_v26  ;;  %v4786_v45 = vld [vmem:[#allocation5 + $0x7e0] sm:$0xff] }
 0x43c   : > { %8487 = vmatmul.mubr.msk.f32.vlgmr.msra.gmra.mrb[0].mxu0 %vm520_vm0, %v4283_v41  ;;  %9138 = vmatprep.subr.bf16.mxu0 %v10211_v4  ;;  %v6133_v41 = vmul.f32 %v9933_v44, %v11848_v26  ;;  %v4531_v44 = vld [vmem:[#allocation5 + $0x738] sm:$0xff] }
 0x43d   : > { %9140 = vmatpush3.bf16.msra.mxu0 %v9139_v48  ;;  %8503 = vmatprep.mubr.msk.f32.mxu0 %vm10213_vm2, %v10212_v31  ;;  %v6162_v48 = vld [vmem:[#allocation8] sm:$0xff] }
 0x43e   : > { %9141 = vmatprep.subr.bf16.mxu0 %v10211_v4  ;;  %9323 = vmatpush3.bf16.msra.mxu1 %v11965_v0 }
 0x43f   : > { %9325 = vmatprep.subr.bf16.mxu1 %v11968_v12 }
 0x441   : > { %9143 = vmatpush3.bf16.msra.mxu0 %v9142_v29  ;;  %v6150_v29 = vmul.f32 %v9934_v51, %v11848_v26  ;;  %v6155_v51 = vmul.f32 %v9943_v62, %v11848_v26  ;;  %v4616_v62 = vld [vmem:[#allocation5 + $0x770] sm:$0xff] }
 0x442   : > { %9144 = vmatprep.subr.bf16.mxu0 %v10211_v4  ;;  %9327 = vmatpush3.bf16.msra.mxu1 %v11984_v32 }
 0x443   : > { %9329 = vmatprep.subr.bf16.mxu1 %v11987_v2  ;;  %v12038_v22 = vpack.c.bf16 %v6151_v10, %v6150_v29  ;;  %v4452_v29 = vld [vmem:[#allocation5 + $0x730] sm:$0x1]  ;;  %v9944_v10 = vld [vmem:[%s10488_s11 + $0x140] sm:$0xff] }
 0x445   : > { %9146 = vmatpush3.bf16.msra.mxu0 %v9145_v54  ;;  %v12035_v54 = vpack.c.bf16 %v6133_v41, %v6132_v63  ;;  %v6137_v63 = vmul.f32 %v9941_v58, %v11848_v26  ;;  %v4532_v41 = vld [vmem:[#allocation5 + $0x740] sm:$0xff]  ;;  %v6159_v58 = vmul.f32 %v11720_v50, %v11848_v26 }
 0x446   : > { %8501 = vmatprep.subr.mxu0 %v10212_v31  ;;  %9331 = vmatpush3.bf16.msra.mxu1 %v11995_v53  ;;  %v9157_v33 = vpack.c.bf16 %v4532_v41, %v4531_v44 }
 0x447   : > { %9333 = vmatprep.subr.bf16.mxu1 %v11998_v15 }
 0x449   : > { %8502 = vmatpush3.msk.msra.mxu0 %vm1735_vm1, %v4367_v56  ;;  %6257 = vmatmul.mubr.f32.vlgmr.msra.gmra.mrb[30].mxu1 %v6162_v48  ;;  %v12049_v56 = vpack.c.bf16 %v6153_v59, %v6152_v6  ;;  %v9940_v48 = vld [vmem:[%s10488_s11 + $0x130] sm:$0xff]  ;;  %v9948_v59 = vld [vmem:[%s10488_s11 + $0x158] sm:$0xff] }
 0x44a   : > { %8504 = vmatmul.mubr.msk.f32.vlgmr.msra.gmra.mrb[0].mxu0 %vm520_vm0, %v4368_v21  ;;  %9147 = vmatprep.subr.bf16.mxu0 %v10211_v4  ;;  %v9942_v21 = vld [vmem:[%s10488_s11 + $0x1c0] sm:$0xff]  ;;  %v9947_v6 = vld [vmem:[%s10488_s11 + $0x150] sm:$0xff] }
 0x44b   : > { %9149 = vmatpush3.bf16.msra.mxu0 %v9148_v11  ;;  %8520 = vmatprep.mubr.msk.f32.mxu0 %vm10213_vm2, %v10212_v31  ;;  %v6136_v11 = vmul.f32 %v9940_v48, %v11848_v26  ;;  %v6154_v27 = vmul.f32 %v9942_v21, %v11848_v26  ;;  %v6140_v28 = vmul.f32 %v9947_v6, %v11848_v26  ;;  %v9949_v21 = vld [vmem:[%s10488_s11 + $0x160] sm:$0xff]  ;;  %v4621_v6 = vld [vmem:[#allocation5 + $0x798] sm:$0xff] }
 0x44c   : > { %9150 = vmatprep.subr.bf16.mxu0 %v10211_v4  ;;  %9335 = vmatpush3.bf16.msra.mxu1 %v12016_v39 }
 0x44d   : > { %9337 = vmatprep.subr.bf16.mxu1 %v12019_v61  ;;  %6261 = vmatprep.mubr.f32.mxu1 %v6167_v13  ;;  %v6138_v13 = vmul.f32 %v9944_v10, %v11848_v26  ;;  %v12066_v40 = vpack.c.bf16 %v6137_v63, %v6136_v11  ;;  %v12069_v55 = vpack.c.bf16 %v6155_v51, %v6154_v27  ;;  %v9950_v27 = vld [vmem:[%s10488_s11 + $0x168] sm:$0xff]  ;;  %v4617_v51 = vld [vmem:[#allocation5 + $0x778] sm:$0xff] }
 0x44e   : > { %6262 = vmatmul.mubr.f32.gmra.mrb[32].mxu1 %v6166_v57  ;;  %v6158_v11 = vmul.f32 %v11708_v46, %v11848_v26  ;;  %v6142_v46 = vmul.f32 %v9949_v21, %v11848_v26  ;;  %v6143_v50 = vmul.f32 %v9950_v27, %v11848_v26  ;;  %v4537_v10 = vld [vmem:[#allocation5 + $0x768] sm:$0x1]  ;;  %v4703_v27 = vld [vmem:[#allocation5 + $0x7b8] sm:$0xff] }
 0x44f   : > { %9152 = vmatpush3.bf16.msra.mxu0 %v9151_v17  ;;  %6266 = vmatprep.mubr.f32.mxu1 %v6171_v3  ;;  %v9945_v17 = vld [vmem:[%s10488_s11 + $0x148] sm:$0xff]  ;;  %v6157_v3 = vmul.f32 %v11697_v25, %v11848_v26  ;;  %v4535_v25 = vld [vmem:[#allocation5 + $0x758] sm:$0xff] }
 0x450   : > { %9153 = vmatprep.subr.bf16.mxu0 %v10211_v4  ;;  %9339 = vmatpush3.bf16.msra.mxu1 %v12035_v54  ;;  %v6139_v57 = vmul.f32 %v9945_v17, %v11848_v26  ;;  %v12100_v41 = vpack.c.bf16 %v6159_v58, %v6158_v11  ;;  %v9951_v17 = vld [vmem:[%s10488_s11 + $0x170] sm:$0xff]  ;;  %v4622_v58 = vld [vmem:[#allocation5 + $0x7a0] sm:$0x1]  ;;  %s10121_s11 = scalar_lea.vmem %s6974_s13, 16 }
 0x451   : > { %9341 = vmatprep.subr.bf16.mxu1 %v12038_v22  ;;  %v12089_v48 = vpack.c.bf16 %v6157_v3, %v6156_v43  ;;  %v4619_v43 = vld [vmem:[#allocation5 + $0x788] sm:$0xff]  ;;  %v12118_v3 = vpack.c.bf16 %v6143_v50, %v6142_v46  ;;  %v4702_v11 = vld [vmem:[#allocation5 + $0x7b0] sm:$0xff]  ;;  %v4623_v46 = vrot.slane %v11541_v34, 2  ;;  %v4704_v50 = vld [vmem:[#allocation5 + $0x7c0] sm:$0xff]  ;;  %p10122_p4 = scmp.ne.s32.totalorder %s6974_s13, %s10121_s11  ;;  %p10129_p0 = scmp.lt.s32.totalorder %s10127_s22, %s10121_s11 }
 0x452   : > { %6267 = vmatmul.mubr.f32.gmra.mrb[34].mxu1 %v6170_v47  ;;  %v4536_v47 = vld [vmem:[#allocation5 + $0x760] sm:$0xff] }
 0x453   : > { %9155 = vmatpush3.bf16.msra.mxu0 %v9154_v30  ;;  %6336 = vmatprep.mubr.f32.mxu1 %v6165_v24  ;;  %v6141_v30 = vmul.f32 %v9948_v59, %v11848_v26  ;;  %v12086_v24 = vpack.c.bf16 %v6139_v57, %v6138_v13  ;;  %v9163_v63 = vpack.c.bf16 %v4536_v47, %v4535_v25  ;;  %v6169_v25 = vld [vmem:[#allocation8 + $0x38] sm:$0xff]  ;;  %v4701_v47 = vld [vmem:[#allocation5 + $0x7a8] sm:$0xff]  ;;  %p10123_p8 = pnand %p10122_p4, %p12722_p7  ;;  %p10130_p6 = por %p10129_p0, %p10128_p5 }
 0x454   : > { %8518 = vmatprep.subr.mxu0 %v10212_v31  ;;  %9343 = vmatpush3.bf16.msra.mxu1 %v12046_v20  ;;  %v9166_v13 = vpack.c.bf16 %v4617_v51, %v4616_v62  ;;  %v6144_v57 = vmul.f32 %v9951_v17, %v11848_v26  ;;  %v9175_v21 = vpack.c.bf16 %v4702_v11, %v4701_v47  ;;  %v6173_v62 = vld [vmem:[#allocation8 + $0x58] sm:$0x7f]  ;;  %v6172_v51 = vld [vmem:[#allocation8 + $0x50] sm:$0x7f]  ;;  %v10214_v17 = vmov 0  }
 0x455   : > { %9345 = vmatprep.subr.bf16.mxu1 %v12049_v56  ;;  %v12097_v44 = vpack.c.bf16 %v6141_v30, %v6140_v28  ;;  %v6164_v30 = vld [vmem:[#allocation8 + $0x10] sm:$0xff]  ;;  %9671 = vset.pattern.permute.xlu1 %v10214_v17  ;;  %p10124_p11 = pneg %p10123_p8 }
 0x456   : > { %v12129_v28 = vpack.c.bf16 %v6145_v60, %v6144_v57  ;;  %9670 = vset.pattern.permute.xlu0 %v10214_v17  ;;  %v6175_v57 = vld [vmem:[#allocation10 + $0x8] sm:$0xff]  ;;  %v4957_v17 = vld [vmem:[#allocation5 + $0x858] sm:$0xff] }
 0x457   : > { %8519 = vmatpush3.msk.msra.mxu0 %vm1735_vm1, %v4452_v29  ;;  %v6160_v29 = vmul.f32 %v11731_v8, %v11848_v26  ;;  %v4618_v8 = vld [vmem:[#allocation5 + $0x780] sm:$0xff]  ;;  %v4787_v60 = vld [vmem:[#allocation5 + $0x7e8] sm:$0xff]  ;;  %6184 = vperm.xlu1 %9671, %v6175_v57   ;;  %p10131_p9 = pnand %p10130_p6, %p10124_p11 }
 0x458   : > { %8521 = vmatmul.mubr.msk.f32.vlgmr.msra.gmra.mrb[0].mxu0 %vm520_vm0, %v11541_v34  ;;  %9156 = vmatprep.subr.bf16.mxu0 %v10211_v4  ;;  %v4791_v47 = vld [vmem:[#allocation5 + $0x808] sm:$0xff] }
 0x459   : > { %9158 = vmatpush3.bf16.msra.mxu0 %v9157_v33  ;;  %8537 = vmatprep.mubr.msk.f32.mxu0 %vm10213_vm2, %v10212_v31  ;;  %v6161_v33 = vmul.f32 %v11742_v1, %v11848_v26  ;;  %v4620_v26 = vld [vmem:[#allocation5 + $0x790] sm:$0xff]  ;;  %v4877_v57 = vld [vmem:[#allocation5 + $0x848] sm:$0x1] }
 0x45a   : > { %9159 = vmatprep.subr.bf16.mxu0 %v10211_v4  ;;  %9347 = vmatpush3.bf16.msra.mxu1 %v12066_v40  ;;  %v9172_v59 = vpack.c.bf16 %v4621_v6, %v4620_v26  ;;  %v4708_v26 = vrot.slane %v11541_v34, 3  ;;  %v4788_v6 = vld [vmem:[#allocation5 + $0x7f0] sm:$0xff] }
 0x45b   : > { %9349 = vmatprep.subr.bf16.mxu1 %v12069_v55  ;;  %v12121_v1 = vpack.c.bf16 %v6161_v33, %v6160_v29  ;;  %v9178_v29 = vpack.c.bf16 %v4704_v50, %v4703_v27  ;;  %v4705_v33 = vld [vmem:[#allocation5 + $0x7c8] sm:$0xff]  ;;  %v4793_v27 = vrot.slane %v11541_v34, 4 }
 0x45c   : > { %v4873_v50 = vld [vmem:[#allocation5 + $0x828] sm:$0xff] }
 0x45d   : > { %9161 = vmatpush3.bf16.msra.mxu0 %v9160_v14  ;;  %v9169_v14 = vpack.c.bf16 %v4619_v43, %v4618_v8  ;;  %v4707_v8 = vld [vmem:[#allocation5 + $0x7d8] sm:$0x1]  ;;  %v9184_v43 = vpack.c.bf16 %v4787_v60, %v4786_v45  ;;  %v4878_v60 = vrot.slane %v11541_v34, 5 }
 0x45e   : > { %9162 = vmatprep.subr.bf16.mxu0 %v10211_v4  ;;  %9351 = vmatpush3.bf16.msra.mxu1 %v12086_v24 }
 0x45f   : > { %9353 = vmatprep.subr.bf16.mxu1 %v12089_v48 }
 0x461   : > { %9164 = vmatpush3.bf16.msra.mxu0 %v9163_v63  ;;  %v6168_v63 = vld [vmem:[#allocation8 + $0x30] sm:$0xff] }
 0x462   : > { %8535 = vmatprep.subr.mxu0 %v10212_v31  ;;  %9355 = vmatpush3.bf16.msra.mxu1 %v12097_v44 }
 0x463   : > { %9357 = vmatprep.subr.bf16.mxu1 %v12100_v41 }
 0x465   : > { %8536 = vmatpush3.msk.msra.mxu0 %vm1735_vm1, %v4537_v10  ;;  %v4706_v10 = vld [vmem:[#allocation5 + $0x7d0] sm:$0xff] }
 0x466   : > { %8538 = vmatmul.mubr.msk.f32.vlgmr.msra.gmra.mrb[0].mxu0 %vm520_vm0, %v4538_v23  ;;  %9165 = vmatprep.subr.bf16.mxu0 %v10211_v4  ;;  %v6174_v23 = vld [vmem:[#allocation10] sm:$0xff] }
 0x467   : > { %9167 = vmatpush3.bf16.msra.mxu0 %v9166_v13  ;;  %8554 = vmatprep.mubr.msk.f32.mxu0 %vm10213_vm2, %v10212_v31  ;;  %v9181_v13 = vpack.c.bf16 %v4706_v10, %v4705_v33  ;;  %v4876_v33 = vld [vmem:[#allocation5 + $0x840] sm:$0xff] }
 0x468   : > { %9168 = vmatprep.subr.bf16.mxu0 %v10211_v4  ;;  %9359 = vmatpush3.bf16.msra.mxu1 %v12118_v3 }
 0x469   : > { %9361 = vmatprep.subr.bf16.mxu1 %v12121_v1  ;;  %6179 = vperm.xlu0 %9670, %v6174_v23   ;;  %v4958_v23 = vld [vmem:[#allocation5 + $0x860] sm:$0xff] }
 0x46b   : > { %9170 = vmatpush3.bf16.msra.mxu0 %v9169_v14  ;;  %v6176_v14 = vld [vmem:[#allocation10 + $0x10] sm:$0x7f] }
 0x46c   : > { %9171 = vmatprep.subr.bf16.mxu0 %v10211_v4  ;;  %9363 = vmatpush3.bf16.msra.mxu1 %v12129_v28 }
 0x46d   : > { %6189 = vperm.xlu1 %9671, %v6176_v14   ;;  %v4960_v14 = vld [vmem:[#allocation5 + $0x870] sm:$0xff]  ;;  %9366 = vmatprep.subr.msk.bf16.mxu1 %vm12233_vm5, %v11873_v37  ;;  %v5558_v37 = vrot.slane %v11552_v18, 5 }
 0x46f   : > { %9173 = vmatpush3.bf16.msra.mxu0 %v9172_v59  ;;  %6337 = vmatmul.mubr.f32.vlgmr.msra.gmra.mrb[36].mxu1 %v6164_v30  ;;  %v4789_v59 = vld [vmem:[#allocation5 + $0x7f8] sm:$0xff] }
 0x470   : > { %8552 = vmatprep.subr.mxu0 %v10212_v31  ;;  %6341 = vmatprep.mubr.f32.mxu1 %v6169_v25  ;;  %v9187_v30 = vpack.c.bf16 %v4789_v59, %v4788_v6  ;;  %v4790_v25 = vld [vmem:[#allocation5 + $0x800] sm:$0xff]  ;;  %v5041_v59 = vld [vmem:[#allocation5 + $0x888] sm:$0xff] }
 0x471   : > { %v9190_v11 = vpack.c.bf16 %v4791_v47, %v4790_v25  ;;  %v4962_v25 = vld [vmem:[#allocation5 + $0x880] sm:$0x1] }
 0x473   : > { %8553 = vmatpush3.msk.msra.mxu0 %vm1735_vm1, %v4622_v58  ;;  %6342 = vmatmul.mubr.f32.gmra.mrb[38].mxu1 %v6168_v63  ;;  %v4871_v58 = vld [vmem:[#allocation5 + $0x818] sm:$0xff]  ;;  %v4872_v63 = vld [vmem:[#allocation5 + $0x820] sm:$0xff] }
 0x474   : > { %8555 = vmatmul.mubr.msk.f32.vlgmr.msra.gmra.mrb[0].mxu0 %vm520_vm0, %v4623_v46  ;;  %9174 = vmatprep.subr.bf16.mxu0 %v10211_v4  ;;  %v9193_v46 = vpack.c.bf16 %v4872_v63, %v4871_v58  ;;  %v5043_v58 = vld [vmem:[#allocation5 + $0x898] sm:$0xff]  ;;  %v5044_v63 = vld [vmem:[#allocation5 + $0x8a0] sm:$0xff] }
 0x475   : > { %9176 = vmatpush3.bf16.msra.mxu0 %v9175_v21  ;;  %8571 = vmatprep.mubr.msk.f32.mxu0 %vm10213_vm2, %v10212_v31  ;;  %v4792_v21 = vld [vmem:[#allocation5 + $0x810] sm:$0x1] }
 0x476   : > { %9177 = vmatprep.subr.bf16.mxu0 %v10211_v4  ;;  %6346 = vmatprep.mubr.f32.mxu1 %v6173_v62  ;;  %v4874_v62 = vld [vmem:[#allocation5 + $0x830] sm:$0xff] }
 0x477   : > { %6347 = vmatmul.mubr.f32.gmra.mrb[40].mxu1 %v6172_v51  ;;  %v9196_v51 = vpack.c.bf16 %v4874_v62, %v4873_v50  ;;  %v5126_v62 = vld [vmem:[#allocation5 + $0x8c0] sm:$0xff] }
 0x478   : > { %9369 = vmatpush3.bf16.xpose.msk.msra.mxu1 %vm12233_vm5, %v11879_v9  ;;  %v5638_v9 = vld [vmem:[#allocation5 + $0xa20] sm:$0xff] }
 0x479   : > { %9179 = vmatpush3.bf16.msra.mxu0 %v9178_v29  ;;  %v4875_v29 = vld [vmem:[#allocation5 + $0x838] sm:$0xff]  ;;  %9372 = vmatprep.subr.msk.bf16.mxu1 %vm12233_vm5, %v11883_v7 }
 0x47a   : > { %9180 = vmatprep.subr.bf16.mxu0 %v10211_v4  ;;  %v9199_v10 = vpack.c.bf16 %v4876_v33, %v4875_v29  ;;  %v5047_v29 = vld [vmem:[#allocation5 + $0x8b8] sm:$0x1] }
 0x47d   : > { %9182 = vmatpush3.bf16.msra.mxu0 %v9181_v13  ;;  %v4956_v13 = vld [vmem:[#allocation5 + $0x850] sm:$0xff] }
 0x47e   : > { %8569 = vmatprep.subr.mxu0 %v10212_v31  ;;  %v9202_v45 = vpack.c.bf16 %v4957_v17, %v4956_v13  ;;  %v5128_v13 = vld [vmem:[#allocation5 + $0x8d0] sm:$0xff]  ;;  %v5129_v17 = vld [vmem:[#allocation5 + $0x8d8] sm:$0xff] }
 0x480   : > { %9375 = vmatpush3.bf16.xpose.msk.msra.mxu1 %vm12233_vm5, %v11897_v52  ;;  %v5640_v52 = vld [vmem:[#allocation5 + $0xa30] sm:$0xff] }
 0x481   : > { %8570 = vmatpush3.msk.msra.mxu0 %vm1735_vm1, %v4707_v8  ;;  %v4959_v8 = vld [vmem:[#allocation5 + $0x868] sm:$0xff]  ;;  %9378 = vmatprep.subr.msk.bf16.mxu1 %vm12233_vm5, %v11906_v19 }
 0x482   : > { %8572 = vmatmul.mubr.msk.f32.vlgmr.msra.gmra.mrb[0].mxu0 %vm520_vm0, %v4708_v26  ;;  %9183 = vmatprep.subr.bf16.mxu0 %v10211_v4  ;;  %v4961_v26 = vld [vmem:[#allocation5 + $0x878] sm:$0xff]  ;;  %v5721_v19 = vld [vmem:[#allocation5 + $0xa48] sm:$0xff] }
 0x483   : > { %9185 = vmatpush3.bf16.msra.mxu0 %v9184_v43  ;;  %8588 = vmatprep.mubr.msk.f32.mxu0 %vm10213_vm2, %v10212_v31  ;;  %v9205_v43 = vpack.c.bf16 %v4959_v8, %v4958_v23  ;;  %v9208_v6 = vpack.c.bf16 %v4961_v26, %v4960_v14  ;;  %v5212_v8 = vld [vmem:[#allocation5 + $0x900] sm:$0xff]  ;;  %v5213_v26 = vld [vmem:[#allocation5 + $0x908] sm:$0xff] }
 0x484   : > { %9186 = vmatprep.subr.bf16.mxu0 %v10211_v4 }
 0x487   : > { %9188 = vmatpush3.bf16.msra.mxu0 %v9187_v30  ;;  %v5042_v30 = vld [vmem:[#allocation5 + $0x890] sm:$0xff] }
 0x488   : > { %9189 = vmatprep.subr.bf16.mxu0 %v10211_v4  ;;  %v9211_v47 = vpack.c.bf16 %v5042_v30, %v5041_v59  ;;  %v5215_v30 = vld [vmem:[#allocation5 + $0x918] sm:$0xff]  ;;  %9381 = vmatpush3.bf16.xpose.msk.msra.mxu1 %vm12233_vm5, %v11914_v36 }
 0x489   : > { %9384 = vmatprep.subr.msk.bf16.mxu1 %vm12233_vm5, %v11918_v38 }
 0x48b   : > { %9191 = vmatpush3.bf16.msra.mxu0 %v9190_v11  ;;  %v4963_v11 = vrot.slane %v11541_v34, 6 }
 0x48c   : > { %8586 = vmatprep.subr.mxu0 %v10212_v31 }
 0x48f   : > { %8587 = vmatpush3.msk.msra.mxu0 %vm1735_vm1, %v4792_v21  ;;  %v9214_v21 = vpack.c.bf16 %v5044_v63, %v5043_v58  ;;  %v5297_v58 = vld [vmem:[#allocation5 + $0x938] sm:$0xff]  ;;  %v5217_v63 = vld [vmem:[#allocation5 + $0x928] sm:$0x1] }
 0x490   : > { %8589 = vmatmul.mubr.msk.f32.vlgmr.msra.gmra.mrb[0].mxu0 %vm520_vm0, %v4793_v27  ;;  %9192 = vmatprep.subr.bf16.mxu0 %v10211_v4  ;;  %v5046_v27 = vld [vmem:[#allocation5 + $0x8b0] sm:$0xff] }
 0x491   : > { %9194 = vmatpush3.bf16.msra.mxu0 %v9193_v46  ;;  %8605 = vmatprep.mubr.msk.f32.mxu0 %vm10213_vm2, %v10212_v31  ;;  %v5045_v46 = vld [vmem:[#allocation5 + $0x8a8] sm:$0xff] }
 0x492   : > { %9195 = vmatprep.subr.bf16.mxu0 %v10211_v4  ;;  %v9217_v50 = vpack.c.bf16 %v5046_v27, %v5045_v46  ;;  %v5218_v46 = vrot.slane %v11552_v18, 1  ;;  %v5298_v27 = vld [vmem:[#allocation5 + $0x940] sm:$0xff]  ;;  %9387 = vmatpush3.bf16.xpose.msk.msra.mxu1 %vm12233_vm5, %v11933_v49 }
 0x493   : > { %9390 = vmatprep.subr.msk.bf16.mxu1 %vm12233_vm5, %v11936_v16  ;;  %v5727_v16 = vld [vmem:[#allocation5 + $0xa78] sm:$0x1] }
 0x495   : > { %9197 = vmatpush3.bf16.msra.mxu0 %v9196_v51  ;;  %v5127_v51 = vld [vmem:[#allocation5 + $0x8c8] sm:$0xff] }
 0x496   : > { %9198 = vmatprep.subr.bf16.mxu0 %v10211_v4  ;;  %v9220_v33 = vpack.c.bf16 %v5127_v51, %v5126_v62  ;;  %v5300_v51 = vld [vmem:[#allocation5 + $0x950] sm:$0xff] }
 0x499   : > { %9200 = vmatpush3.bf16.msra.mxu0 %v9199_v10  ;;  %v5048_v10 = vrot.slane %v11541_v34, 7  ;;  %v5211_v34 = vld [vmem:[#allocation5 + $0x8f8] sm:$0xff] }
 0x49a   : > { %8603 = vmatprep.subr.mxu0 %v10212_v31  ;;  %v9229_v14 = vpack.c.bf16 %v5212_v8, %v5211_v34  ;;  %v5385_v8 = vld [vmem:[#allocation5 + $0x988] sm:$0xff]  ;;  %9393 = vmatpush3.bf16.xpose.msk.msra.mxu1 %vm12233_vm5, %v11944_v42 }
 0x49b   : > { %9396 = vmatprep.subr.msk.bf16.mxu1 %vm12233_vm5, %v11951_v35  ;;  %v5810_v35 = vld [vmem:[#allocation5 + $0xaa0] sm:$0xff] }
 0x49d   : > { %8604 = vmatpush3.msk.msra.mxu0 %vm1735_vm1, %v4877_v57  ;;  %v9223_v57 = vpack.c.bf16 %v5129_v17, %v5128_v13  ;;  %v5382_v13 = vld [vmem:[#allocation5 + $0x970] sm:$0xff]  ;;  %v5302_v17 = vld [vmem:[#allocation5 + $0x960] sm:$0x1] }
 0x49e   : > { %8606 = vmatmul.mubr.msk.f32.vlgmr.msra.gmra.mrb[0].mxu0 %vm520_vm0, %v4878_v60  ;;  %9201 = vmatprep.subr.bf16.mxu0 %v10211_v4  ;;  %v5131_v60 = vld [vmem:[#allocation5 + $0x8e8] sm:$0xff] }
 0x49f   : > { %9203 = vmatpush3.bf16.msra.mxu0 %v9202_v45  ;;  %8622 = vmatprep.mubr.msk.f32.mxu0 %vm10213_vm2, %v10212_v31  ;;  %v5130_v45 = vld [vmem:[#allocation5 + $0x8e0] sm:$0xff] }
 0x4a0   : > { %9204 = vmatprep.subr.bf16.mxu0 %v10211_v4  ;;  %v9226_v23 = vpack.c.bf16 %v5131_v60, %v5130_v45  ;;  %v5303_v45 = vrot.slane %v11552_v18, 2  ;;  %v5383_v60 = vld [vmem:[#allocation5 + $0x978] sm:$0xff] }
 0x4a2   : > { %9399 = vmatpush3.bf16.xpose.msk.msra.mxu1 %vm12233_vm5, %v11965_v0 }
 0x4a3   : > { %9206 = vmatpush3.bf16.msra.mxu0 %v9205_v43  ;;  %v5132_v43 = vld [vmem:[#allocation5 + $0x8f0] sm:$0x1]  ;;  %9402 = vmatprep.subr.msk.bf16.mxu1 %vm12233_vm5, %v11968_v12 }
 0x4a4   : > { %9207 = vmatprep.subr.bf16.mxu0 %v10211_v4 }
 0x4a7   : > { %9209 = vmatpush3.bf16.msra.mxu0 %v9208_v6  ;;  %v5214_v6 = vld [vmem:[#allocation5 + $0x910] sm:$0xff] }
 0x4a8   : > { %8620 = vmatprep.subr.mxu0 %v10212_v31  ;;  %v9232_v59 = vpack.c.bf16 %v5214_v6, %v5213_v26  ;;  %v5466_v26 = vld [vmem:[#allocation5 + $0x9a0] sm:$0xff]  ;;  %v5467_v6 = vld [vmem:[#allocation5 + $0x9a8] sm:$0xff] }
 0x4aa   : > { %9405 = vmatpush3.bf16.xpose.msk.msra.mxu1 %vm12233_vm5, %v11984_v32 }
 0x4ab   : > { %8621 = vmatpush3.msk.msra.mxu0 %vm1735_vm1, %v4962_v25  ;;  %v5216_v25 = vld [vmem:[#allocation5 + $0x920] sm:$0xff]  ;;  %9408 = vmatprep.subr.msk.bf16.mxu1 %vm12233_vm5, %v11987_v2 }
 0x4ac   : > { %8623 = vmatmul.mubr.msk.f32.vlgmr.msra.gmra.mrb[0].mxu0 %vm520_vm0, %v4963_v11  ;;  %9210 = vmatprep.subr.bf16.mxu0 %v10211_v4  ;;  %v5296_v11 = vld [vmem:[#allocation5 + $0x930] sm:$0xff] }
 0x4ad   : > { %9212 = vmatpush3.bf16.msra.mxu0 %v9211_v47  ;;  %8639 = vmatprep.mubr.msk.f32.mxu0 %vm10213_vm2, %v10212_v31  ;;  %v9235_v47 = vpack.c.bf16 %v5216_v25, %v5215_v30  ;;  %v9256_v30 = vpack.c.bf16 %v5467_v6, %v5466_v26  ;;  %v5388_v25 = vrot.slane %v11552_v18, 3  ;;  %v5639_v6 = vld [vmem:[#allocation5 + $0xa28] sm:$0xff] }
 0x4ae   : > { %9213 = vmatprep.subr.bf16.mxu0 %v10211_v4  ;;  %v9277_v7 = vpack.c.bf16 %v5639_v6, %v5638_v9 }
 0x4b1   : > { %9215 = vmatpush3.bf16.msra.mxu0 %v9214_v21  ;;  %v9238_v21 = vpack.c.bf16 %v5297_v58, %v5296_v11  ;;  %v5469_v11 = vld [vmem:[#allocation5 + $0x9b8] sm:$0xff] }
 0x4b2   : > { %9216 = vmatprep.subr.bf16.mxu0 %v10211_v4  ;;  %9411 = vmatpush3.bf16.xpose.msk.msra.mxu1 %vm12233_vm5, %v11995_v53 }
 0x4b3   : > { %9414 = vmatprep.subr.msk.bf16.mxu1 %vm12233_vm5, %v11998_v15 }
 0x4b5   : > { %9218 = vmatpush3.bf16.msra.mxu0 %v9217_v50  ;;  %v5299_v50 = vld [vmem:[#allocation5 + $0x948] sm:$0xff] }
 0x4b6   : > { %8637 = vmatprep.subr.mxu0 %v10212_v31  ;;  %v9241_v62 = vpack.c.bf16 %v5299_v50, %v5298_v27  ;;  %v5551_v27 = vld [vmem:[#allocation5 + $0x9d8] sm:$0xff]  ;;  %v5552_v50 = vld [vmem:[#allocation5 + $0x9e0] sm:$0xff] }
 0x4b9   : > { %8638 = vmatpush3.msk.msra.mxu0 %vm1735_vm1, %v5047_v29  ;;  %v5301_v29 = vld [vmem:[#allocation5 + $0x958] sm:$0xff] }
 0x4ba   : > { %8640 = vmatmul.mubr.msk.f32.vlgmr.msra.gmra.mrb[0].mxu0 %vm520_vm0, %v5048_v10  ;;  %9219 = vmatprep.subr.bf16.mxu0 %v10211_v4  ;;  %v5381_v10 = vld [vmem:[#allocation5 + $0x968] sm:$0xff] }
 0x4bb   : > { %9221 = vmatpush3.bf16.msra.mxu0 %v9220_v33  ;;  %8656 = vmatprep.mubr.msk.f32.mxu0 %vm10213_vm2, %v10212_v31  ;;  %v9244_v33 = vpack.c.bf16 %v5301_v29, %v5300_v51  ;;  %v5472_v29 = vld [vmem:[#allocation5 + $0x9d0] sm:$0x1] }
 0x4bc   : > { %9222 = vmatprep.subr.bf16.mxu0 %v10211_v4 }
 0x4bf   : > { %9224 = vmatpush3.bf16.msra.mxu0 %v9223_v57  ;;  %v9247_v57 = vpack.c.bf16 %v5382_v13, %v5381_v10  ;;  %v5473_v10 = vrot.slane %v11552_v18, 4  ;;  %v5553_v13 = vld [vmem:[#allocation5 + $0x9e8] sm:$0xff] }
 0x4c0   : > { %9225 = vmatprep.subr.bf16.mxu0 %v10211_v4 }
 0x4c3   : > { %9227 = vmatpush3.bf16.msra.mxu0 %v9226_v23  ;;  %v5384_v23 = vld [vmem:[#allocation5 + $0x980] sm:$0xff] }
 0x4c4   : > { %8654 = vmatprep.subr.mxu0 %v10212_v31  ;;  %v9250_v34 = vpack.c.bf16 %v5384_v23, %v5383_v60  ;;  %v5555_v60 = vld [vmem:[#allocation5 + $0x9f8] sm:$0xff]  ;;  %v5556_v23 = vld [vmem:[#allocation5 + $0xa00] sm:$0xff] }
 0x4c7   : > { %8655 = vmatpush3.msk.msra.mxu0 %vm1735_vm1, %v5132_v43  ;;  %v5386_v43 = vld [vmem:[#allocation5 + $0x990] sm:$0xff] }
 0x4c8   : > { %8657 = vmatmul.mubr.msk.f32.vlgmr.msra.gmra.mrb[0].mxu0 %vm520_vm0, %v11552_v18  ;;  %9228 = vmatprep.subr.bf16.mxu0 %v10211_v4 }
 0x4c9   : > { %9230 = vmatpush3.bf16.msra.mxu0 %v9229_v14  ;;  %8673 = vmatprep.mubr.msk.f32.mxu0 %vm10213_vm2, %v10212_v31  ;;  %v9253_v14 = vpack.c.bf16 %v5386_v43, %v5385_v8  ;;  %v5636_v8 = vld [vmem:[#allocation5 + $0xa10] sm:$0xff]  ;;  %v5637_v43 = vld [vmem:[#allocation5 + $0xa18] sm:$0xff] }
 0x4ca   : > { %9231 = vmatprep.subr.bf16.mxu0 %v10211_v4  ;;  %v9274_v26 = vpack.c.bf16 %v5637_v43, %v5636_v8  ;;  %v5728_v8 = vrot.slane %v11552_v18, 7  ;;  %v5808_v43 = vld [vmem:[#allocation5 + $0xa90] sm:$0xff] }
 0x4cd   : > { %9233 = vmatpush3.bf16.msra.mxu0 %v9232_v59  ;;  %v5387_v59 = vld [vmem:[#allocation5 + $0x998] sm:$0x1] }
 0x4ce   : > { %9234 = vmatprep.subr.bf16.mxu0 %v10211_v4 }
 0x4d1   : > { %9236 = vmatpush3.bf16.msra.mxu0 %v9235_v47  ;;  %v5468_v47 = vld [vmem:[#allocation5 + $0x9b0] sm:$0xff] }
 0x4d2   : > { %8671 = vmatprep.subr.mxu0 %v10212_v31  ;;  %v9259_v58 = vpack.c.bf16 %v5469_v11, %v5468_v47  ;;  %v5642_v47 = vld [vmem:[#allocation5 + $0xa40] sm:$0x1] }
 0x4d5   : > { %8672 = vmatpush3.msk.msra.mxu0 %vm1735_vm1, %v5217_v63  ;;  %v5470_v63 = vld [vmem:[#allocation5 + $0x9c0] sm:$0xff] }
 0x4d6   : > { %8674 = vmatmul.mubr.msk.f32.vlgmr.msra.gmra.mrb[0].mxu0 %vm520_vm0, %v5218_v46  ;;  %9237 = vmatprep.subr.bf16.mxu0 %v10211_v4 }
 0x4d7   : > { %9239 = vmatpush3.bf16.msra.mxu0 %v9238_v21  ;;  %8690 = vmatprep.mubr.msk.f32.mxu0 %vm10213_vm2, %v10212_v31  ;;  %v5471_v21 = vld [vmem:[#allocation5 + $0x9c8] sm:$0xff] }
 0x4d8   : > { %9240 = vmatprep.subr.bf16.mxu0 %v10211_v4  ;;  %v9262_v46 = vpack.c.bf16 %v5471_v21, %v5470_v63  ;;  %v5723_v63 = vld [vmem:[#allocation5 + $0xa58] sm:$0xff]  ;;  %v5724_v21 = vld [vmem:[#allocation5 + $0xa60] sm:$0xff] }
 0x4d9   : > { %v9286_v38 = vpack.c.bf16 %v5724_v21, %v5723_v63 }
 0x4db   : > { %9242 = vmatpush3.bf16.msra.mxu0 %v9241_v62 }
 0x4dc   : > { %9243 = vmatprep.subr.bf16.mxu0 %v10211_v4 }
 0x4df   : > { %9245 = vmatpush3.bf16.msra.mxu0 %v9244_v33  ;;  %v9265_v33 = vpack.c.bf16 %v5552_v50, %v5551_v27  ;;  %v5725_v27 = vld [vmem:[#allocation5 + $0xa68] sm:$0xff]  ;;  %v5726_v50 = vld [vmem:[#allocation5 + $0xa70] sm:$0xff] }
 0x4e0   : > { %8688 = vmatprep.subr.mxu0 %v10212_v31  ;;  %v9289_v49 = vpack.c.bf16 %v5726_v50, %v5725_v27 }
 0x4e3   : > { %8689 = vmatpush3.msk.msra.mxu0 %vm1735_vm1, %v5302_v17  ;;  %v5554_v17 = vld [vmem:[#allocation5 + $0x9f0] sm:$0xff] }
 0x4e4   : > { %8691 = vmatmul.mubr.msk.f32.vlgmr.msra.gmra.mrb[0].mxu0 %vm520_vm0, %v5303_v45  ;;  %9246 = vmatprep.subr.bf16.mxu0 %v10211_v4  ;;  %v9268_v45 = vpack.c.bf16 %v5554_v17, %v5553_v13  ;;  %v5806_v13 = vld [vmem:[#allocation5 + $0xa80] sm:$0xff]  ;;  %v5807_v17 = vld [vmem:[#allocation5 + $0xa88] sm:$0xff] }
 0x4e5   : > { %9248 = vmatpush3.bf16.msra.mxu0 %v9247_v57  ;;  %8707 = vmatprep.mubr.msk.f32.mxu0 %vm10213_vm2, %v10212_v31 }
 0x4e6   : > { %9249 = vmatprep.subr.bf16.mxu0 %v10211_v4 }
 0x4e9   : > { %9251 = vmatpush3.bf16.msra.mxu0 %v9250_v34  ;;  %v9271_v34 = vpack.c.bf16 %v5556_v23, %v5555_v60  ;;  %v9292_v23 = vpack.c.bf16 %v5807_v17, %v5806_v13 }
 0x4ea   : > { %9252 = vmatprep.subr.bf16.mxu0 %v10211_v4 }
 0x4ed   : > { %9254 = vmatpush3.bf16.msra.mxu0 %v9253_v14  ;;  %v5557_v14 = vld [vmem:[#allocation5 + $0xa08] sm:$0x1] }
 0x4ee   : > { %8705 = vmatprep.subr.mxu0 %v10212_v31 }
 0x4f1   : > { %8706 = vmatpush3.msk.msra.mxu0 %vm1735_vm1, %v5387_v59  ;;  %v5641_v59 = vld [vmem:[#allocation5 + $0xa38] sm:$0xff] }
 0x4f2   : > { %8708 = vmatmul.mubr.msk.f32.vlgmr.msra.gmra.mrb[0].mxu0 %vm520_vm0, %v5388_v25  ;;  %9255 = vmatprep.subr.bf16.mxu0 %v10211_v4  ;;  %v5722_v25 = vld [vmem:[#allocation5 + $0xa50] sm:$0xff] }
 0x4f3   : > { %9257 = vmatpush3.bf16.msra.mxu0 %v9256_v30  ;;  %8724 = vmatprep.mubr.msk.f32.mxu0 %vm10213_vm2, %v10212_v31  ;;  %v9280_v30 = vpack.c.bf16 %v5641_v59, %v5640_v52  ;;  %v9283_v11 = vpack.c.bf16 %v5722_v25, %v5721_v19 }
 0x4f4   : > { %9258 = vmatprep.subr.bf16.mxu0 %v10211_v4 }
 0x4f7   : > { %9260 = vmatpush3.bf16.msra.mxu0 %v9259_v58  ;;  %v5643_v58 = vrot.slane %v11552_v18, 6 }
 0x4f8   : > { %9261 = vmatprep.subr.bf16.mxu0 %v10211_v4 }
 0x4fb   : > { %v12224_v62 = vpop.f32.mrb[28].mxu1  ;;  %9263 = vmatpush3.bf16.msra.mxu0 %v9262_v46 }
 0x4fc   : > { %v8216_v51 = vpop.f32.mrb[29].mxu1  ;;  %8722 = vmatprep.subr.mxu0 %v10212_v31 }
 0x4ff   : > { %8723 = vmatpush3.msk.msra.mxu0 %vm1735_vm1, %v5472_v29 }
 0x500   : > { %8725 = vmatmul.mubr.msk.f32.vlgmr.msra.gmra.mrb[0].mxu0 %vm520_vm0, %v5473_v10  ;;  %9264 = vmatprep.subr.bf16.mxu0 %v10211_v4 }
 0x501   : > { %9266 = vmatpush3.bf16.msra.mxu0 %v9265_v33  ;;  %8741 = vmatprep.mubr.msk.f32.mxu0 %vm10213_vm2, %v10212_v31 }
 0x502   : > { %9267 = vmatprep.subr.bf16.mxu0 %v10211_v4 }
 0x505   : > { %9269 = vmatpush3.bf16.msra.mxu0 %v9268_v45 }
 0x506   : > { %9270 = vmatprep.subr.bf16.mxu0 %v10211_v4 }
 0x509   : > { %9272 = vmatpush3.bf16.msra.mxu0 %v9271_v34 }
 0x50a   : > { %8739 = vmatprep.subr.mxu0 %v10212_v31 }
 0x50d   : > { %8740 = vmatpush3.msk.msra.mxu0 %vm1735_vm1, %v5557_v14  ;;  %v5809_v14 = vld [vmem:[#allocation5 + $0xa98] sm:$0xff] }
 0x50e   : > { %8742 = vmatmul.mubr.msk.f32.vlgmr.msra.gmra.mrb[0].mxu0 %vm520_vm0, %v5558_v37  ;;  %9273 = vmatprep.subr.bf16.mxu0 %v10211_v4  ;;  %v9295_v42 = vpack.c.bf16 %v5809_v14, %v5808_v43  ;;  %v5812_v37 = vld [vmem:[#allocation5 + $0xab0] sm:$0x1] }
 0x50f   : > { %9275 = vmatpush3.bf16.msra.mxu0 %v9274_v26  ;;  %8758 = vmatprep.mubr.msk.f32.mxu0 %vm10213_vm2, %v10212_v31  ;;  %v5811_v26 = vld [vmem:[#allocation5 + $0xaa8] sm:$0xff] }
 0x510   : > { %9276 = vmatprep.subr.bf16.mxu0 %v10211_v4  ;;  %v9298_v18 = vpack.c.bf16 %v5811_v26, %v5810_v35 }
 0x513   : > { %9278 = vmatpush3.bf16.msra.mxu0 %v9277_v7 }
 0x514   : > { %9279 = vmatprep.subr.bf16.mxu0 %v10211_v4 }
 0x517   : > { %9281 = vmatpush3.bf16.msra.mxu0 %v9280_v30 }
 0x518   : > { %8756 = vmatprep.subr.mxu0 %v10212_v31 }
 0x51b   : > { %8757 = vmatpush3.msk.msra.mxu0 %vm1735_vm1, %v5642_v47 }
 0x51c   : > { %8759 = vmatmul.mubr.msk.f32.vlgmr.msra.gmra.mrb[0].mxu0 %vm520_vm0, %v5643_v58  ;;  %9282 = vmatprep.subr.bf16.mxu0 %v10211_v4  ;;  %v7836_v36 = vpop.f32.mrb[30].mxu1 }
 0x51d   : > { %9284 = vmatpush3.bf16.msra.mxu0 %v9283_v11  ;;  %8775 = vmatprep.mubr.msk.f32.mxu0 %vm10213_vm2, %v10212_v31  ;;  %v7837_v46 = vpop.f32.mrb[31].mxu1 }
 0x51e   : > { %9285 = vmatprep.subr.bf16.mxu0 %v10211_v4  ;;  %v7838_v51 = vadd.f32 %v7837_v46, %v7836_v36 }
 0x521   : > { %9287 = vmatpush3.bf16.msra.mxu0 %v9286_v38  ;;  %v7839_v29 = vpop.f32.mrb[32].mxu1 }
 0x522   : > { %9288 = vmatprep.subr.bf16.mxu0 %v10211_v4  ;;  %v7840_v33 = vpop.f32.mrb[33].mxu1 }
 0x523   : > { %v7841_v10 = vadd.f32 %v7840_v33, %v7839_v29 }
 0x525   : > { %9290 = vmatpush3.bf16.msra.mxu0 %v9289_v49  ;;  %v7842_v45 = vpop.f32.mrb[34].mxu1 }
 0x526   : > { %8773 = vmatprep.subr.mxu0 %v10212_v31  ;;  %v7843_v60 = vpop.f32.mrb[35].mxu1 }
 0x527   : > { %v7844_v34 = vadd.f32 %v7843_v60, %v7842_v45 }
 0x529   : > { %8774 = vmatpush3.msk.msra.mxu0 %vm1735_vm1, %v5727_v16 }
 0x52a   : > { %8776 = vmatmul.mubr.msk.f32.vlgmr.msra.gmra.mrb[0].mxu0 %vm520_vm0, %v5728_v8  ;;  %9291 = vmatprep.subr.bf16.mxu0 %v10211_v4 }
 0x52b   : > { %9293 = vmatpush3.bf16.msra.mxu0 %v9292_v23  ;;  %8792 = vmatprep.mubr.msk.f32.mxu0 %vm10213_vm2, %v10212_v31 }
 0x52c   : > { %9294 = vmatprep.subr.bf16.mxu0 %v10211_v4 }
 0x52f   : > { %9296 = vmatpush3.bf16.msra.mxu0 %v9295_v42 }
 0x530   : > { %9297 = vmatprep.subr.bf16.mxu0 %v10211_v4  ;;  %v6180_v4 = vpop.permute.xlu0 %6179 }
 0x531   : > { %v6259_v12 = vadd.f32 %v7838_v51, %v6180_v4 }
 0x533   : > { %9299 = vmatpush3.bf16.msra.mxu0 %v9298_v18 }
 0x534   : > { %8790 = vmatprep.subr.mxu0 %v10212_v31  ;;  %v6185_v31 = vpop.permute.xlu1 %6184 }
 0x535   : > { %v6264_v2 = vadd.f32 %v7841_v10, %v6185_v31 }
 0x537   : > { %8791 = vmatpush3.msk.msra.mxu0 %vm1735_vm1, %v5812_v37 }
 0x538   : > { %8793 = vmatmul.mubr.msk.f32.vlgmr.msra.gmra.mrb[0].mxu0 %vm520_vm0, %v11562_v5  ;;  %v6190_v59 = vpop.permute.xlu1 %6189 }
 0x539   : > { %v6269_v25 = vadd.f32 %v7844_v34, %v6190_v59 }
 0x542   : > { %v7877_v0 = vpop.f32.mrb[36].mxu1 }
 0x543   : > { %v7878_v32 = vpop.f32.mrb[37].mxu1 }
 0x544   : > { %v7879_v9 = vadd.f32 %v7878_v32, %v7877_v0 }
 0x546   : > { %v7880_v6 = vpop.f32.mrb[38].mxu1  ;;  %v6339_v7 = vadd.f32 %v7879_v9, %v6259_v12 }
 0x547   : > { %v7881_v52 = vpop.f32.mrb[39].mxu1 }
 0x548   : > { %v7882_v5 = vadd.f32 %v7881_v52, %v7880_v6  ;;  %v6352_v30 = vsel %vm520_vm0, %v6339_v7, -inf }
 0x54a   : > { %v6344_v19 = vadd.f32 %v7882_v5, %v6264_v2  ;;  %v7883_v53 = vpop.f32.mrb[40].mxu1  ;;  %v6389_v2 = vlaneseq }
 0x54b   : > { %v7884_v47 = vpop.f32.mrb[41].mxu1 }
 0x54c   : > { %v6353_v15 = vsel %vm520_vm0, %v6344_v19, -inf  ;;  %v7885_v11 = vadd.f32 %v7884_v47, %v7883_v53  ;;  %v6390_v6 = vshrl.u32 %v6389_v2, 7 }
 0x54d   : > { %v6356_v58 = vmax.f32 %v6352_v30, %v6353_v15 }
 0x54e   : > { %v6349_v63 = vadd.f32 %v7885_v11, %v6269_v25  ;;  %v6391_v59 = vsub.s32 0, %v6390_v6 }
 0x550   : > { %v6355_v21 = vsel %vm6354_vm6, %v6349_v63, -inf }
 0x551   : > { %v6357_v36 = vmax.f32 %v6356_v58, %v6355_v21  ;;  %v6772_v21 = vld [vmem:[#allocation11 + $0x40] sm:$0x7f] }
 0x553   : > { %v6358_v38 = vrot.slane %v6357_v36, 4 }
 0x555   : > { %v6359_v46 = vmax.f32 %v6357_v36, %v6358_v38  ;;  %v6773_v36 = vld [vmem:[#allocation11 + $0x48] sm:$0x7f]  ;;  %v6766_v38 = vld [vmem:[#allocation11 + $0x10] sm:$0xff] }
 0x557   : > { %v6360_v27 = vrot.slane %v6359_v46, 2 }
 0x559   : > { %v6361_v50 = vmax.f32 %v6359_v46, %v6360_v27 }
 0x55b   : > { %v6362_v51 = vrot.slane %v6361_v50, 1 }
 0x55d   : > { %v6363_v49 = vmax.f32 %v6361_v50, %v6362_v51  ;;  %v6767_v50 = vld [vmem:[#allocation11 + $0x18] sm:$0xff] }
 0x55f   : > { %v6364_v29 = vsub.f32 %v6339_v7, %v6363_v49  ;;  %v6365_v33 = vsub.f32 %v6344_v19, %v6363_v49  ;;  %v6366_v10 = vsub.f32 %v6349_v63, %v6363_v49  ;;  %v1724_v7 = vld [vmem:[#allocation7] sm:$0x1] }
 0x560   : > { %v9460_v52 = vadd.f32 %v12224_v62, %v1724_v7 }
 0x561   : > { %v6367_v13 = vmul.f32 1.442695, %v6364_v29  ;;  %v6369_v17 = vmul.f32 1.442695, %v6365_v33  ;;  %v6371_v45 = vmul.f32 1.442695, %v6366_v10 }
 0x563   : > { %9804 = vpow2.f32 %v6367_v13 }
 0x564   : > { %9806 = vpow2.f32 %v6369_v17 }
 0x565   : > { %9808 = vpow2.f32 %v6371_v45  ;;  %v6770_v45 = vld [vmem:[#allocation11 + $0x30] sm:$0xff] }
 0x56d   : > { %v9805_v16 = vpop.eup %9804 }
 0x56e   : > { %v9807_v60 = vpop.eup %9806  ;;  %v6373_v23 = vsel %vm520_vm0, %v9805_v16, 0.0 }
 0x56f   : > { %v9809_v34 = vpop.eup %9808  ;;  %v6374_v8 = vsel %vm520_vm0, %v9807_v60, 0.0 }
 0x570   : > { %v6375_v43 = vadd.f32 %v6374_v8, %v6373_v23  ;;  %v6376_v14 = vsel %vm6354_vm6, %v9809_v34, 0.0 }
 0x572   : > { %v6377_v42 = vadd.f32 %v6376_v14, %v6375_v43  ;;  %v6771_v14 = vld [vmem:[#allocation11 + $0x38] sm:$0xff] }
 0x574   : > { %v6378_v35 = vrot.slane %v6377_v42, 4 }
 0x576   : > { %v6379_v26 = vadd.f32 %v6378_v35, %v6377_v42 }
 0x578   : > { %v6380_v18 = vrot.slane %v6379_v26, 2 }
 0x57a   : > { %v6381_v37 = vadd.f32 %v6380_v18, %v6379_v26 }
 0x57c   : > { %v6382_v4 = vrot.slane %v6381_v37, 1 }
 0x57e   : > { %v6383_v31 = vadd.f32 %v6382_v4, %v6381_v37 }
 0x580   : > { %9810 = vrcp.f32 %v6383_v31 }
 0x58a   : > { %v9811_v0 = vpop.eup %9810 }
 0x58b   : > { %v6385_v12 = vmul.f32 %v9811_v0, %v9805_v16  ;;  %v6386_v32 = vmul.f32 %v9811_v0, %v9807_v60  ;;  %v6387_v9 = vmul.f32 %v9811_v0, %v9809_v34 }
 0x60b   : > { %v5885_v5 = vpop.f32.mrb[0].mxu0 }
 0x60c   : > { %v9461_v30 = vadd.f32 %v9460_v52, %v5885_v5  ;;  %v8794_v19 = vpop.f32.mrb[1].mxu0 }
 0x60e   : > { %v6392_v53 = vrot.slane %v9461_v30, %v6391_v59  ;;  %5891 = vst.msk [vmem:[%s12333_s18] sm:$0x1] %vm5890_vm7, %v9461_v30  ;;  %v6775_v59 = vld [vmem:[#allocation11 + $0x58] sm:$0x7f] }
 0x610   : > { %v6394_v25 = vmul.f32 %v6392_v53, %v6385_v12  ;;  %v6395_v47 = vmul.f32 %v6392_v53, %v6386_v32  ;;  %v6396_v15 = vmul.f32 %v6392_v53, %v6387_v9  ;;  %v6774_v32 = vld [vmem:[#allocation11 + $0x50] sm:$0x7f] }
 0x612   : > { %7918 = vmatprep.mubr.msk.f32.mxu1 %vm520_vm0, %v6394_v25  ;;  %v6779_v11 = vsel %vm520_vm0, %v6395_v47, 0.0  ;;  %v6776_v62 = vsel %vm520_vm0, %v6394_v25, 0.0  ;;  %v6782_v58 = vsel %vm6354_vm6, %v6396_v15, 0.0 }
 0x613   : > { %6780 = vadd.xlane.f32.xlu0 %v6779_v11  ;;  %6777 = vadd.xlane.f32.xlu1 %v6776_v62 }
 0x614   : > { %7919 = vmatmul.mubr.msk.f32.vlgmr.msra.gmra.mrb[42].mxu1 %vm520_vm0, %v6394_v25 }
 0x615   : > { %9417 = vmatpush3.bf16.xpose.msk.msra.mxu1 %vm12233_vm5, %v12016_v39  ;;  %7920 = vmatprep.mubr.msk.f32.mxu1 %vm520_vm0, %v6395_v47 }
 0x616   : > { %9420 = vmatprep.subr.msk.bf16.mxu1 %vm12233_vm5, %v12019_v61 }
 0x617   : > { %6783 = vadd.xlane.f32.xlu1 %v6782_v58 }
 0x618   : > { %7921 = vmatmul.mubr.msk.f32.gmra.mrb[44].mxu1 %vm520_vm0, %v6395_v47 }
 0x619   : > { %7922 = vmatprep.mubr.msk.f32.mxu1 %vm520_vm0, %v6396_v15 }
 0x61c   : > { %7923 = vmatmul.mubr.msk.f32.gmra.mrb[46].mxu1 %vm520_vm0, %v6396_v15 }
 0x61d   : > { %9423 = vmatpush3.bf16.xpose.msk.msra.mxu1 %vm12233_vm5, %v12035_v54  ;;  %7956 = vmatprep.mubr.msk.f32.mxu1 %vm520_vm0, %v6394_v25 }
 0x61e   : > { %9426 = vmatprep.subr.msk.bf16.mxu1 %vm12233_vm5, %v12038_v22 }
 0x625   : > { %9429 = vmatpush3.bf16.xpose.msk.msra.mxu1 %vm12233_vm5, %v12046_v20 }
 0x626   : > { %9432 = vmatprep.subr.msk.bf16.mxu1 %vm12233_vm5, %v12049_v56 }
 0x62d   : > { %9435 = vmatpush3.bf16.xpose.msk.msra.mxu1 %vm12233_vm5, %v12066_v40 }
 0x62e   : > { %9438 = vmatprep.subr.msk.bf16.mxu1 %vm12233_vm5, %v12069_v55  ;;  %v6764_v55 = vld [vmem:[#allocation11] sm:$0xff] }
 0x635   : > { %9441 = vmatpush3.bf16.xpose.msk.msra.mxu1 %vm12233_vm5, %v12086_v24  ;;  %v6765_v24 = vld [vmem:[#allocation11 + $0x8] sm:$0xff] }
 0x636   : > { %9444 = vmatprep.subr.msk.bf16.mxu1 %vm12233_vm5, %v12089_v48 }
 0x63d   : > { %9447 = vmatpush3.bf16.xpose.msk.msra.mxu1 %vm12233_vm5, %v12097_v44 }
 0x63e   : > { %9450 = vmatprep.subr.msk.bf16.mxu1 %vm12233_vm5, %v12100_v41 }
 0x645   : > { %9453 = vmatpush3.bf16.xpose.msk.msra.mxu1 %vm12233_vm5, %v12118_v3  ;;  %v6768_v3 = vld [vmem:[#allocation11 + $0x20] sm:$0xff] }
 0x646   : > { %9456 = vmatprep.subr.msk.bf16.mxu1 %vm12233_vm5, %v12121_v1  ;;  %v6769_v1 = vld [vmem:[#allocation11 + $0x28] sm:$0xff] }
 0x64d   : > { %9459 = vmatpush3.bf16.xpose.msk.msra.mxu1 %vm12233_vm5, %v12129_v28 }
 0x654   : > { %7957 = vmatmul.mubr.msk.f32.vlgmr.msra.gmra.mrb[48].mxu1 %vm520_vm0, %v6394_v25 }
 0x655   : > { %7958 = vmatprep.mubr.msk.f32.mxu1 %vm520_vm0, %v6395_v47 }
 0x658   : > { %7959 = vmatmul.mubr.msk.f32.gmra.mrb[50].mxu1 %vm520_vm0, %v6395_v47 }
 0x659   : > { %7960 = vmatprep.mubr.msk.f32.mxu1 %vm520_vm0, %v6396_v15 }
 0x65c   : > { %7961 = vmatmul.mubr.msk.f32.gmra.mrb[52].mxu1 %vm520_vm0, %v6396_v15 }
 0x6a0   : > { %v6778_v40 = vpop.xlane.xlu1 %6777  ;;  %v6781_v41 = vpop.xlane.xlu0 %6780 }
 0x6a1   : > { %v6785_v48 = vmul.f32 %v6778_v40, %v6764_v55  ;;  %v6786_v44 = vmul.f32 %v6778_v40, %v6765_v24  ;;  %v6789_v46 = vmul.f32 %v6781_v41, %v6768_v3  ;;  %v6790_v27 = vmul.f32 %v6781_v41, %v6769_v1 }
 0x6a2   : > { %v6787_v29 = vmul.f32 %v6778_v40, %v6766_v38  ;;  %v6788_v60 = vmul.f32 %v6778_v40, %v6767_v50  ;;  %v6791_v35 = vmul.f32 %v6781_v41, %v6770_v45  ;;  %v6792_v12 = vmul.f32 %v6781_v41, %v6771_v14 }
 0x6a4   : > { %v6784_v28 = vpop.xlane.xlu1 %6783 }
 0x6a5   : > { %v6793_v51 = vmul.f32 %v6784_v28, %v6772_v21  ;;  %v6794_v49 = vmul.f32 %v6784_v28, %v6773_v36  ;;  %v6795_v53 = vmul.f32 %v6784_v28, %v6774_v32  ;;  %v6796_v11 = vmul.f32 %v6784_v28, %v6775_v59 }
 0x6e7   : > { %v6664_v39 = vpop.f32.mrb[42].mxu1 }
 0x6e8   : > { %v6666_v61 = vpop.f32.mrb[43].mxu1  ;;  %v12396_v57 = vsub.f32 %v6664_v39, %v6785_v48 }
 0x6e9   : > { %v12398_v63 = vsub.f32 %v6666_v61, %v6786_v44 }
 0x6ea   : > { %v6809_v33 = vmul.f32 %v12396_v57, %v12396_v57 }
 0x6eb   : > { %v6670_v54 = vpop.f32.mrb[44].mxu1  ;;  %v6810_v10 = vmul.f32 %v12398_v63, %v12398_v63 }
 0x6ec   : > { %v6672_v22 = vpop.f32.mrb[45].mxu1  ;;  %v12404_v13 = vsub.f32 %v6670_v54, %v6789_v46 }
 0x6ed   : > { %v12406_v17 = vsub.f32 %v6672_v22, %v6790_v27  ;;  %v6821_v26 = vadd.f32 %v6810_v10, %v6809_v33 }
 0x6ee   : > { %v6813_v18 = vmul.f32 %v12404_v13, %v12404_v13 }
 0x6ef   : > { %v6676_v20 = vpop.f32.mrb[46].mxu1  ;;  %v6814_v37 = vmul.f32 %v12406_v17, %v12406_v17 }
 0x6f0   : > { %v6678_v56 = vpop.f32.mrb[47].mxu1  ;;  %v12408_v23 = vsub.f32 %v6676_v20, %v6793_v51 }
 0x6f1   : > { %v12410_v34 = vsub.f32 %v6678_v56, %v6794_v49  ;;  %v6826_v30 = vadd.f32 %v6814_v37, %v6813_v18 }
 0x6f2   : > { %v6817_v9 = vmul.f32 %v12408_v23, %v12408_v23 }
 0x6f3   : > { %v6818_v2 = vmul.f32 %v12410_v34, %v12410_v34 }
 0x6f4   : > { %v6832_v62 = vsel %vm6831_vm8, %v6817_v9, 0.0 }
 0x6f5   : > { %v6833_v58 = vsel %vm6831_vm8, %v6818_v2, 0.0 }
 0x6f6   : > { %v6834_v40 = vadd.f32 %v6833_v58, %v6832_v62 }
 0x727   : > { %v6747_v16 = vpop.f32.mrb[48].mxu1 }
 0x728   : > { %v12412_v8 = vsub.f32 %v6747_v16, %v6787_v29  ;;  %v6749_v43 = vpop.f32.mrb[49].mxu1 }
 0x729   : > { %v12414_v42 = vsub.f32 %v6749_v43, %v6788_v60 }
 0x72a   : > { %v6811_v4 = vmul.f32 %v12412_v8, %v12412_v8 }
 0x72b   : > { %v6812_v31 = vmul.f32 %v12414_v42, %v12414_v42  ;;  %v6753_v0 = vpop.f32.mrb[50].mxu1 }
 0x72c   : > { %v6822_v6 = vadd.f32 %v6821_v26, %v6811_v4  ;;  %v12428_v7 = vsub.f32 %v6753_v0, %v6791_v35  ;;  %v6755_v52 = vpop.f32.mrb[51].mxu1 }
 0x72d   : > { %v12430_v5 = vsub.f32 %v6755_v52, %v6792_v12 }
 0x72e   : > { %v6815_v19 = vmul.f32 %v12428_v7, %v12428_v7  ;;  %v6823_v25 = vadd.f32 %v6822_v6, %v6812_v31 }
 0x72f   : > { %v6816_v47 = vmul.f32 %v12430_v5, %v12430_v5  ;;  %v6759_v15 = vpop.f32.mrb[52].mxu1 }
 0x730   : > { %v6827_v39 = vadd.f32 %v6826_v30, %v6815_v19  ;;  %v12438_v61 = vsub.f32 %v6759_v15, %v6795_v53  ;;  %6824 = vadd.xlane.f32.xlu1 %v6823_v25  ;;  %v6761_v54 = vpop.f32.mrb[53].mxu1 }
 0x731   : > { %v12440_v22 = vsub.f32 %v6761_v54, %v6796_v11 }
 0x732   : > { %v6819_v20 = vmul.f32 %v12438_v61, %v12438_v61  ;;  %v6828_v56 = vadd.f32 %v6827_v39, %v6816_v47 }
 0x733   : > { %v6820_v55 = vmul.f32 %v12440_v22, %v12440_v22 }
 0x734   : > { %v6835_v24 = vsel %vm6831_vm8, %v6819_v20, 0.0  ;;  %6829 = vadd.xlane.f32.xlu1 %v6828_v56 }
 0x735   : > { %v6836_v48 = vadd.f32 %v6835_v24, %v6834_v40  ;;  %v6837_v44 = vsel %vm6831_vm8, %v6820_v55, 0.0 }
 0x737   : > { %v6838_v41 = vadd.f32 %v6837_v44, %v6836_v48 }
 0x739   : > { %6839 = vadd.xlane.f32.xlu1 %v6838_v41 }
 0x7bd   : > { %v6825_v3 = vpop.xlane.xlu1 %6824 }
 0x7be   : > { %9812 = vrsqrt.f32 %v6825_v3  ;;  %vm6843_vm9 = vcmp.eq.f32.partialorder %v6825_v3, inf  ;;  %v6846_v38 = vand.u32 2147483648, %v6825_v3  ;;  %vm6845_vm10 = vcmp.eq.f32.partialorder %v6825_v3, 0.0 }
 0x7c1   : > { %v6830_v1 = vpop.xlane.xlu1 %6829 }
 0x7c2   : > { %9814 = vrsqrt.f32 %v6830_v1  ;;  %vm6850_vm11 = vcmp.eq.f32.partialorder %v6830_v1, inf  ;;  %v6853_v29 = vand.u32 2147483648, %v6830_v1  ;;  %vm6852_vm12 = vcmp.eq.f32.partialorder %v6830_v1, 0.0 }
 0x7c6   : > { %v6840_v28 = vpop.xlane.xlu1 %6839 }
 0x7c7   : > { %9816 = vrsqrt.f32 %v6840_v28  ;;  %vm6857_vm13 = vcmp.eq.f32.partialorder %v6840_v28, inf  ;;  %v6860_v43 = vand.u32 2147483648, %v6840_v28  ;;  %vm6859_vm14 = vcmp.eq.f32.partialorder %v6840_v28, 0.0 }
 0x7c8   : > { %v9813_v21 = vpop.eup %9812 }
 0x7c9   : > { %v6842_v36 = vmul.f32 %v9813_v21, %v6825_v3 }
 0x7cb   : > { %v6844_v46 = vsel %vm6843_vm9, %v6825_v3, %v6842_v36 }
 0x7cc   : > { %v9815_v27 = vpop.eup %9814  ;;  %v6847_v50 = vsel %vm6845_vm10, %v6846_v38, %v6844_v46 }
 0x7cd   : > { %v6862_v51 = vmax.f32 %v6847_v50, 1e-12  ;;  %v6849_v49 = vmul.f32 %v9815_v27, %v6830_v1 }
 0x7cf   : > { %9818 = vrcp.f32 %v6862_v51  ;;  %v6851_v33 = vsel %vm6850_vm11, %v6830_v1, %v6849_v49 }
 0x7d0   : > { %v6854_v10 = vsel %vm6852_vm12, %v6853_v29, %v6851_v33 }
 0x7d1   : > { %v9817_v45 = vpop.eup %9816  ;;  %v6863_v16 = vmax.f32 %v6854_v10, 1e-12 }
 0x7d2   : > { %v6856_v60 = vmul.f32 %v9817_v45, %v6840_v28 }
 0x7d3   : > { %9820 = vrcp.f32 %v6863_v16 }
 0x7d4   : > { %v6858_v14 = vsel %vm6857_vm13, %v6840_v28, %v6856_v60 }
 0x7d5   : > { %v6861_v35 = vsel %vm6859_vm14, %v6860_v43, %v6858_v14 }
 0x7d6   : > { %v6864_v26 = vmax.f32 %v6861_v35, 1e-12 }
 0x7d8   : > { %9822 = vrcp.f32 %v6864_v26 }
 0x7d9   : > { %v9819_v18 = vpop.eup %9818 }
 0x7da   : > { %v12449_v37 = vmul.f32 %v9819_v18, %v12396_v57  ;;  %v12452_v4 = vmul.f32 %v9819_v18, %v12398_v63  ;;  %v12455_v31 = vmul.f32 %v9819_v18, %v12412_v8  ;;  %v12462_v9 = vmul.f32 %v9819_v18, %v12414_v42 }
 0x7dc   : > { %v6880_v0 = vmul.f32 %v12449_v37, %v12449_v37  ;;  %v6881_v12 = vmul.f32 %v12452_v4, %v12452_v4  ;;  %v6882_v57 = vmul.f32 %v12455_v31, %v12455_v31  ;;  %v6883_v59 = vmul.f32 %v12462_v9, %v12462_v9 }
 0x7dd   : > { %v9821_v32 = vpop.eup %9820 }
 0x7de   : > { %v6892_v2 = vadd.f32 %v6881_v12, %v6880_v0  ;;  %v12467_v63 = vmul.f32 %v9821_v32, %v12404_v13  ;;  %v12470_v52 = vmul.f32 %v9821_v32, %v12406_v17  ;;  %v12475_v30 = vmul.f32 %v9821_v32, %v12428_v7 }
 0x7df   : > { %v12483_v13 = vmul.f32 %v9821_v32, %v12430_v5 }
 0x7e0   : > { %v6893_v6 = vadd.f32 %v6892_v2, %v6882_v57  ;;  %v6884_v42 = vmul.f32 %v12467_v63, %v12467_v63  ;;  %v6885_v17 = vmul.f32 %v12470_v52, %v12470_v52  ;;  %v6886_v7 = vmul.f32 %v12475_v30, %v12475_v30 }
 0x7e1   : > { %v6887_v5 = vmul.f32 %v12483_v13, %v12483_v13 }
 0x7e2   : > { %v9823_v8 = vpop.eup %9822  ;;  %v6894_v19 = vadd.f32 %v6893_v6, %v6883_v59 }
 0x7e3   : > { %v12480_v53 = vmul.f32 %v9823_v8, %v12408_v23  ;;  %v12488_v47 = vmul.f32 %v9823_v8, %v12410_v34  ;;  %v12493_v11 = vmul.f32 %v9823_v8, %v12438_v61  ;;  %v12500_v58 = vmul.f32 %v9823_v8, %v12440_v22 }
 0x7e4   : > { %v6895_v25 = vadd.f32 %v6894_v19, %v6884_v42 }
 0x7e5   : > { %v6888_v23 = vmul.f32 %v12480_v53, %v12480_v53  ;;  %v6889_v34 = vmul.f32 %v12488_v47, %v12488_v47  ;;  %v6890_v54 = vmul.f32 %v12493_v11, %v12493_v11  ;;  %v6891_v56 = vmul.f32 %v12500_v58, %v12500_v58 }
 0x7e6   : > { %v6896_v15 = vadd.f32 %v6895_v25, %v6885_v17 }
 0x7e7   : > { %v6899_v61 = vsel %vm6831_vm8, %v6888_v23, 0.0  ;;  %v6901_v40 = vsel %vm6831_vm8, %v6889_v34, 0.0  ;;  %v6903_v22 = vsel %vm6831_vm8, %v6890_v54, 0.0  ;;  %v6905_v48 = vsel %vm6831_vm8, %v6891_v56, 0.0 }
 0x7e8   : > { %v6897_v62 = vadd.f32 %v6896_v15, %v6886_v7 }
 0x7ea   : > { %v6898_v39 = vadd.f32 %v6897_v62, %v6887_v5 }
 0x7ec   : > { %v6900_v20 = vadd.f32 %v6899_v61, %v6898_v39 }
 0x7ee   : > { %v6902_v55 = vadd.f32 %v6901_v40, %v6900_v20 }
 0x7f0   : > { %v6904_v24 = vadd.f32 %v6903_v22, %v6902_v55 }
 0x7f2   : > { %v6906_v44 = vadd.f32 %v6905_v48, %v6904_v24 }
 0x7f4   : > { %6907 = vadd.xlane.f32.xlu1 %v6906_v44 }
 0x881   : > { %v6908_v41 = vpop.xlane.xlu1 %6907 }
 0x882   : > { %v6909_v3 = vrot.slane %v6908_v41, 4 }
 0x884   : > { %v6910_v1 = vadd.f32 %v6909_v3, %v6908_v41 }
 0x886   : > { %v6911_v28 = vrot.slane %v6910_v1, 2 }
 0x888   : > { %v6912_v21 = vadd.f32 %v6911_v28, %v6910_v1 }
 0x88a   : > { %v6913_v36 = vrot.slane %v6912_v21, 1 }
 0x88c   : > { %v6914_v38 = vadd.f32 %v6913_v36, %v6912_v21 }
 0x88e   : > { %9557 = vpush %v6914_v38 }
 0x88f   : > { %10134 = shalt.err (!%p10131_p9)
}
 0x890   : > { %s10135_s17 = scalar_lea.hbm %s12517_s26, 16  ;;  %s10139_s27 = scalar_lea.hbm %s12581_s10, 32 }
 0x891   : > { %p10136_p10 = scmp.ne.s32.totalorder %s12517_s26, %s10135_s17  ;;  %p10140_p1 = scmp.lt.u32.totalorder %s12517_s26, %s12581_s10 }
 0x892   : > { %p10141_p2 = scmp.lt.u32.totalorder %s10139_s27, %s10135_s17  ;;  %p10143_p4 = scmp.lt.u32.totalorder %s10135_s17, %s12517_s26 }
 0x893   : > { %p10137_p13 = pnand %p10136_p10, %p12722_p7 }
 0x894   : > { %p10142_p3 = por %p10141_p2, %p10140_p1 }
 0x895   : > { %p10138_p12 = pneg %p10137_p13 }
 0x896   : > { %p10144_p8 = por %p10143_p4, %p10142_p3 }
 0x898   : > { %p10145_p11 = pnand %p10144_p8, %p10138_p12 }
 0x89a   : > { %10148 = shalt.err (!%p10145_p11)
}
 0x89b   : > { %9585 = dma.vmem_to_hbm [thread:$0]  (%p12722_p7), %s6974_s13, 16, %s12517_s26, %s6958_s24  }
 0x89c   : > { %s10216_s15 = smov 1e-12   ;;  %s9556_s23 = smul.u32 96, %s10482_s25 }
 0x89d   : > { %s12723_s26 = sld [smem:[#allocation47_spill]] }
 0x8a3   : > { %s455_s24 = scalar_lea.vmem %s12723_s26, %s9556_s23 }
 0x8bf   : > { %s9558_s20 = spop %9557 }
 0x8c0   : > { %v6916_v46 = vstv %s9558_s20 }
 0x8c1   : > { %9824 = vrsqrt.f32 %v6916_v46  ;;  %vm6919_vm15 = vcmp.eq.f32.partialorder %v6916_v46, inf  ;;  %v6922_v51 = vand.u32 2147483648, %v6916_v46  ;;  %vm6921_vm0 = vcmp.eq.f32.partialorder %v6916_v46, 0.0 }
 0x8cb   : > { %v9825_v27 = vpop.eup %9824 }
 0x8cc   : > { %v6918_v50 = vmul.f32 %v9825_v27, %v6916_v46 }
 0x8ce   : > { %v6920_v49 = vsel %vm6919_vm15, %v6916_v46, %v6918_v50 }
 0x8cf   : > { %v6923_v29 = vsel %vm6921_vm0, %v6922_v51, %v6920_v49 }
 0x8d0   : > { %9559 = vpush %v6923_v29 }
 0x901   : > { %s9560_s18 = spop %9559 }
 0x902   : > { %s6925_s16 = smax.f32 %s10216_s15, %s9560_s18 }
 0x903   : > { %v6926_v33 = vstv %s6925_s16 }
 0x904   : > { %9826 = vrcp.f32 %v6926_v33 }
 0x90e   : > { %v9827_v10 = vpop.eup %9826 }
 0x90f   : > { %v6928_v45 = vmul.f32 %v9827_v10, %v12449_v37  ;;  %v6929_v16 = vmul.f32 %v9827_v10, %v12452_v4  ;;  %v6930_v60 = vmul.f32 %v9827_v10, %v12455_v31  ;;  %v6931_v43 = vmul.f32 %v9827_v10, %v12462_v9 }
 0x910   : > { %v6932_v14 = vmul.f32 %v9827_v10, %v12467_v63  ;;  %v6933_v35 = vmul.f32 %v9827_v10, %v12470_v52  ;;  %v6934_v26 = vmul.f32 %v9827_v10, %v12475_v30  ;;  %v6935_v18 = vmul.f32 %v9827_v10, %v12483_v13 }
 0x911   : > { %v6936_v0 = vmul.f32 %v9827_v10, %v12480_v53  ;;  %v6937_v12 = vmul.f32 %v9827_v10, %v12488_v47  ;;  %v6938_v37 = vmul.f32 %v9827_v10, %v12493_v11  ;;  %v6939_v4 = vmul.f32 %v9827_v10, %v12500_v58  ;;  %6940 = vst [vmem:[%s455_s24] sm:$0xff] %v6928_v45 }
 0x912   : > { %6941 = vst [vmem:[%s455_s24 + $0x8] sm:$0xff] %v6929_v16  ;;  %6942 = vst [vmem:[%s455_s24 + $0x10] sm:$0xff] %v6930_v60 }
 0x913   : > { %6943 = vst [vmem:[%s455_s24 + $0x18] sm:$0xff] %v6931_v43  ;;  %6944 = vst [vmem:[%s455_s24 + $0x20] sm:$0xff] %v6932_v14 }
 0x914   : > { %6945 = vst [vmem:[%s455_s24 + $0x28] sm:$0xff] %v6933_v35  ;;  %6946 = vst [vmem:[%s455_s24 + $0x30] sm:$0xff] %v6934_v26 }
 0x915   : > { %6947 = vst [vmem:[%s455_s24 + $0x38] sm:$0xff] %v6935_v18  ;;  %6948 = vst [vmem:[%s455_s24 + $0x40] sm:$0x7f] %v6936_v0 }
 0x916   : > { %6949 = vst [vmem:[%s455_s24 + $0x48] sm:$0x7f] %v6937_v12  ;;  %6950 = vst [vmem:[%s455_s24 + $0x50] sm:$0x7f] %v6938_v37 }
 0x917   : > { %6951 = vst [vmem:[%s455_s24 + $0x58] sm:$0x7f] %v6939_v4 }
 0x918 PF: > { %s12724_s25 = sld [smem:[#allocation21_spill]]  ;;  %s12725_s11 = sld [smem:[#allocation19_spill]] }
 0x919   : > { %s12726_s19 = sld [smem:[#allocation24_spill]] }
 0x91e   : > { %p9622_p7 = scmp.ge.s32.totalorder %s12724_s25, 2  ;;  %s6993_s12 = sand.u32 1, %s12725_s11  }
 0x91f   : > { %p12727_p5 = scmp.ne.s32.totalorder %s12726_s19, 0  ;;  %s6994_s22 = scalar_lea.sflag [#allocation4], %s6993_s12 }
 0x921   : > { %p9607_p0 = pnand %p9622_p7, %p12727_p5 }
 0x923   : > { %10182 = dma.done.wait (!%p9607_p0), %s6994_s22, 16  }
 0x924   : > { %10184 = vsyncadd (!%p9607_p0), %s6994_s22, 4294967280  ;;  %s12728_s16 = sld [smem:[#allocation22_spill]]  ;;  %s12729_s17 = sld [smem:[#allocation20_spill]] }
 0x925   : > { %s12730_s15 = sld [smem:[#allocation23_spill]]  ;;  %s12731_s13 = smov %s10191_s14 }
 0x92a   : > { %p25_p6 = scmp.ge.s32.totalorder %s12728_s16, 4   ;;  %s12732_s14 = smov %s12729_s17 }
 0x92c   :  { %27 = sbr.rel (!%p25_p6) target bundleno = 9 (0x9), region = 176 }
 0x933   :  { %6998 = vsyncpa [#allocation3], 1 }
 0x934   :  { %7000 = vsyncpa [#allocation3 + $0x1], 1 }
 0x935   :  { %7001 = vsyncpa [#allocation6], 1 }
 0x936   :  { %7002 = vsyncpa [#allocation9], 1 }
 0x937   :  { %7003 = vsyncpa [#allocation12], 1 }
 0x938   :  { %7004 = vsyncpa [#allocation4], 1 }
 0x939   :  { %7006 = vsyncpa [#allocation4 + $0x1], 1 }

</bundles_post_ra>
